<compile_context>
chip_gen: v7x
topology: tpu7x:2x2x1
jax: 0.10.0
libtpu: 0.0.40
codegen_flags: <defaults>
</compile_context>

<pallas_src>
import functools

import jax
import jax.numpy as jnp
from jax.experimental import pallas as pl
from jax.experimental.pallas import tpu as pltpu

_D_IN, _H1, _H2 = 2048, 1024, 512
_LANE = 128


def _mlp_kernel(x_ref, w1_ref, b1_ref, w2_ref, b2_ref, w3_ref, b3_ref, o_ref):
    # fc1 + ReLU  (bf16 operands on the MXU, f32 accumulation + f32 epilogue)
    x = x_ref[...]
    if x.dtype != jnp.bfloat16:          # no-op when the producer already emits bf16
        x = x.astype(jnp.bfloat16)
    h1 = jnp.dot(x, w1_ref[...], preferred_element_type=jnp.float32)
    h1 = jnp.maximum(h1 + b1_ref[...], 0.0)
    # fc2 + ReLU
    h2 = jnp.dot(h1.astype(jnp.bfloat16), w2_ref[...],
                 preferred_element_type=jnp.float32)
    h2 = jnp.maximum(h2 + b2_ref[...], 0.0)
    # fc3 (lane-padded output, no activation)
    h3 = jnp.dot(h2.astype(jnp.bfloat16), w3_ref[...],
                 preferred_element_type=jnp.float32) + b3_ref[...]
    o_ref[...] = h3.astype(o_ref.dtype)


def prepare_params(params):
    """One-time prep: bf16 weights, fc3 lanes padded to 128, biases as (1, N) f32.

    Call once and reuse across forward calls; the dominant per-call cost is
    streaming the (resident-friendly) weights, so the cast/pad is amortized.
    """
    w1, b1 = params["w1"], params["b1"]
    w2, b2 = params["w2"], params["b2"]
    w3, b3 = params["w3"], params["b3"]
    cls_num = w3.shape[1]
    c_pad = ((cls_num + _LANE - 1) // _LANE) * _LANE

    w3p = jnp.zeros((w3.shape[0], c_pad), jnp.float32).at[:, :cls_num].set(w3)
    b3p = jnp.zeros((c_pad,), jnp.float32).at[:cls_num].set(b3)

    # TODO(synk): for the weight-bound small-batch regime, store W1/W2 as int8
    # (v5e/v6e MXU int path) or fp8-e4m3 (v7x, no int path) with per-output-channel
    # f32 scales folded into the bias/ReLU epilogue to halve weight traffic again.
    return dict(
        w1=w1.astype(jnp.bfloat16), b1=b1.reshape(1, -1).astype(jnp.float32),
        w2=w2.astype(jnp.bfloat16), b2=b2.reshape(1, -1).astype(jnp.float32),
        w3=w3p.astype(jnp.bfloat16), b3=b3p.reshape(1, -1).astype(jnp.float32),
        cls_num=cls_num, c_pad=c_pad,
    )


def _pick_tile(batch):
    """Largest batch tile <= 512 that divides `batch`, preferring >= 2 grid steps
    so the 1-D "parallel" grid keeps both v7x TensorCores busy."""
    candidates = (512, 256, 128, 64, 32, 16, 8)
    for cand in candidates:
        if batch % cand == 0 and batch // cand >= 2:
            return cand
    for cand in candidates:
        if batch % cand == 0:
            return cand
    return None  # not a multiple of 8 -> caller pads the batch


def _choose_tiling(batch):
    """Returns (tb, padded_batch)."""
    tb = _pick_tile(batch)
    b_pad = batch
    if tb is None:                         # not a multiple of 8: pad sublane rows
        b_pad = -(-batch // 8) * 8
        tb = _pick_tile(b_pad)
    if tb < 128 and b_pad > 1024:          # awkward large batch: pad rows rather than
        tb = 256                           # taking thousands of tiny grid steps
        b_pad = -(-b_pad // tb) * tb
    return tb, b_pad


_BUFFERED1_SUPPORTED = None


def _single_buffer_supported():
    """One-time capability probe: does this JAX build accept pl.Buffered(1)?

    Only the tiny probe is guarded; real calls never mask genuine errors."""
    global _BUFFERED1_SUPPORTED
    if _BUFFERED1_SUPPORTED is None:
        try:
            def _probe(a_ref, o_ref):
                o_ref[...] = a_ref[...] + 1.0

            f = pl.pallas_call(
                _probe,
                out_shape=jax.ShapeDtypeStruct((8, _LANE), jnp.float32),
                grid_spec=pltpu.PrefetchScalarGridSpec(
                    num_scalar_prefetch=0,
                    grid=(1,),
                    in_specs=[pl.BlockSpec((8, _LANE), lambda i: (0, 0),
                                           pipeline_mode=pl.Buffered(1))],
                    out_specs=pl.BlockSpec((8, _LANE), lambda i: (i, 0)),
                ),
            )
            jax.block_until_ready(f(jnp.zeros((8, _LANE), jnp.float32)))
            _BUFFERED1_SUPPORTED = True
        except Exception:
            _BUFFERED1_SUPPORTED = False
    return _BUFFERED1_SUPPORTED


@functools.lru_cache(maxsize=None)
def _build_call(B, tb, c_pad, x_itemsize, single_buffer):
    # Resident weights/biases (constant index_map): single VMEM buffer if supported.
    wkw = {"pipeline_mode": pl.Buffered(1)} if single_buffer else {}
    const = lambda i: (0, 0)
    cost = pl.CostEstimate(
        flops=2 * B * (_D_IN * _H1 + _H1 * _H2 + _H2 * c_pad),
        transcendentals=0,
        bytes_accessed=(2 * (_D_IN * _H1 + _H1 * _H2 + _H2 * c_pad)   # bf16 weights
                        + 4 * (_H1 + _H2 + c_pad)                     # f32 biases
                        + x_itemsize * B * _D_IN                      # x in
                        + 4 * B * c_pad),                             # logits out
    )
    return pl.pallas_call(
        _mlp_kernel,
        out_shape=jax.ShapeDtypeStruct((B, c_pad), jnp.float32),
        grid_spec=pltpu.PrefetchScalarGridSpec(
            num_scalar_prefetch=0,
            grid=(B // tb,),
            in_specs=[
                pl.BlockSpec((tb, _D_IN), lambda i: (i, 0)),       # x tile (streamed)
                pl.BlockSpec((_D_IN, _H1), const, **wkw),          # W1 (resident)
                pl.BlockSpec((1, _H1), const, **wkw),              # b1
                pl.BlockSpec((_H1, _H2), const, **wkw),            # W2
                pl.BlockSpec((1, _H2), const, **wkw),              # b2
                pl.BlockSpec((_H2, c_pad), const, **wkw),          # W3 (lane-padded)
                pl.BlockSpec((1, c_pad), const, **wkw),            # b3
            ],
            out_specs=pl.BlockSpec((tb, c_pad), lambda i: (i, 0)),
        ),
        compiler_params=pltpu.CompilerParams(
            dimension_semantics=("parallel",),
            # tb<=512 keeps usage ~20-28 MiB; 48 MiB fits v7x's 64 MiB VMEM with
            # headroom and is far under v5e/v6e's 128 MiB.
            vmem_limit_bytes=48 * 1024 * 1024,
        ),
        cost_estimate=cost,
    )


def visual_mlp_forward(x, prepared, *, tb=None, return_padded=False):
    """x: [B, 2048] float32 or bfloat16.  prepared: output of prepare_params().

    If return_padded=True the lane-dense (B, 128-padded) logits slab is returned
    (pad columns are exactly zero); otherwise it is sliced back to cls_num.
    """
    B, d_in = x.shape
    assert d_in == _D_IN
    c_pad, cls_num = prepared["c_pad"], prepared["cls_num"]

    if tb is not None:
        b_pad = -(-B // tb) * tb
    else:
        tb, b_pad = _choose_tiling(B)
    if b_pad != B:
        x = jnp.zeros((b_pad, d_in), x.dtype).at[:B].set(x)

    call = _build_call(b_pad, tb, c_pad, jnp.dtype(x.dtype).itemsize,
                       _single_buffer_supported())
    out = call(x, prepared["w1"], prepared["b1"], prepared["w2"], prepared["b2"],
               prepared["w3"], prepared["b3"])
    if return_padded:
        return out if b_pad == B else out[:B]
    return out[:B, :cls_num]


def init_params(key, cls_num=8):
    """Deterministic synthetic init (PyTorch-like uniform fan-in scaling)."""
    dims = [(2048, 1024), (1024, 512), (512, cls_num)]
    params = {}
    for idx, (fan_in, fan_out) in enumerate(dims, start=1):
        key, kw, kb = jax.random.split(key, 3)
        bound = 1.0 / jnp.sqrt(fan_in)
        # stored as [in, out] (transpose of PyTorch's [out, in]) so y = x @ W + b
        params[f"w{idx}"] = jax.random.uniform(
            kw, (fan_in, fan_out), jnp.float32, -bound, bound)
        params[f"b{idx}"] = jax.random.uniform(
            kb, (fan_out,), jnp.float32, -bound, bound)
    return params


def reference_forward(x, params):
    """Pure-JAX reference mirroring the kernel's bf16-operand / f32-accumulate math."""
    q = lambda a: a.astype(jnp.bfloat16).astype(jnp.float32)
    h = jnp.maximum(q(x) @ q(params["w1"]) + params["b1"], 0.0)
    h = jnp.maximum(q(h) @ q(params["w2"]) + params["b2"], 0.0)
    return q(h) @ q(params["w3"]) + params["b3"]


if __name__ == "__main__":
    key = jax.random.PRNGKey(0)
    kx, kp = jax.random.split(key)

    B, cls_num = 8, 8
    x = jax.random.normal(kx, (B, _D_IN), jnp.float32)
    params = init_params(kp, cls_num=cls_num)
    prepared = prepare_params(params)

    out = jax.block_until_ready(visual_mlp_forward(x, prepared))
    ref = reference_forward(x, params)
    assert out.shape == (B, cls_num)
    assert jnp.allclose(out, ref, atol=2e-2, rtol=2e-2), (
        float(jnp.max(jnp.abs(out - ref))))

    # exercise the bf16-activation fast path (upstream producer emits bf16)
    out_bf = jax.block_until_ready(
        visual_mlp_forward(x.astype(jnp.bfloat16), prepared))
    assert out_bf.shape == (B, cls_num)
    assert jnp.allclose(out_bf, ref, atol=5e-2, rtol=5e-2), (
        float(jnp.max(jnp.abs(out_bf - ref))))

    print("KERNEL_OK")
</pallas_src>

<mosaic_0001>
module attributes {stable_mosaic.version = 11 : i64} {
  func.func @_probe(%arg0: i32, %arg1: memref<8x128xf32, #tpu.memory_space<vmem>>, %arg2: memref<8x128xf32, #tpu.memory_space<vmem>>) attributes {dimension_semantics = [#tpu.dimension_semantics<arbitrary>], iteration_bounds = array<i64: 1>, scalar_prefetch = 0 : i64, scratch_operands = 0 : i64, tpu.core_type = #tpu.core_type<tc>, window_params = [{pipeline_mode = #tpu.pipeline_mode<synchronous>, transform_indices = @transform_0, window_bounds = array<i64: 8, 128>}, {transform_indices = @transform_1, window_bounds = array<i64: 8, 128>}]} {
    %c0 = arith.constant 0 : index
    %c0_0 = arith.constant 0 : index
    %0 = vector.load %arg1[%c0, %c0_0] : memref<8x128xf32, #tpu.memory_space<vmem>>, vector<8x128xf32>
    %cst = arith.constant 1.000000e+00 : f32
    %1 = vector.broadcast %cst : f32 to vector<8x128xf32>
    %2 = arith.addf %0, %1 : vector<8x128xf32>
    %c0_1 = arith.constant 0 : index
    %c0_2 = arith.constant 0 : index
    %3 = vector.load %arg2[%c0_1, %c0_2] : memref<8x128xf32, #tpu.memory_space<vmem>>, vector<8x128xf32>
    tpu.vector_store %arg2[%c0_1, %c0_2], %2 {strides = array<i32>} : memref<8x128xf32, #tpu.memory_space<vmem>>, vector<8x128xf32>,
    return
  }
  func.func @transform_0(%arg0: i32) -> (i32, i32) {
    %c0_i32 = arith.constant 0 : i32
    %c0_i32_0 = arith.constant 0 : i32
    %c0_i32_1 = arith.constant 0 : i32
    return %c0_i32, %c0_i32_0 : i32, i32
  }
  func.func @transform_1(%arg0: i32) -> (i32, i32) {
    %c0_i32 = arith.constant 0 : i32
    %c0_i32_0 = arith.constant 0 : i32
    return %arg0, %c0_i32 : i32, i32
  }
}

module attributes {stable_mosaic.version = 11 : i64} {
  func.func @_mlp_kernel(%arg0: i32, %arg1: memref<8x2048xf32, #tpu.memory_space<vmem>>, %arg2: memref<2048x1024xbf16, #tpu.memory_space<vmem>>, %arg3: memref<1x1024xf32, #tpu.memory_space<vmem>>, %arg4: memref<1024x512xbf16, #tpu.memory_space<vmem>>, %arg5: memref<1x512xf32, #tpu.memory_space<vmem>>, %arg6: memref<512x128xbf16, #tpu.memory_space<vmem>>, %arg7: memref<1x128xf32, #tpu.memory_space<vmem>>, %arg8: memref<8x128xf32, #tpu.memory_space<vmem>>) attributes {dimension_semantics = [#tpu.dimension_semantics<parallel>], iteration_bounds = array<i64: 1>, scalar_prefetch = 0 : i64, scratch_operands = 0 : i64, tpu.core_type = #tpu.core_type<tc>, window_params = [{transform_indices = @transform_0, window_bounds = array<i64: 8, 2048>}, {pipeline_mode = #tpu.pipeline_mode<synchronous>, transform_indices = @transform_1, window_bounds = array<i64: 2048, 1024>}, {pipeline_mode = #tpu.pipeline_mode<synchronous>, transform_indices = @transform_2, window_bounds = array<i64: 1, 1024>}, {pipeline_mode = #tpu.pipeline_mode<synchronous>, transform_indices = @transform_3, window_bounds = array<i64: 1024, 512>}, {pipeline_mode = #tpu.pipeline_mode<synchronous>, transform_indices = @transform_4, window_bounds = array<i64: 1, 512>}, {pipeline_mode = #tpu.pipeline_mode<synchronous>, transform_indices = @transform_5, window_bounds = array<i64: 512, 128>}, {pipeline_mode = #tpu.pipeline_mode<synchronous>, transform_indices = @transform_6, window_bounds = array<i64: 1, 128>}, {transform_indices = @transform_7, window_bounds = array<i64: 8, 128>}]} {
    %c0 = arith.constant 0 : index
    %c0_0 = arith.constant 0 : index
    %0 = vector.load %arg1[%c0, %c0_0] : memref<8x2048xf32, #tpu.memory_space<vmem>>, vector<8x2048xf32>
    %1 = arith.truncf %0 : vector<8x2048xf32> to vector<8x2048xbf16>
    %c0_1 = arith.constant 0 : index
    %c0_2 = arith.constant 0 : index
    %2 = vector.load %arg2[%c0_1, %c0_2] : memref<2048x1024xbf16, #tpu.memory_space<vmem>>, vector<2048x1024xbf16>
    %cst = arith.constant dense<0.000000e+00> : vector<8x1024xf32>
    %3 = tpu.matmul %1, %2, %cst {dimension_numbers = #tpu.dot_dimension_numbers<[1], [0], [0], [1], [0, 0, 1, 1], [], []>} : vector<8x2048xbf16>, vector<2048x1024xbf16>, vector<8x1024xf32> -> vector<8x1024xf32>
    %c0_3 = arith.constant 0 : index
    %c0_4 = arith.constant 0 : index
    %4 = vector.load %arg3[%c0_3, %c0_4] : memref<1x1024xf32, #tpu.memory_space<vmem>>, vector<1x1024xf32>
    %5 = vector.broadcast %4 : vector<1x1024xf32> to vector<8x1024xf32>
    %6 = arith.addf %3, %5 : vector<8x1024xf32>
    %cst_5 = arith.constant 0.000000e+00 : f32
    %7 = vector.broadcast %cst_5 : f32 to vector<8x1024xf32>
    %8 = arith.maximumf %6, %7 : vector<8x1024xf32>
    %9 = arith.truncf %8 : vector<8x1024xf32> to vector<8x1024xbf16>
    %c0_6 = arith.constant 0 : index
    %c0_7 = arith.constant 0 : index
    %10 = vector.load %arg4[%c0_6, %c0_7] : memref<1024x512xbf16, #tpu.memory_space<vmem>>, vector<1024x512xbf16>
    %cst_8 = arith.constant dense<0.000000e+00> : vector<8x512xf32>
    %11 = tpu.matmul %9, %10, %cst_8 {dimension_numbers = #tpu.dot_dimension_numbers<[1], [0], [0], [1], [0, 0, 1, 1], [], []>} : vector<8x1024xbf16>, vector<1024x512xbf16>, vector<8x512xf32> -> vector<8x512xf32>
    %c0_9 = arith.constant 0 : index
    %c0_10 = arith.constant 0 : index
    %12 = vector.load %arg5[%c0_9, %c0_10] : memref<1x512xf32, #tpu.memory_space<vmem>>, vector<1x512xf32>
    %13 = vector.broadcast %12 : vector<1x512xf32> to vector<8x512xf32>
    %14 = arith.addf %11, %13 : vector<8x512xf32>
    %cst_11 = arith.constant 0.000000e+00 : f32
    %15 = vector.broadcast %cst_11 : f32 to vector<8x512xf32>
    %16 = arith.maximumf %14, %15 : vector<8x512xf32>
    %17 = arith.truncf %16 : vector<8x512xf32> to vector<8x512xbf16>
    %c0_12 = arith.constant 0 : index
    %c0_13 = arith.constant 0 : index
    %18 = vector.load %arg6[%c0_12, %c0_13] : memref<512x128xbf16, #tpu.memory_space<vmem>>, vector<512x128xbf16>
    %cst_14 = arith.constant dense<0.000000e+00> : vector<8x128xf32>
    %19 = tpu.matmul %17, %18, %cst_14 {dimension_numbers = #tpu.dot_dimension_numbers<[1], [0], [0], [1], [0, 0, 1, 1], [], []>} : vector<8x512xbf16>, vector<512x128xbf16>, vector<8x128xf32> -> vector<8x128xf32>
    %c0_15 = arith.constant 0 : index
    %c0_16 = arith.constant 0 : index
    %20 = vector.load %arg7[%c0_15, %c0_16] : memref<1x128xf32, #tpu.memory_space<vmem>>, vector<1x128xf32>
    %21 = vector.broadcast %20 : vector<1x128xf32> to vector<8x128xf32>
    %22 = arith.addf %19, %21 : vector<8x128xf32>
    %c0_17 = arith.constant 0 : index
    %c0_18 = arith.constant 0 : index
    %23 = vector.load %arg8[%c0_17, %c0_18] : memref<8x128xf32, #tpu.memory_space<vmem>>, vector<8x128xf32>
    tpu.vector_store %arg8[%c0_17, %c0_18], %22 {strides = array<i32>} : memref<8x128xf32, #tpu.memory_space<vmem>>, vector<8x128xf32>,
    return
  }
  func.func @transform_0(%arg0: i32) -> (i32, i32) {
    %c0_i32 = arith.constant 0 : i32
    %c0_i32_0 = arith.constant 0 : i32
    return %arg0, %c0_i32 : i32, i32
  }
  func.func @transform_1(%arg0: i32) -> (i32, i32) {
    %c0_i32 = arith.constant 0 : i32
    %c0_i32_0 = arith.constant 0 : i32
    %c0_i32_1 = arith.constant 0 : i32
    return %c0_i32, %c0_i32_0 : i32, i32
  }
  func.func @transform_2(%arg0: i32) -> (i32, i32) {
    %c0_i32 = arith.constant 0 : i32
    %c0_i32_0 = arith.constant 0 : i32
    %c0_i32_1 = arith.constant 0 : i32
    return %c0_i32, %c0_i32_0 : i32, i32
  }
  func.func @transform_3(%arg0: i32) -> (i32, i32) {
    %c0_i32 = arith.constant 0 : i32
    %c0_i32_0 = arith.constant 0 : i32
    %c0_i32_1 = arith.constant 0 : i32
    return %c0_i32, %c0_i32_0 : i32, i32
  }
  func.func @transform_4(%arg0: i32) -> (i32, i32) {
    %c0_i32 = arith.constant 0 : i32
    %c0_i32_0 = arith.constant 0 : i32
    %c0_i32_1 = arith.constant 0 : i32
    return %c0_i32, %c0_i32_0 : i32, i32
  }
  func.func @transform_5(%arg0: i32) -> (i32, i32) {
    %c0_i32 = arith.constant 0 : i32
    %c0_i32_0 = arith.constant 0 : i32
    %c0_i32_1 = arith.constant 0 : i32
    return %c0_i32, %c0_i32_0 : i32, i32
  }
  func.func @transform_6(%arg0: i32) -> (i32, i32) {
    %c0_i32 = arith.constant 0 : i32
    %c0_i32_0 = arith.constant 0 : i32
    %c0_i32_1 = arith.constant 0 : i32
    return %c0_i32, %c0_i32_0 : i32, i32
  }
  func.func @transform_7(%arg0: i32) -> (i32, i32) {
    %c0_i32 = arith.constant 0 : i32
    %c0_i32_0 = arith.constant 0 : i32
    return %arg0, %c0_i32 : i32, i32
  }
}

</mosaic_0001>

<bundles_post_ra>
// kernel: tpu_custom_call.1
= control target key start
LH: loop header
LB: loop body
LE: loop exit
PB: predicated region body
PF: predicated region fallthrough
CT: control target
= control target key end

     0   :  { %6 = vsyncpa [#allocation3], 0  ;;  %s125_s0 = inlined_call_operand.hbm [shape: f32[8,128], index: 0, kind: input, shape index: {}]   ;;  %s126_s1 = inlined_call_operand.hbm [shape: f32[8,128], index: 1, kind: output, shape index: {}]  }
   0x1   :  { %7 = vsyncpa [#allocation4], 0  ;;  %s89_s6 = smov [#allocation2]   ;;  %s41_s10 = scalar_lea.hbm %s125_s0, 128 }
   0x2   :  { %s14_s7 = sshll.u32 %s89_s6, 4  ;;  %p42_p0 = scmp.ne.s32.totalorder %s125_s0, %s41_s10  ;;  %s15_s7 = int_to_ptr.vmem [resolvable:$true] %s14_s7 }
   0x3   :  { %p45_p1 = scmp.lt.u32.totalorder %s41_s10, %s125_s0 }
   0x5   :  { %p47_p2 = pnand %p45_p1, %p42_p0 }
   0x7   :  { %50 = shalt.err (!%p47_p2)
}
   0x8   :  { %s51_s15 = scalar_lea.vmem %s15_s7, 128  ;;  %p56_p4 = scmp.lt.s32.totalorder %s15_s7, %s15_s7 }
   0x9   :  { %p52_p3 = scmp.ne.s32.totalorder %s15_s7, %s51_s15  ;;  %p57_p5 = scmp.lt.s32.totalorder %s51_s15, %s51_s15 }
   0xb   :  { %p58_p6 = por %p57_p5, %p56_p4 }
   0xd   :  { %p59_p7 = pnand %p58_p6, %p52_p3 }
   0xf   :  { %62 = shalt.err (!%p59_p7)
}
  0x10   :  { %17 = dma.hbm_to_vmem [thread:$0]  %s125_s0, 128, %s15_s7, [#allocation3]  }
  0x11   :  { %85 = dma.done.wait [#allocation3], 128  }
  0x12   :  { %86 = vsyncadd [#allocation3], 4294967168  ;;  %s90_s18 = smov [#allocation5]   ;;  %v21_v0 = vld [vmem:[#allocation2] sm:$0xff] }
  0x13   :  { %s30_s19 = sshll.u32 %s90_s18, 4  ;;  %v22_v1 = vadd.f32 1.0, %v21_v0  ;;  %s31_s19 = int_to_ptr.vmem [resolvable:$true] %s30_s19 }
  0x14   :  { %s63_s20 = scalar_lea.vmem %s31_s19, 128  ;;  %p68_p9 = scmp.lt.s32.totalorder %s31_s19, %s31_s19 }
  0x15   :  { %23 = vst [vmem:[#allocation5] sm:$0xff] %v22_v1  ;;  %p64_p8 = scmp.ne.s32.totalorder %s31_s19, %s63_s20  ;;  %p69_p10 = scmp.lt.s32.totalorder %s63_s20, %s63_s20 }
  0x17   :  { %p70_p11 = por %p69_p10, %p68_p9 }
  0x19   :  { %p71_p12 = pnand %p70_p11, %p64_p8 }
  0x1b   :  { %74 = shalt.err (!%p71_p12)
}
  0x1c   :  { %s75_s23 = scalar_lea.hbm %s126_s1, 128 }
  0x1d   :  { %p76_p13 = scmp.ne.s32.totalorder %s126_s1, %s75_s23  ;;  %p79_p0 = scmp.lt.u32.totalorder %s75_s23, %s126_s1 }
  0x1f   :  { %p81_p1 = pnand %p79_p0, %p76_p13 }
  0x21   :  { %84 = shalt.err (!%p81_p1)
}
  0x22   :  { %33 = dma.vmem_to_hbm [thread:$0]  %s31_s19, 128, %s126_s1, [#allocation4]  }
  0x23   :  { %87 = dma.done.wait [#allocation4], 128  }
  0x24   :  { %88 = vsyncadd [#allocation4], 4294967168 }
  0x25   :  { %37 = vsyncpa [#allocation3], 1 }
  0x26   :  { %38 = vsyncpa [#allocation4], 1 }

// kernel: tpu_custom_call.1
= control target key start
LH: loop header
LB: loop body
LE: loop exit
PB: predicated region body
PF: predicated region fallthrough
CT: control target
= control target key end

     0   :  { %12 = vsyncpa [#allocation3], 0  ;;  %s12335_s0 = inlined_call_operand.hbm [shape: f32[8,2048], index: 0, kind: input, shape index: {}]   ;;  %s12336_s1 = inlined_call_operand.hbm [shape: bf16[2048,1024], index: 1, kind: input, shape index: {}]   ;;  %s12337_s2 = inlined_call_operand.hbm [shape: f32[1,1024], index: 2, kind: input, shape index: {}]   ;;  %s12338_s3 = inlined_call_operand.hbm [shape: bf16[1024,512], index: 3, kind: input, shape index: {}]   ;;  %s12339_s4 = inlined_call_operand.hbm [shape: f32[1,512], index: 4, kind: input, shape index: {}]   ;;  %s12340_s5 = inlined_call_operand.hbm [shape: bf16[512,128], index: 5, kind: input, shape index: {}]   ;;  %s12341_s6 = inlined_call_operand.hbm [shape: f32[1,128], index: 6, kind: input, shape index: {}]   ;;  %s12342_s7 = inlined_call_operand.hbm [shape: f32[8,128], index: 7, kind: output, shape index: {}]  }
   0x1   :  { %13 = vsyncpa [#allocation6], 0 }
   0x2   :  { %14 = vsyncpa [#allocation9], 0 }
   0x3   :  { %15 = vsyncpa [#allocation12], 0 }
   0x4   :  { %16 = vsyncpa [#allocation4], 0  ;;  %s12039_s24 = smov [#allocation5]   ;;  %s11853_s28 = scalar_lea.hbm %s12336_s1, 131072 }
   0x5   :  { %s32_s25 = sshll.u32 %s12039_s24, 4  ;;  %p11854_p0 = scmp.ne.s32.totalorder %s12336_s1, %s11853_s28  ;;  %s33_s25 = int_to_ptr.vmem [resolvable:$true] %s32_s25 }
   0x6   :  { %p11857_p1 = scmp.lt.u32.totalorder %s11853_s28, %s12336_s1 }
   0x8   :  { %p11859_p2 = pnand %p11857_p1, %p11854_p0 }
   0xa   :  { %11862 = shalt.err (!%p11859_p2)
}
   0xb   :  { %s11863_s10 = scalar_lea.vmem %s33_s25, 131072  ;;  %p11868_p4 = scmp.lt.s32.totalorder %s33_s25, %s33_s25 }
   0xc   :  { %p11864_p3 = scmp.ne.s32.totalorder %s33_s25, %s11863_s10  ;;  %p11869_p5 = scmp.lt.s32.totalorder %s11863_s10, %s11863_s10 }
   0xe   :  { %p11870_p6 = por %p11869_p5, %p11868_p4 }
  0x10   :  { %p11871_p7 = pnand %p11870_p6, %p11864_p3 }
  0x12   :  { %11874 = shalt.err (!%p11871_p7)
}
  0x13   :  { %s12040_s11 = smov 512   ;;  %s12041_s12 = smov 32  }
  0x14   :  { %38 = dma.hbm_to_vmem [thread:$0]  %s12336_s1, 131072, %s33_s25, [#allocation6], %s12040_s11, %s12040_s11, %s12041_s12  }
  0x15   :  { %s12042_s15 = smov [#allocation8]   ;;  %s11875_s19 = scalar_lea.hbm %s12338_s3, 32768 }
  0x16   :  { %s54_s16 = sshll.u32 %s12042_s15, 4  ;;  %p11876_p8 = scmp.ne.s32.totalorder %s12338_s3, %s11875_s19  ;;  %s55_s16 = int_to_ptr.vmem [resolvable:$true] %s54_s16 }
  0x17   :  { %p11879_p9 = scmp.lt.u32.totalorder %s11875_s19, %s12338_s3 }
  0x19   :  { %p11881_p10 = pnand %p11879_p9, %p11876_p8 }
  0x1b   :  { %11884 = shalt.err (!%p11881_p10)
}
  0x1c   :  { %s11885_s24 = scalar_lea.vmem %s55_s16, 32768  ;;  %p11890_p12 = scmp.lt.s32.totalorder %s55_s16, %s55_s16 }
  0x1d   :  { %p11886_p11 = scmp.ne.s32.totalorder %s55_s16, %s11885_s24  ;;  %p11891_p13 = scmp.lt.s32.totalorder %s11885_s24, %s11885_s24 }
  0x1f   :  { %p11892_p0 = por %p11891_p13, %p11890_p12 }
  0x21   :  { %p11893_p1 = pnand %p11892_p0, %p11886_p11 }
  0x23   :  { %11896 = shalt.err (!%p11893_p1)
}
  0x24   :  { %s12043_s1 = smov 256   ;;  %s12044_s25 = smov 16  }
  0x25   :  { %60 = dma.hbm_to_vmem [thread:$0]  %s12338_s3, 32768, %s55_s16, [#allocation9], %s12043_s1, %s12043_s1, %s12044_s25  }
  0x26   :  { %s12045_s28 = smov [#allocation11]   ;;  %s11897_s9 = scalar_lea.hbm %s12340_s5, 4096 }
  0x27   :  { %s76_s29 = sshll.u32 %s12045_s28, 4  ;;  %p11898_p2 = scmp.ne.s32.totalorder %s12340_s5, %s11897_s9  ;;  %s77_s29 = int_to_ptr.vmem [resolvable:$true] %s76_s29 }
  0x28   :  { %p11901_p3 = scmp.lt.u32.totalorder %s11897_s9, %s12340_s5 }
  0x2a   :  { %p11903_p4 = pnand %p11901_p3, %p11898_p2 }
  0x2c   :  { %11906 = shalt.err (!%p11903_p4)
}
  0x2d   :  { %s11907_s14 = scalar_lea.vmem %s77_s29, 4096  ;;  %p11912_p6 = scmp.lt.s32.totalorder %s77_s29, %s77_s29 }
  0x2e   :  { %p11908_p5 = scmp.ne.s32.totalorder %s77_s29, %s11907_s14  ;;  %p11913_p7 = scmp.lt.s32.totalorder %s11907_s14, %s11907_s14 }
  0x30   :  { %p11914_p8 = por %p11913_p7, %p11912_p6 }
  0x32   :  { %p11915_p9 = pnand %p11914_p8, %p11908_p5 }
  0x34   :  { %11918 = shalt.err (!%p11915_p9)
}
  0x35   :  { %s12046_s3 = smov 64   ;;  %s12047_s15 = smov 4  }
  0x36   :  { %82 = dma.hbm_to_vmem [thread:$0]  %s12340_s5, 4096, %s77_s29, [#allocation12], %s12046_s3, %s12046_s3, %s12047_s15  }
  0x37   :  { %s12048_s18 = smov [#allocation2]   ;;  %s12049_s20 = smov [#allocation7]  }
  0x38   :  { %s23_s19 = sshll.u32 %s12048_s18, 4  ;;  %s45_s21 = sshll.u32 %s12049_s20, 4  ;;  %s24_s19 = int_to_ptr.vmem [resolvable:$true] %s23_s19  ;;  %s46_s21 = int_to_ptr.vmem [resolvable:$true] %s45_s21 }
  0x39   :  { %s11919_s24 = scalar_lea.hbm %s12335_s0, 2048 }
  0x3a   :  { %p11920_p10 = scmp.ne.s32.totalorder %s12335_s0, %s11919_s24  ;;  %p11923_p11 = scmp.lt.u32.totalorder %s11919_s24, %s12335_s0 }
  0x3c   :  { %p11925_p12 = pnand %p11923_p11, %p11920_p10 }
  0x3e   :  { %11928 = shalt.err (!%p11925_p12)
}
  0x3f   :  { %s11929_s5 = scalar_lea.vmem %s24_s19, 2048  ;;  %p11934_p0 = scmp.lt.s32.totalorder %s24_s19, %s24_s19 }
  0x40   :  { %p11930_p13 = scmp.ne.s32.totalorder %s24_s19, %s11929_s5  ;;  %p11935_p1 = scmp.lt.s32.totalorder %s11929_s5, %s11929_s5 }
  0x42   :  { %p11936_p2 = por %p11935_p1, %p11934_p0 }
  0x44   :  { %p11937_p3 = pnand %p11936_p2, %p11930_p13 }
  0x46   :  { %11940 = shalt.err (!%p11937_p3)
}
  0x47   :  { %26 = dma.hbm_to_vmem [thread:$0]  %s12335_s0, 2048, %s24_s19, [#allocation3]  }
  0x48   :  { %s11941_s9 = scalar_lea.hbm %s12337_s2, 128 }
  0x49   :  { %p11942_p4 = scmp.ne.s32.totalorder %s12337_s2, %s11941_s9  ;;  %p11945_p5 = scmp.lt.u32.totalorder %s11941_s9, %s12337_s2 }
  0x4b   :  { %p11947_p6 = pnand %p11945_p5, %p11942_p4 }
  0x4d   :  { %11950 = shalt.err (!%p11947_p6)
}
  0x4e   :  { %s11951_s14 = scalar_lea.vmem %s46_s21, 128  ;;  %p11956_p8 = scmp.lt.s32.totalorder %s46_s21, %s46_s21 }
  0x4f   :  { %p11952_p7 = scmp.ne.s32.totalorder %s46_s21, %s11951_s14  ;;  %p11957_p9 = scmp.lt.s32.totalorder %s11951_s14, %s11951_s14 }
  0x51   :  { %p11958_p10 = por %p11957_p9, %p11956_p8 }
  0x53   :  { %p11959_p11 = pnand %p11958_p10, %p11952_p7 }
  0x55   :  { %11962 = shalt.err (!%p11959_p11)
}
  0x56   :  { %48 = dma.hbm_to_vmem [thread:$0]  %s12337_s2, 128, %s46_s21, [#allocation6]  }
  0x57   :  { %s12050_s15 = smov [#allocation10]   ;;  %s12051_s17 = smov [#allocation13]  }
  0x58   :  { %s67_s16 = sshll.u32 %s12050_s15, 4  ;;  %s89_s18 = sshll.u32 %s12051_s17, 4  ;;  %s68_s16 = int_to_ptr.vmem [resolvable:$true] %s67_s16  ;;  %s90_s18 = int_to_ptr.vmem [resolvable:$true] %s89_s18 }
  0x59   :  { %s11963_s22 = scalar_lea.hbm %s12339_s4, 64 }
  0x5a   :  { %p11964_p12 = scmp.ne.s32.totalorder %s12339_s4, %s11963_s22  ;;  %p11967_p13 = scmp.lt.u32.totalorder %s11963_s22, %s12339_s4 }
  0x5c   :  { %p11969_p0 = pnand %p11967_p13, %p11964_p12 }
  0x5e   :  { %11972 = shalt.err (!%p11969_p0)
}
  0x5f   :  { %s11973_s2 = scalar_lea.vmem %s68_s16, 64  ;;  %p11978_p2 = scmp.lt.s32.totalorder %s68_s16, %s68_s16 }
  0x60   :  { %p11974_p1 = scmp.ne.s32.totalorder %s68_s16, %s11973_s2  ;;  %p11979_p3 = scmp.lt.s32.totalorder %s11973_s2, %s11973_s2 }
  0x62   :  { %p11980_p4 = por %p11979_p3, %p11978_p2 }
  0x64   :  { %p11981_p5 = pnand %p11980_p4, %p11974_p1 }
  0x66   :  { %11984 = shalt.err (!%p11981_p5)
}
  0x67   :  { %70 = dma.hbm_to_vmem [thread:$0]  %s12339_s4, 64, %s68_s16, [#allocation9]  }
  0x68   :  { %s11985_s28 = scalar_lea.hbm %s12341_s6, 16 }
  0x69   :  { %p11986_p6 = scmp.ne.s32.totalorder %s12341_s6, %s11985_s28  ;;  %p11989_p7 = scmp.lt.u32.totalorder %s11985_s28, %s12341_s6 }
  0x6b   :  { %p11991_p8 = pnand %p11989_p7, %p11986_p6 }
  0x6d   :  { %11994 = shalt.err (!%p11991_p8)
}
  0x6e   :  { %s11995_s10 = scalar_lea.vmem %s90_s18, 16  ;;  %s11999_s11 = scalar_lea.vmem %s90_s18, 32 }
  0x6f   :  { %p11996_p9 = scmp.ne.s32.totalorder %s90_s18, %s11995_s10  ;;  %p12000_p10 = scmp.lt.s32.totalorder %s90_s18, %s90_s18 }
  0x70   :  { %p12001_p11 = scmp.lt.s32.totalorder %s11999_s11, %s11995_s10 }
  0x72   :  { %p12002_p12 = por %p12001_p11, %p12000_p10 }
  0x74   :  { %p12003_p13 = pnand %p12002_p12, %p11996_p9 }
  0x76   :  { %12006 = shalt.err (!%p12003_p13)
}
  0x77   :  { %92 = dma.hbm_to_vmem [thread:$0]  %s12341_s6, 16, %s90_s18, [#allocation12]  }
  0x78   :  { %12029 = dma.done.wait [#allocation3], 2048  }
  0x79   :  { %12030 = vsyncadd [#allocation3], 4294965248 }
  0x7a   :  { %12031 = dma.done.wait [#allocation6], 131200  }
  0x7b   :  { %12032 = vsyncadd [#allocation6], 4294836096 }
  0x7c   :  { %12033 = dma.done.wait [#allocation9], 32832  }
  0x7d   :  { %12034 = vsyncadd [#allocation9], 4294934464 }
  0x7e   :  { %12035 = dma.done.wait [#allocation12], 4112  }
  0x7f   :  { %12036 = vsyncadd [#allocation12], 4294963184  ;;  %v147_v0 = vld [vmem:[#allocation5] sm:$0xff]  ;;  %v148_v2 = vld [vmem:[#allocation5 + $0x8] sm:$0xff]  ;;  %s12052_s6 = smov [#allocation14]  }
  0x80   :  { %v151_v1 = vld [vmem:[#allocation5 + $0x20] sm:$0xff]  ;;  %v152_v4 = vld [vmem:[#allocation5 + $0x28] sm:$0xff]  ;;  %s9905_s13 = sshll.u32 %s12052_s6, 4  ;;  %s9906_s13 = int_to_ptr.vmem [resolvable:$true] %s9905_s13 }
  0x81   :  { %v9918_v3 = vcombine.high %v147_v0, %v151_v1  ;;  %v9917_v5 = vcombine.low %v147_v0, %v151_v1  ;;  %v155_v6 = vld [vmem:[#allocation5 + $0x40] sm:$0xff]  ;;  %v9920_v8 = vcombine.high %v148_v2, %v152_v4  ;;  %v9919_v9 = vcombine.low %v148_v2, %v152_v4  ;;  %v156_v11 = vld [vmem:[#allocation5 + $0x48] sm:$0xff]  ;;  %s12007_s14 = scalar_lea.vmem %s9906_s13, 128  ;;  %p12012_p1 = scmp.lt.s32.totalorder %s9906_s13, %s9906_s13 }
  0x82   :  { %v159_v7 = vld [vmem:[#allocation5 + $0x60] sm:$0xff]  ;;  %v160_v12 = vld [vmem:[#allocation5 + $0x68] sm:$0xff]  ;;  %p12008_p0 = scmp.ne.s32.totalorder %s9906_s13, %s12007_s14  ;;  %p12013_p2 = scmp.lt.s32.totalorder %s12007_s14, %s12007_s14 }
  0x83   :  { %v9926_v10 = vcombine.high %v155_v6, %v159_v7  ;;  %v163_v13 = vld [vmem:[#allocation5 + $0x80] sm:$0xff]  ;;  %6333 = vmatprep.subr.bf16.mxu0 %v9918_v3  ;;  %v9928_v14 = vcombine.high %v156_v11, %v160_v12  ;;  %v164_v16 = vld [vmem:[#allocation5 + $0x88] sm:$0xff]  ;;  %6661 = vmatprep.subr.bf16.mxu1 %v9920_v8  ;;  %v9925_v18 = vcombine.low %v155_v6, %v159_v7 }
  0x84   :  { %v167_v15 = vld [vmem:[#allocation5 + $0xa0] sm:$0xff]  ;;  %v168_v17 = vld [vmem:[#allocation5 + $0xa8] sm:$0xff]  ;;  %6334 = vmatpush1.bf16.msra.mxu0 %v9917_v5  ;;  %6662 = vmatpush1.bf16.msra.mxu1 %v9919_v9  ;;  %v9927_v19 = vcombine.low %v156_v11, %v160_v12  ;;  %p12014_p3 = por %p12013_p2, %p12012_p1 }
  0x85   :  { %6335 = vmatprep.subr.bf16.mxu0 %v9926_v10  ;;  %v9934_v20 = vcombine.high %v163_v13, %v167_v15  ;;  %6663 = vmatprep.subr.bf16.mxu1 %v9928_v14  ;;  %v9936_v21 = vcombine.high %v164_v16, %v168_v17  ;;  %v171_v22 = vld [vmem:[#allocation5 + $0xc0] sm:$0xff]  ;;  %v172_v24 = vld [vmem:[#allocation5 + $0xc8] sm:$0xff]  ;;  %v9933_v26 = vcombine.low %v163_v13, %v167_v15 }
  0x86   :  { %v175_v23 = vld [vmem:[#allocation5 + $0xe0] sm:$0xff]  ;;  %v176_v25 = vld [vmem:[#allocation5 + $0xe8] sm:$0xff]  ;;  %v9935_v27 = vcombine.low %v164_v16, %v168_v17  ;;  %p12015_p4 = pnand %p12014_p3, %p12008_p0 }
  0x87   :  { %v9942_v28 = vcombine.high %v171_v22, %v175_v23  ;;  %v9944_v29 = vcombine.high %v172_v24, %v176_v25  ;;  %v179_v30 = vld [vmem:[#allocation5 + $0x100] sm:$0xff]  ;;  %v180_v32 = vld [vmem:[#allocation5 + $0x108] sm:$0xff]  ;;  %v9941_v34 = vcombine.low %v171_v22, %v175_v23  ;;  %v9943_v35 = vcombine.low %v172_v24, %v176_v25 }
  0x88   :  { %6336 = vmatpush1.bf16.msra.mxu0 %v9925_v18  ;;  %6664 = vmatpush1.bf16.msra.mxu1 %v9927_v19  ;;  %v183_v31 = vld [vmem:[#allocation5 + $0x120] sm:$0xff]  ;;  %v184_v33 = vld [vmem:[#allocation5 + $0x128] sm:$0xff] }
  0x89   :  { %6337 = vmatprep.subr.bf16.mxu0 %v9934_v20  ;;  %6665 = vmatprep.subr.bf16.mxu1 %v9936_v21  ;;  %v9950_v36 = vcombine.high %v179_v30, %v183_v31  ;;  %v9952_v37 = vcombine.high %v180_v32, %v184_v33  ;;  %v187_v38 = vld [vmem:[#allocation5 + $0x140] sm:$0xff]  ;;  %v188_v40 = vld [vmem:[#allocation5 + $0x148] sm:$0xff]  ;;  %v9949_v42 = vcombine.low %v179_v30, %v183_v31 }
  0x8a   :  { %v191_v39 = vld [vmem:[#allocation5 + $0x160] sm:$0xff]  ;;  %v192_v41 = vld [vmem:[#allocation5 + $0x168] sm:$0xff]  ;;  %v9951_v43 = vcombine.low %v180_v32, %v184_v33 }
  0x8b   :  { %v9958_v44 = vcombine.high %v187_v38, %v191_v39  ;;  %v9960_v45 = vcombine.high %v188_v40, %v192_v41  ;;  %v195_v46 = vld [vmem:[#allocation5 + $0x180] sm:$0xff]  ;;  %v196_v48 = vld [vmem:[#allocation5 + $0x188] sm:$0xff]  ;;  %v9957_v50 = vcombine.low %v187_v38, %v191_v39  ;;  %v9959_v51 = vcombine.low %v188_v40, %v192_v41 }
  0x8c   :  { %6338 = vmatpush1.bf16.msra.mxu0 %v9933_v26  ;;  %6666 = vmatpush1.bf16.msra.mxu1 %v9935_v27  ;;  %v199_v47 = vld [vmem:[#allocation5 + $0x1a0] sm:$0xff]  ;;  %v200_v49 = vld [vmem:[#allocation5 + $0x1a8] sm:$0xff] }
  0x8d   :  { %6339 = vmatprep.subr.bf16.mxu0 %v9942_v28  ;;  %6667 = vmatprep.subr.bf16.mxu1 %v9944_v29  ;;  %v9966_v52 = vcombine.high %v195_v46, %v199_v47  ;;  %v116_v53 = vld [vmem:[#allocation2 + $0x8] sm:$0xff]  ;;  %v9968_v54 = vcombine.high %v196_v48, %v200_v49  ;;  %v203_v55 = vld [vmem:[#allocation5 + $0x1c0] sm:$0xff]  ;;  %v9965_v60 = vcombine.low %v195_v46, %v199_v47 }
  0x8e   :  { %v207_v56 = vld [vmem:[#allocation5 + $0x1e0] sm:$0xff]  ;;  %v12177_v57 = vpack.c.bf16 %v116_v53, %v116_v53  ;;  %v204_v58 = vld [vmem:[#allocation5 + $0x1c8] sm:$0xff]  ;;  %v9967_v61 = vcombine.low %v196_v48, %v200_v49 }
  0x8f   :  { %v208_v59 = vld [vmem:[#allocation5 + $0x1e8] sm:$0xff]  ;;  %v9974_v62 = vcombine.high %v203_v55, %v207_v56  ;;  %v211_v0 = vld [vmem:[#allocation5 + $0x200] sm:$0xff]  ;;  %v9973_v4 = vcombine.low %v203_v55, %v207_v56 }
  0x90   :  { %6340 = vmatpush1.bf16.msra.mxu0 %v9941_v34  ;;  %6668 = vmatpush1.bf16.msra.mxu1 %v9943_v35  ;;  %v9976_v63 = vcombine.high %v204_v58, %v208_v59  ;;  %v215_v1 = vld [vmem:[#allocation5 + $0x220] sm:$0xff]  ;;  %v212_v2 = vld [vmem:[#allocation5 + $0x208] sm:$0xff]  ;;  %v9975_v5 = vcombine.low %v204_v58, %v208_v59 }
  0x91   :  { %6341 = vmatprep.subr.bf16.mxu0 %v9950_v36  ;;  %6669 = vmatprep.subr.bf16.mxu1 %v9952_v37  ;;  %v216_v3 = vld [vmem:[#allocation5 + $0x228] sm:$0xff]  ;;  %v9982_v6 = vcombine.high %v211_v0, %v215_v1  ;;  %v219_v8 = vld [vmem:[#allocation5 + $0x240] sm:$0xff]  ;;  %v9981_v12 = vcombine.low %v211_v0, %v215_v1 }
  0x92   :  { %6365 = vmatprep.mubr.bf16.mxu0 %v12177_v57  ;;  %6693 = vmatprep.mubr.bf16.mxu1 %v12177_v57  ;;  %v9984_v7 = vcombine.high %v212_v2, %v216_v3  ;;  %v223_v9 = vld [vmem:[#allocation5 + $0x260] sm:$0xff]  ;;  %v220_v10 = vld [vmem:[#allocation5 + $0x248] sm:$0xff]  ;;  %v9983_v13 = vcombine.low %v212_v2, %v216_v3 }
  0x93   :  { %v224_v11 = vld [vmem:[#allocation5 + $0x268] sm:$0xff]  ;;  %v9990_v14 = vcombine.high %v219_v8, %v223_v9  ;;  %v227_v16 = vld [vmem:[#allocation5 + $0x280] sm:$0xff]  ;;  %v9989_v20 = vcombine.low %v219_v8, %v223_v9 }
  0x94   :  { %6342 = vmatpush1.bf16.msra.mxu0 %v9949_v42  ;;  %6670 = vmatpush1.bf16.msra.mxu1 %v9951_v43  ;;  %v9992_v15 = vcombine.high %v220_v10, %v224_v11  ;;  %v231_v17 = vld [vmem:[#allocation5 + $0x2a0] sm:$0xff]  ;;  %v228_v18 = vld [vmem:[#allocation5 + $0x288] sm:$0xff]  ;;  %v9991_v21 = vcombine.low %v220_v10, %v224_v11 }
  0x95   :  { %6343 = vmatprep.subr.bf16.mxu0 %v9958_v44  ;;  %6671 = vmatprep.subr.bf16.mxu1 %v9960_v45  ;;  %v232_v19 = vld [vmem:[#allocation5 + $0x2a8] sm:$0xff]  ;;  %v9998_v22 = vcombine.high %v227_v16, %v231_v17  ;;  %v235_v24 = vld [vmem:[#allocation5 + $0x2c0] sm:$0xff]  ;;  %v9997_v28 = vcombine.low %v227_v16, %v231_v17 }
  0x96   :  { %v10000_v23 = vcombine.high %v228_v18, %v232_v19  ;;  %v239_v25 = vld [vmem:[#allocation5 + $0x2e0] sm:$0xff]  ;;  %v236_v26 = vld [vmem:[#allocation5 + $0x2c8] sm:$0xff]  ;;  %v9999_v29 = vcombine.low %v228_v18, %v232_v19 }
  0x97   :  { %v240_v27 = vld [vmem:[#allocation5 + $0x2e8] sm:$0xff]  ;;  %v10006_v30 = vcombine.high %v235_v24, %v239_v25  ;;  %v243_v32 = vld [vmem:[#allocation5 + $0x300] sm:$0xff]  ;;  %v10005_v36 = vcombine.low %v235_v24, %v239_v25 }
  0x98   :  { %6344 = vmatpush1.bf16.msra.mxu0 %v9957_v50  ;;  %6672 = vmatpush1.bf16.msra.mxu1 %v9959_v51  ;;  %v10008_v31 = vcombine.high %v236_v26, %v240_v27  ;;  %v247_v33 = vld [vmem:[#allocation5 + $0x320] sm:$0xff]  ;;  %v244_v34 = vld [vmem:[#allocation5 + $0x308] sm:$0xff]  ;;  %v10007_v37 = vcombine.low %v236_v26, %v240_v27 }
  0x99   :  { %6345 = vmatprep.subr.bf16.mxu0 %v9966_v52  ;;  %6673 = vmatprep.subr.bf16.mxu1 %v9968_v54  ;;  %v248_v35 = vld [vmem:[#allocation5 + $0x328] sm:$0xff]  ;;  %v10014_v38 = vcombine.high %v243_v32, %v247_v33  ;;  %v251_v40 = vld [vmem:[#allocation5 + $0x340] sm:$0xff]  ;;  %v10013_v44 = vcombine.low %v243_v32, %v247_v33 }
  0x9a   :  { %v10016_v39 = vcombine.high %v244_v34, %v248_v35  ;;  %v255_v41 = vld [vmem:[#allocation5 + $0x360] sm:$0xff]  ;;  %v252_v42 = vld [vmem:[#allocation5 + $0x348] sm:$0xff]  ;;  %v10015_v45 = vcombine.low %v244_v34, %v248_v35 }
  0x9b   :  { %v256_v43 = vld [vmem:[#allocation5 + $0x368] sm:$0xff]  ;;  %v10022_v46 = vcombine.high %v251_v40, %v255_v41  ;;  %v259_v48 = vld [vmem:[#allocation5 + $0x380] sm:$0xff]  ;;  %v10021_v52 = vcombine.low %v251_v40, %v255_v41 }
  0x9c   :  { %6346 = vmatpush1.bf16.msra.mxu0 %v9965_v60  ;;  %6674 = vmatpush1.bf16.msra.mxu1 %v9967_v61  ;;  %v10024_v47 = vcombine.high %v252_v42, %v256_v43  ;;  %v263_v49 = vld [vmem:[#allocation5 + $0x3a0] sm:$0xff]  ;;  %v260_v50 = vld [vmem:[#allocation5 + $0x388] sm:$0xff]  ;;  %v10023_v53 = vcombine.low %v252_v42, %v256_v43 }
  0x9d   :  { %6347 = vmatprep.subr.bf16.mxu0 %v9974_v62  ;;  %6675 = vmatprep.subr.bf16.mxu1 %v9976_v63  ;;  %v264_v51 = vld [vmem:[#allocation5 + $0x3a8] sm:$0xff]  ;;  %v10030_v54 = vcombine.high %v259_v48, %v263_v49  ;;  %v267_v56 = vld [vmem:[#allocation5 + $0x3c0] sm:$0xff]  ;;  %v10029_v61 = vcombine.low %v259_v48, %v263_v49 }
  0x9e   :  { %v10032_v55 = vcombine.high %v260_v50, %v264_v51  ;;  %v271_v58 = vld [vmem:[#allocation5 + $0x3e0] sm:$0xff]  ;;  %v268_v59 = vld [vmem:[#allocation5 + $0x3c8] sm:$0xff]  ;;  %v10031_v62 = vcombine.low %v260_v50, %v264_v51 }
  0x9f   :  { %v272_v60 = vld [vmem:[#allocation5 + $0x3e8] sm:$0xff]  ;;  %v10038_v63 = vcombine.high %v267_v56, %v271_v58  ;;  %v275_v1 = vld [vmem:[#allocation5 + $0x400] sm:$0xff] }
  0xa0   :  { %6348 = vmatpush1.bf16.msra.mxu0 %v9973_v4  ;;  %6676 = vmatpush1.bf16.msra.mxu1 %v9975_v5  ;;  %v10040_v0 = vcombine.high %v268_v59, %v272_v60  ;;  %v279_v2 = vld [vmem:[#allocation5 + $0x420] sm:$0xff]  ;;  %v276_v3 = vld [vmem:[#allocation5 + $0x408] sm:$0xff]  ;;  %v10037_v5 = vcombine.low %v267_v56, %v271_v58 }
  0xa1   :  { %6349 = vmatprep.subr.bf16.mxu0 %v9982_v6  ;;  %6677 = vmatprep.subr.bf16.mxu1 %v9984_v7  ;;  %v280_v4 = vld [vmem:[#allocation5 + $0x428] sm:$0xff]  ;;  %v115_v6 = vld [vmem:[#allocation2] sm:$0xff]  ;;  %v10039_v7 = vcombine.low %v268_v59, %v272_v60  ;;  %v10046_v8 = vcombine.high %v275_v1, %v279_v2  ;;  %v10045_v16 = vcombine.low %v275_v1, %v279_v2 }
  0xa2   :  { %v10048_v9 = vcombine.high %v276_v3, %v280_v4  ;;  %v283_v10 = vld [vmem:[#allocation5 + $0x440] sm:$0xff]  ;;  %v10047_v17 = vcombine.low %v276_v3, %v280_v4  ;;  %v296_v24 = vld [vmem:[#allocation5 + $0x4a8] sm:$0xff] }
  0xa3   :  { %v287_v11 = vld [vmem:[#allocation5 + $0x460] sm:$0xff]  ;;  %v304_v32 = vld [vmem:[#allocation5 + $0x4e8] sm:$0xff] }
  0xa4   :  { %6350 = vmatpush1.bf16.msra.mxu0 %v9981_v12  ;;  %6678 = vmatpush1.bf16.msra.mxu1 %v9983_v13  ;;  %v12181_v12 = vpack.c.bf16 %v115_v6, %v115_v6  ;;  %v284_v13 = vld [vmem:[#allocation5 + $0x448] sm:$0xff]  ;;  %v10054_v18 = vcombine.high %v283_v10, %v287_v11  ;;  %v10053_v25 = vcombine.low %v283_v10, %v287_v11  ;;  %v343_v6 = vld [vmem:[#allocation5 + $0x620] sm:$0xff] }
  0xa5   :  { %6351 = vmatprep.subr.bf16.mxu0 %v9990_v14  ;;  %6679 = vmatprep.subr.bf16.mxu1 %v9992_v15  ;;  %v288_v14 = vld [vmem:[#allocation5 + $0x468] sm:$0xff]  ;;  %v118_v15 = vld [vmem:[#allocation2 + $0x18] sm:$0xff] }
  0xa6   :  { %v10056_v19 = vcombine.high %v284_v13, %v288_v14  ;;  %v10055_v26 = vcombine.low %v284_v13, %v288_v14  ;;  %v312_v40 = vld [vmem:[#allocation5 + $0x528] sm:$0xff]  ;;  %v347_v14 = vld [vmem:[#allocation5 + $0x640] sm:$0xff] }
  0xa7   :  { %v320_v48 = vld [vmem:[#allocation5 + $0x568] sm:$0xff] }
  0xa8   :  { %6352 = vmatpush1.bf16.msra.mxu0 %v9989_v20  ;;  %6680 = vmatpush1.bf16.msra.mxu1 %v9991_v21  ;;  %v291_v20 = vld [vmem:[#allocation5 + $0x480] sm:$0xff]  ;;  %v328_v56 = vld [vmem:[#allocation5 + $0x5a8] sm:$0xff] }
  0xa9   :  { %6353 = vmatprep.subr.bf16.mxu0 %v9998_v22  ;;  %6681 = vmatprep.subr.bf16.mxu1 %v10000_v23  ;;  %v295_v21 = vld [vmem:[#allocation5 + $0x4a0] sm:$0xff]  ;;  %v292_v22 = vld [vmem:[#allocation5 + $0x488] sm:$0xff]  ;;  %v12183_v23 = vpack.c.bf16 %v118_v15, %v118_v15 }
  0xaa   :  { %v10062_v27 = vcombine.high %v291_v20, %v295_v21  ;;  %v10061_v33 = vcombine.low %v291_v20, %v295_v21  ;;  %v10063_v34 = vcombine.low %v292_v22, %v296_v24  ;;  %v336_v1 = vld [vmem:[#allocation5 + $0x5e8] sm:$0xff]  ;;  %v351_v15 = vld [vmem:[#allocation5 + $0x660] sm:$0xff] }
  0xab   :  { %v10118_v21 = vcombine.high %v347_v14, %v351_v15 }
  0xac   :  { %6354 = vmatpush1.bf16.msra.mxu0 %v9997_v28  ;;  %6682 = vmatpush1.bf16.msra.mxu1 %v9999_v29  ;;  %v299_v28 = vld [vmem:[#allocation5 + $0x4c0] sm:$0xff] }
  0xad   :  { %6355 = vmatprep.subr.bf16.mxu0 %v10006_v30  ;;  %6683 = vmatprep.subr.bf16.mxu1 %v10008_v31  ;;  %v303_v29 = vld [vmem:[#allocation5 + $0x4e0] sm:$0xff]  ;;  %v300_v30 = vld [vmem:[#allocation5 + $0x4c8] sm:$0xff]  ;;  %v10064_v31 = vcombine.high %v292_v22, %v296_v24 }
  0xae   :  { %v10070_v35 = vcombine.high %v299_v28, %v303_v29  ;;  %v10069_v41 = vcombine.low %v299_v28, %v303_v29  ;;  %v10071_v42 = vcombine.low %v300_v30, %v304_v32  ;;  %v355_v22 = vld [vmem:[#allocation5 + $0x680] sm:$0xff]  ;;  %v10117_v28 = vcombine.low %v347_v14, %v351_v15  ;;  %v117_v14 = vld [vmem:[#allocation2 + $0x10] sm:$0xff] }
  0xaf   :  { %v359_v24 = vld [vmem:[#allocation5 + $0x6a0] sm:$0xff] }
  0xb0   :  { %6356 = vmatpush1.bf16.msra.mxu0 %v10005_v36  ;;  %6684 = vmatpush1.bf16.msra.mxu1 %v10007_v37  ;;  %v307_v36 = vld [vmem:[#allocation5 + $0x500] sm:$0xff] }
  0xb1   :  { %6357 = vmatprep.subr.bf16.mxu0 %v10014_v38  ;;  %6685 = vmatprep.subr.bf16.mxu1 %v10016_v39  ;;  %v311_v37 = vld [vmem:[#allocation5 + $0x520] sm:$0xff]  ;;  %v308_v38 = vld [vmem:[#allocation5 + $0x508] sm:$0xff]  ;;  %v10072_v39 = vcombine.high %v300_v30, %v304_v32  ;;  %v10126_v30 = vcombine.high %v355_v22, %v359_v24 }
  0xb2   :  { %v10078_v43 = vcombine.high %v307_v36, %v311_v37  ;;  %v10077_v49 = vcombine.low %v307_v36, %v311_v37  ;;  %v10079_v50 = vcombine.low %v308_v38, %v312_v40  ;;  %v367_v32 = vld [vmem:[#allocation5 + $0x6e0] sm:$0xff]  ;;  %v10125_v36 = vcombine.low %v355_v22, %v359_v24  ;;  %v120_v24 = vld [vmem:[#allocation2 + $0x28] sm:$0xff] }
  0xb4   :  { %6358 = vmatpush1.bf16.msra.mxu0 %v10013_v44  ;;  %6686 = vmatpush1.bf16.msra.mxu1 %v10015_v45  ;;  %v315_v44 = vld [vmem:[#allocation5 + $0x540] sm:$0xff] }
  0xb5   :  { %6359 = vmatprep.subr.bf16.mxu0 %v10022_v46  ;;  %6687 = vmatprep.subr.bf16.mxu1 %v10024_v47  ;;  %v319_v45 = vld [vmem:[#allocation5 + $0x560] sm:$0xff]  ;;  %v316_v46 = vld [vmem:[#allocation5 + $0x548] sm:$0xff]  ;;  %v10080_v47 = vcombine.high %v308_v38, %v312_v40 }
  0xb6   :  { %v10086_v51 = vcombine.high %v315_v44, %v319_v45  ;;  %v10085_v58 = vcombine.low %v315_v44, %v319_v45  ;;  %v10087_v59 = vcombine.low %v316_v46, %v320_v48  ;;  %v375_v40 = vld [vmem:[#allocation5 + $0x720] sm:$0xff] }
  0xb8   :  { %6360 = vmatpush1.bf16.msra.mxu0 %v10021_v52  ;;  %6688 = vmatpush1.bf16.msra.mxu1 %v10023_v53  ;;  %v323_v52 = vld [vmem:[#allocation5 + $0x580] sm:$0xff] }
  0xb9   :  { %6361 = vmatprep.subr.bf16.mxu0 %v10030_v54  ;;  %6689 = vmatprep.subr.bf16.mxu1 %v10032_v55  ;;  %v327_v53 = vld [vmem:[#allocation5 + $0x5a0] sm:$0xff]  ;;  %v324_v54 = vld [vmem:[#allocation5 + $0x588] sm:$0xff]  ;;  %v10088_v55 = vcombine.high %v316_v46, %v320_v48 }
  0xba   :  { %v10094_v60 = vcombine.high %v323_v52, %v327_v53  ;;  %v10093_v2 = vcombine.low %v323_v52, %v327_v53  ;;  %v10095_v3 = vcombine.low %v324_v54, %v328_v56  ;;  %v383_v48 = vld [vmem:[#allocation5 + $0x760] sm:$0xff] }
  0xbc   :  { %6362 = vmatpush1.bf16.msra.mxu0 %v10029_v61  ;;  %6690 = vmatpush1.bf16.msra.mxu1 %v10031_v62  ;;  %v331_v61 = vld [vmem:[#allocation5 + $0x5c0] sm:$0xff] }
  0xbd   :  { %6363 = vmatprep.subr.bf16.mxu0 %v10038_v63  ;;  %6691 = vmatprep.subr.bf16.mxu1 %v10040_v0  ;;  %v335_v62 = vld [vmem:[#allocation5 + $0x5e0] sm:$0xff]  ;;  %v332_v63 = vld [vmem:[#allocation5 + $0x5c8] sm:$0xff]  ;;  %v10096_v0 = vcombine.high %v324_v54, %v328_v56 }
  0xbe   :  { %v10102_v4 = vcombine.high %v331_v61, %v335_v62  ;;  %v10101_v10 = vcombine.low %v331_v61, %v335_v62  ;;  %v10103_v11 = vcombine.low %v332_v63, %v336_v1  ;;  %v391_v56 = vld [vmem:[#allocation5 + $0x7a0] sm:$0xff] }
  0xc0   :  { %6364 = vmatpush1.bf16.msra.mxu0 %v10037_v5  ;;  %6692 = vmatpush1.bf16.msra.mxu1 %v10039_v7  ;;  %v339_v5 = vld [vmem:[#allocation5 + $0x600] sm:$0xff]  ;;  %v340_v7 = vld [vmem:[#allocation5 + $0x608] sm:$0xff] }
  0xc1   :  { %6374 = vmatprep.subr.bf16.mxu0 %v10046_v8  ;;  %6702 = vmatprep.subr.bf16.mxu1 %v10048_v9  ;;  %v10104_v8 = vcombine.high %v332_v63, %v336_v1  ;;  %v344_v9 = vld [vmem:[#allocation5 + $0x628] sm:$0xff]  ;;  %v10110_v13 = vcombine.high %v339_v5, %v343_v6  ;;  %v399_v1 = vld [vmem:[#allocation5 + $0x7e0] sm:$0xff] }
  0xc2   :  { %v10111_v20 = vcombine.low %v340_v7, %v344_v9 }
  0xc3   :  { %6366 = vmatmul.mubr.bf16.vlgmr.msra.gmra.mrb[0].mxu0 %v12181_v12  ;;  %6694 = vmatmul.mubr.bf16.vlgmr.msra.gmra.mrb[0].mxu1 %v12181_v12 }
  0xc4   :  { %6375 = vmatpush1.bf16.msra.mxu0 %v10045_v16  ;;  %6703 = vmatpush1.bf16.msra.mxu1 %v10047_v17  ;;  %v348_v16 = vld [vmem:[#allocation5 + $0x648] sm:$0xff]  ;;  %v10112_v17 = vcombine.high %v340_v7, %v344_v9  ;;  %v407_v9 = vld [vmem:[#allocation5 + $0x820] sm:$0xff] }
  0xc5   :  { %6376 = vmatprep.subr.bf16.mxu0 %v10054_v18  ;;  %6704 = vmatprep.subr.bf16.mxu1 %v10056_v19  ;;  %v352_v18 = vld [vmem:[#allocation5 + $0x668] sm:$0xff]  ;;  %v10109_v19 = vcombine.low %v339_v5, %v343_v6  ;;  %v403_v6 = vld [vmem:[#allocation5 + $0x800] sm:$0xff] }
  0xc6   :  { %6406 = vmatprep.mubr.bf16.mxu0 %v12183_v23  ;;  %6734 = vmatprep.mubr.bf16.mxu1 %v12183_v23  ;;  %v10119_v29 = vcombine.low %v348_v16, %v352_v18 }
  0xc8   :  { %6377 = vmatpush1.bf16.msra.mxu0 %v10053_v25  ;;  %6705 = vmatpush1.bf16.msra.mxu1 %v10055_v26  ;;  %v356_v25 = vld [vmem:[#allocation5 + $0x688] sm:$0xff]  ;;  %v10120_v26 = vcombine.high %v348_v16, %v352_v18  ;;  %v411_v16 = vld [vmem:[#allocation5 + $0x840] sm:$0xff]  ;;  %v10174_v18 = vcombine.high %v403_v6, %v407_v9 }
  0xc9   :  { %6378 = vmatprep.subr.bf16.mxu0 %v10062_v27  ;;  %6706 = vmatprep.subr.bf16.mxu1 %v10064_v31  ;;  %v360_v27 = vld [vmem:[#allocation5 + $0x6a8] sm:$0xff]  ;;  %v363_v31 = vld [vmem:[#allocation5 + $0x6c0] sm:$0xff] }
  0xca   :  { %v10127_v37 = vcombine.low %v356_v25, %v360_v27  ;;  %v10134_v38 = vcombine.high %v363_v31, %v367_v32  ;;  %v10133_v44 = vcombine.low %v363_v31, %v367_v32  ;;  %v423_v31 = vld [vmem:[#allocation5 + $0x8a0] sm:$0xff]  ;;  %v420_v32 = vld [vmem:[#allocation5 + $0x888] sm:$0xff] }
  0xcc   :  { %6379 = vmatpush1.bf16.msra.mxu0 %v10061_v33  ;;  %6707 = vmatpush1.bf16.msra.mxu1 %v10063_v34  ;;  %v364_v33 = vld [vmem:[#allocation5 + $0x6c8] sm:$0xff]  ;;  %v10128_v34 = vcombine.high %v356_v25, %v360_v27  ;;  %v12189_v25 = vpack.c.bf16 %v117_v14, %v117_v14 }
  0xcd   :  { %6380 = vmatprep.subr.bf16.mxu0 %v10070_v35  ;;  %6708 = vmatprep.subr.bf16.mxu1 %v10072_v39  ;;  %v368_v35 = vld [vmem:[#allocation5 + $0x6e8] sm:$0xff]  ;;  %v371_v39 = vld [vmem:[#allocation5 + $0x700] sm:$0xff] }
  0xce   :  { %v10135_v45 = vcombine.low %v364_v33, %v368_v35  ;;  %v10142_v46 = vcombine.high %v371_v39, %v375_v40  ;;  %v10141_v52 = vcombine.low %v371_v39, %v375_v40  ;;  %v431_v39 = vld [vmem:[#allocation5 + $0x8e0] sm:$0xff]  ;;  %v428_v40 = vld [vmem:[#allocation5 + $0x8c8] sm:$0xff] }
  0xd0   :  { %6381 = vmatpush1.bf16.msra.mxu0 %v10069_v41  ;;  %6709 = vmatpush1.bf16.msra.mxu1 %v10071_v42  ;;  %v372_v41 = vld [vmem:[#allocation5 + $0x708] sm:$0xff]  ;;  %v10136_v42 = vcombine.high %v364_v33, %v368_v35 }
  0xd1   :  { %6382 = vmatprep.subr.bf16.mxu0 %v10078_v43  ;;  %6710 = vmatprep.subr.bf16.mxu1 %v10080_v47  ;;  %v376_v43 = vld [vmem:[#allocation5 + $0x728] sm:$0xff]  ;;  %v379_v47 = vld [vmem:[#allocation5 + $0x740] sm:$0xff] }
  0xd2   :  { %v10143_v53 = vcombine.low %v372_v41, %v376_v43  ;;  %v10150_v54 = vcombine.high %v379_v47, %v383_v48  ;;  %v10149_v61 = vcombine.low %v379_v47, %v383_v48  ;;  %v424_v33 = vld [vmem:[#allocation5 + $0x8a8] sm:$0xff]  ;;  %v439_v47 = vld [vmem:[#allocation5 + $0x920] sm:$0xff] }
  0xd3   :  { %v436_v48 = vld [vmem:[#allocation5 + $0x908] sm:$0xff] }
  0xd4   :  { %6383 = vmatpush1.bf16.msra.mxu0 %v10077_v49  ;;  %6711 = vmatpush1.bf16.msra.mxu1 %v10079_v50  ;;  %v380_v49 = vld [vmem:[#allocation5 + $0x748] sm:$0xff]  ;;  %v10144_v50 = vcombine.high %v372_v41, %v376_v43  ;;  %v10192_v41 = vcombine.high %v420_v32, %v424_v33 }
  0xd5   :  { %6384 = vmatprep.subr.bf16.mxu0 %v10086_v51  ;;  %6712 = vmatprep.subr.bf16.mxu1 %v10088_v55  ;;  %v384_v51 = vld [vmem:[#allocation5 + $0x768] sm:$0xff]  ;;  %v387_v55 = vld [vmem:[#allocation5 + $0x780] sm:$0xff] }
  0xd6   :  { %v10151_v62 = vcombine.low %v380_v49, %v384_v51  ;;  %v10158_v63 = vcombine.high %v387_v55, %v391_v56  ;;  %v10157_v5 = vcombine.low %v387_v55, %v391_v56  ;;  %v447_v55 = vld [vmem:[#allocation5 + $0x960] sm:$0xff]  ;;  %v444_v56 = vld [vmem:[#allocation5 + $0x948] sm:$0xff] }
  0xd8   :  { %6385 = vmatpush1.bf16.msra.mxu0 %v10085_v58  ;;  %6713 = vmatpush1.bf16.msra.mxu1 %v10087_v59  ;;  %v388_v58 = vld [vmem:[#allocation5 + $0x788] sm:$0xff]  ;;  %v10152_v59 = vcombine.high %v380_v49, %v384_v51 }
  0xd9   :  { %6386 = vmatprep.subr.bf16.mxu0 %v10094_v60  ;;  %6714 = vmatprep.subr.bf16.mxu1 %v10096_v0  ;;  %v392_v60 = vld [vmem:[#allocation5 + $0x7a8] sm:$0xff]  ;;  %v395_v0 = vld [vmem:[#allocation5 + $0x7c0] sm:$0xff] }
  0xda   :  { %v10159_v7 = vcombine.low %v388_v58, %v392_v60  ;;  %v10165_v15 = vcombine.low %v395_v0, %v399_v1 }
  0xdc   :  { %6387 = vmatpush1.bf16.msra.mxu0 %v10093_v2  ;;  %6715 = vmatpush1.bf16.msra.mxu1 %v10095_v3  ;;  %v396_v2 = vld [vmem:[#allocation5 + $0x7c8] sm:$0xff]  ;;  %v10160_v3 = vcombine.high %v388_v58, %v392_v60 }
  0xdd   :  { %6388 = vmatprep.subr.bf16.mxu0 %v10102_v4  ;;  %6716 = vmatprep.subr.bf16.mxu1 %v10104_v8  ;;  %v400_v4 = vld [vmem:[#allocation5 + $0x7e8] sm:$0xff]  ;;  %v10166_v8 = vcombine.high %v395_v0, %v399_v1  ;;  %v455_v0 = vld [vmem:[#allocation5 + $0x9a0] sm:$0xff] }
  0xde   :  { %v452_v1 = vld [vmem:[#allocation5 + $0x988] sm:$0xff] }
  0xe0   :  { %6389 = vmatpush1.bf16.msra.mxu0 %v10101_v10  ;;  %6717 = vmatpush1.bf16.msra.mxu1 %v10103_v11  ;;  %v404_v10 = vld [vmem:[#allocation5 + $0x808] sm:$0xff] }
  0xe1   :  { %6390 = vmatprep.subr.bf16.mxu0 %v10110_v13  ;;  %6718 = vmatprep.subr.bf16.mxu1 %v10112_v17  ;;  %v408_v11 = vld [vmem:[#allocation5 + $0x828] sm:$0xff]  ;;  %v10168_v13 = vcombine.high %v396_v2, %v400_v4  ;;  %v10167_v17 = vcombine.low %v396_v2, %v400_v4 }
  0xe2   :  { %v10176_v22 = vcombine.high %v404_v10, %v408_v11  ;;  %v10175_v27 = vcombine.low %v404_v10, %v408_v11  ;;  %v464_v11 = vld [vmem:[#allocation5 + $0x9e8] sm:$0xff] }
  0xe4   :  { %6391 = vmatpush1.bf16.msra.mxu0 %v10109_v19  ;;  %6719 = vmatpush1.bf16.msra.mxu1 %v10111_v20  ;;  %v415_v19 = vld [vmem:[#allocation5 + $0x860] sm:$0xff]  ;;  %v412_v20 = vld [vmem:[#allocation5 + $0x848] sm:$0xff] }
  0xe5   :  { %6392 = vmatprep.subr.bf16.mxu0 %v10118_v21  ;;  %6720 = vmatprep.subr.bf16.mxu1 %v10120_v26  ;;  %v416_v21 = vld [vmem:[#allocation5 + $0x868] sm:$0xff]  ;;  %v10173_v26 = vcombine.low %v403_v6, %v407_v9  ;;  %v10181_v35 = vcombine.low %v411_v16, %v415_v19 }
  0xe6   :  { %v460_v9 = vld [vmem:[#allocation5 + $0x9c8] sm:$0xff] }
  0xe8   :  { %6393 = vmatpush1.bf16.msra.mxu0 %v10117_v28  ;;  %6721 = vmatpush1.bf16.msra.mxu1 %v10119_v29  ;;  %v10182_v28 = vcombine.high %v411_v16, %v415_v19  ;;  %v419_v29 = vld [vmem:[#allocation5 + $0x880] sm:$0xff]  ;;  %v10232_v19 = vcombine.high %v460_v9, %v464_v11 }
  0xe9   :  { %6394 = vmatprep.subr.bf16.mxu0 %v10126_v30  ;;  %6722 = vmatprep.subr.bf16.mxu1 %v10128_v34  ;;  %v10184_v30 = vcombine.high %v412_v20, %v416_v21  ;;  %v12191_v34 = vpack.c.bf16 %v120_v24, %v120_v24  ;;  %v10189_v43 = vcombine.low %v419_v29, %v423_v31  ;;  %v467_v16 = vld [vmem:[#allocation5 + $0xa00] sm:$0xff] }
  0xec   :  { %6395 = vmatpush1.bf16.msra.mxu0 %v10125_v36  ;;  %6723 = vmatpush1.bf16.msra.mxu1 %v10127_v37  ;;  %v10183_v36 = vcombine.low %v412_v20, %v416_v21  ;;  %v10190_v37 = vcombine.high %v419_v29, %v423_v31  ;;  %v472_v20 = vld [vmem:[#allocation5 + $0xa28] sm:$0xff] }
  0xed   :  { %6396 = vmatprep.subr.bf16.mxu0 %v10134_v38  ;;  %6724 = vmatprep.subr.bf16.mxu1 %v10136_v42  ;;  %v427_v38 = vld [vmem:[#allocation5 + $0x8c0] sm:$0xff]  ;;  %v432_v42 = vld [vmem:[#allocation5 + $0x8e8] sm:$0xff] }
  0xee   :  { %v10200_v49 = vcombine.high %v428_v40, %v432_v42  ;;  %v10197_v51 = vcombine.low %v427_v38, %v431_v39 }
  0xf0   :  { %6397 = vmatpush1.bf16.msra.mxu0 %v10133_v44  ;;  %6725 = vmatpush1.bf16.msra.mxu1 %v10135_v45  ;;  %v10191_v44 = vcombine.low %v420_v32, %v424_v33  ;;  %v10198_v45 = vcombine.high %v427_v38, %v431_v39  ;;  %v488_v39 = vld [vmem:[#allocation5 + $0xaa8] sm:$0xff] }
  0xf1   :  { %6398 = vmatprep.subr.bf16.mxu0 %v10142_v46  ;;  %6726 = vmatprep.subr.bf16.mxu1 %v10144_v50  ;;  %v435_v46 = vld [vmem:[#allocation5 + $0x900] sm:$0xff]  ;;  %v440_v50 = vld [vmem:[#allocation5 + $0x928] sm:$0xff] }
  0xf2   :  { %v10208_v58 = vcombine.high %v436_v48, %v440_v50  ;;  %v10205_v60 = vcombine.low %v435_v46, %v439_v47 }
  0xf4   :  { %6399 = vmatpush1.bf16.msra.mxu0 %v10141_v52  ;;  %6727 = vmatpush1.bf16.msra.mxu1 %v10143_v53  ;;  %v10199_v52 = vcombine.low %v428_v40, %v432_v42  ;;  %v10206_v53 = vcombine.high %v435_v46, %v439_v47  ;;  %v496_v47 = vld [vmem:[#allocation5 + $0xae8] sm:$0xff] }
  0xf5   :  { %6400 = vmatprep.subr.bf16.mxu0 %v10150_v54  ;;  %6728 = vmatprep.subr.bf16.mxu1 %v10152_v59  ;;  %v443_v54 = vld [vmem:[#allocation5 + $0x940] sm:$0xff]  ;;  %v448_v59 = vld [vmem:[#allocation5 + $0x968] sm:$0xff] }
  0xf6   :  { %v10216_v2 = vcombine.high %v444_v56, %v448_v59  ;;  %v10213_v4 = vcombine.low %v443_v54, %v447_v55 }
  0xf8   :  { %6401 = vmatpush1.bf16.msra.mxu0 %v10149_v61  ;;  %6729 = vmatpush1.bf16.msra.mxu1 %v10151_v62  ;;  %v10207_v61 = vcombine.low %v436_v48, %v440_v50  ;;  %v10214_v62 = vcombine.high %v443_v54, %v447_v55  ;;  %v504_v55 = vld [vmem:[#allocation5 + $0xb28] sm:$0xff] }
  0xf9   :  { %6402 = vmatprep.subr.bf16.mxu0 %v10158_v63  ;;  %6730 = vmatprep.subr.bf16.mxu1 %v10160_v3  ;;  %v451_v63 = vld [vmem:[#allocation5 + $0x980] sm:$0xff]  ;;  %v456_v3 = vld [vmem:[#allocation5 + $0x9a8] sm:$0xff] }
  0xfa   :  { %v10222_v6 = vcombine.high %v451_v63, %v455_v0  ;;  %v10224_v10 = vcombine.high %v452_v1, %v456_v3  ;;  %v10223_v14 = vcombine.low %v452_v1, %v456_v3 }
  0xfc   :  { %6403 = vmatpush1.bf16.msra.mxu0 %v10157_v5  ;;  %6731 = vmatpush1.bf16.msra.mxu1 %v10159_v7  ;;  %v10215_v5 = vcombine.low %v444_v56, %v448_v59  ;;  %v459_v7 = vld [vmem:[#allocation5 + $0x9c0] sm:$0xff] }
  0xfd   :  { %6404 = vmatprep.subr.bf16.mxu0 %v10166_v8  ;;  %6732 = vmatprep.subr.bf16.mxu1 %v10168_v13  ;;  %v463_v8 = vld [vmem:[#allocation5 + $0x9e0] sm:$0xff]  ;;  %v10221_v13 = vcombine.low %v451_v63, %v455_v0  ;;  %v512_v0 = vld [vmem:[#allocation5 + $0xb68] sm:$0xff] }
  0xfe   :  { %v10229_v21 = vcombine.low %v459_v7, %v463_v8 }
 0x100   :  { %6405 = vmatpush1.bf16.msra.mxu0 %v10165_v15  ;;  %6733 = vmatpush1.bf16.msra.mxu1 %v10167_v17  ;;  %v10230_v15 = vcombine.high %v459_v7, %v463_v8  ;;  %v471_v17 = vld [vmem:[#allocation5 + $0xa20] sm:$0xff]  ;;  %v520_v8 = vld [vmem:[#allocation5 + $0xba8] sm:$0xff] }
 0x101   :  { %6415 = vmatprep.subr.bf16.mxu0 %v10174_v18  ;;  %6743 = vmatprep.subr.bf16.mxu1 %v10176_v22  ;;  %v468_v18 = vld [vmem:[#allocation5 + $0xa08] sm:$0xff]  ;;  %v10231_v22 = vcombine.low %v460_v9, %v464_v11  ;;  %v10238_v24 = vcombine.high %v467_v16, %v471_v17  ;;  %v10237_v31 = vcombine.low %v467_v16, %v471_v17 }
 0x102   :  { %v10240_v29 = vcombine.high %v468_v18, %v472_v20  ;;  %v10239_v32 = vcombine.low %v468_v18, %v472_v20  ;;  %v528_v17 = vld [vmem:[#allocation5 + $0xbe8] sm:$0xff] }
 0x103   :  { %6407 = vmatmul.mubr.bf16.vlgmr.msra.gmra.mrb[0].mxu0 %v12189_v25  ;;  %6735 = vmatmul.mubr.bf16.vlgmr.msra.gmra.mrb[0].mxu1 %v12189_v25 }
 0x104   :  { %6416 = vmatpush1.bf16.msra.mxu0 %v10173_v26  ;;  %6744 = vmatpush1.bf16.msra.mxu1 %v10175_v27  ;;  %v475_v26 = vld [vmem:[#allocation5 + $0xa40] sm:$0xff] }
 0x105   :  { %6417 = vmatprep.subr.bf16.mxu0 %v10182_v28  ;;  %6745 = vmatprep.subr.bf16.mxu1 %v10184_v30  ;;  %v479_v27 = vld [vmem:[#allocation5 + $0xa60] sm:$0xff]  ;;  %v476_v28 = vld [vmem:[#allocation5 + $0xa48] sm:$0xff] }
 0x106   :  { %6447 = vmatprep.mubr.bf16.mxu0 %v12191_v34  ;;  %6775 = vmatprep.mubr.bf16.mxu1 %v12191_v34  ;;  %v480_v30 = vld [vmem:[#allocation5 + $0xa68] sm:$0xff]  ;;  %v10246_v33 = vcombine.high %v475_v26, %v479_v27  ;;  %v10245_v40 = vcombine.low %v475_v26, %v479_v27 }
 0x107   :  { %v10248_v38 = vcombine.high %v476_v28, %v480_v30  ;;  %v536_v26 = vld [vmem:[#allocation5 + $0xc28] sm:$0xff] }
 0x108   :  { %6418 = vmatpush1.bf16.msra.mxu0 %v10181_v35  ;;  %6746 = vmatpush1.bf16.msra.mxu1 %v10183_v36  ;;  %v483_v35 = vld [vmem:[#allocation5 + $0xa80] sm:$0xff] }
 0x109   :  { %6419 = vmatprep.subr.bf16.mxu0 %v10190_v37  ;;  %6747 = vmatprep.subr.bf16.mxu1 %v10192_v41  ;;  %v487_v36 = vld [vmem:[#allocation5 + $0xaa0] sm:$0xff]  ;;  %v484_v37 = vld [vmem:[#allocation5 + $0xa88] sm:$0xff]  ;;  %v10247_v41 = vcombine.low %v476_v28, %v480_v30 }
 0x10a   :  { %v10254_v42 = vcombine.high %v483_v35, %v487_v36  ;;  %v10256_v46 = vcombine.high %v484_v37, %v488_v39  ;;  %v10253_v48 = vcombine.low %v483_v35, %v487_v36  ;;  %v119_v28 = vld [vmem:[#allocation2 + $0x20] sm:$0xff]  ;;  %v540_v35 = vld [vmem:[#allocation5 + $0xc48] sm:$0xff] }
 0x10b   :  { %v539_v30 = vld [vmem:[#allocation5 + $0xc40] sm:$0xff]  ;;  %v544_v36 = vld [vmem:[#allocation5 + $0xc68] sm:$0xff] }
 0x10c   :  { %6420 = vmatpush1.bf16.msra.mxu0 %v10189_v43  ;;  %6748 = vmatpush1.bf16.msra.mxu1 %v10191_v44  ;;  %v491_v43 = vld [vmem:[#allocation5 + $0xac0] sm:$0xff] }
 0x10d   :  { %6421 = vmatprep.subr.bf16.mxu0 %v10198_v45  ;;  %6749 = vmatprep.subr.bf16.mxu1 %v10200_v49  ;;  %v495_v44 = vld [vmem:[#allocation5 + $0xae0] sm:$0xff]  ;;  %v492_v45 = vld [vmem:[#allocation5 + $0xac8] sm:$0xff]  ;;  %v10255_v49 = vcombine.low %v484_v37, %v488_v39  ;;  %v12197_v39 = vpack.c.bf16 %v119_v28, %v119_v28 }
 0x10e   :  { %v10262_v50 = vcombine.high %v491_v43, %v495_v44  ;;  %v10264_v54 = vcombine.high %v492_v45, %v496_v47  ;;  %v10261_v56 = vcombine.low %v491_v43, %v495_v44  ;;  %v547_v43 = vld [vmem:[#allocation5 + $0xc80] sm:$0xff]  ;;  %v10312_v44 = vcombine.high %v540_v35, %v544_v36  ;;  %v592_v28 = vld [vmem:[#allocation5 + $0xde8] sm:$0xff] }
 0x110   :  { %6422 = vmatpush1.bf16.msra.mxu0 %v10197_v51  ;;  %6750 = vmatpush1.bf16.msra.mxu1 %v10199_v52  ;;  %v499_v51 = vld [vmem:[#allocation5 + $0xb00] sm:$0xff] }
 0x111   :  { %6423 = vmatprep.subr.bf16.mxu0 %v10206_v53  ;;  %6751 = vmatprep.subr.bf16.mxu1 %v10208_v58  ;;  %v503_v52 = vld [vmem:[#allocation5 + $0xb20] sm:$0xff]  ;;  %v500_v53 = vld [vmem:[#allocation5 + $0xb08] sm:$0xff]  ;;  %v10263_v58 = vcombine.low %v492_v45, %v496_v47 }
 0x112   :  { %v10270_v59 = vcombine.high %v499_v51, %v503_v52  ;;  %v10272_v63 = vcombine.high %v500_v53, %v504_v55  ;;  %v10269_v1 = vcombine.low %v499_v51, %v503_v52  ;;  %v551_v45 = vld [vmem:[#allocation5 + $0xca0] sm:$0xff]  ;;  %v552_v47 = vld [vmem:[#allocation5 + $0xca8] sm:$0xff] }
 0x113   :  { %v10318_v51 = vcombine.high %v547_v43, %v551_v45  ;;  %v555_v52 = vld [vmem:[#allocation5 + $0xcc0] sm:$0xff] }
 0x114   :  { %6424 = vmatpush1.bf16.msra.mxu0 %v10205_v60  ;;  %6752 = vmatpush1.bf16.msra.mxu1 %v10207_v61  ;;  %v507_v60 = vld [vmem:[#allocation5 + $0xb40] sm:$0xff] }
 0x115   :  { %6425 = vmatprep.subr.bf16.mxu0 %v10214_v62  ;;  %6753 = vmatprep.subr.bf16.mxu1 %v10216_v2  ;;  %v511_v61 = vld [vmem:[#allocation5 + $0xb60] sm:$0xff]  ;;  %v508_v62 = vld [vmem:[#allocation5 + $0xb48] sm:$0xff]  ;;  %v10271_v2 = vcombine.low %v500_v53, %v504_v55 }
 0x116   :  { %v10278_v3 = vcombine.high %v507_v60, %v511_v61  ;;  %v10280_v7 = vcombine.high %v508_v62, %v512_v0  ;;  %v10277_v9 = vcombine.low %v507_v60, %v511_v61  ;;  %v559_v53 = vld [vmem:[#allocation5 + $0xce0] sm:$0xff] }
 0x117   :  { %v10326_v60 = vcombine.high %v555_v52, %v559_v53  ;;  %v563_v61 = vld [vmem:[#allocation5 + $0xd00] sm:$0xff] }
 0x118   :  { %6426 = vmatpush1.bf16.msra.mxu0 %v10213_v4  ;;  %6754 = vmatpush1.bf16.msra.mxu1 %v10215_v5  ;;  %v515_v4 = vld [vmem:[#allocation5 + $0xb80] sm:$0xff] }
 0x119   :  { %6427 = vmatprep.subr.bf16.mxu0 %v10222_v6  ;;  %6755 = vmatprep.subr.bf16.mxu1 %v10224_v10  ;;  %v519_v5 = vld [vmem:[#allocation5 + $0xba0] sm:$0xff]  ;;  %v516_v6 = vld [vmem:[#allocation5 + $0xb88] sm:$0xff]  ;;  %v10279_v10 = vcombine.low %v508_v62, %v512_v0 }
 0x11a   :  { %v10286_v11 = vcombine.high %v515_v4, %v519_v5  ;;  %v10288_v16 = vcombine.high %v516_v6, %v520_v8  ;;  %v10285_v18 = vcombine.low %v515_v4, %v519_v5  ;;  %v10287_v20 = vcombine.low %v516_v6, %v520_v8  ;;  %v567_v62 = vld [vmem:[#allocation5 + $0xd20] sm:$0xff] }
 0x11b   :  { %v10334_v4 = vcombine.high %v563_v61, %v567_v62  ;;  %v571_v5 = vld [vmem:[#allocation5 + $0xd40] sm:$0xff] }
 0x11c   :  { %6428 = vmatpush1.bf16.msra.mxu0 %v10221_v13  ;;  %6756 = vmatpush1.bf16.msra.mxu1 %v10223_v14  ;;  %v523_v13 = vld [vmem:[#allocation5 + $0xbc0] sm:$0xff] }
 0x11d   :  { %6429 = vmatprep.subr.bf16.mxu0 %v10230_v15  ;;  %6757 = vmatprep.subr.bf16.mxu1 %v10232_v19  ;;  %v527_v14 = vld [vmem:[#allocation5 + $0xbe0] sm:$0xff]  ;;  %v524_v15 = vld [vmem:[#allocation5 + $0xbc8] sm:$0xff] }
 0x11e   :  { %v531_v19 = vld [vmem:[#allocation5 + $0xc00] sm:$0xff]  ;;  %v10296_v27 = vcombine.high %v524_v15, %v528_v17 }
 0x11f   :  { %v575_v6 = vld [vmem:[#allocation5 + $0xd60] sm:$0xff] }
 0x120   :  { %6430 = vmatpush1.bf16.msra.mxu0 %v10229_v21  ;;  %6758 = vmatpush1.bf16.msra.mxu1 %v10231_v22  ;;  %v10294_v21 = vcombine.high %v523_v13, %v527_v14  ;;  %v535_v22 = vld [vmem:[#allocation5 + $0xc20] sm:$0xff] }
 0x121   :  { %6431 = vmatprep.subr.bf16.mxu0 %v10238_v24  ;;  %6759 = vmatprep.subr.bf16.mxu1 %v10240_v29  ;;  %v532_v24 = vld [vmem:[#allocation5 + $0xc08] sm:$0xff]  ;;  %v10293_v29 = vcombine.low %v523_v13, %v527_v14  ;;  %v10342_v13 = vcombine.high %v571_v5, %v575_v6  ;;  %v579_v14 = vld [vmem:[#allocation5 + $0xd80] sm:$0xff] }
 0x122   :  { %v10304_v37 = vcombine.high %v532_v24, %v536_v26 }
 0x124   :  { %6432 = vmatpush1.bf16.msra.mxu0 %v10237_v31  ;;  %6760 = vmatpush1.bf16.msra.mxu1 %v10239_v32  ;;  %v10295_v31 = vcombine.low %v524_v15, %v528_v17  ;;  %v10302_v32 = vcombine.high %v531_v19, %v535_v22  ;;  %v583_v15 = vld [vmem:[#allocation5 + $0xda0] sm:$0xff] }
 0x125   :  { %6433 = vmatprep.subr.bf16.mxu0 %v10246_v33  ;;  %6761 = vmatprep.subr.bf16.mxu1 %v10248_v38  ;;  %v543_v33 = vld [vmem:[#allocation5 + $0xc60] sm:$0xff]  ;;  %v122_v38 = vld [vmem:[#allocation2 + $0x38] sm:$0xff] }
 0x128   :  { %6434 = vmatpush1.bf16.msra.mxu0 %v10245_v40  ;;  %6762 = vmatpush1.bf16.msra.mxu1 %v10247_v41  ;;  %v10301_v40 = vcombine.low %v531_v19, %v535_v22  ;;  %v10303_v41 = vcombine.low %v532_v24, %v536_v26  ;;  %v10341_v19 = vcombine.low %v571_v5, %v575_v6  ;;  %v587_v22 = vld [vmem:[#allocation5 + $0xdc0] sm:$0xff]  ;;  %v588_v26 = vld [vmem:[#allocation5 + $0xdc8] sm:$0xff] }
 0x129   :  { %6435 = vmatprep.subr.bf16.mxu0 %v10254_v42  ;;  %6763 = vmatprep.subr.bf16.mxu1 %v10256_v46  ;;  %v10310_v42 = vcombine.high %v539_v30, %v543_v33  ;;  %v548_v46 = vld [vmem:[#allocation5 + $0xc88] sm:$0xff]  ;;  %v591_v24 = vld [vmem:[#allocation5 + $0xde0] sm:$0xff] }
 0x12a   :  { %v10320_v55 = vcombine.high %v548_v46, %v552_v47  ;;  %v627_v5 = vld [vmem:[#allocation5 + $0xf00] sm:$0xff] }
 0x12b   :  { %v631_v6 = vld [vmem:[#allocation5 + $0xf20] sm:$0xff] }
 0x12c   :  { %6436 = vmatpush1.bf16.msra.mxu0 %v10253_v48  ;;  %6764 = vmatpush1.bf16.msra.mxu1 %v10255_v49  ;;  %v12199_v48 = vpack.c.bf16 %v122_v38, %v122_v38  ;;  %v10309_v49 = vcombine.low %v539_v30, %v543_v33  ;;  %v599_v33 = vld [vmem:[#allocation5 + $0xe20] sm:$0xff]  ;;  %v10357_v38 = vcombine.low %v587_v22, %v591_v24 }
 0x12d   :  { %6437 = vmatprep.subr.bf16.mxu0 %v10262_v50  ;;  %6765 = vmatprep.subr.bf16.mxu1 %v10264_v54  ;;  %v10311_v50 = vcombine.low %v540_v35, %v544_v36  ;;  %v556_v54 = vld [vmem:[#allocation5 + $0xcc8] sm:$0xff]  ;;  %v10360_v36 = vcombine.high %v588_v26, %v592_v28 }
 0x12e   :  { %v596_v35 = vld [vmem:[#allocation5 + $0xe08] sm:$0xff] }
 0x130   :  { %6438 = vmatpush1.bf16.msra.mxu0 %v10261_v56  ;;  %6766 = vmatpush1.bf16.msra.mxu1 %v10263_v58  ;;  %v560_v56 = vld [vmem:[#allocation5 + $0xce8] sm:$0xff]  ;;  %v10317_v58 = vcombine.low %v547_v43, %v551_v45  ;;  %v607_v43 = vld [vmem:[#allocation5 + $0xe60] sm:$0xff] }
 0x131   :  { %6439 = vmatprep.subr.bf16.mxu0 %v10270_v59  ;;  %6767 = vmatprep.subr.bf16.mxu1 %v10272_v63  ;;  %v10319_v59 = vcombine.low %v548_v46, %v552_v47  ;;  %v564_v63 = vld [vmem:[#allocation5 + $0xd08] sm:$0xff]  ;;  %v10328_v0 = vcombine.high %v556_v54, %v560_v56 }
 0x132   :  { %v608_v46 = vld [vmem:[#allocation5 + $0xe68] sm:$0xff] }
 0x134   :  { %6440 = vmatpush1.bf16.msra.mxu0 %v10269_v1  ;;  %6768 = vmatpush1.bf16.msra.mxu1 %v10271_v2  ;;  %v568_v1 = vld [vmem:[#allocation5 + $0xd28] sm:$0xff]  ;;  %v10325_v2 = vcombine.low %v555_v52, %v559_v53  ;;  %v615_v52 = vld [vmem:[#allocation5 + $0xea0] sm:$0xff] }
 0x135   :  { %6441 = vmatprep.subr.bf16.mxu0 %v10278_v3  ;;  %6769 = vmatprep.subr.bf16.mxu1 %v10280_v7  ;;  %v10327_v3 = vcombine.low %v556_v54, %v560_v56  ;;  %v572_v7 = vld [vmem:[#allocation5 + $0xd48] sm:$0xff]  ;;  %v10336_v8 = vcombine.high %v564_v63, %v568_v1 }
 0x136   :  { %v612_v53 = vld [vmem:[#allocation5 + $0xe88] sm:$0xff] }
 0x138   :  { %6442 = vmatpush1.bf16.msra.mxu0 %v10277_v9  ;;  %6770 = vmatpush1.bf16.msra.mxu1 %v10279_v10  ;;  %v576_v9 = vld [vmem:[#allocation5 + $0xd68] sm:$0xff]  ;;  %v10333_v10 = vcombine.low %v563_v61, %v567_v62  ;;  %v619_v61 = vld [vmem:[#allocation5 + $0xec0] sm:$0xff] }
 0x139   :  { %6443 = vmatprep.subr.bf16.mxu0 %v10286_v11  ;;  %6771 = vmatprep.subr.bf16.mxu1 %v10288_v16  ;;  %v10335_v11 = vcombine.low %v564_v63, %v568_v1  ;;  %v580_v16 = vld [vmem:[#allocation5 + $0xd88] sm:$0xff]  ;;  %v10344_v17 = vcombine.high %v572_v7, %v576_v9  ;;  %v623_v62 = vld [vmem:[#allocation5 + $0xee0] sm:$0xff] }
 0x13a   :  { %v620_v63 = vld [vmem:[#allocation5 + $0xec8] sm:$0xff] }
 0x13c   :  { %6444 = vmatpush1.bf16.msra.mxu0 %v10285_v18  ;;  %6772 = vmatpush1.bf16.msra.mxu1 %v10287_v20  ;;  %v584_v18 = vld [vmem:[#allocation5 + $0xda8] sm:$0xff]  ;;  %v10343_v20 = vcombine.low %v572_v7, %v576_v9  ;;  %v10389_v9 = vcombine.low %v619_v61, %v623_v62 }
 0x13d   :  { %6445 = vmatprep.subr.bf16.mxu0 %v10294_v21  ;;  %6773 = vmatprep.subr.bf16.mxu1 %v10296_v27  ;;  %v10350_v21 = vcombine.high %v579_v14, %v583_v15  ;;  %v10352_v27 = vcombine.high %v580_v16, %v584_v18  ;;  %v10351_v30 = vcombine.low %v580_v16, %v584_v18  ;;  %v628_v7 = vld [vmem:[#allocation5 + $0xf08] sm:$0xff] }
 0x13e   :  { %v636_v16 = vld [vmem:[#allocation5 + $0xf48] sm:$0xff]  ;;  %v10397_v18 = vcombine.low %v627_v5, %v631_v6 }
 0x140   :  { %6446 = vmatpush1.bf16.msra.mxu0 %v10293_v29  ;;  %6774 = vmatpush1.bf16.msra.mxu1 %v10295_v31  ;;  %v10349_v29 = vcombine.low %v579_v14, %v583_v15  ;;  %v10358_v31 = vcombine.high %v587_v22, %v591_v24  ;;  %v635_v14 = vld [vmem:[#allocation5 + $0xf40] sm:$0xff] }
 0x141   :  { %6456 = vmatprep.subr.bf16.mxu0 %v10302_v32  ;;  %6784 = vmatprep.subr.bf16.mxu1 %v10304_v37  ;;  %v595_v32 = vld [vmem:[#allocation5 + $0xe00] sm:$0xff]  ;;  %v600_v37 = vld [vmem:[#allocation5 + $0xe28] sm:$0xff] }
 0x142   :  { %v10368_v45 = vcombine.high %v596_v35, %v600_v37  ;;  %v10365_v47 = vcombine.low %v595_v32, %v599_v33  ;;  %v639_v15 = vld [vmem:[#allocation5 + $0xf60] sm:$0xff] }
 0x143   :  { %6448 = vmatmul.mubr.bf16.vlgmr.msra.gmra.mrb[0].mxu0 %v12197_v39  ;;  %6776 = vmatmul.mubr.bf16.vlgmr.msra.gmra.mrb[0].mxu1 %v12197_v39  ;;  %v643_v22 = vld [vmem:[#allocation5 + $0xf80] sm:$0xff] }
 0x144   :  { %6457 = vmatpush1.bf16.msra.mxu0 %v10301_v40  ;;  %6785 = vmatpush1.bf16.msra.mxu1 %v10303_v41  ;;  %v10359_v40 = vcombine.low %v588_v26, %v592_v28  ;;  %v10366_v41 = vcombine.high %v595_v32, %v599_v33  ;;  %v647_v24 = vld [vmem:[#allocation5 + $0xfa0] sm:$0xff]  ;;  %v644_v26 = vld [vmem:[#allocation5 + $0xf88] sm:$0xff]  ;;  %v10405_v28 = vcombine.low %v635_v14, %v639_v15 }
 0x145   :  { %6458 = vmatprep.subr.bf16.mxu0 %v10310_v42  ;;  %6786 = vmatprep.subr.bf16.mxu1 %v10312_v44  ;;  %v603_v42 = vld [vmem:[#allocation5 + $0xe40] sm:$0xff]  ;;  %v604_v44 = vld [vmem:[#allocation5 + $0xe48] sm:$0xff] }
 0x146   :  { %6488 = vmatprep.mubr.bf16.mxu0 %v12199_v48  ;;  %6816 = vmatprep.mubr.bf16.mxu1 %v12199_v48  ;;  %v10376_v54 = vcombine.high %v604_v44, %v608_v46  ;;  %v10373_v56 = vcombine.low %v603_v42, %v607_v43  ;;  %v651_v32 = vld [vmem:[#allocation5 + $0xfc0] sm:$0xff] }
 0x147   :  { %v655_v33 = vld [vmem:[#allocation5 + $0xfe0] sm:$0xff] }
 0x148   :  { %6459 = vmatpush1.bf16.msra.mxu0 %v10309_v49  ;;  %6787 = vmatpush1.bf16.msra.mxu1 %v10311_v50  ;;  %v10367_v49 = vcombine.low %v596_v35, %v600_v37  ;;  %v10374_v50 = vcombine.high %v603_v42, %v607_v43  ;;  %v652_v35 = vld [vmem:[#allocation5 + $0xfc8] sm:$0xff]  ;;  %v10413_v37 = vcombine.low %v643_v22, %v647_v24  ;;  %v659_v42 = vld [vmem:[#allocation5 + $0x1000] sm:$0xff] }
 0x149   :  { %6460 = vmatprep.subr.bf16.mxu0 %v10318_v51  ;;  %6788 = vmatprep.subr.bf16.mxu1 %v10320_v55  ;;  %v611_v51 = vld [vmem:[#allocation5 + $0xe80] sm:$0xff]  ;;  %v616_v55 = vld [vmem:[#allocation5 + $0xea8] sm:$0xff] }
 0x14a   :  { %v10381_v1 = vcombine.low %v611_v51, %v615_v52  ;;  %v663_v43 = vld [vmem:[#allocation5 + $0x1020] sm:$0xff] }
 0x14c   :  { %6461 = vmatpush1.bf16.msra.mxu0 %v10317_v58  ;;  %6789 = vmatpush1.bf16.msra.mxu1 %v10319_v59  ;;  %v10375_v58 = vcombine.low %v604_v44, %v608_v46  ;;  %v10382_v59 = vcombine.high %v611_v51, %v615_v52  ;;  %v660_v44 = vld [vmem:[#allocation5 + $0x1008] sm:$0xff]  ;;  %v10421_v46 = vcombine.low %v651_v32, %v655_v33  ;;  %v667_v52 = vld [vmem:[#allocation5 + $0x1040] sm:$0xff] }
 0x14d   :  { %6462 = vmatprep.subr.bf16.mxu0 %v10326_v60  ;;  %6790 = vmatprep.subr.bf16.mxu1 %v10328_v0  ;;  %v10384_v60 = vcombine.high %v612_v53, %v616_v55  ;;  %v624_v0 = vld [vmem:[#allocation5 + $0xee8] sm:$0xff] }
 0x150   :  { %6463 = vmatpush1.bf16.msra.mxu0 %v10325_v2  ;;  %6791 = vmatpush1.bf16.msra.mxu1 %v10327_v3  ;;  %v10383_v2 = vcombine.low %v612_v53, %v616_v55  ;;  %v10390_v3 = vcombine.high %v619_v61, %v623_v62  ;;  %v671_v53 = vld [vmem:[#allocation5 + $0x1060] sm:$0xff]  ;;  %v668_v55 = vld [vmem:[#allocation5 + $0x1048] sm:$0xff] }
 0x151   :  { %6464 = vmatprep.subr.bf16.mxu0 %v10334_v4  ;;  %6792 = vmatprep.subr.bf16.mxu1 %v10336_v8  ;;  %v10392_v4 = vcombine.high %v620_v63, %v624_v0  ;;  %v632_v8 = vld [vmem:[#allocation5 + $0xf28] sm:$0xff]  ;;  %v10438_v61 = vcombine.high %v667_v52, %v671_v53 }
 0x154   :  { %6465 = vmatpush1.bf16.msra.mxu0 %v10333_v10  ;;  %6793 = vmatpush1.bf16.msra.mxu1 %v10335_v11  ;;  %v10391_v10 = vcombine.low %v620_v63, %v624_v0  ;;  %v10398_v11 = vcombine.high %v627_v5, %v631_v6  ;;  %v675_v63 = vld [vmem:[#allocation5 + $0x1080] sm:$0xff] }
 0x155   :  { %6466 = vmatprep.subr.bf16.mxu0 %v10342_v13  ;;  %6794 = vmatprep.subr.bf16.mxu1 %v10344_v17  ;;  %v10400_v13 = vcombine.high %v628_v7, %v632_v8  ;;  %v640_v17 = vld [vmem:[#allocation5 + $0xf68] sm:$0xff]  ;;  %v679_v0 = vld [vmem:[#allocation5 + $0x10a0] sm:$0xff] }
 0x156   :  { %v10446_v6 = vcombine.high %v675_v63, %v679_v0 }
 0x158   :  { %6467 = vmatpush1.bf16.msra.mxu0 %v10341_v19  ;;  %6795 = vmatpush1.bf16.msra.mxu1 %v10343_v20  ;;  %v10399_v19 = vcombine.low %v628_v7, %v632_v8  ;;  %v10406_v20 = vcombine.high %v635_v14, %v639_v15  ;;  %v683_v8 = vld [vmem:[#allocation5 + $0x10c0] sm:$0xff] }
 0x159   :  { %6468 = vmatprep.subr.bf16.mxu0 %v10350_v21  ;;  %6796 = vmatprep.subr.bf16.mxu1 %v10352_v27  ;;  %v10408_v21 = vcombine.high %v636_v16, %v640_v17  ;;  %v648_v27 = vld [vmem:[#allocation5 + $0xfa8] sm:$0xff] }
 0x15c   :  { %6469 = vmatpush1.bf16.msra.mxu0 %v10349_v29  ;;  %6797 = vmatpush1.bf16.msra.mxu1 %v10351_v30  ;;  %v10407_v29 = vcombine.low %v636_v16, %v640_v17  ;;  %v10414_v30 = vcombine.high %v643_v22, %v647_v24  ;;  %v691_v17 = vld [vmem:[#allocation5 + $0x1100] sm:$0xff] }
 0x15d   :  { %6470 = vmatprep.subr.bf16.mxu0 %v10358_v31  ;;  %6798 = vmatprep.subr.bf16.mxu1 %v10360_v36  ;;  %v10416_v31 = vcombine.high %v644_v26, %v648_v27  ;;  %v656_v36 = vld [vmem:[#allocation5 + $0xfe8] sm:$0xff] }
 0x160   :  { %6471 = vmatpush1.bf16.msra.mxu0 %v10357_v38  ;;  %6799 = vmatpush1.bf16.msra.mxu1 %v10359_v40  ;;  %v10415_v38 = vcombine.low %v644_v26, %v648_v27  ;;  %v10422_v40 = vcombine.high %v651_v32, %v655_v33  ;;  %v699_v27 = vld [vmem:[#allocation5 + $0x1140] sm:$0xff] }
 0x161   :  { %6472 = vmatprep.subr.bf16.mxu0 %v10366_v41  ;;  %6800 = vmatprep.subr.bf16.mxu1 %v10368_v45  ;;  %v10424_v41 = vcombine.high %v652_v35, %v656_v36  ;;  %v664_v45 = vld [vmem:[#allocation5 + $0x1028] sm:$0xff] }
 0x162   :  { %v10432_v51 = vcombine.high %v660_v44, %v664_v45 }
 0x164   :  { %6473 = vmatpush1.bf16.msra.mxu0 %v10365_v47  ;;  %6801 = vmatpush1.bf16.msra.mxu1 %v10367_v49  ;;  %v121_v47 = vld [vmem:[#allocation2 + $0x30] sm:$0xff]  ;;  %v10423_v49 = vcombine.low %v652_v35, %v656_v36  ;;  %v707_v36 = vld [vmem:[#allocation5 + $0x1180] sm:$0xff] }
 0x165   :  { %6474 = vmatprep.subr.bf16.mxu0 %v10374_v50  ;;  %6802 = vmatprep.subr.bf16.mxu1 %v10376_v54  ;;  %v10430_v50 = vcombine.high %v659_v42, %v663_v43  ;;  %v12205_v54 = vpack.c.bf16 %v121_v47, %v121_v47  ;;  %v716_v47 = vld [vmem:[#allocation5 + $0x11c8] sm:$0xff] }
 0x168   :  { %6475 = vmatpush1.bf16.msra.mxu0 %v10373_v56  ;;  %6803 = vmatpush1.bf16.msra.mxu1 %v10375_v58  ;;  %v672_v56 = vld [vmem:[#allocation5 + $0x1068] sm:$0xff] }
 0x169   :  { %6476 = vmatprep.subr.bf16.mxu0 %v10382_v59  ;;  %6804 = vmatprep.subr.bf16.mxu1 %v10384_v60  ;;  %v124_v58 = vld [vmem:[#allocation2 + $0x48] sm:$0xff]  ;;  %v10429_v59 = vcombine.low %v659_v42, %v663_v43  ;;  %v10431_v60 = vcombine.low %v660_v44, %v664_v45  ;;  %v10440_v62 = vcombine.high %v668_v55, %v672_v56  ;;  %v715_v45 = vld [vmem:[#allocation5 + $0x11c0] sm:$0xff] }
 0x16a   :  { %v10439_v5 = vcombine.low %v668_v55, %v672_v56  ;;  %v723_v55 = vld [vmem:[#allocation5 + $0x1200] sm:$0xff] }
 0x16b   :  { %v727_v56 = vld [vmem:[#allocation5 + $0x1220] sm:$0xff] }
 0x16c   :  { %6477 = vmatpush1.bf16.msra.mxu0 %v10381_v1  ;;  %6805 = vmatpush1.bf16.msra.mxu1 %v10383_v2  ;;  %v12207_v1 = vpack.c.bf16 %v124_v58, %v124_v58  ;;  %v676_v2 = vld [vmem:[#allocation5 + $0x1088] sm:$0xff] }
 0x16d   :  { %6478 = vmatprep.subr.bf16.mxu0 %v10390_v3  ;;  %6806 = vmatprep.subr.bf16.mxu1 %v10392_v4  ;;  %v680_v3 = vld [vmem:[#allocation5 + $0x10a8] sm:$0xff]  ;;  %v10437_v4 = vcombine.low %v667_v52, %v671_v53 }
 0x16e   :  { %v10448_v7 = vcombine.high %v676_v2, %v680_v3  ;;  %v10447_v14 = vcombine.low %v676_v2, %v680_v3  ;;  %v724_v58 = vld [vmem:[#allocation5 + $0x1208] sm:$0xff]  ;;  %v735_v2 = vld [vmem:[#allocation5 + $0x1260] sm:$0xff] }
 0x16f   :  { %v732_v3 = vld [vmem:[#allocation5 + $0x1248] sm:$0xff] }
 0x170   :  { %6479 = vmatpush1.bf16.msra.mxu0 %v10389_v9  ;;  %6807 = vmatpush1.bf16.msra.mxu1 %v10391_v10  ;;  %v687_v9 = vld [vmem:[#allocation5 + $0x10e0] sm:$0xff]  ;;  %v684_v10 = vld [vmem:[#allocation5 + $0x10c8] sm:$0xff] }
 0x171   :  { %6480 = vmatprep.subr.bf16.mxu0 %v10398_v11  ;;  %6808 = vmatprep.subr.bf16.mxu1 %v10400_v13  ;;  %v688_v11 = vld [vmem:[#allocation5 + $0x10e8] sm:$0xff]  ;;  %v10445_v13 = vcombine.low %v675_v63, %v679_v0  ;;  %v10454_v15 = vcombine.high %v683_v8, %v687_v9  ;;  %v731_v0 = vld [vmem:[#allocation5 + $0x1240] sm:$0xff] }
 0x172   :  { %v10456_v16 = vcombine.high %v684_v10, %v688_v11  ;;  %v10455_v22 = vcombine.low %v684_v10, %v688_v11  ;;  %v743_v10 = vld [vmem:[#allocation5 + $0x12a0] sm:$0xff]  ;;  %v740_v11 = vld [vmem:[#allocation5 + $0x1288] sm:$0xff] }
 0x174   :  { %6481 = vmatpush1.bf16.msra.mxu0 %v10397_v18  ;;  %6809 = vmatpush1.bf16.msra.mxu1 %v10399_v19  ;;  %v695_v18 = vld [vmem:[#allocation5 + $0x1120] sm:$0xff]  ;;  %v692_v19 = vld [vmem:[#allocation5 + $0x1108] sm:$0xff] }
 0x175   :  { %6482 = vmatprep.subr.bf16.mxu0 %v10406_v20  ;;  %6810 = vmatprep.subr.bf16.mxu1 %v10408_v21  ;;  %v696_v20 = vld [vmem:[#allocation5 + $0x1128] sm:$0xff]  ;;  %v10453_v21 = vcombine.low %v683_v8, %v687_v9  ;;  %v10462_v24 = vcombine.high %v691_v17, %v695_v18  ;;  %v739_v9 = vld [vmem:[#allocation5 + $0x1280] sm:$0xff] }
 0x176   :  { %v10464_v26 = vcombine.high %v692_v19, %v696_v20  ;;  %v10463_v32 = vcombine.low %v692_v19, %v696_v20  ;;  %v751_v19 = vld [vmem:[#allocation5 + $0x12e0] sm:$0xff]  ;;  %v748_v20 = vld [vmem:[#allocation5 + $0x12c8] sm:$0xff] }
 0x178   :  { %6483 = vmatpush1.bf16.msra.mxu0 %v10405_v28  ;;  %6811 = vmatpush1.bf16.msra.mxu1 %v10407_v29  ;;  %v703_v28 = vld [vmem:[#allocation5 + $0x1160] sm:$0xff]  ;;  %v700_v29 = vld [vmem:[#allocation5 + $0x1148] sm:$0xff] }
 0x179   :  { %6484 = vmatprep.subr.bf16.mxu0 %v10414_v30  ;;  %6812 = vmatprep.subr.bf16.mxu1 %v10416_v31  ;;  %v704_v30 = vld [vmem:[#allocation5 + $0x1168] sm:$0xff]  ;;  %v10461_v31 = vcombine.low %v691_v17, %v695_v18  ;;  %v10470_v33 = vcombine.high %v699_v27, %v703_v28  ;;  %v747_v18 = vld [vmem:[#allocation5 + $0x12c0] sm:$0xff] }
 0x17a   :  { %v10472_v35 = vcombine.high %v700_v29, %v704_v30  ;;  %v10471_v42 = vcombine.low %v700_v29, %v704_v30  ;;  %v759_v29 = vld [vmem:[#allocation5 + $0x1320] sm:$0xff]  ;;  %v756_v30 = vld [vmem:[#allocation5 + $0x1308] sm:$0xff] }
 0x17c   :  { %6485 = vmatpush1.bf16.msra.mxu0 %v10413_v37  ;;  %6813 = vmatpush1.bf16.msra.mxu1 %v10415_v38  ;;  %v711_v37 = vld [vmem:[#allocation5 + $0x11a0] sm:$0xff]  ;;  %v708_v38 = vld [vmem:[#allocation5 + $0x1188] sm:$0xff] }
 0x17d   :  { %6486 = vmatprep.subr.bf16.mxu0 %v10422_v40  ;;  %6814 = vmatprep.subr.bf16.mxu1 %v10424_v41  ;;  %v712_v40 = vld [vmem:[#allocation5 + $0x11a8] sm:$0xff]  ;;  %v10469_v41 = vcombine.low %v699_v27, %v703_v28  ;;  %v10478_v43 = vcombine.high %v707_v36, %v711_v37  ;;  %v755_v28 = vld [vmem:[#allocation5 + $0x1300] sm:$0xff] }
 0x17e   :  { %v10480_v44 = vcombine.high %v708_v38, %v712_v40 }
 0x180   :  { %6487 = vmatpush1.bf16.msra.mxu0 %v10421_v46  ;;  %6815 = vmatpush1.bf16.msra.mxu1 %v10423_v49  ;;  %v719_v46 = vld [vmem:[#allocation5 + $0x11e0] sm:$0xff]  ;;  %v720_v49 = vld [vmem:[#allocation5 + $0x11e8] sm:$0xff] }
 0x181   :  { %6497 = vmatprep.subr.bf16.mxu0 %v10430_v50  ;;  %6825 = vmatprep.subr.bf16.mxu1 %v10432_v51  ;;  %v10477_v50 = vcombine.low %v707_v36, %v711_v37  ;;  %v10479_v51 = vcombine.low %v708_v38, %v712_v40  ;;  %v10486_v52 = vcombine.high %v715_v45, %v719_v46  ;;  %v763_v37 = vld [vmem:[#allocation5 + $0x1340] sm:$0xff]  ;;  %v764_v40 = vld [vmem:[#allocation5 + $0x1348] sm:$0xff] }
 0x182   :  { %v10488_v53 = vcombine.high %v716_v47, %v720_v49  ;;  %v767_v38 = vld [vmem:[#allocation5 + $0x1360] sm:$0xff] }
 0x183   :  { %6489 = vmatmul.mubr.bf16.vlgmr.msra.gmra.mrb[0].mxu0 %v12205_v54  ;;  %6817 = vmatmul.mubr.bf16.vlgmr.msra.gmra.mrb[0].mxu1 %v12205_v54 }
 0x184   :  { %6498 = vmatpush1.bf16.msra.mxu0 %v10429_v59  ;;  %6826 = vmatpush1.bf16.msra.mxu1 %v10431_v60  ;;  %v728_v59 = vld [vmem:[#allocation5 + $0x1228] sm:$0xff]  ;;  %v10485_v60 = vcombine.low %v715_v45, %v719_v46  ;;  %v771_v46 = vld [vmem:[#allocation5 + $0x1380] sm:$0xff] }
 0x185   :  { %6499 = vmatprep.subr.bf16.mxu0 %v10438_v61  ;;  %6827 = vmatprep.subr.bf16.mxu1 %v10440_v62  ;;  %v10487_v61 = vcombine.low %v716_v47, %v720_v49  ;;  %v10494_v62 = vcombine.high %v723_v55, %v727_v56  ;;  %v10496_v63 = vcombine.high %v724_v58, %v728_v59  ;;  %v775_v47 = vld [vmem:[#allocation5 + $0x13a0] sm:$0xff]  ;;  %v772_v49 = vld [vmem:[#allocation5 + $0x1388] sm:$0xff] }
 0x186   :  { %6529 = vmatprep.mubr.bf16.mxu0 %v12207_v1  ;;  %6857 = vmatprep.mubr.bf16.mxu1 %v12207_v1 }
 0x188   :  { %6500 = vmatpush1.bf16.msra.mxu0 %v10437_v4  ;;  %6828 = vmatpush1.bf16.msra.mxu1 %v10439_v5  ;;  %v736_v4 = vld [vmem:[#allocation5 + $0x1268] sm:$0xff]  ;;  %v10493_v5 = vcombine.low %v723_v55, %v727_v56  ;;  %v779_v56 = vld [vmem:[#allocation5 + $0x13c0] sm:$0xff] }
 0x189   :  { %6501 = vmatprep.subr.bf16.mxu0 %v10446_v6  ;;  %6829 = vmatprep.subr.bf16.mxu1 %v10448_v7  ;;  %v10495_v6 = vcombine.low %v724_v58, %v728_v59  ;;  %v10502_v7 = vcombine.high %v731_v0, %v735_v2  ;;  %v10504_v8 = vcombine.high %v732_v3, %v736_v4  ;;  %v783_v58 = vld [vmem:[#allocation5 + $0x13e0] sm:$0xff]  ;;  %v780_v59 = vld [vmem:[#allocation5 + $0x13c8] sm:$0xff] }
 0x18c   :  { %6502 = vmatpush1.bf16.msra.mxu0 %v10445_v13  ;;  %6830 = vmatpush1.bf16.msra.mxu1 %v10447_v14  ;;  %v744_v13 = vld [vmem:[#allocation5 + $0x12a8] sm:$0xff]  ;;  %v10501_v14 = vcombine.low %v731_v0, %v735_v2  ;;  %v787_v2 = vld [vmem:[#allocation5 + $0x1400] sm:$0xff] }
 0x18d   :  { %6503 = vmatprep.subr.bf16.mxu0 %v10454_v15  ;;  %6831 = vmatprep.subr.bf16.mxu1 %v10456_v16  ;;  %v10503_v15 = vcombine.low %v732_v3, %v736_v4  ;;  %v10510_v16 = vcombine.high %v739_v9, %v743_v10  ;;  %v10512_v17 = vcombine.high %v740_v11, %v744_v13  ;;  %v791_v3 = vld [vmem:[#allocation5 + $0x1420] sm:$0xff]  ;;  %v788_v4 = vld [vmem:[#allocation5 + $0x1408] sm:$0xff] }
 0x190   :  { %6504 = vmatpush1.bf16.msra.mxu0 %v10453_v21  ;;  %6832 = vmatpush1.bf16.msra.mxu1 %v10455_v22  ;;  %v752_v21 = vld [vmem:[#allocation5 + $0x12e8] sm:$0xff]  ;;  %v10509_v22 = vcombine.low %v739_v9, %v743_v10  ;;  %v10558_v9 = vcombine.high %v787_v2, %v791_v3 }
 0x191   :  { %6505 = vmatprep.subr.bf16.mxu0 %v10462_v24  ;;  %6833 = vmatprep.subr.bf16.mxu1 %v10464_v26  ;;  %v10511_v24 = vcombine.low %v740_v11, %v744_v13  ;;  %v10518_v26 = vcombine.high %v747_v18, %v751_v19  ;;  %v10520_v27 = vcombine.high %v748_v20, %v752_v21  ;;  %v795_v11 = vld [vmem:[#allocation5 + $0x1440] sm:$0xff] }
 0x192   :  { %v799_v13 = vld [vmem:[#allocation5 + $0x1460] sm:$0xff] }
 0x194   :  { %6506 = vmatpush1.bf16.msra.mxu0 %v10461_v31  ;;  %6834 = vmatpush1.bf16.msra.mxu1 %v10463_v32  ;;  %v760_v31 = vld [vmem:[#allocation5 + $0x1328] sm:$0xff]  ;;  %v10517_v32 = vcombine.low %v747_v18, %v751_v19  ;;  %v10557_v18 = vcombine.low %v787_v2, %v791_v3 }
 0x195   :  { %6507 = vmatprep.subr.bf16.mxu0 %v10470_v33  ;;  %6835 = vmatprep.subr.bf16.mxu1 %v10472_v35  ;;  %v10519_v33 = vcombine.low %v748_v20, %v752_v21  ;;  %v10526_v35 = vcombine.high %v755_v28, %v759_v29  ;;  %v10528_v36 = vcombine.high %v756_v30, %v760_v31  ;;  %v840_v2 = vld [vmem:[#allocation5 + $0x15a8] sm:$0xff] }
 0x196   :  { %v10566_v20 = vcombine.high %v795_v11, %v799_v13 }
 0x198   :  { %6508 = vmatpush1.bf16.msra.mxu0 %v10469_v41  ;;  %6836 = vmatpush1.bf16.msra.mxu1 %v10471_v42  ;;  %v768_v41 = vld [vmem:[#allocation5 + $0x1368] sm:$0xff]  ;;  %v10525_v42 = vcombine.low %v755_v28, %v759_v29  ;;  %v10565_v29 = vcombine.low %v795_v11, %v799_v13 }
 0x199   :  { %6509 = vmatprep.subr.bf16.mxu0 %v10478_v43  ;;  %6837 = vmatprep.subr.bf16.mxu1 %v10480_v44  ;;  %v10527_v43 = vcombine.low %v756_v30, %v760_v31  ;;  %v10534_v44 = vcombine.high %v763_v37, %v767_v38  ;;  %v10536_v45 = vcombine.high %v764_v40, %v768_v41  ;;  %v808_v28 = vld [vmem:[#allocation5 + $0x14a8] sm:$0xff] }
 0x19c   :  { %6510 = vmatpush1.bf16.msra.mxu0 %v10477_v50  ;;  %6838 = vmatpush1.bf16.msra.mxu1 %v10479_v51  ;;  %v776_v50 = vld [vmem:[#allocation5 + $0x13a8] sm:$0xff]  ;;  %v10533_v51 = vcombine.low %v763_v37, %v767_v38 }
 0x19d   :  { %6511 = vmatprep.subr.bf16.mxu0 %v10486_v52  ;;  %6839 = vmatprep.subr.bf16.mxu1 %v10488_v53  ;;  %v10535_v52 = vcombine.low %v764_v40, %v768_v41  ;;  %v10542_v53 = vcombine.high %v771_v46, %v775_v47  ;;  %v10544_v55 = vcombine.high %v772_v49, %v776_v50  ;;  %v816_v37 = vld [vmem:[#allocation5 + $0x14e8] sm:$0xff] }
 0x1a0   :  { %6512 = vmatpush1.bf16.msra.mxu0 %v10485_v60  ;;  %6840 = vmatpush1.bf16.msra.mxu1 %v10487_v61  ;;  %v784_v60 = vld [vmem:[#allocation5 + $0x13e8] sm:$0xff]  ;;  %v10541_v61 = vcombine.low %v771_v46, %v775_v47 }
 0x1a1   :  { %6513 = vmatprep.subr.bf16.mxu0 %v10494_v62  ;;  %6841 = vmatprep.subr.bf16.mxu1 %v10496_v63  ;;  %v10543_v62 = vcombine.low %v772_v49, %v776_v50  ;;  %v10550_v63 = vcombine.high %v779_v56, %v783_v58  ;;  %v10552_v0 = vcombine.high %v780_v59, %v784_v60  ;;  %v824_v46 = vld [vmem:[#allocation5 + $0x1528] sm:$0xff] }
 0x1a4   :  { %6514 = vmatpush1.bf16.msra.mxu0 %v10493_v5  ;;  %6842 = vmatpush1.bf16.msra.mxu1 %v10495_v6  ;;  %v792_v5 = vld [vmem:[#allocation5 + $0x1428] sm:$0xff]  ;;  %v10549_v6 = vcombine.low %v779_v56, %v783_v58 }
 0x1a5   :  { %6515 = vmatprep.subr.bf16.mxu0 %v10502_v7  ;;  %6843 = vmatprep.subr.bf16.mxu1 %v10504_v8  ;;  %v123_v7 = vld [vmem:[#allocation2 + $0x40] sm:$0xff]  ;;  %v10551_v8 = vcombine.low %v780_v59, %v784_v60  ;;  %v10560_v10 = vcombine.high %v788_v4, %v792_v5  ;;  %v10559_v19 = vcombine.low %v788_v4, %v792_v5  ;;  %v832_v56 = vld [vmem:[#allocation5 + $0x1568] sm:$0xff] }
 0x1a8   :  { %6516 = vmatpush1.bf16.msra.mxu0 %v10501_v14  ;;  %6844 = vmatpush1.bf16.msra.mxu1 %v10503_v15  ;;  %v12213_v14 = vpack.c.bf16 %v123_v7, %v123_v7  ;;  %v796_v15 = vld [vmem:[#allocation5 + $0x1448] sm:$0xff]  ;;  %v843_v7 = vld [vmem:[#allocation5 + $0x15c0] sm:$0xff] }
 0x1a9   :  { %6517 = vmatprep.subr.bf16.mxu0 %v10510_v16  ;;  %6845 = vmatprep.subr.bf16.mxu1 %v10512_v17  ;;  %v800_v16 = vld [vmem:[#allocation5 + $0x1468] sm:$0xff]  ;;  %v126_v17 = vld [vmem:[#allocation2 + $0x58] sm:$0xff] }
 0x1aa   :  { %v10568_v21 = vcombine.high %v796_v15, %v800_v16  ;;  %v10567_v30 = vcombine.low %v796_v15, %v800_v16 }
 0x1ac   :  { %6518 = vmatpush1.bf16.msra.mxu0 %v10509_v22  ;;  %6846 = vmatpush1.bf16.msra.mxu1 %v10511_v24  ;;  %v803_v22 = vld [vmem:[#allocation5 + $0x1480] sm:$0xff] }
 0x1ad   :  { %6519 = vmatprep.subr.bf16.mxu0 %v10518_v26  ;;  %6847 = vmatprep.subr.bf16.mxu1 %v10520_v27  ;;  %v807_v24 = vld [vmem:[#allocation5 + $0x14a0] sm:$0xff]  ;;  %v12215_v26 = vpack.c.bf16 %v126_v17, %v126_v17  ;;  %v804_v27 = vld [vmem:[#allocation5 + $0x1488] sm:$0xff] }
 0x1ae   :  { %v10574_v31 = vcombine.high %v803_v22, %v807_v24  ;;  %v10573_v38 = vcombine.low %v803_v22, %v807_v24  ;;  %v10575_v40 = vcombine.low %v804_v27, %v808_v28  ;;  %v851_v17 = vld [vmem:[#allocation5 + $0x1600] sm:$0xff] }
 0x1b0   :  { %6520 = vmatpush1.bf16.msra.mxu0 %v10517_v32  ;;  %6848 = vmatpush1.bf16.msra.mxu1 %v10519_v33  ;;  %v10576_v32 = vcombine.high %v804_v27, %v808_v28  ;;  %v811_v33 = vld [vmem:[#allocation5 + $0x14c0] sm:$0xff] }
 0x1b1   :  { %6521 = vmatprep.subr.bf16.mxu0 %v10526_v35  ;;  %6849 = vmatprep.subr.bf16.mxu1 %v10528_v36  ;;  %v815_v35 = vld [vmem:[#allocation5 + $0x14e0] sm:$0xff]  ;;  %v812_v36 = vld [vmem:[#allocation5 + $0x14c8] sm:$0xff] }
 0x1b2   :  { %v10582_v41 = vcombine.high %v811_v33, %v815_v35  ;;  %v10581_v47 = vcombine.low %v811_v33, %v815_v35  ;;  %v10583_v49 = vcombine.low %v812_v36, %v816_v37  ;;  %v859_v28 = vld [vmem:[#allocation5 + $0x1640] sm:$0xff] }
 0x1b4   :  { %6522 = vmatpush1.bf16.msra.mxu0 %v10525_v42  ;;  %6850 = vmatpush1.bf16.msra.mxu1 %v10527_v43  ;;  %v10584_v42 = vcombine.high %v812_v36, %v816_v37  ;;  %v819_v43 = vld [vmem:[#allocation5 + $0x1500] sm:$0xff] }
 0x1b5   :  { %6523 = vmatprep.subr.bf16.mxu0 %v10534_v44  ;;  %6851 = vmatprep.subr.bf16.mxu1 %v10536_v45  ;;  %v823_v44 = vld [vmem:[#allocation5 + $0x1520] sm:$0xff]  ;;  %v820_v45 = vld [vmem:[#allocation5 + $0x1508] sm:$0xff] }
 0x1b6   :  { %v10590_v50 = vcombine.high %v819_v43, %v823_v44  ;;  %v10589_v58 = vcombine.low %v819_v43, %v823_v44  ;;  %v10591_v59 = vcombine.low %v820_v45, %v824_v46  ;;  %v867_v37 = vld [vmem:[#allocation5 + $0x1680] sm:$0xff] }
 0x1b8   :  { %6524 = vmatpush1.bf16.msra.mxu0 %v10533_v51  ;;  %6852 = vmatpush1.bf16.msra.mxu1 %v10535_v52  ;;  %v10592_v51 = vcombine.high %v820_v45, %v824_v46  ;;  %v827_v52 = vld [vmem:[#allocation5 + $0x1540] sm:$0xff] }
 0x1b9   :  { %6525 = vmatprep.subr.bf16.mxu0 %v10542_v53  ;;  %6853 = vmatprep.subr.bf16.mxu1 %v10544_v55  ;;  %v831_v53 = vld [vmem:[#allocation5 + $0x1560] sm:$0xff]  ;;  %v828_v55 = vld [vmem:[#allocation5 + $0x1548] sm:$0xff] }
 0x1ba   :  { %v10598_v60 = vcombine.high %v827_v52, %v831_v53  ;;  %v10597_v3 = vcombine.low %v827_v52, %v831_v53  ;;  %v10599_v4 = vcombine.low %v828_v55, %v832_v56  ;;  %v875_v46 = vld [vmem:[#allocation5 + $0x16c0] sm:$0xff] }
 0x1bc   :  { %6526 = vmatpush1.bf16.msra.mxu0 %v10541_v61  ;;  %6854 = vmatpush1.bf16.msra.mxu1 %v10543_v62  ;;  %v10600_v61 = vcombine.high %v828_v55, %v832_v56  ;;  %v835_v62 = vld [vmem:[#allocation5 + $0x1580] sm:$0xff] }
 0x1bd   :  { %6527 = vmatprep.subr.bf16.mxu0 %v10550_v63  ;;  %6855 = vmatprep.subr.bf16.mxu1 %v10552_v0  ;;  %v839_v63 = vld [vmem:[#allocation5 + $0x15a0] sm:$0xff]  ;;  %v836_v0 = vld [vmem:[#allocation5 + $0x1588] sm:$0xff] }
 0x1be   :  { %v10606_v5 = vcombine.high %v835_v62, %v839_v63  ;;  %v10605_v11 = vcombine.low %v835_v62, %v839_v63  ;;  %v10607_v13 = vcombine.low %v836_v0, %v840_v2  ;;  %v883_v56 = vld [vmem:[#allocation5 + $0x1700] sm:$0xff] }
 0x1c0   :  { %6528 = vmatpush1.bf16.msra.mxu0 %v10549_v6  ;;  %6856 = vmatpush1.bf16.msra.mxu1 %v10551_v8  ;;  %v10608_v6 = vcombine.high %v836_v0, %v840_v2  ;;  %v847_v8 = vld [vmem:[#allocation5 + $0x15e0] sm:$0xff] }
 0x1c1   :  { %6538 = vmatprep.subr.bf16.mxu0 %v10558_v9  ;;  %6866 = vmatprep.subr.bf16.mxu1 %v10560_v10  ;;  %v844_v9 = vld [vmem:[#allocation5 + $0x15c8] sm:$0xff]  ;;  %v10614_v15 = vcombine.high %v843_v7, %v847_v8  ;;  %v891_v2 = vld [vmem:[#allocation5 + $0x1740] sm:$0xff] }
 0x1c2   :  { %v848_v10 = vld [vmem:[#allocation5 + $0x15e8] sm:$0xff] }
 0x1c3   :  { %6530 = vmatmul.mubr.bf16.vlgmr.msra.gmra.mrb[0].mxu0 %v12213_v14  ;;  %6858 = vmatmul.mubr.bf16.vlgmr.msra.gmra.mrb[0].mxu1 %v12213_v14  ;;  %v10616_v16 = vcombine.high %v844_v9, %v848_v10  ;;  %v10615_v22 = vcombine.low %v844_v9, %v848_v10  ;;  %v899_v10 = vld [vmem:[#allocation5 + $0x1780] sm:$0xff] }
 0x1c4   :  { %6539 = vmatpush1.bf16.msra.mxu0 %v10557_v18  ;;  %6867 = vmatpush1.bf16.msra.mxu1 %v10559_v19  ;;  %v855_v18 = vld [vmem:[#allocation5 + $0x1620] sm:$0xff]  ;;  %v852_v19 = vld [vmem:[#allocation5 + $0x1608] sm:$0xff] }
 0x1c5   :  { %6540 = vmatprep.subr.bf16.mxu0 %v10566_v20  ;;  %6868 = vmatprep.subr.bf16.mxu1 %v10568_v21  ;;  %v856_v20 = vld [vmem:[#allocation5 + $0x1628] sm:$0xff]  ;;  %v10613_v21 = vcombine.low %v843_v7, %v847_v8  ;;  %v10622_v24 = vcombine.high %v851_v17, %v855_v18 }
 0x1c6   :  { %6570 = vmatprep.mubr.bf16.mxu0 %v12215_v26  ;;  %6898 = vmatprep.mubr.bf16.mxu1 %v12215_v26  ;;  %v10624_v27 = vcombine.high %v852_v19, %v856_v20  ;;  %v10623_v33 = vcombine.low %v852_v19, %v856_v20  ;;  %v907_v20 = vld [vmem:[#allocation5 + $0x17c0] sm:$0xff] }
 0x1c8   :  { %6541 = vmatpush1.bf16.msra.mxu0 %v10565_v29  ;;  %6869 = vmatpush1.bf16.msra.mxu1 %v10567_v30  ;;  %v863_v29 = vld [vmem:[#allocation5 + $0x1660] sm:$0xff]  ;;  %v860_v30 = vld [vmem:[#allocation5 + $0x1648] sm:$0xff] }
 0x1c9   :  { %6542 = vmatprep.subr.bf16.mxu0 %v10574_v31  ;;  %6870 = vmatprep.subr.bf16.mxu1 %v10576_v32  ;;  %v864_v31 = vld [vmem:[#allocation5 + $0x1668] sm:$0xff]  ;;  %v10621_v32 = vcombine.low %v851_v17, %v855_v18  ;;  %v10630_v35 = vcombine.high %v859_v28, %v863_v29 }
 0x1ca   :  { %v10632_v36 = vcombine.high %v860_v30, %v864_v31  ;;  %v10631_v43 = vcombine.low %v860_v30, %v864_v31  ;;  %v915_v31 = vld [vmem:[#allocation5 + $0x1800] sm:$0xff] }
 0x1cc   :  { %6543 = vmatpush1.bf16.msra.mxu0 %v10573_v38  ;;  %6871 = vmatpush1.bf16.msra.mxu1 %v10575_v40  ;;  %v871_v38 = vld [vmem:[#allocation5 + $0x16a0] sm:$0xff]  ;;  %v868_v40 = vld [vmem:[#allocation5 + $0x1688] sm:$0xff] }
 0x1cd   :  { %6544 = vmatprep.subr.bf16.mxu0 %v10582_v41  ;;  %6872 = vmatprep.subr.bf16.mxu1 %v10584_v42  ;;  %v872_v41 = vld [vmem:[#allocation5 + $0x16a8] sm:$0xff]  ;;  %v10629_v42 = vcombine.low %v859_v28, %v863_v29  ;;  %v10638_v44 = vcombine.high %v867_v37, %v871_v38 }
 0x1ce   :  { %v10640_v45 = vcombine.high %v868_v40, %v872_v41  ;;  %v10639_v52 = vcombine.low %v868_v40, %v872_v41 }
 0x1d0   :  { %6545 = vmatpush1.bf16.msra.mxu0 %v10581_v47  ;;  %6873 = vmatpush1.bf16.msra.mxu1 %v10583_v49  ;;  %v879_v47 = vld [vmem:[#allocation5 + $0x16e0] sm:$0xff]  ;;  %v876_v49 = vld [vmem:[#allocation5 + $0x16c8] sm:$0xff] }
 0x1d1   :  { %6546 = vmatprep.subr.bf16.mxu0 %v10590_v50  ;;  %6874 = vmatprep.subr.bf16.mxu1 %v10592_v51  ;;  %v880_v50 = vld [vmem:[#allocation5 + $0x16e8] sm:$0xff]  ;;  %v10637_v51 = vcombine.low %v867_v37, %v871_v38  ;;  %v10646_v53 = vcombine.high %v875_v46, %v879_v47  ;;  %v125_v37 = vld [vmem:[#allocation2 + $0x50] sm:$0xff] }
 0x1d2   :  { %v10648_v55 = vcombine.high %v876_v49, %v880_v50  ;;  %v10647_v62 = vcombine.low %v876_v49, %v880_v50 }
 0x1d4   :  { %6547 = vmatpush1.bf16.msra.mxu0 %v10589_v58  ;;  %6875 = vmatpush1.bf16.msra.mxu1 %v10591_v59  ;;  %v887_v58 = vld [vmem:[#allocation5 + $0x1720] sm:$0xff]  ;;  %v884_v59 = vld [vmem:[#allocation5 + $0x1708] sm:$0xff] }
 0x1d5   :  { %6548 = vmatprep.subr.bf16.mxu0 %v10598_v60  ;;  %6876 = vmatprep.subr.bf16.mxu1 %v10600_v61  ;;  %v888_v60 = vld [vmem:[#allocation5 + $0x1728] sm:$0xff]  ;;  %v10645_v61 = vcombine.low %v875_v46, %v879_v47  ;;  %v10654_v63 = vcombine.high %v883_v56, %v887_v58 }
 0x1d6   :  { %v10656_v0 = vcombine.high %v884_v59, %v888_v60  ;;  %v10655_v7 = vcombine.low %v884_v59, %v888_v60  ;;  %v928_v46 = vld [vmem:[#allocation5 + $0x1868] sm:$0xff] }
 0x1d7   :  { %v128_v47 = vld [vmem:[#allocation2 + $0x68] sm:$0xff] }
 0x1d8   :  { %6549 = vmatpush1.bf16.msra.mxu0 %v10597_v3  ;;  %6877 = vmatpush1.bf16.msra.mxu1 %v10599_v4  ;;  %v895_v3 = vld [vmem:[#allocation5 + $0x1760] sm:$0xff]  ;;  %v892_v4 = vld [vmem:[#allocation5 + $0x1748] sm:$0xff] }
 0x1d9   :  { %6550 = vmatprep.subr.bf16.mxu0 %v10606_v5  ;;  %6878 = vmatprep.subr.bf16.mxu1 %v10608_v6  ;;  %v896_v5 = vld [vmem:[#allocation5 + $0x1768] sm:$0xff]  ;;  %v10653_v6 = vcombine.low %v883_v56, %v887_v58  ;;  %v10662_v8 = vcombine.high %v891_v2, %v895_v3  ;;  %v12223_v56 = vpack.c.bf16 %v128_v47, %v128_v47 }
 0x1da   :  { %v10664_v9 = vcombine.high %v892_v4, %v896_v5  ;;  %v10663_v17 = vcombine.low %v892_v4, %v896_v5  ;;  %v932_v58 = vld [vmem:[#allocation5 + $0x1888] sm:$0xff] }
 0x1db   :  { %v936_v59 = vld [vmem:[#allocation5 + $0x18a8] sm:$0xff] }
 0x1dc   :  { %6551 = vmatpush1.bf16.msra.mxu0 %v10605_v11  ;;  %6879 = vmatpush1.bf16.msra.mxu1 %v10607_v13  ;;  %v903_v11 = vld [vmem:[#allocation5 + $0x17a0] sm:$0xff]  ;;  %v900_v13 = vld [vmem:[#allocation5 + $0x1788] sm:$0xff] }
 0x1dd   :  { %6552 = vmatprep.subr.bf16.mxu0 %v10614_v15  ;;  %6880 = vmatprep.subr.bf16.mxu1 %v10616_v16  ;;  %v904_v15 = vld [vmem:[#allocation5 + $0x17a8] sm:$0xff]  ;;  %v10661_v16 = vcombine.low %v891_v2, %v895_v3  ;;  %v10670_v18 = vcombine.high %v899_v10, %v903_v11  ;;  %v943_v2 = vld [vmem:[#allocation5 + $0x18e0] sm:$0xff] }
 0x1de   :  { %v10672_v19 = vcombine.high %v900_v13, %v904_v15  ;;  %v10671_v28 = vcombine.low %v900_v13, %v904_v15  ;;  %v940_v3 = vld [vmem:[#allocation5 + $0x18c8] sm:$0xff] }
 0x1df   :  { %v944_v4 = vld [vmem:[#allocation5 + $0x18e8] sm:$0xff] }
 0x1e0   :  { %6553 = vmatpush1.bf16.msra.mxu0 %v10613_v21  ;;  %6881 = vmatpush1.bf16.msra.mxu1 %v10615_v22  ;;  %v911_v21 = vld [vmem:[#allocation5 + $0x17e0] sm:$0xff]  ;;  %v908_v22 = vld [vmem:[#allocation5 + $0x17c8] sm:$0xff] }
 0x1e1   :  { %6554 = vmatprep.subr.bf16.mxu0 %v10622_v24  ;;  %6882 = vmatprep.subr.bf16.mxu1 %v10624_v27  ;;  %v912_v24 = vld [vmem:[#allocation5 + $0x17e8] sm:$0xff]  ;;  %v10669_v27 = vcombine.low %v899_v10, %v903_v11  ;;  %v10678_v29 = vcombine.high %v907_v20, %v911_v21  ;;  %v951_v10 = vld [vmem:[#allocation5 + $0x1920] sm:$0xff] }
 0x1e2   :  { %v10680_v30 = vcombine.high %v908_v22, %v912_v24  ;;  %v10679_v38 = vcombine.low %v908_v22, %v912_v24  ;;  %v948_v11 = vld [vmem:[#allocation5 + $0x1908] sm:$0xff] }
 0x1e3   :  { %v952_v13 = vld [vmem:[#allocation5 + $0x1928] sm:$0xff] }
 0x1e4   :  { %6555 = vmatpush1.bf16.msra.mxu0 %v10621_v32  ;;  %6883 = vmatpush1.bf16.msra.mxu1 %v10623_v33  ;;  %v919_v32 = vld [vmem:[#allocation5 + $0x1820] sm:$0xff]  ;;  %v916_v33 = vld [vmem:[#allocation5 + $0x1808] sm:$0xff] }
 0x1e5   :  { %6556 = vmatprep.subr.bf16.mxu0 %v10630_v35  ;;  %6884 = vmatprep.subr.bf16.mxu1 %v10632_v36  ;;  %v920_v35 = vld [vmem:[#allocation5 + $0x1828] sm:$0xff]  ;;  %v10677_v36 = vcombine.low %v907_v20, %v911_v21  ;;  %v10686_v40 = vcombine.high %v915_v31, %v919_v32  ;;  %v10685_v49 = vcombine.low %v915_v31, %v919_v32  ;;  %v959_v20 = vld [vmem:[#allocation5 + $0x1960] sm:$0xff] }
 0x1e6   :  { %v10688_v41 = vcombine.high %v916_v33, %v920_v35  ;;  %v10687_v50 = vcombine.low %v916_v33, %v920_v35  ;;  %v956_v21 = vld [vmem:[#allocation5 + $0x1948] sm:$0xff]  ;;  %v967_v31 = vld [vmem:[#allocation5 + $0x19a0] sm:$0xff] }
 0x1e7   :  { %v960_v22 = vld [vmem:[#allocation5 + $0x1968] sm:$0xff] }
 0x1e8   :  { %6557 = vmatpush1.bf16.msra.mxu0 %v10629_v42  ;;  %6885 = vmatpush1.bf16.msra.mxu1 %v10631_v43  ;;  %v923_v42 = vld [vmem:[#allocation5 + $0x1840] sm:$0xff]  ;;  %v964_v32 = vld [vmem:[#allocation5 + $0x1988] sm:$0xff] }
 0x1e9   :  { %6558 = vmatprep.subr.bf16.mxu0 %v10638_v44  ;;  %6886 = vmatprep.subr.bf16.mxu1 %v10640_v45  ;;  %v927_v43 = vld [vmem:[#allocation5 + $0x1860] sm:$0xff]  ;;  %v12221_v44 = vpack.c.bf16 %v125_v37, %v125_v37  ;;  %v924_v45 = vld [vmem:[#allocation5 + $0x1848] sm:$0xff] }
 0x1ea   :  { %v10693_v60 = vcombine.low %v923_v42, %v927_v43  ;;  %v968_v33 = vld [vmem:[#allocation5 + $0x19a8] sm:$0xff] }
 0x1ec   :  { %6559 = vmatpush1.bf16.msra.mxu0 %v10637_v51  ;;  %6887 = vmatpush1.bf16.msra.mxu1 %v10639_v52  ;;  %v10694_v51 = vcombine.high %v923_v42, %v927_v43  ;;  %v10696_v52 = vcombine.high %v924_v45, %v928_v46  ;;  %v972_v42 = vld [vmem:[#allocation5 + $0x19c8] sm:$0xff] }
 0x1ed   :  { %6560 = vmatprep.subr.bf16.mxu0 %v10646_v53  ;;  %6888 = vmatprep.subr.bf16.mxu1 %v10648_v55  ;;  %v931_v53 = vld [vmem:[#allocation5 + $0x1880] sm:$0xff]  ;;  %v976_v43 = vld [vmem:[#allocation5 + $0x19e8] sm:$0xff] }
 0x1ee   :  { %v935_v55 = vld [vmem:[#allocation5 + $0x18a0] sm:$0xff] }
 0x1ef   :  { %v10701_v5 = vcombine.low %v931_v53, %v935_v55 }
 0x1f0   :  { %6561 = vmatpush1.bf16.msra.mxu0 %v10645_v61  ;;  %6889 = vmatpush1.bf16.msra.mxu1 %v10647_v62  ;;  %v10695_v61 = vcombine.low %v924_v45, %v928_v46  ;;  %v10702_v62 = vcombine.high %v931_v53, %v935_v55  ;;  %v10735_v46 = vcombine.low %v964_v32, %v968_v33  ;;  %v984_v53 = vld [vmem:[#allocation5 + $0x1a28] sm:$0xff] }
 0x1f1   :  { %6562 = vmatprep.subr.bf16.mxu0 %v10654_v63  ;;  %6890 = vmatprep.subr.bf16.mxu1 %v10656_v0  ;;  %v10704_v63 = vcombine.high %v932_v58, %v936_v59  ;;  %v939_v0 = vld [vmem:[#allocation5 + $0x18c0] sm:$0xff] }
 0x1f2   :  { %v10709_v15 = vcombine.low %v939_v0, %v943_v2 }
 0x1f4   :  { %6563 = vmatpush1.bf16.msra.mxu0 %v10653_v6  ;;  %6891 = vmatpush1.bf16.msra.mxu1 %v10655_v7  ;;  %v10703_v6 = vcombine.low %v932_v58, %v936_v59  ;;  %v10710_v7 = vcombine.high %v939_v0, %v943_v2  ;;  %v10743_v58 = vcombine.low %v972_v42, %v976_v43  ;;  %v992_v0 = vld [vmem:[#allocation5 + $0x1a68] sm:$0xff] }
 0x1f5   :  { %6564 = vmatprep.subr.bf16.mxu0 %v10662_v8  ;;  %6892 = vmatprep.subr.bf16.mxu1 %v10664_v9  ;;  %v10712_v8 = vcombine.high %v940_v3, %v944_v4  ;;  %v947_v9 = vld [vmem:[#allocation5 + $0x1900] sm:$0xff] }
 0x1f6   :  { %v10717_v24 = vcombine.low %v947_v9, %v951_v10 }
 0x1f8   :  { %6565 = vmatpush1.bf16.msra.mxu0 %v10661_v16  ;;  %6893 = vmatpush1.bf16.msra.mxu1 %v10663_v17  ;;  %v10711_v16 = vcombine.low %v940_v3, %v944_v4  ;;  %v10718_v17 = vcombine.high %v947_v9, %v951_v10  ;;  %v1000_v9 = vld [vmem:[#allocation5 + $0x1aa8] sm:$0xff] }
 0x1f9   :  { %6566 = vmatprep.subr.bf16.mxu0 %v10670_v18  ;;  %6894 = vmatprep.subr.bf16.mxu1 %v10672_v19  ;;  %v10720_v18 = vcombine.high %v948_v11, %v952_v13  ;;  %v955_v19 = vld [vmem:[#allocation5 + $0x1940] sm:$0xff] }
 0x1fa   :  { %v10725_v35 = vcombine.low %v955_v19, %v959_v20 }
 0x1fc   :  { %6567 = vmatpush1.bf16.msra.mxu0 %v10669_v27  ;;  %6895 = vmatpush1.bf16.msra.mxu1 %v10671_v28  ;;  %v10719_v27 = vcombine.low %v948_v11, %v952_v13  ;;  %v10726_v28 = vcombine.high %v955_v19, %v959_v20  ;;  %v1008_v19 = vld [vmem:[#allocation5 + $0x1ae8] sm:$0xff] }
 0x1fd   :  { %6568 = vmatprep.subr.bf16.mxu0 %v10678_v29  ;;  %6896 = vmatprep.subr.bf16.mxu1 %v10680_v30  ;;  %v10728_v29 = vcombine.high %v956_v21, %v960_v22  ;;  %v963_v30 = vld [vmem:[#allocation5 + $0x1980] sm:$0xff] }
 0x1fe   :  { %v10734_v37 = vcombine.high %v963_v30, %v967_v31  ;;  %v10733_v45 = vcombine.low %v963_v30, %v967_v31  ;;  %v1016_v30 = vld [vmem:[#allocation5 + $0x1b28] sm:$0xff] }
 0x200   :  { %6569 = vmatpush1.bf16.msra.mxu0 %v10677_v36  ;;  %6897 = vmatpush1.bf16.msra.mxu1 %v10679_v38  ;;  %v10727_v36 = vcombine.low %v956_v21, %v960_v22  ;;  %v10736_v38 = vcombine.high %v964_v32, %v968_v33 }
 0x201   :  { %6579 = vmatprep.subr.bf16.mxu0 %v10686_v40  ;;  %6907 = vmatprep.subr.bf16.mxu1 %v10688_v41  ;;  %v971_v40 = vld [vmem:[#allocation5 + $0x19c0] sm:$0xff] }
 0x202   :  { %v975_v41 = vld [vmem:[#allocation5 + $0x19e0] sm:$0xff] }
 0x203   :  { %6571 = vmatmul.mubr.bf16.vlgmr.msra.gmra.mrb[0].mxu0 %v12221_v44  ;;  %6899 = vmatmul.mubr.bf16.vlgmr.msra.gmra.mrb[0].mxu1 %v12221_v44  ;;  %v10742_v47 = vcombine.high %v971_v40, %v975_v41  ;;  %v10741_v55 = vcombine.low %v971_v40, %v975_v41  ;;  %v1024_v40 = vld [vmem:[#allocation5 + $0x1b68] sm:$0xff] }
 0x204   :  { %6580 = vmatpush1.bf16.msra.mxu0 %v10685_v49  ;;  %6908 = vmatpush1.bf16.msra.mxu1 %v10687_v50  ;;  %v10744_v49 = vcombine.high %v972_v42, %v976_v43  ;;  %v979_v50 = vld [vmem:[#allocation5 + $0x1a00] sm:$0xff] }
 0x205   :  { %6581 = vmatprep.subr.bf16.mxu0 %v10694_v51  ;;  %6909 = vmatprep.subr.bf16.mxu1 %v10696_v52  ;;  %v983_v51 = vld [vmem:[#allocation5 + $0x1a20] sm:$0xff]  ;;  %v980_v52 = vld [vmem:[#allocation5 + $0x1a08] sm:$0xff] }
 0x206   :  { %6611 = vmatprep.mubr.bf16.mxu0 %v12223_v56  ;;  %6939 = vmatprep.mubr.bf16.mxu1 %v12223_v56  ;;  %v10750_v59 = vcombine.high %v979_v50, %v983_v51  ;;  %v10749_v2 = vcombine.low %v979_v50, %v983_v51  ;;  %v10751_v3 = vcombine.low %v980_v52, %v984_v53  ;;  %v1032_v50 = vld [vmem:[#allocation5 + $0x1ba8] sm:$0xff] }
 0x208   :  { %6582 = vmatpush1.bf16.msra.mxu0 %v10693_v60  ;;  %6910 = vmatpush1.bf16.msra.mxu1 %v10695_v61  ;;  %v10752_v60 = vcombine.high %v980_v52, %v984_v53  ;;  %v987_v61 = vld [vmem:[#allocation5 + $0x1a40] sm:$0xff] }
 0x209   :  { %6583 = vmatprep.subr.bf16.mxu0 %v10702_v62  ;;  %6911 = vmatprep.subr.bf16.mxu1 %v10704_v63  ;;  %v991_v62 = vld [vmem:[#allocation5 + $0x1a60] sm:$0xff]  ;;  %v988_v63 = vld [vmem:[#allocation5 + $0x1a48] sm:$0xff] }
 0x20a   :  { %v10758_v4 = vcombine.high %v987_v61, %v991_v62  ;;  %v10757_v10 = vcombine.low %v987_v61, %v991_v62  ;;  %v10759_v11 = vcombine.low %v988_v63, %v992_v0  ;;  %v1040_v61 = vld [vmem:[#allocation5 + $0x1be8] sm:$0xff] }
 0x20c   :  { %6584 = vmatpush1.bf16.msra.mxu0 %v10701_v5  ;;  %6912 = vmatpush1.bf16.msra.mxu1 %v10703_v6  ;;  %v10760_v5 = vcombine.high %v988_v63, %v992_v0  ;;  %v995_v6 = vld [vmem:[#allocation5 + $0x1a80] sm:$0xff] }
 0x20d   :  { %6585 = vmatprep.subr.bf16.mxu0 %v10710_v7  ;;  %6913 = vmatprep.subr.bf16.mxu1 %v10712_v8  ;;  %v999_v7 = vld [vmem:[#allocation5 + $0x1aa0] sm:$0xff]  ;;  %v996_v8 = vld [vmem:[#allocation5 + $0x1a88] sm:$0xff] }
 0x20e   :  { %v10766_v13 = vcombine.high %v995_v6, %v999_v7  ;;  %v10765_v20 = vcombine.low %v995_v6, %v999_v7  ;;  %v10767_v21 = vcombine.low %v996_v8, %v1000_v9  ;;  %v1048_v6 = vld [vmem:[#allocation5 + $0x1c28] sm:$0xff] }
 0x210   :  { %6586 = vmatpush1.bf16.msra.mxu0 %v10709_v15  ;;  %6914 = vmatpush1.bf16.msra.mxu1 %v10711_v16  ;;  %v10768_v15 = vcombine.high %v996_v8, %v1000_v9  ;;  %v1003_v16 = vld [vmem:[#allocation5 + $0x1ac0] sm:$0xff] }
 0x211   :  { %6587 = vmatprep.subr.bf16.mxu0 %v10718_v17  ;;  %6915 = vmatprep.subr.bf16.mxu1 %v10720_v18  ;;  %v1007_v17 = vld [vmem:[#allocation5 + $0x1ae0] sm:$0xff]  ;;  %v1004_v18 = vld [vmem:[#allocation5 + $0x1ac8] sm:$0xff] }
 0x212   :  { %v10774_v22 = vcombine.high %v1003_v16, %v1007_v17  ;;  %v10773_v31 = vcombine.low %v1003_v16, %v1007_v17  ;;  %v10775_v32 = vcombine.low %v1004_v18, %v1008_v19  ;;  %v127_v8 = vld [vmem:[#allocation2 + $0x60] sm:$0xff]  ;;  %v1052_v17 = vld [vmem:[#allocation5 + $0x1c48] sm:$0xff] }
 0x213   :  { %v12229_v16 = vpack.c.bf16 %v127_v8, %v127_v8 }
 0x214   :  { %6588 = vmatpush1.bf16.msra.mxu0 %v10717_v24  ;;  %6916 = vmatpush1.bf16.msra.mxu1 %v10719_v27  ;;  %v10776_v24 = vcombine.high %v1004_v18, %v1008_v19  ;;  %v1011_v27 = vld [vmem:[#allocation5 + $0x1b00] sm:$0xff]  ;;  %v1056_v18 = vld [vmem:[#allocation5 + $0x1c68] sm:$0xff]  ;;  %v130_v19 = vld [vmem:[#allocation2 + $0x78] sm:$0xff] }
 0x215   :  { %6589 = vmatprep.subr.bf16.mxu0 %v10726_v28  ;;  %6917 = vmatprep.subr.bf16.mxu1 %v10728_v29  ;;  %v1015_v28 = vld [vmem:[#allocation5 + $0x1b20] sm:$0xff]  ;;  %v1012_v29 = vld [vmem:[#allocation5 + $0x1b08] sm:$0xff] }
 0x216   :  { %v10782_v33 = vcombine.high %v1011_v27, %v1015_v28  ;;  %v10781_v41 = vcombine.low %v1011_v27, %v1015_v28  ;;  %v10783_v42 = vcombine.low %v1012_v29, %v1016_v30  ;;  %v1059_v27 = vld [vmem:[#allocation5 + $0x1c80] sm:$0xff] }
 0x217   :  { %v1063_v28 = vld [vmem:[#allocation5 + $0x1ca0] sm:$0xff] }
 0x218   :  { %6590 = vmatpush1.bf16.msra.mxu0 %v10725_v35  ;;  %6918 = vmatpush1.bf16.msra.mxu1 %v10727_v36  ;;  %v10784_v35 = vcombine.high %v1012_v29, %v1016_v30  ;;  %v1019_v36 = vld [vmem:[#allocation5 + $0x1b40] sm:$0xff]  ;;  %v12231_v29 = vpack.c.bf16 %v130_v19, %v130_v19  ;;  %v1060_v30 = vld [vmem:[#allocation5 + $0x1c88] sm:$0xff] }
 0x219   :  { %6591 = vmatprep.subr.bf16.mxu0 %v10734_v37  ;;  %6919 = vmatprep.subr.bf16.mxu1 %v10736_v38  ;;  %v1023_v37 = vld [vmem:[#allocation5 + $0x1b60] sm:$0xff]  ;;  %v1020_v38 = vld [vmem:[#allocation5 + $0x1b48] sm:$0xff] }
 0x21a   :  { %v10790_v43 = vcombine.high %v1019_v36, %v1023_v37  ;;  %v10789_v51 = vcombine.low %v1019_v36, %v1023_v37  ;;  %v10791_v52 = vcombine.low %v1020_v38, %v1024_v40  ;;  %v1067_v37 = vld [vmem:[#allocation5 + $0x1cc0] sm:$0xff] }
 0x21c   :  { %6592 = vmatpush1.bf16.msra.mxu0 %v10733_v45  ;;  %6920 = vmatpush1.bf16.msra.mxu1 %v10735_v46  ;;  %v10792_v45 = vcombine.high %v1020_v38, %v1024_v40  ;;  %v1027_v46 = vld [vmem:[#allocation5 + $0x1b80] sm:$0xff]  ;;  %v1068_v40 = vld [vmem:[#allocation5 + $0x1cc8] sm:$0xff] }
 0x21d   :  { %6593 = vmatprep.subr.bf16.mxu0 %v10742_v47  ;;  %6921 = vmatprep.subr.bf16.mxu1 %v10744_v49  ;;  %v1031_v47 = vld [vmem:[#allocation5 + $0x1ba0] sm:$0xff]  ;;  %v1028_v49 = vld [vmem:[#allocation5 + $0x1b88] sm:$0xff] }
 0x21e   :  { %v10798_v53 = vcombine.high %v1027_v46, %v1031_v47  ;;  %v10797_v62 = vcombine.low %v1027_v46, %v1031_v47  ;;  %v10799_v63 = vcombine.low %v1028_v49, %v1032_v50  ;;  %v1071_v38 = vld [vmem:[#allocation5 + $0x1ce0] sm:$0xff] }
 0x21f   :  { %v1075_v47 = vld [vmem:[#allocation5 + $0x1d00] sm:$0xff] }
 0x220   :  { %6594 = vmatpush1.bf16.msra.mxu0 %v10741_v55  ;;  %6922 = vmatpush1.bf16.msra.mxu1 %v10743_v58  ;;  %v10800_v55 = vcombine.high %v1028_v49, %v1032_v50  ;;  %v1035_v58 = vld [vmem:[#allocation5 + $0x1bc0] sm:$0xff]  ;;  %v1076_v50 = vld [vmem:[#allocation5 + $0x1d08] sm:$0xff] }
 0x221   :  { %6595 = vmatprep.subr.bf16.mxu0 %v10750_v59  ;;  %6923 = vmatprep.subr.bf16.mxu1 %v10752_v60  ;;  %v1039_v59 = vld [vmem:[#allocation5 + $0x1be0] sm:$0xff]  ;;  %v1036_v60 = vld [vmem:[#allocation5 + $0x1bc8] sm:$0xff] }
 0x222   :  { %v10806_v0 = vcombine.high %v1035_v58, %v1039_v59  ;;  %v10805_v7 = vcombine.low %v1035_v58, %v1039_v59  ;;  %v10807_v9 = vcombine.low %v1036_v60, %v1040_v61  ;;  %v1079_v49 = vld [vmem:[#allocation5 + $0x1d20] sm:$0xff] }
 0x223   :  { %v1083_v59 = vld [vmem:[#allocation5 + $0x1d40] sm:$0xff] }
 0x224   :  { %6596 = vmatpush1.bf16.msra.mxu0 %v10749_v2  ;;  %6924 = vmatpush1.bf16.msra.mxu1 %v10751_v3  ;;  %v10808_v2 = vcombine.high %v1036_v60, %v1040_v61  ;;  %v1043_v3 = vld [vmem:[#allocation5 + $0x1c00] sm:$0xff]  ;;  %v1084_v61 = vld [vmem:[#allocation5 + $0x1d48] sm:$0xff] }
 0x225   :  { %6597 = vmatprep.subr.bf16.mxu0 %v10758_v4  ;;  %6925 = vmatprep.subr.bf16.mxu1 %v10760_v5  ;;  %v1047_v4 = vld [vmem:[#allocation5 + $0x1c20] sm:$0xff]  ;;  %v1044_v5 = vld [vmem:[#allocation5 + $0x1c08] sm:$0xff] }
 0x226   :  { %v1087_v60 = vld [vmem:[#allocation5 + $0x1d60] sm:$0xff] }
 0x227   :  { %v10853_v8 = vcombine.low %v1083_v59, %v1087_v60 }
 0x228   :  { %6598 = vmatpush1.bf16.msra.mxu0 %v10757_v10  ;;  %6926 = vmatpush1.bf16.msra.mxu1 %v10759_v11  ;;  %v10814_v10 = vcombine.high %v1043_v3, %v1047_v4  ;;  %v10816_v11 = vcombine.high %v1044_v5, %v1048_v6 }
 0x229   :  { %6599 = vmatprep.subr.bf16.mxu0 %v10766_v13  ;;  %6927 = vmatprep.subr.bf16.mxu1 %v10768_v15  ;;  %v1051_v13 = vld [vmem:[#allocation5 + $0x1c40] sm:$0xff] }
 0x22a   :  { %v1055_v15 = vld [vmem:[#allocation5 + $0x1c60] sm:$0xff] }
 0x22c   :  { %6600 = vmatpush1.bf16.msra.mxu0 %v10765_v20  ;;  %6928 = vmatpush1.bf16.msra.mxu1 %v10767_v21  ;;  %v10813_v20 = vcombine.low %v1043_v3, %v1047_v4  ;;  %v10815_v21 = vcombine.low %v1044_v5, %v1048_v6  ;;  %v1091_v4 = vld [vmem:[#allocation5 + $0x1d80] sm:$0xff]  ;;  %v1092_v6 = vld [vmem:[#allocation5 + $0x1d88] sm:$0xff] }
 0x22d   :  { %6601 = vmatprep.subr.bf16.mxu0 %v10774_v22  ;;  %6929 = vmatprep.subr.bf16.mxu1 %v10776_v24  ;;  %v10822_v22 = vcombine.high %v1051_v13, %v1055_v15  ;;  %v10824_v24 = vcombine.high %v1052_v17, %v1056_v18  ;;  %v1095_v5 = vld [vmem:[#allocation5 + $0x1da0] sm:$0xff] }
 0x22e   :  { %v10861_v19 = vcombine.low %v1091_v4, %v1095_v5 }
 0x230   :  { %6602 = vmatpush1.bf16.msra.mxu0 %v10773_v31  ;;  %6930 = vmatpush1.bf16.msra.mxu1 %v10775_v32  ;;  %v1064_v31 = vld [vmem:[#allocation5 + $0x1ca8] sm:$0xff]  ;;  %v10821_v32 = vcombine.low %v1051_v13, %v1055_v15  ;;  %v1099_v13 = vld [vmem:[#allocation5 + $0x1dc0] sm:$0xff] }
 0x231   :  { %6603 = vmatprep.subr.bf16.mxu0 %v10782_v33  ;;  %6931 = vmatprep.subr.bf16.mxu1 %v10784_v35  ;;  %v10823_v33 = vcombine.low %v1052_v17, %v1056_v18  ;;  %v10830_v35 = vcombine.high %v1059_v27, %v1063_v28  ;;  %v10832_v36 = vcombine.high %v1060_v30, %v1064_v31  ;;  %v1103_v15 = vld [vmem:[#allocation5 + $0x1de0] sm:$0xff]  ;;  %v1100_v17 = vld [vmem:[#allocation5 + $0x1dc8] sm:$0xff] }
 0x232   :  { %v1104_v18 = vld [vmem:[#allocation5 + $0x1de8] sm:$0xff] }
 0x234   :  { %6604 = vmatpush1.bf16.msra.mxu0 %v10781_v41  ;;  %6932 = vmatpush1.bf16.msra.mxu1 %v10783_v42  ;;  %v1072_v41 = vld [vmem:[#allocation5 + $0x1ce8] sm:$0xff]  ;;  %v10829_v42 = vcombine.low %v1059_v27, %v1063_v28  ;;  %v1111_v27 = vld [vmem:[#allocation5 + $0x1e20] sm:$0xff] }
 0x235   :  { %6605 = vmatprep.subr.bf16.mxu0 %v10790_v43  ;;  %6933 = vmatprep.subr.bf16.mxu1 %v10792_v45  ;;  %v10831_v43 = vcombine.low %v1060_v30, %v1064_v31  ;;  %v10838_v45 = vcombine.high %v1067_v37, %v1071_v38  ;;  %v10840_v46 = vcombine.high %v1068_v40, %v1072_v41  ;;  %v1108_v28 = vld [vmem:[#allocation5 + $0x1e08] sm:$0xff] }
 0x236   :  { %v1112_v30 = vld [vmem:[#allocation5 + $0x1e28] sm:$0xff]  ;;  %v10869_v31 = vcombine.low %v1099_v13, %v1103_v15 }
 0x238   :  { %6606 = vmatpush1.bf16.msra.mxu0 %v10789_v51  ;;  %6934 = vmatpush1.bf16.msra.mxu1 %v10791_v52  ;;  %v1080_v51 = vld [vmem:[#allocation5 + $0x1d28] sm:$0xff]  ;;  %v10837_v52 = vcombine.low %v1067_v37, %v1071_v38  ;;  %v1119_v37 = vld [vmem:[#allocation5 + $0x1e60] sm:$0xff] }
 0x239   :  { %6607 = vmatprep.subr.bf16.mxu0 %v10798_v53  ;;  %6935 = vmatprep.subr.bf16.mxu1 %v10800_v55  ;;  %v10839_v53 = vcombine.low %v1068_v40, %v1072_v41  ;;  %v10846_v55 = vcombine.high %v1075_v47, %v1079_v49  ;;  %v10848_v58 = vcombine.high %v1076_v50, %v1080_v51  ;;  %v1116_v38 = vld [vmem:[#allocation5 + $0x1e48] sm:$0xff] }
 0x23a   :  { %v1120_v40 = vld [vmem:[#allocation5 + $0x1e68] sm:$0xff] }
 0x23c   :  { %6608 = vmatpush1.bf16.msra.mxu0 %v10797_v62  ;;  %6936 = vmatpush1.bf16.msra.mxu1 %v10799_v63  ;;  %v1088_v62 = vld [vmem:[#allocation5 + $0x1d68] sm:$0xff]  ;;  %v10845_v63 = vcombine.low %v1075_v47, %v1079_v49  ;;  %v1127_v47 = vld [vmem:[#allocation5 + $0x1ea0] sm:$0xff] }
 0x23d   :  { %6609 = vmatprep.subr.bf16.mxu0 %v10806_v0  ;;  %6937 = vmatprep.subr.bf16.mxu1 %v10808_v2  ;;  %v10847_v0 = vcombine.low %v1076_v50, %v1080_v51  ;;  %v10854_v2 = vcombine.high %v1083_v59, %v1087_v60  ;;  %v10856_v3 = vcombine.high %v1084_v61, %v1088_v62  ;;  %v1124_v49 = vld [vmem:[#allocation5 + $0x1e88] sm:$0xff]  ;;  %v1135_v59 = vld [vmem:[#allocation5 + $0x1ee0] sm:$0xff] }
 0x23e   :  { %v1128_v50 = vld [vmem:[#allocation5 + $0x1ea8] sm:$0xff] }
 0x23f   :  { %v1132_v60 = vld [vmem:[#allocation5 + $0x1ec8] sm:$0xff] }
 0x240   :  { %6610 = vmatpush1.bf16.msra.mxu0 %v10805_v7  ;;  %6938 = vmatpush1.bf16.msra.mxu1 %v10807_v9  ;;  %v1096_v7 = vld [vmem:[#allocation5 + $0x1da8] sm:$0xff]  ;;  %v10855_v9 = vcombine.low %v1084_v61, %v1088_v62 }
 0x241   :  { %6620 = vmatprep.subr.bf16.mxu0 %v10814_v10  ;;  %6948 = vmatprep.subr.bf16.mxu1 %v10816_v11  ;;  %v10862_v10 = vcombine.high %v1091_v4, %v1095_v5  ;;  %v10864_v11 = vcombine.high %v1092_v6, %v1096_v7  ;;  %v1136_v61 = vld [vmem:[#allocation5 + $0x1ee8] sm:$0xff]  ;;  %v1143_v4 = vld [vmem:[#allocation5 + $0x1f20] sm:$0xff] }
 0x242   :  { %v1140_v5 = vld [vmem:[#allocation5 + $0x1f08] sm:$0xff] }
 0x243   :  { %6612 = vmatmul.mubr.bf16.vlgmr.msra.gmra.mrb[0].mxu0 %v12229_v16  ;;  %6940 = vmatmul.mubr.bf16.vlgmr.msra.gmra.mrb[0].mxu1 %v12229_v16 }
 0x244   :  { %6621 = vmatpush1.bf16.msra.mxu0 %v10813_v20  ;;  %6949 = vmatpush1.bf16.msra.mxu1 %v10815_v21  ;;  %v10863_v20 = vcombine.low %v1092_v6, %v1096_v7  ;;  %v10870_v21 = vcombine.high %v1099_v13, %v1103_v15  ;;  %v1144_v6 = vld [vmem:[#allocation5 + $0x1f28] sm:$0xff]  ;;  %v1151_v13 = vld [vmem:[#allocation5 + $0x1f60] sm:$0xff] }
 0x245   :  { %6622 = vmatprep.subr.bf16.mxu0 %v10822_v22  ;;  %6950 = vmatprep.subr.bf16.mxu1 %v10824_v24  ;;  %v10872_v22 = vcombine.high %v1100_v17, %v1104_v18  ;;  %v1107_v24 = vld [vmem:[#allocation5 + $0x1e00] sm:$0xff]  ;;  %v1148_v15 = vld [vmem:[#allocation5 + $0x1f48] sm:$0xff] }
 0x246   :  { %6652 = vmatprep.mubr.bf16.mxu0 %v12231_v29  ;;  %6980 = vmatprep.mubr.bf16.mxu1 %v12231_v29  ;;  %v10877_v41 = vcombine.low %v1107_v24, %v1111_v27 }
 0x248   :  { %6623 = vmatpush1.bf16.msra.mxu0 %v10821_v32  ;;  %6951 = vmatpush1.bf16.msra.mxu1 %v10823_v33  ;;  %v10871_v32 = vcombine.low %v1100_v17, %v1104_v18  ;;  %v10878_v33 = vcombine.high %v1107_v24, %v1111_v27  ;;  %v1152_v17 = vld [vmem:[#allocation5 + $0x1f68] sm:$0xff]  ;;  %v1159_v24 = vld [vmem:[#allocation5 + $0x1fa0] sm:$0xff] }
 0x249   :  { %6624 = vmatprep.subr.bf16.mxu0 %v10830_v35  ;;  %6952 = vmatprep.subr.bf16.mxu1 %v10832_v36  ;;  %v10880_v35 = vcombine.high %v1108_v28, %v1112_v30  ;;  %v1115_v36 = vld [vmem:[#allocation5 + $0x1e40] sm:$0xff]  ;;  %v1156_v27 = vld [vmem:[#allocation5 + $0x1f88] sm:$0xff] }
 0x24a   :  { %v10885_v51 = vcombine.low %v1115_v36, %v1119_v37 }
 0x24c   :  { %6625 = vmatpush1.bf16.msra.mxu0 %v10829_v42  ;;  %6953 = vmatpush1.bf16.msra.mxu1 %v10831_v43  ;;  %v10879_v42 = vcombine.low %v1108_v28, %v1112_v30  ;;  %v10886_v43 = vcombine.high %v1115_v36, %v1119_v37  ;;  %v1160_v28 = vld [vmem:[#allocation5 + $0x1fa8] sm:$0xff]  ;;  %v1167_v36 = vld [vmem:[#allocation5 + $0x1fe0] sm:$0xff] }
 0x24d   :  { %6626 = vmatprep.subr.bf16.mxu0 %v10838_v45  ;;  %6954 = vmatprep.subr.bf16.mxu1 %v10840_v46  ;;  %v10888_v45 = vcombine.high %v1116_v38, %v1120_v40  ;;  %v1123_v46 = vld [vmem:[#allocation5 + $0x1e80] sm:$0xff]  ;;  %v1164_v37 = vld [vmem:[#allocation5 + $0x1fc8] sm:$0xff] }
 0x24e   :  { %v10893_v62 = vcombine.low %v1123_v46, %v1127_v47 }
 0x250   :  { %6627 = vmatpush1.bf16.msra.mxu0 %v10837_v52  ;;  %6955 = vmatpush1.bf16.msra.mxu1 %v10839_v53  ;;  %v10887_v52 = vcombine.low %v1116_v38, %v1120_v40  ;;  %v10894_v53 = vcombine.high %v1123_v46, %v1127_v47  ;;  %v1168_v38 = vld [vmem:[#allocation5 + $0x1fe8] sm:$0xff]  ;;  %v153_v46 = vld [vmem:[#allocation5 + $0x30] sm:$0xff]  ;;  %v150_v47 = vld [vmem:[#allocation5 + $0x18] sm:$0xff] }
 0x251   :  { %6628 = vmatprep.subr.bf16.mxu0 %v10846_v55  ;;  %6956 = vmatprep.subr.bf16.mxu1 %v10848_v58  ;;  %v10896_v55 = vcombine.high %v1124_v49, %v1128_v50  ;;  %v1131_v58 = vld [vmem:[#allocation5 + $0x1ec0] sm:$0xff] }
 0x252   :  { %v10901_v7 = vcombine.low %v1131_v58, %v1135_v59 }
 0x254   :  { %6629 = vmatpush1.bf16.msra.mxu0 %v10845_v63  ;;  %6957 = vmatpush1.bf16.msra.mxu1 %v10847_v0  ;;  %v10895_v63 = vcombine.low %v1124_v49, %v1128_v50  ;;  %v10902_v0 = vcombine.high %v1131_v58, %v1135_v59  ;;  %v154_v49 = vld [vmem:[#allocation5 + $0x38] sm:$0xff]  ;;  %v157_v58 = vld [vmem:[#allocation5 + $0x50] sm:$0xff] }
 0x255   :  { %6630 = vmatprep.subr.bf16.mxu0 %v10854_v2  ;;  %6958 = vmatprep.subr.bf16.mxu1 %v10856_v3  ;;  %v10904_v2 = vcombine.high %v1132_v60, %v1136_v61  ;;  %v1139_v3 = vld [vmem:[#allocation5 + $0x1f00] sm:$0xff]  ;;  %v161_v59 = vld [vmem:[#allocation5 + $0x70] sm:$0xff] }
 0x256   :  { %v10909_v18 = vcombine.low %v1139_v3, %v1143_v4 }
 0x258   :  { %6631 = vmatpush1.bf16.msra.mxu0 %v10853_v8  ;;  %6959 = vmatpush1.bf16.msra.mxu1 %v10855_v9  ;;  %v10903_v8 = vcombine.low %v1132_v60, %v1136_v61  ;;  %v10910_v9 = vcombine.high %v1139_v3, %v1143_v4  ;;  %v158_v61 = vld [vmem:[#allocation5 + $0x58] sm:$0xff]  ;;  %v165_v4 = vld [vmem:[#allocation5 + $0x90] sm:$0xff] }
 0x259   :  { %6632 = vmatprep.subr.bf16.mxu0 %v10862_v10  ;;  %6960 = vmatprep.subr.bf16.mxu1 %v10864_v11  ;;  %v10912_v10 = vcombine.high %v1140_v5, %v1144_v6  ;;  %v1147_v11 = vld [vmem:[#allocation5 + $0x1f40] sm:$0xff] }
 0x25a   :  { %v10917_v30 = vcombine.low %v1147_v11, %v1151_v13 }
 0x25c   :  { %6633 = vmatpush1.bf16.msra.mxu0 %v10861_v19  ;;  %6961 = vmatpush1.bf16.msra.mxu1 %v10863_v20  ;;  %v10911_v19 = vcombine.low %v1140_v5, %v1144_v6  ;;  %v10918_v20 = vcombine.high %v1147_v11, %v1151_v13  ;;  %v169_v5 = vld [vmem:[#allocation5 + $0xb0] sm:$0xff]  ;;  %v166_v6 = vld [vmem:[#allocation5 + $0x98] sm:$0xff] }
 0x25d   :  { %6634 = vmatprep.subr.bf16.mxu0 %v10870_v21  ;;  %6962 = vmatprep.subr.bf16.mxu1 %v10872_v22  ;;  %v10920_v21 = vcombine.high %v1148_v15, %v1152_v17  ;;  %v1155_v22 = vld [vmem:[#allocation5 + $0x1f80] sm:$0xff]  ;;  %v173_v13 = vld [vmem:[#allocation5 + $0xd0] sm:$0xff] }
 0x25e   :  { %v10925_v40 = vcombine.low %v1155_v22, %v1159_v24 }
 0x260   :  { %6635 = vmatpush1.bf16.msra.mxu0 %v10869_v31  ;;  %6963 = vmatpush1.bf16.msra.mxu1 %v10871_v32  ;;  %v10919_v31 = vcombine.low %v1148_v15, %v1152_v17  ;;  %v10926_v32 = vcombine.high %v1155_v22, %v1159_v24  ;;  %v177_v15 = vld [vmem:[#allocation5 + $0xf0] sm:$0xff]  ;;  %v174_v17 = vld [vmem:[#allocation5 + $0xd8] sm:$0xff] }
 0x261   :  { %6636 = vmatprep.subr.bf16.mxu0 %v10878_v33  ;;  %6964 = vmatprep.subr.bf16.mxu1 %v10880_v35  ;;  %v10928_v33 = vcombine.high %v1156_v27, %v1160_v28  ;;  %v1163_v35 = vld [vmem:[#allocation5 + $0x1fc0] sm:$0xff]  ;;  %v181_v24 = vld [vmem:[#allocation5 + $0x110] sm:$0xff] }
 0x262   :  { %v10933_v50 = vcombine.low %v1163_v35, %v1167_v36 }
 0x264   :  { %6637 = vmatpush1.bf16.msra.mxu0 %v10877_v41  ;;  %6965 = vmatpush1.bf16.msra.mxu1 %v10879_v42  ;;  %v10927_v41 = vcombine.low %v1156_v27, %v1160_v28  ;;  %v10934_v42 = vcombine.high %v1163_v35, %v1167_v36  ;;  %v185_v27 = vld [vmem:[#allocation5 + $0x130] sm:$0xff]  ;;  %v182_v28 = vld [vmem:[#allocation5 + $0x118] sm:$0xff] }
 0x265   :  { %6638 = vmatprep.subr.bf16.mxu0 %v10886_v43  ;;  %6966 = vmatprep.subr.bf16.mxu1 %v10888_v45  ;;  %v10936_v43 = vcombine.high %v1164_v37, %v1168_v38  ;;  %v149_v45 = vld [vmem:[#allocation5 + $0x10] sm:$0xff] }
 0x266   :  { %v189_v35 = vld [vmem:[#allocation5 + $0x150] sm:$0xff] }
 0x267   :  { %v193_v36 = vld [vmem:[#allocation5 + $0x170] sm:$0xff] }
 0x268   :  { %6639 = vmatpush1.bf16.msra.mxu0 %v10885_v51  ;;  %6967 = vmatpush1.bf16.msra.mxu1 %v10887_v52  ;;  %v129_v51 = vld [vmem:[#allocation2 + $0x70] sm:$0xff]  ;;  %v10935_v52 = vcombine.low %v1164_v37, %v1168_v38  ;;  %v190_v37 = vld [vmem:[#allocation5 + $0x158] sm:$0xff] }
 0x269   :  { %6640 = vmatprep.subr.bf16.mxu0 %v10894_v53  ;;  %6968 = vmatprep.subr.bf16.mxu1 %v10896_v55  ;;  %v9922_v53 = vcombine.high %v149_v45, %v153_v46  ;;  %v9924_v55 = vcombine.high %v150_v47, %v154_v49  ;;  %v12237_v60 = vpack.c.bf16 %v129_v51, %v129_v51  ;;  %v194_v38 = vld [vmem:[#allocation5 + $0x178] sm:$0xff] }
 0x26a   :  { %v9963_v51 = vcombine.low %v190_v37, %v194_v38 }
 0x26c   :  { %6641 = vmatpush1.bf16.msra.mxu0 %v10893_v62  ;;  %6969 = vmatpush1.bf16.msra.mxu1 %v10895_v63  ;;  %v162_v62 = vld [vmem:[#allocation5 + $0x78] sm:$0xff]  ;;  %v9921_v63 = vcombine.low %v149_v45, %v153_v46  ;;  %v197_v45 = vld [vmem:[#allocation5 + $0x190] sm:$0xff] }
 0x26d   :  { %6642 = vmatprep.subr.bf16.mxu0 %v10902_v0  ;;  %6970 = vmatprep.subr.bf16.mxu1 %v10904_v2  ;;  %v9923_v0 = vcombine.low %v150_v47, %v154_v49  ;;  %v9930_v2 = vcombine.high %v157_v58, %v161_v59  ;;  %v9932_v3 = vcombine.high %v158_v61, %v162_v62  ;;  %v201_v46 = vld [vmem:[#allocation5 + $0x1b0] sm:$0xff]  ;;  %v198_v47 = vld [vmem:[#allocation5 + $0x198] sm:$0xff] }
 0x26e   :  { %v202_v49 = vld [vmem:[#allocation5 + $0x1b8] sm:$0xff] }
 0x270   :  { %6643 = vmatpush1.bf16.msra.mxu0 %v10901_v7  ;;  %6971 = vmatpush1.bf16.msra.mxu1 %v10903_v8  ;;  %v170_v7 = vld [vmem:[#allocation5 + $0xb8] sm:$0xff]  ;;  %v9929_v8 = vcombine.low %v157_v58, %v161_v59  ;;  %v209_v58 = vld [vmem:[#allocation5 + $0x1f0] sm:$0xff] }
 0x271   :  { %6644 = vmatprep.subr.bf16.mxu0 %v10910_v9  ;;  %6972 = vmatprep.subr.bf16.mxu1 %v10912_v10  ;;  %v9931_v9 = vcombine.low %v158_v61, %v162_v62  ;;  %v9938_v10 = vcombine.high %v165_v4, %v169_v5  ;;  %v9940_v11 = vcombine.high %v166_v6, %v170_v7  ;;  %v206_v59 = vld [vmem:[#allocation5 + $0x1d8] sm:$0xff] }
 0x272   :  { %v210_v61 = vld [vmem:[#allocation5 + $0x1f8] sm:$0xff]  ;;  %v9969_v62 = vcombine.low %v197_v45, %v201_v46 }
 0x274   :  { %6645 = vmatpush1.bf16.msra.mxu0 %v10909_v18  ;;  %6973 = vmatpush1.bf16.msra.mxu1 %v10911_v19  ;;  %v178_v18 = vld [vmem:[#allocation5 + $0xf8] sm:$0xff]  ;;  %v9937_v19 = vcombine.low %v165_v4, %v169_v5  ;;  %v217_v4 = vld [vmem:[#allocation5 + $0x230] sm:$0xff] }
 0x275   :  { %6646 = vmatprep.subr.bf16.mxu0 %v10918_v20  ;;  %6974 = vmatprep.subr.bf16.mxu1 %v10920_v21  ;;  %v9939_v20 = vcombine.low %v166_v6, %v170_v7  ;;  %v9946_v21 = vcombine.high %v173_v13, %v177_v15  ;;  %v9948_v22 = vcombine.high %v174_v17, %v178_v18  ;;  %v214_v5 = vld [vmem:[#allocation5 + $0x218] sm:$0xff] }
 0x276   :  { %v218_v6 = vld [vmem:[#allocation5 + $0x238] sm:$0xff] }
 0x278   :  { %6647 = vmatpush1.bf16.msra.mxu0 %v10917_v30  ;;  %6975 = vmatpush1.bf16.msra.mxu1 %v10919_v31  ;;  %v186_v30 = vld [vmem:[#allocation5 + $0x138] sm:$0xff]  ;;  %v9945_v31 = vcombine.low %v173_v13, %v177_v15  ;;  %v225_v13 = vld [vmem:[#allocation5 + $0x270] sm:$0xff] }
 0x279   :  { %6648 = vmatprep.subr.bf16.mxu0 %v10926_v32  ;;  %6976 = vmatprep.subr.bf16.mxu1 %v10928_v33  ;;  %v9947_v32 = vcombine.low %v174_v17, %v178_v18  ;;  %v9954_v33 = vcombine.high %v181_v24, %v185_v27  ;;  %v222_v15 = vld [vmem:[#allocation5 + $0x258] sm:$0xff] }
 0x27a   :  { %v226_v17 = vld [vmem:[#allocation5 + $0x278] sm:$0xff] }
 0x27c   :  { %6649 = vmatpush1.bf16.msra.mxu0 %v10925_v40  ;;  %6977 = vmatpush1.bf16.msra.mxu1 %v10927_v41  ;;  %v9953_v40 = vcombine.low %v181_v24, %v185_v27  ;;  %v9955_v41 = vcombine.low %v182_v28, %v186_v30  ;;  %v233_v24 = vld [vmem:[#allocation5 + $0x2b0] sm:$0xff]  ;;  %v230_v27 = vld [vmem:[#allocation5 + $0x298] sm:$0xff] }
 0x27d   :  { %6650 = vmatprep.subr.bf16.mxu0 %v10934_v42  ;;  %6978 = vmatprep.subr.bf16.mxu1 %v10936_v43  ;;  %v9962_v42 = vcombine.high %v189_v35, %v193_v36  ;;  %v9964_v43 = vcombine.high %v190_v37, %v194_v38  ;;  %v242_v37 = vld [vmem:[#allocation5 + $0x2f8] sm:$0xff] }
 0x280   :  { %6651 = vmatpush1.bf16.msra.mxu0 %v10933_v50  ;;  %6979 = vmatpush1.bf16.msra.mxu1 %v10935_v52  ;;  %v9961_v50 = vcombine.low %v189_v35, %v193_v36  ;;  %v9970_v52 = vcombine.high %v197_v45, %v201_v46  ;;  %v241_v35 = vld [vmem:[#allocation5 + $0x2f0] sm:$0xff]  ;;  %v238_v36 = vld [vmem:[#allocation5 + $0x2d8] sm:$0xff] }
 0x281   :  { %6989 = vmatprep.subr.bf16.mxu0 %v9922_v53  ;;  %7317 = vmatprep.subr.bf16.mxu1 %v9924_v55  ;;  %v9972_v53 = vcombine.high %v198_v47, %v202_v49  ;;  %v205_v55 = vld [vmem:[#allocation5 + $0x1d0] sm:$0xff]  ;;  %v246_v46 = vld [vmem:[#allocation5 + $0x318] sm:$0xff] }
 0x282   :  { %v9977_v7 = vcombine.low %v205_v55, %v209_v58  ;;  %v249_v45 = vld [vmem:[#allocation5 + $0x330] sm:$0xff] }
 0x283   :  { %6653 = vmatmul.mubr.bf16.vlgmr.msra.gmra.mrb[0].mxu0 %v12237_v60  ;;  %6981 = vmatmul.mubr.bf16.vlgmr.msra.gmra.mrb[0].mxu1 %v12237_v60 }
 0x284   :  { %6990 = vmatpush1.bf16.msra.mxu0 %v9921_v63  ;;  %7318 = vmatpush1.bf16.msra.mxu1 %v9923_v0  ;;  %v9971_v63 = vcombine.low %v198_v47, %v202_v49  ;;  %v9978_v0 = vcombine.high %v205_v55, %v209_v58  ;;  %v250_v47 = vld [vmem:[#allocation5 + $0x338] sm:$0xff]  ;;  %v257_v55 = vld [vmem:[#allocation5 + $0x370] sm:$0xff] }
 0x285   :  { %6991 = vmatprep.subr.bf16.mxu0 %v9930_v2  ;;  %7319 = vmatprep.subr.bf16.mxu1 %v9932_v3  ;;  %v9980_v2 = vcombine.high %v206_v59, %v210_v61  ;;  %v213_v3 = vld [vmem:[#allocation5 + $0x210] sm:$0xff]  ;;  %v254_v58 = vld [vmem:[#allocation5 + $0x358] sm:$0xff] }
 0x286   :  { %7021 = vmatprep.mubr.bf16.mxu0 %v12177_v57  ;;  %7349 = vmatprep.mubr.bf16.mxu1 %v12177_v57  ;;  %v9956_v57 = vcombine.high %v182_v28, %v186_v30  ;;  %v9985_v18 = vcombine.low %v213_v3, %v217_v4  ;;  %v234_v28 = vld [vmem:[#allocation5 + $0x2b8] sm:$0xff] }
 0x288   :  { %6992 = vmatpush1.bf16.msra.mxu0 %v9929_v8  ;;  %7320 = vmatpush1.bf16.msra.mxu1 %v9931_v9  ;;  %v9979_v8 = vcombine.low %v206_v59, %v210_v61  ;;  %v9986_v9 = vcombine.high %v213_v3, %v217_v4  ;;  %v258_v59 = vld [vmem:[#allocation5 + $0x378] sm:$0xff]  ;;  %v265_v3 = vld [vmem:[#allocation5 + $0x3b0] sm:$0xff] }
 0x289   :  { %6993 = vmatprep.subr.bf16.mxu0 %v9938_v10  ;;  %7321 = vmatprep.subr.bf16.mxu1 %v9940_v11  ;;  %v9988_v10 = vcombine.high %v214_v5, %v218_v6  ;;  %v221_v11 = vld [vmem:[#allocation5 + $0x250] sm:$0xff]  ;;  %v262_v4 = vld [vmem:[#allocation5 + $0x398] sm:$0xff] }
 0x28a   :  { %v9993_v30 = vcombine.low %v221_v11, %v225_v13 }
 0x28c   :  { %6994 = vmatpush1.bf16.msra.mxu0 %v9937_v19  ;;  %7322 = vmatpush1.bf16.msra.mxu1 %v9939_v20  ;;  %v9987_v19 = vcombine.low %v214_v5, %v218_v6  ;;  %v9994_v20 = vcombine.high %v221_v11, %v225_v13  ;;  %v266_v5 = vld [vmem:[#allocation5 + $0x3b8] sm:$0xff]  ;;  %v273_v11 = vld [vmem:[#allocation5 + $0x3f0] sm:$0xff] }
 0x28d   :  { %6995 = vmatprep.subr.bf16.mxu0 %v9946_v21  ;;  %7323 = vmatprep.subr.bf16.mxu1 %v9948_v22  ;;  %v9996_v21 = vcombine.high %v222_v15, %v226_v17  ;;  %v229_v22 = vld [vmem:[#allocation5 + $0x290] sm:$0xff]  ;;  %v270_v13 = vld [vmem:[#allocation5 + $0x3d8] sm:$0xff] }
 0x28e   :  { %v10001_v38 = vcombine.low %v229_v22, %v233_v24 }
 0x290   :  { %6996 = vmatpush1.bf16.msra.mxu0 %v9945_v31  ;;  %7324 = vmatpush1.bf16.msra.mxu1 %v9947_v32  ;;  %v9995_v31 = vcombine.low %v222_v15, %v226_v17  ;;  %v10002_v32 = vcombine.high %v229_v22, %v233_v24  ;;  %v274_v15 = vld [vmem:[#allocation5 + $0x3f8] sm:$0xff]  ;;  %v281_v22 = vld [vmem:[#allocation5 + $0x430] sm:$0xff] }
 0x291   :  { %6997 = vmatprep.subr.bf16.mxu0 %v9954_v33  ;;  %7325 = vmatprep.subr.bf16.mxu1 %v9956_v57  ;;  %v10004_v33 = vcombine.high %v230_v27, %v234_v28  ;;  %v237_v57 = vld [vmem:[#allocation5 + $0x2d0] sm:$0xff]  ;;  %v278_v24 = vld [vmem:[#allocation5 + $0x418] sm:$0xff] }
 0x292   :  { %v10009_v49 = vcombine.low %v237_v57, %v241_v35 }
 0x294   :  { %6998 = vmatpush1.bf16.msra.mxu0 %v9953_v40  ;;  %7326 = vmatpush1.bf16.msra.mxu1 %v9955_v41  ;;  %v10003_v40 = vcombine.low %v230_v27, %v234_v28  ;;  %v10010_v41 = vcombine.high %v237_v57, %v241_v35  ;;  %v282_v27 = vld [vmem:[#allocation5 + $0x438] sm:$0xff]  ;;  %v289_v57 = vld [vmem:[#allocation5 + $0x470] sm:$0xff] }
 0x295   :  { %6999 = vmatprep.subr.bf16.mxu0 %v9962_v42  ;;  %7327 = vmatprep.subr.bf16.mxu1 %v9964_v43  ;;  %v10012_v42 = vcombine.high %v238_v36, %v242_v37  ;;  %v245_v43 = vld [vmem:[#allocation5 + $0x310] sm:$0xff]  ;;  %v286_v35 = vld [vmem:[#allocation5 + $0x458] sm:$0xff] }
 0x296   :  { %v10017_v61 = vcombine.low %v245_v43, %v249_v45 }
 0x298   :  { %7000 = vmatpush1.bf16.msra.mxu0 %v9961_v50  ;;  %7328 = vmatpush1.bf16.msra.mxu1 %v9963_v51  ;;  %v10011_v50 = vcombine.low %v238_v36, %v242_v37  ;;  %v10018_v51 = vcombine.high %v245_v43, %v249_v45  ;;  %v290_v36 = vld [vmem:[#allocation5 + $0x478] sm:$0xff]  ;;  %v297_v43 = vld [vmem:[#allocation5 + $0x4b0] sm:$0xff] }
 0x299   :  { %7001 = vmatprep.subr.bf16.mxu0 %v9970_v52  ;;  %7329 = vmatprep.subr.bf16.mxu1 %v9972_v53  ;;  %v10020_v52 = vcombine.high %v246_v46, %v250_v47  ;;  %v253_v53 = vld [vmem:[#allocation5 + $0x350] sm:$0xff]  ;;  %v294_v45 = vld [vmem:[#allocation5 + $0x498] sm:$0xff] }
 0x29a   :  { %v10025_v6 = vcombine.low %v253_v53, %v257_v55 }
 0x29c   :  { %7002 = vmatpush1.bf16.msra.mxu0 %v9969_v62  ;;  %7330 = vmatpush1.bf16.msra.mxu1 %v9971_v63  ;;  %v10019_v62 = vcombine.low %v246_v46, %v250_v47  ;;  %v10026_v63 = vcombine.high %v253_v53, %v257_v55  ;;  %v298_v46 = vld [vmem:[#allocation5 + $0x4b8] sm:$0xff]  ;;  %v305_v53 = vld [vmem:[#allocation5 + $0x4f0] sm:$0xff] }
 0x29d   :  { %7003 = vmatprep.subr.bf16.mxu0 %v9978_v0  ;;  %7331 = vmatprep.subr.bf16.mxu1 %v9980_v2  ;;  %v10028_v0 = vcombine.high %v254_v58, %v258_v59  ;;  %v261_v2 = vld [vmem:[#allocation5 + $0x390] sm:$0xff]  ;;  %v302_v55 = vld [vmem:[#allocation5 + $0x4d8] sm:$0xff] }
 0x29e   :  { %v10033_v17 = vcombine.low %v261_v2, %v265_v3 }
 0x2a0   :  { %7004 = vmatpush1.bf16.msra.mxu0 %v9977_v7  ;;  %7332 = vmatpush1.bf16.msra.mxu1 %v9979_v8  ;;  %v10027_v7 = vcombine.low %v254_v58, %v258_v59  ;;  %v10034_v8 = vcombine.high %v261_v2, %v265_v3  ;;  %v306_v58 = vld [vmem:[#allocation5 + $0x4f8] sm:$0xff] }
 0x2a1   :  { %7005 = vmatprep.subr.bf16.mxu0 %v9986_v9  ;;  %7333 = vmatprep.subr.bf16.mxu1 %v9988_v10  ;;  %v10036_v9 = vcombine.high %v262_v4, %v266_v5  ;;  %v269_v10 = vld [vmem:[#allocation5 + $0x3d0] sm:$0xff]  ;;  %v310_v2 = vld [vmem:[#allocation5 + $0x518] sm:$0xff] }
 0x2a2   :  { %v10041_v28 = vcombine.low %v269_v10, %v273_v11  ;;  %v314_v3 = vld [vmem:[#allocation5 + $0x538] sm:$0xff] }
 0x2a4   :  { %7006 = vmatpush1.bf16.msra.mxu0 %v9985_v18  ;;  %7334 = vmatpush1.bf16.msra.mxu1 %v9987_v19  ;;  %v10035_v18 = vcombine.low %v262_v4, %v266_v5  ;;  %v10042_v19 = vcombine.high %v269_v10, %v273_v11  ;;  %v10075_v5 = vcombine.low %v302_v55, %v306_v58  ;;  %v322_v10 = vld [vmem:[#allocation5 + $0x578] sm:$0xff] }
 0x2a5   :  { %7007 = vmatprep.subr.bf16.mxu0 %v9994_v20  ;;  %7335 = vmatprep.subr.bf16.mxu1 %v9996_v21  ;;  %v10044_v20 = vcombine.high %v270_v13, %v274_v15  ;;  %v277_v21 = vld [vmem:[#allocation5 + $0x410] sm:$0xff] }
 0x2a6   :  { %v10049_v37 = vcombine.low %v277_v21, %v281_v22 }
 0x2a8   :  { %7008 = vmatpush1.bf16.msra.mxu0 %v9993_v30  ;;  %7336 = vmatpush1.bf16.msra.mxu1 %v9995_v31  ;;  %v10043_v30 = vcombine.low %v270_v13, %v274_v15  ;;  %v10050_v31 = vcombine.high %v277_v21, %v281_v22  ;;  %v10083_v13 = vcombine.low %v310_v2, %v314_v3  ;;  %v330_v21 = vld [vmem:[#allocation5 + $0x5b8] sm:$0xff] }
 0x2a9   :  { %7009 = vmatprep.subr.bf16.mxu0 %v10002_v32  ;;  %7337 = vmatprep.subr.bf16.mxu1 %v10004_v33  ;;  %v10052_v32 = vcombine.high %v278_v24, %v282_v27  ;;  %v285_v33 = vld [vmem:[#allocation5 + $0x450] sm:$0xff] }
 0x2aa   :  { %v10057_v47 = vcombine.low %v285_v33, %v289_v57 }
 0x2ac   :  { %7010 = vmatpush1.bf16.msra.mxu0 %v10001_v38  ;;  %7338 = vmatpush1.bf16.msra.mxu1 %v10003_v40  ;;  %v10051_v38 = vcombine.low %v278_v24, %v282_v27  ;;  %v10058_v40 = vcombine.high %v285_v33, %v289_v57  ;;  %v338_v33 = vld [vmem:[#allocation5 + $0x5f8] sm:$0xff] }
 0x2ad   :  { %7011 = vmatprep.subr.bf16.mxu0 %v10010_v41  ;;  %7339 = vmatprep.subr.bf16.mxu1 %v10012_v42  ;;  %v10060_v41 = vcombine.high %v286_v35, %v290_v36  ;;  %v293_v42 = vld [vmem:[#allocation5 + $0x490] sm:$0xff] }
 0x2ae   :  { %v10065_v59 = vcombine.low %v293_v42, %v297_v43 }
 0x2b0   :  { %7012 = vmatpush1.bf16.msra.mxu0 %v10009_v49  ;;  %7340 = vmatpush1.bf16.msra.mxu1 %v10011_v50  ;;  %v10059_v49 = vcombine.low %v286_v35, %v290_v36  ;;  %v10066_v50 = vcombine.high %v293_v42, %v297_v43  ;;  %v346_v42 = vld [vmem:[#allocation5 + $0x638] sm:$0xff] }
 0x2b1   :  { %7013 = vmatprep.subr.bf16.mxu0 %v10018_v51  ;;  %7341 = vmatprep.subr.bf16.mxu1 %v10020_v52  ;;  %v10068_v51 = vcombine.high %v294_v45, %v298_v46  ;;  %v301_v52 = vld [vmem:[#allocation5 + $0x4d0] sm:$0xff] }
 0x2b2   :  { %v10073_v4 = vcombine.low %v301_v52, %v305_v53 }
 0x2b4   :  { %7014 = vmatpush1.bf16.msra.mxu0 %v10017_v61  ;;  %7342 = vmatpush1.bf16.msra.mxu1 %v10019_v62  ;;  %v10074_v61 = vcombine.high %v301_v52, %v305_v53  ;;  %v10076_v62 = vcombine.high %v302_v55, %v306_v58  ;;  %v354_v52 = vld [vmem:[#allocation5 + $0x678] sm:$0xff] }
 0x2b5   :  { %7015 = vmatprep.subr.bf16.mxu0 %v10026_v63  ;;  %7343 = vmatprep.subr.bf16.mxu1 %v10028_v0  ;;  %v309_v63 = vld [vmem:[#allocation5 + $0x510] sm:$0xff] }
 0x2b6   :  { %v313_v0 = vld [vmem:[#allocation5 + $0x530] sm:$0xff] }
 0x2b7   :  { %v10081_v11 = vcombine.low %v309_v63, %v313_v0 }
 0x2b8   :  { %7016 = vmatpush1.bf16.msra.mxu0 %v10025_v6  ;;  %7344 = vmatpush1.bf16.msra.mxu1 %v10027_v7  ;;  %v10082_v6 = vcombine.high %v309_v63, %v313_v0  ;;  %v317_v7 = vld [vmem:[#allocation5 + $0x550] sm:$0xff]  ;;  %v362_v63 = vld [vmem:[#allocation5 + $0x6b8] sm:$0xff] }
 0x2b9   :  { %7017 = vmatprep.subr.bf16.mxu0 %v10034_v8  ;;  %7345 = vmatprep.subr.bf16.mxu1 %v10036_v9  ;;  %v321_v8 = vld [vmem:[#allocation5 + $0x570] sm:$0xff]  ;;  %v318_v9 = vld [vmem:[#allocation5 + $0x558] sm:$0xff] }
 0x2ba   :  { %v10090_v15 = vcombine.high %v317_v7, %v321_v8  ;;  %v10089_v22 = vcombine.low %v317_v7, %v321_v8  ;;  %v10091_v24 = vcombine.low %v318_v9, %v322_v10  ;;  %v370_v7 = vld [vmem:[#allocation5 + $0x6f8] sm:$0xff] }
 0x2bc   :  { %7018 = vmatpush1.bf16.msra.mxu0 %v10033_v17  ;;  %7346 = vmatpush1.bf16.msra.mxu1 %v10035_v18  ;;  %v10092_v17 = vcombine.high %v318_v9, %v322_v10  ;;  %v325_v18 = vld [vmem:[#allocation5 + $0x590] sm:$0xff] }
 0x2bd   :  { %7019 = vmatprep.subr.bf16.mxu0 %v10042_v19  ;;  %7347 = vmatprep.subr.bf16.mxu1 %v10044_v20  ;;  %v329_v19 = vld [vmem:[#allocation5 + $0x5b0] sm:$0xff]  ;;  %v326_v20 = vld [vmem:[#allocation5 + $0x598] sm:$0xff] }
 0x2be   :  { %v10098_v27 = vcombine.high %v325_v18, %v329_v19  ;;  %v10097_v57 = vcombine.low %v325_v18, %v329_v19  ;;  %v10099_v35 = vcombine.low %v326_v20, %v330_v21  ;;  %v378_v18 = vld [vmem:[#allocation5 + $0x738] sm:$0xff] }
 0x2c0   :  { %7020 = vmatpush1.bf16.msra.mxu0 %v10041_v28  ;;  %7348 = vmatpush1.bf16.msra.mxu1 %v10043_v30  ;;  %v10100_v28 = vcombine.high %v326_v20, %v330_v21  ;;  %v333_v30 = vld [vmem:[#allocation5 + $0x5d0] sm:$0xff] }
 0x2c1   :  { %7030 = vmatprep.subr.bf16.mxu0 %v10050_v31  ;;  %7358 = vmatprep.subr.bf16.mxu1 %v10052_v32  ;;  %v337_v31 = vld [vmem:[#allocation5 + $0x5f0] sm:$0xff]  ;;  %v334_v32 = vld [vmem:[#allocation5 + $0x5d8] sm:$0xff] }
 0x2c2   :  { %v10106_v36 = vcombine.high %v333_v30, %v337_v31  ;;  %v10105_v43 = vcombine.low %v333_v30, %v337_v31  ;;  %v386_v30 = vld [vmem:[#allocation5 + $0x778] sm:$0xff] }
 0x2c3   :  { %7022 = vmatmul.mubr.bf16.vlgmr.msra.gmra.mrb[4].mxu0 %v12181_v12  ;;  %7350 = vmatmul.mubr.bf16.vlgmr.msra.gmra.mrb[4].mxu1 %v12181_v12  ;;  %v10067_v12 = vcombine.low %v294_v45, %v298_v46  ;;  %v10107_v45 = vcombine.low %v334_v32, %v338_v33 }
 0x2c4   :  { %7031 = vmatpush1.bf16.msra.mxu0 %v10049_v37  ;;  %7359 = vmatpush1.bf16.msra.mxu1 %v10051_v38  ;;  %v10108_v37 = vcombine.high %v334_v32, %v338_v33  ;;  %v341_v38 = vld [vmem:[#allocation5 + $0x610] sm:$0xff] }
 0x2c5   :  { %7032 = vmatprep.subr.bf16.mxu0 %v10058_v40  ;;  %7360 = vmatprep.subr.bf16.mxu1 %v10060_v41  ;;  %v345_v40 = vld [vmem:[#allocation5 + $0x630] sm:$0xff]  ;;  %v342_v41 = vld [vmem:[#allocation5 + $0x618] sm:$0xff] }
 0x2c6   :  { %7062 = vmatprep.mubr.bf16.mxu0 %v12183_v23  ;;  %7390 = vmatprep.mubr.bf16.mxu1 %v12183_v23  ;;  %v10084_v23 = vcombine.high %v310_v2, %v314_v3  ;;  %v10114_v46 = vcombine.high %v341_v38, %v345_v40  ;;  %v10113_v53 = vcombine.low %v341_v38, %v345_v40  ;;  %v394_v38 = vld [vmem:[#allocation5 + $0x7b8] sm:$0xff] }
 0x2c7   :  { %v10115_v55 = vcombine.low %v342_v41, %v346_v42 }
 0x2c8   :  { %7033 = vmatpush1.bf16.msra.mxu0 %v10057_v47  ;;  %7361 = vmatpush1.bf16.msra.mxu1 %v10059_v49  ;;  %v10116_v47 = vcombine.high %v342_v41, %v346_v42  ;;  %v349_v49 = vld [vmem:[#allocation5 + $0x650] sm:$0xff] }
 0x2c9   :  { %7034 = vmatprep.subr.bf16.mxu0 %v10066_v50  ;;  %7362 = vmatprep.subr.bf16.mxu1 %v10068_v51  ;;  %v353_v50 = vld [vmem:[#allocation5 + $0x670] sm:$0xff]  ;;  %v350_v51 = vld [vmem:[#allocation5 + $0x658] sm:$0xff] }
 0x2ca   :  { %v10122_v58 = vcombine.high %v349_v49, %v353_v50  ;;  %v10121_v0 = vcombine.low %v349_v49, %v353_v50  ;;  %v10123_v2 = vcombine.low %v350_v51, %v354_v52  ;;  %v402_v49 = vld [vmem:[#allocation5 + $0x7f8] sm:$0xff] }
 0x2cc   :  { %7035 = vmatpush1.bf16.msra.mxu0 %v10065_v59  ;;  %7363 = vmatpush1.bf16.msra.mxu1 %v10067_v12  ;;  %v10124_v59 = vcombine.high %v350_v51, %v354_v52  ;;  %v357_v12 = vld [vmem:[#allocation5 + $0x690] sm:$0xff] }
 0x2cd   :  { %7036 = vmatprep.subr.bf16.mxu0 %v10074_v61  ;;  %7364 = vmatprep.subr.bf16.mxu1 %v10076_v62  ;;  %v361_v61 = vld [vmem:[#allocation5 + $0x6b0] sm:$0xff]  ;;  %v358_v62 = vld [vmem:[#allocation5 + $0x698] sm:$0xff] }
 0x2ce   :  { %v10130_v3 = vcombine.high %v357_v12, %v361_v61  ;;  %v10129_v8 = vcombine.low %v357_v12, %v361_v61  ;;  %v10131_v9 = vcombine.low %v358_v62, %v362_v63  ;;  %v410_v12 = vld [vmem:[#allocation5 + $0x838] sm:$0xff] }
 0x2d0   :  { %7037 = vmatpush1.bf16.msra.mxu0 %v10073_v4  ;;  %7365 = vmatpush1.bf16.msra.mxu1 %v10075_v5  ;;  %v10132_v4 = vcombine.high %v358_v62, %v362_v63  ;;  %v365_v5 = vld [vmem:[#allocation5 + $0x6d0] sm:$0xff] }
 0x2d1   :  { %7038 = vmatprep.subr.bf16.mxu0 %v10082_v6  ;;  %7366 = vmatprep.subr.bf16.mxu1 %v10084_v23  ;;  %v369_v6 = vld [vmem:[#allocation5 + $0x6f0] sm:$0xff]  ;;  %v366_v23 = vld [vmem:[#allocation5 + $0x6d8] sm:$0xff] }
 0x2d2   :  { %v10138_v10 = vcombine.high %v365_v5, %v369_v6  ;;  %v10137_v19 = vcombine.low %v365_v5, %v369_v6  ;;  %v10139_v20 = vcombine.low %v366_v23, %v370_v7  ;;  %v418_v5 = vld [vmem:[#allocation5 + $0x878] sm:$0xff] }
 0x2d4   :  { %7039 = vmatpush1.bf16.msra.mxu0 %v10081_v11  ;;  %7367 = vmatpush1.bf16.msra.mxu1 %v10083_v13  ;;  %v10140_v11 = vcombine.high %v366_v23, %v370_v7  ;;  %v373_v13 = vld [vmem:[#allocation5 + $0x710] sm:$0xff] }
 0x2d5   :  { %7040 = vmatprep.subr.bf16.mxu0 %v10090_v15  ;;  %7368 = vmatprep.subr.bf16.mxu1 %v10092_v17  ;;  %v377_v15 = vld [vmem:[#allocation5 + $0x730] sm:$0xff]  ;;  %v374_v17 = vld [vmem:[#allocation5 + $0x718] sm:$0xff] }
 0x2d6   :  { %v10146_v21 = vcombine.high %v373_v13, %v377_v15  ;;  %v10145_v31 = vcombine.low %v373_v13, %v377_v15  ;;  %v10147_v32 = vcombine.low %v374_v17, %v378_v18  ;;  %v426_v13 = vld [vmem:[#allocation5 + $0x8b8] sm:$0xff] }
 0x2d8   :  { %7041 = vmatpush1.bf16.msra.mxu0 %v10089_v22  ;;  %7369 = vmatpush1.bf16.msra.mxu1 %v10091_v24  ;;  %v10148_v22 = vcombine.high %v374_v17, %v378_v18  ;;  %v381_v24 = vld [vmem:[#allocation5 + $0x750] sm:$0xff] }
 0x2d9   :  { %7042 = vmatprep.subr.bf16.mxu0 %v10098_v27  ;;  %7370 = vmatprep.subr.bf16.mxu1 %v10100_v28  ;;  %v385_v27 = vld [vmem:[#allocation5 + $0x770] sm:$0xff]  ;;  %v382_v28 = vld [vmem:[#allocation5 + $0x758] sm:$0xff] }
 0x2da   :  { %v10154_v33 = vcombine.high %v381_v24, %v385_v27  ;;  %v10153_v40 = vcombine.low %v381_v24, %v385_v27  ;;  %v10155_v41 = vcombine.low %v382_v28, %v386_v30  ;;  %v434_v24 = vld [vmem:[#allocation5 + $0x8f8] sm:$0xff] }
 0x2dc   :  { %7043 = vmatpush1.bf16.msra.mxu0 %v10097_v57  ;;  %7371 = vmatpush1.bf16.msra.mxu1 %v10099_v35  ;;  %v10156_v57 = vcombine.high %v382_v28, %v386_v30  ;;  %v389_v35 = vld [vmem:[#allocation5 + $0x790] sm:$0xff] }
 0x2dd   :  { %7044 = vmatprep.subr.bf16.mxu0 %v10106_v36  ;;  %7372 = vmatprep.subr.bf16.mxu1 %v10108_v37  ;;  %v393_v36 = vld [vmem:[#allocation5 + $0x7b0] sm:$0xff]  ;;  %v390_v37 = vld [vmem:[#allocation5 + $0x798] sm:$0xff] }
 0x2de   :  { %v10162_v42 = vcombine.high %v389_v35, %v393_v36  ;;  %v10161_v50 = vcombine.low %v389_v35, %v393_v36  ;;  %v10163_v51 = vcombine.low %v390_v37, %v394_v38 }
 0x2e0   :  { %7045 = vmatpush1.bf16.msra.mxu0 %v10105_v43  ;;  %7373 = vmatpush1.bf16.msra.mxu1 %v10107_v45  ;;  %v10164_v43 = vcombine.high %v390_v37, %v394_v38  ;;  %v397_v45 = vld [vmem:[#allocation5 + $0x7d0] sm:$0xff] }
 0x2e1   :  { %7046 = vmatprep.subr.bf16.mxu0 %v10114_v46  ;;  %7374 = vmatprep.subr.bf16.mxu1 %v10116_v47  ;;  %v401_v46 = vld [vmem:[#allocation5 + $0x7f0] sm:$0xff]  ;;  %v398_v47 = vld [vmem:[#allocation5 + $0x7d8] sm:$0xff] }
 0x2e2   :  { %v10170_v52 = vcombine.high %v397_v45, %v401_v46  ;;  %v10169_v61 = vcombine.low %v397_v45, %v401_v46  ;;  %v10171_v62 = vcombine.low %v398_v47, %v402_v49  ;;  %v445_v38 = vld [vmem:[#allocation5 + $0x950] sm:$0xff] }
 0x2e4   :  { %7047 = vmatpush1.bf16.msra.mxu0 %v10113_v53  ;;  %7375 = vmatpush1.bf16.msra.mxu1 %v10115_v55  ;;  %v10172_v53 = vcombine.high %v398_v47, %v402_v49  ;;  %v405_v55 = vld [vmem:[#allocation5 + $0x810] sm:$0xff] }
 0x2e5   :  { %7048 = vmatprep.subr.bf16.mxu0 %v10122_v58  ;;  %7376 = vmatprep.subr.bf16.mxu1 %v10124_v59  ;;  %v409_v58 = vld [vmem:[#allocation5 + $0x830] sm:$0xff]  ;;  %v406_v59 = vld [vmem:[#allocation5 + $0x818] sm:$0xff] }
 0x2e6   :  { %v10178_v63 = vcombine.high %v405_v55, %v409_v58  ;;  %v10177_v6 = vcombine.low %v405_v55, %v409_v58  ;;  %v10179_v23 = vcombine.low %v406_v59, %v410_v12  ;;  %v453_v49 = vld [vmem:[#allocation5 + $0x990] sm:$0xff] }
 0x2e8   :  { %7049 = vmatpush1.bf16.msra.mxu0 %v10121_v0  ;;  %7377 = vmatpush1.bf16.msra.mxu1 %v10123_v2  ;;  %v10180_v0 = vcombine.high %v406_v59, %v410_v12  ;;  %v413_v2 = vld [vmem:[#allocation5 + $0x850] sm:$0xff] }
 0x2e9   :  { %7050 = vmatprep.subr.bf16.mxu0 %v10130_v3  ;;  %7378 = vmatprep.subr.bf16.mxu1 %v10132_v4  ;;  %v417_v3 = vld [vmem:[#allocation5 + $0x870] sm:$0xff]  ;;  %v414_v4 = vld [vmem:[#allocation5 + $0x858] sm:$0xff] }
 0x2ea   :  { %v10186_v7 = vcombine.high %v413_v2, %v417_v3  ;;  %v10185_v15 = vcombine.low %v413_v2, %v417_v3  ;;  %v10187_v17 = vcombine.low %v414_v4, %v418_v5  ;;  %v461_v12 = vld [vmem:[#allocation5 + $0x9d0] sm:$0xff] }
 0x2ec   :  { %7051 = vmatpush1.bf16.msra.mxu0 %v10129_v8  ;;  %7379 = vmatpush1.bf16.msra.mxu1 %v10131_v9  ;;  %v10188_v8 = vcombine.high %v414_v4, %v418_v5  ;;  %v421_v9 = vld [vmem:[#allocation5 + $0x890] sm:$0xff] }
 0x2ed   :  { %7052 = vmatprep.subr.bf16.mxu0 %v10138_v10  ;;  %7380 = vmatprep.subr.bf16.mxu1 %v10140_v11  ;;  %v425_v10 = vld [vmem:[#allocation5 + $0x8b0] sm:$0xff]  ;;  %v422_v11 = vld [vmem:[#allocation5 + $0x898] sm:$0xff] }
 0x2ee   :  { %v10194_v18 = vcombine.high %v421_v9, %v425_v10  ;;  %v10193_v27 = vcombine.low %v421_v9, %v425_v10  ;;  %v469_v5 = vld [vmem:[#allocation5 + $0xa10] sm:$0xff] }
 0x2f0   :  { %7053 = vmatpush1.bf16.msra.mxu0 %v10137_v19  ;;  %7381 = vmatpush1.bf16.msra.mxu1 %v10139_v20  ;;  %v10196_v19 = vcombine.high %v422_v11, %v426_v13  ;;  %v429_v20 = vld [vmem:[#allocation5 + $0x8d0] sm:$0xff] }
 0x2f1   :  { %7054 = vmatprep.subr.bf16.mxu0 %v10146_v21  ;;  %7382 = vmatprep.subr.bf16.mxu1 %v10148_v22  ;;  %v433_v21 = vld [vmem:[#allocation5 + $0x8f0] sm:$0xff]  ;;  %v430_v22 = vld [vmem:[#allocation5 + $0x8d8] sm:$0xff] }
 0x2f2   :  { %v10202_v28 = vcombine.high %v429_v20, %v433_v21  ;;  %v10204_v30 = vcombine.high %v430_v22, %v434_v24  ;;  %v10201_v35 = vcombine.low %v429_v20, %v433_v21  ;;  %v10203_v36 = vcombine.low %v430_v22, %v434_v24  ;;  %v485_v24 = vld [vmem:[#allocation5 + $0xa90] sm:$0xff] }
 0x2f4   :  { %7055 = vmatpush1.bf16.msra.mxu0 %v10145_v31  ;;  %7383 = vmatpush1.bf16.msra.mxu1 %v10147_v32  ;;  %v437_v31 = vld [vmem:[#allocation5 + $0x910] sm:$0xff] }
 0x2f5   :  { %7056 = vmatprep.subr.bf16.mxu0 %v10154_v33  ;;  %7384 = vmatprep.subr.bf16.mxu1 %v10156_v57  ;;  %v441_v32 = vld [vmem:[#allocation5 + $0x930] sm:$0xff]  ;;  %v438_v33 = vld [vmem:[#allocation5 + $0x918] sm:$0xff] }
 0x2f6   :  { %v442_v57 = vld [vmem:[#allocation5 + $0x938] sm:$0xff]  ;;  %v10210_v37 = vcombine.high %v437_v31, %v441_v32 }
 0x2f7   :  { %v10211_v45 = vcombine.low %v438_v33, %v442_v57 }
 0x2f8   :  { %7057 = vmatpush1.bf16.msra.mxu0 %v10153_v40  ;;  %7385 = vmatpush1.bf16.msra.mxu1 %v10155_v41  ;;  %v449_v40 = vld [vmem:[#allocation5 + $0x970] sm:$0xff]  ;;  %v446_v41 = vld [vmem:[#allocation5 + $0x958] sm:$0xff] }
 0x2f9   :  { %7058 = vmatprep.subr.bf16.mxu0 %v10162_v42  ;;  %7386 = vmatprep.subr.bf16.mxu1 %v10164_v43  ;;  %v450_v42 = vld [vmem:[#allocation5 + $0x978] sm:$0xff]  ;;  %v10209_v43 = vcombine.low %v437_v31, %v441_v32  ;;  %v10218_v46 = vcombine.high %v445_v38, %v449_v40 }
 0x2fa   :  { %v10220_v47 = vcombine.high %v446_v41, %v450_v42  ;;  %v10219_v55 = vcombine.low %v446_v41, %v450_v42  ;;  %v501_v42 = vld [vmem:[#allocation5 + $0xb10] sm:$0xff] }
 0x2fc   :  { %7059 = vmatpush1.bf16.msra.mxu0 %v10161_v50  ;;  %7387 = vmatpush1.bf16.msra.mxu1 %v10163_v51  ;;  %v457_v50 = vld [vmem:[#allocation5 + $0x9b0] sm:$0xff]  ;;  %v454_v51 = vld [vmem:[#allocation5 + $0x998] sm:$0xff] }
 0x2fd   :  { %7060 = vmatprep.subr.bf16.mxu0 %v10170_v52  ;;  %7388 = vmatprep.subr.bf16.mxu1 %v10172_v53  ;;  %v458_v52 = vld [vmem:[#allocation5 + $0x9b8] sm:$0xff]  ;;  %v10217_v53 = vcombine.low %v445_v38, %v449_v40  ;;  %v10226_v58 = vcombine.high %v453_v49, %v457_v50 }
 0x2fe   :  { %v10228_v59 = vcombine.high %v454_v51, %v458_v52  ;;  %v10227_v2 = vcombine.low %v454_v51, %v458_v52  ;;  %v509_v52 = vld [vmem:[#allocation5 + $0xb50] sm:$0xff] }
 0x300   :  { %7061 = vmatpush1.bf16.msra.mxu0 %v10169_v61  ;;  %7389 = vmatpush1.bf16.msra.mxu1 %v10171_v62  ;;  %v465_v61 = vld [vmem:[#allocation5 + $0x9f0] sm:$0xff]  ;;  %v462_v62 = vld [vmem:[#allocation5 + $0x9d8] sm:$0xff] }
 0x301   :  { %7071 = vmatprep.subr.bf16.mxu0 %v10178_v63  ;;  %7399 = vmatprep.subr.bf16.mxu1 %v10180_v0  ;;  %v466_v63 = vld [vmem:[#allocation5 + $0x9f8] sm:$0xff]  ;;  %v10225_v0 = vcombine.low %v453_v49, %v457_v50  ;;  %v10234_v3 = vcombine.high %v461_v12, %v465_v61 }
 0x302   :  { %v10236_v4 = vcombine.high %v462_v62, %v466_v63  ;;  %v10235_v9 = vcombine.low %v462_v62, %v466_v63  ;;  %v517_v63 = vld [vmem:[#allocation5 + $0xb90] sm:$0xff] }
 0x303   :  { %7063 = vmatmul.mubr.bf16.vlgmr.msra.gmra.mrb[4].mxu0 %v12189_v25  ;;  %7391 = vmatmul.mubr.bf16.vlgmr.msra.gmra.mrb[4].mxu1 %v12189_v25  ;;  %v10195_v25 = vcombine.low %v422_v11, %v426_v13  ;;  %v477_v13 = vld [vmem:[#allocation5 + $0xa50] sm:$0xff] }
 0x304   :  { %7072 = vmatpush1.bf16.msra.mxu0 %v10177_v6  ;;  %7400 = vmatpush1.bf16.msra.mxu1 %v10179_v23  ;;  %v473_v6 = vld [vmem:[#allocation5 + $0xa30] sm:$0xff]  ;;  %v470_v23 = vld [vmem:[#allocation5 + $0xa18] sm:$0xff] }
 0x305   :  { %7073 = vmatprep.subr.bf16.mxu0 %v10186_v7  ;;  %7401 = vmatprep.subr.bf16.mxu1 %v10188_v8  ;;  %v474_v7 = vld [vmem:[#allocation5 + $0xa38] sm:$0xff]  ;;  %v10233_v8 = vcombine.low %v461_v12, %v465_v61  ;;  %v10242_v10 = vcombine.high %v469_v5, %v473_v6 }
 0x306   :  { %7103 = vmatprep.mubr.bf16.mxu0 %v12191_v34  ;;  %7431 = vmatprep.mubr.bf16.mxu1 %v12191_v34  ;;  %v10212_v34 = vcombine.high %v438_v33, %v442_v57  ;;  %v10244_v11 = vcombine.high %v470_v23, %v474_v7  ;;  %v10243_v20 = vcombine.low %v470_v23, %v474_v7  ;;  %v493_v57 = vld [vmem:[#allocation5 + $0xad0] sm:$0xff] }
 0x307   :  { %v525_v7 = vld [vmem:[#allocation5 + $0xbd0] sm:$0xff] }
 0x308   :  { %7074 = vmatpush1.bf16.msra.mxu0 %v10185_v15  ;;  %7402 = vmatpush1.bf16.msra.mxu1 %v10187_v17  ;;  %v481_v15 = vld [vmem:[#allocation5 + $0xa70] sm:$0xff]  ;;  %v478_v17 = vld [vmem:[#allocation5 + $0xa58] sm:$0xff] }
 0x309   :  { %7075 = vmatprep.subr.bf16.mxu0 %v10194_v18  ;;  %7403 = vmatprep.subr.bf16.mxu1 %v10196_v19  ;;  %v482_v18 = vld [vmem:[#allocation5 + $0xa78] sm:$0xff]  ;;  %v10241_v19 = vcombine.low %v469_v5, %v473_v6  ;;  %v10250_v21 = vcombine.high %v477_v13, %v481_v15 }
 0x30a   :  { %v10252_v22 = vcombine.high %v478_v17, %v482_v18  ;;  %v10251_v31 = vcombine.low %v478_v17, %v482_v18  ;;  %v533_v18 = vld [vmem:[#allocation5 + $0xc10] sm:$0xff] }
 0x30c   :  { %7076 = vmatpush1.bf16.msra.mxu0 %v10193_v27  ;;  %7404 = vmatpush1.bf16.msra.mxu1 %v10195_v25  ;;  %v489_v27 = vld [vmem:[#allocation5 + $0xab0] sm:$0xff]  ;;  %v486_v25 = vld [vmem:[#allocation5 + $0xa98] sm:$0xff] }
 0x30d   :  { %7077 = vmatprep.subr.bf16.mxu0 %v10202_v28  ;;  %7405 = vmatprep.subr.bf16.mxu1 %v10204_v30  ;;  %v490_v28 = vld [vmem:[#allocation5 + $0xab8] sm:$0xff]  ;;  %v10249_v30 = vcombine.low %v477_v13, %v481_v15  ;;  %v10258_v32 = vcombine.high %v485_v24, %v489_v27 }
 0x30e   :  { %v10260_v33 = vcombine.high %v486_v25, %v490_v28  ;;  %v10259_v38 = vcombine.low %v486_v25, %v490_v28  ;;  %v541_v28 = vld [vmem:[#allocation5 + $0xc50] sm:$0xff] }
 0x310   :  { %7078 = vmatpush1.bf16.msra.mxu0 %v10201_v35  ;;  %7406 = vmatpush1.bf16.msra.mxu1 %v10203_v36  ;;  %v497_v35 = vld [vmem:[#allocation5 + $0xaf0] sm:$0xff]  ;;  %v494_v36 = vld [vmem:[#allocation5 + $0xad8] sm:$0xff] }
 0x311   :  { %7079 = vmatprep.subr.bf16.mxu0 %v10210_v37  ;;  %7407 = vmatprep.subr.bf16.mxu1 %v10212_v34  ;;  %v498_v37 = vld [vmem:[#allocation5 + $0xaf8] sm:$0xff]  ;;  %v10257_v34 = vcombine.low %v485_v24, %v489_v27  ;;  %v10266_v40 = vcombine.high %v493_v57, %v497_v35 }
 0x312   :  { %v10268_v41 = vcombine.high %v494_v36, %v498_v37  ;;  %v10267_v49 = vcombine.low %v494_v36, %v498_v37  ;;  %v549_v37 = vld [vmem:[#allocation5 + $0xc90] sm:$0xff] }
 0x314   :  { %7080 = vmatpush1.bf16.msra.mxu0 %v10209_v43  ;;  %7408 = vmatpush1.bf16.msra.mxu1 %v10211_v45  ;;  %v505_v43 = vld [vmem:[#allocation5 + $0xb30] sm:$0xff]  ;;  %v502_v45 = vld [vmem:[#allocation5 + $0xb18] sm:$0xff] }
 0x315   :  { %7081 = vmatprep.subr.bf16.mxu0 %v10218_v46  ;;  %7409 = vmatprep.subr.bf16.mxu1 %v10220_v47  ;;  %v506_v46 = vld [vmem:[#allocation5 + $0xb38] sm:$0xff]  ;;  %v10265_v47 = vcombine.low %v493_v57, %v497_v35  ;;  %v10274_v50 = vcombine.high %v501_v42, %v505_v43 }
 0x316   :  { %v10276_v51 = vcombine.high %v502_v45, %v506_v46  ;;  %v10275_v12 = vcombine.low %v502_v45, %v506_v46  ;;  %v557_v46 = vld [vmem:[#allocation5 + $0xcd0] sm:$0xff] }
 0x318   :  { %7082 = vmatpush1.bf16.msra.mxu0 %v10217_v53  ;;  %7410 = vmatpush1.bf16.msra.mxu1 %v10219_v55  ;;  %v513_v53 = vld [vmem:[#allocation5 + $0xb70] sm:$0xff]  ;;  %v510_v55 = vld [vmem:[#allocation5 + $0xb58] sm:$0xff] }
 0x319   :  { %7083 = vmatprep.subr.bf16.mxu0 %v10226_v58  ;;  %7411 = vmatprep.subr.bf16.mxu1 %v10228_v59  ;;  %v514_v58 = vld [vmem:[#allocation5 + $0xb78] sm:$0xff]  ;;  %v10273_v59 = vcombine.low %v501_v42, %v505_v43  ;;  %v10282_v61 = vcombine.high %v509_v52, %v513_v53 }
 0x31a   :  { %v10284_v62 = vcombine.high %v510_v55, %v514_v58  ;;  %v10283_v5 = vcombine.low %v510_v55, %v514_v58  ;;  %v565_v55 = vld [vmem:[#allocation5 + $0xd10] sm:$0xff] }
 0x31b   :  { %v569_v58 = vld [vmem:[#allocation5 + $0xd30] sm:$0xff] }
 0x31c   :  { %7084 = vmatpush1.bf16.msra.mxu0 %v10225_v0  ;;  %7412 = vmatpush1.bf16.msra.mxu1 %v10227_v2  ;;  %v521_v0 = vld [vmem:[#allocation5 + $0xbb0] sm:$0xff]  ;;  %v518_v2 = vld [vmem:[#allocation5 + $0xb98] sm:$0xff] }
 0x31d   :  { %7085 = vmatprep.subr.bf16.mxu0 %v10234_v3  ;;  %7413 = vmatprep.subr.bf16.mxu1 %v10236_v4  ;;  %v522_v3 = vld [vmem:[#allocation5 + $0xbb8] sm:$0xff]  ;;  %v10281_v4 = vcombine.low %v509_v52, %v513_v53  ;;  %v10290_v6 = vcombine.high %v517_v63, %v521_v0 }
 0x31e   :  { %v10292_v23 = vcombine.high %v518_v2, %v522_v3  ;;  %v10291_v13 = vcombine.low %v518_v2, %v522_v3  ;;  %v577_v2 = vld [vmem:[#allocation5 + $0xd70] sm:$0xff]  ;;  %v574_v3 = vld [vmem:[#allocation5 + $0xd58] sm:$0xff] }
 0x320   :  { %7086 = vmatpush1.bf16.msra.mxu0 %v10233_v8  ;;  %7414 = vmatpush1.bf16.msra.mxu1 %v10235_v9  ;;  %v529_v8 = vld [vmem:[#allocation5 + $0xbf0] sm:$0xff]  ;;  %v526_v9 = vld [vmem:[#allocation5 + $0xbd8] sm:$0xff] }
 0x321   :  { %7087 = vmatprep.subr.bf16.mxu0 %v10242_v10  ;;  %7415 = vmatprep.subr.bf16.mxu1 %v10244_v11  ;;  %v530_v10 = vld [vmem:[#allocation5 + $0xbf8] sm:$0xff]  ;;  %v10289_v11 = vcombine.low %v517_v63, %v521_v0  ;;  %v10298_v15 = vcombine.high %v525_v7, %v529_v8  ;;  %v10338_v63 = vcombine.high %v565_v55, %v569_v58  ;;  %v573_v0 = vld [vmem:[#allocation5 + $0xd50] sm:$0xff] }
 0x322   :  { %v10300_v17 = vcombine.high %v526_v9, %v530_v10  ;;  %v10299_v24 = vcombine.low %v526_v9, %v530_v10  ;;  %v585_v9 = vld [vmem:[#allocation5 + $0xdb0] sm:$0xff]  ;;  %v582_v10 = vld [vmem:[#allocation5 + $0xd98] sm:$0xff] }
 0x324   :  { %7088 = vmatpush1.bf16.msra.mxu0 %v10241_v19  ;;  %7416 = vmatpush1.bf16.msra.mxu1 %v10243_v20  ;;  %v537_v19 = vld [vmem:[#allocation5 + $0xc30] sm:$0xff]  ;;  %v534_v20 = vld [vmem:[#allocation5 + $0xc18] sm:$0xff] }
 0x325   :  { %7089 = vmatprep.subr.bf16.mxu0 %v10250_v21  ;;  %7417 = vmatprep.subr.bf16.mxu1 %v10252_v22  ;;  %v538_v21 = vld [vmem:[#allocation5 + $0xc38] sm:$0xff]  ;;  %v10297_v22 = vcombine.low %v525_v7, %v529_v8  ;;  %v10306_v27 = vcombine.high %v533_v18, %v537_v19  ;;  %v581_v8 = vld [vmem:[#allocation5 + $0xd90] sm:$0xff] }
 0x326   :  { %v10308_v25 = vcombine.high %v534_v20, %v538_v21  ;;  %v10307_v57 = vcombine.low %v534_v20, %v538_v21  ;;  %v589_v20 = vld [vmem:[#allocation5 + $0xdd0] sm:$0xff] }
 0x327   :  { %v593_v21 = vld [vmem:[#allocation5 + $0xdf0] sm:$0xff] }
 0x328   :  { %7090 = vmatpush1.bf16.msra.mxu0 %v10249_v30  ;;  %7418 = vmatpush1.bf16.msra.mxu1 %v10251_v31  ;;  %v545_v30 = vld [vmem:[#allocation5 + $0xc70] sm:$0xff]  ;;  %v542_v31 = vld [vmem:[#allocation5 + $0xc58] sm:$0xff] }
 0x329   :  { %7091 = vmatprep.subr.bf16.mxu0 %v10258_v32  ;;  %7419 = vmatprep.subr.bf16.mxu1 %v10260_v33  ;;  %v546_v32 = vld [vmem:[#allocation5 + $0xc78] sm:$0xff]  ;;  %v10305_v33 = vcombine.low %v533_v18, %v537_v19  ;;  %v10314_v35 = vcombine.high %v541_v28, %v545_v30 }
 0x32a   :  { %v10316_v36 = vcombine.high %v542_v31, %v546_v32  ;;  %v10315_v42 = vcombine.low %v542_v31, %v546_v32  ;;  %v10353_v31 = vcombine.low %v581_v8, %v585_v9 }
 0x32c   :  { %7092 = vmatpush1.bf16.msra.mxu0 %v10257_v34  ;;  %7420 = vmatpush1.bf16.msra.mxu1 %v10259_v38  ;;  %v553_v34 = vld [vmem:[#allocation5 + $0xcb0] sm:$0xff]  ;;  %v550_v38 = vld [vmem:[#allocation5 + $0xc98] sm:$0xff] }
 0x32d   :  { %7093 = vmatprep.subr.bf16.mxu0 %v10266_v40  ;;  %7421 = vmatprep.subr.bf16.mxu1 %v10268_v41  ;;  %v554_v40 = vld [vmem:[#allocation5 + $0xcb8] sm:$0xff]  ;;  %v10313_v41 = vcombine.low %v541_v28, %v545_v30  ;;  %v10322_v43 = vcombine.high %v549_v37, %v553_v34 }
 0x32e   :  { %v10324_v45 = vcombine.high %v550_v38, %v554_v40 }
 0x330   :  { %7094 = vmatpush1.bf16.msra.mxu0 %v10265_v47  ;;  %7422 = vmatpush1.bf16.msra.mxu1 %v10267_v49  ;;  %v561_v47 = vld [vmem:[#allocation5 + $0xcf0] sm:$0xff]  ;;  %v558_v49 = vld [vmem:[#allocation5 + $0xcd8] sm:$0xff] }
 0x331   :  { %7095 = vmatprep.subr.bf16.mxu0 %v10274_v50  ;;  %7423 = vmatprep.subr.bf16.mxu1 %v10276_v51  ;;  %v562_v50 = vld [vmem:[#allocation5 + $0xcf8] sm:$0xff]  ;;  %v10321_v51 = vcombine.low %v549_v37, %v553_v34  ;;  %v10330_v52 = vcombine.high %v557_v46, %v561_v47  ;;  %v597_v34 = vld [vmem:[#allocation5 + $0xe10] sm:$0xff] }
 0x332   :  { %v10332_v53 = vcombine.high %v558_v49, %v562_v50 }
 0x334   :  { %7096 = vmatpush1.bf16.msra.mxu0 %v10273_v59  ;;  %7424 = vmatpush1.bf16.msra.mxu1 %v10275_v12  ;;  %v566_v59 = vld [vmem:[#allocation5 + $0xd18] sm:$0xff] }
 0x335   :  { %7097 = vmatprep.subr.bf16.mxu0 %v10282_v61  ;;  %7425 = vmatprep.subr.bf16.mxu1 %v10284_v62  ;;  %v570_v12 = vld [vmem:[#allocation5 + $0xd38] sm:$0xff]  ;;  %v10329_v61 = vcombine.low %v557_v46, %v561_v47  ;;  %v10331_v62 = vcombine.low %v558_v49, %v562_v50  ;;  %v605_v47 = vld [vmem:[#allocation5 + $0xe50] sm:$0xff] }
 0x336   :  { %v609_v49 = vld [vmem:[#allocation5 + $0xe70] sm:$0xff]  ;;  %v606_v50 = vld [vmem:[#allocation5 + $0xe58] sm:$0xff] }
 0x338   :  { %7098 = vmatpush1.bf16.msra.mxu0 %v10281_v4  ;;  %7426 = vmatpush1.bf16.msra.mxu1 %v10283_v5  ;;  %v578_v4 = vld [vmem:[#allocation5 + $0xd78] sm:$0xff]  ;;  %v10337_v5 = vcombine.low %v565_v55, %v569_v58  ;;  %v613_v58 = vld [vmem:[#allocation5 + $0xe90] sm:$0xff] }
 0x339   :  { %7099 = vmatprep.subr.bf16.mxu0 %v10290_v6  ;;  %7427 = vmatprep.subr.bf16.mxu1 %v10292_v23  ;;  %v10339_v6 = vcombine.low %v566_v59, %v570_v12  ;;  %v10346_v23 = vcombine.high %v573_v0, %v577_v2  ;;  %v10348_v7 = vcombine.high %v574_v3, %v578_v4 }
 0x33c   :  { %7100 = vmatpush1.bf16.msra.mxu0 %v10289_v11  ;;  %7428 = vmatpush1.bf16.msra.mxu1 %v10291_v13  ;;  %v586_v11 = vld [vmem:[#allocation5 + $0xdb8] sm:$0xff]  ;;  %v10345_v13 = vcombine.low %v573_v0, %v577_v2  ;;  %v621_v2 = vld [vmem:[#allocation5 + $0xed0] sm:$0xff] }
 0x33d   :  { %7101 = vmatprep.subr.bf16.mxu0 %v10298_v15  ;;  %7429 = vmatprep.subr.bf16.mxu1 %v10300_v17  ;;  %v10347_v15 = vcombine.low %v574_v3, %v578_v4  ;;  %v10354_v17 = vcombine.high %v581_v8, %v585_v9  ;;  %v10356_v19 = vcombine.high %v582_v10, %v586_v11  ;;  %v625_v3 = vld [vmem:[#allocation5 + $0xef0] sm:$0xff]  ;;  %v622_v4 = vld [vmem:[#allocation5 + $0xed8] sm:$0xff] }
 0x33e   :  { %v629_v9 = vld [vmem:[#allocation5 + $0xf10] sm:$0xff] }
 0x340   :  { %7102 = vmatpush1.bf16.msra.mxu0 %v10297_v22  ;;  %7430 = vmatpush1.bf16.msra.mxu1 %v10299_v24 }
 0x341   :  { %7112 = vmatprep.subr.bf16.mxu0 %v10306_v27  ;;  %7440 = vmatprep.subr.bf16.mxu1 %v10308_v25  ;;  %v590_v27 = vld [vmem:[#allocation5 + $0xdd8] sm:$0xff] }
 0x342   :  { %v594_v25 = vld [vmem:[#allocation5 + $0xdf8] sm:$0xff] }
 0x343   :  { %7104 = vmatmul.mubr.bf16.vlgmr.msra.gmra.mrb[4].mxu0 %v12197_v39  ;;  %7432 = vmatmul.mubr.bf16.vlgmr.msra.gmra.mrb[4].mxu1 %v12197_v39  ;;  %v10323_v39 = vcombine.low %v550_v38, %v554_v40  ;;  %v10364_v37 = vcombine.high %v590_v27, %v594_v25  ;;  %v601_v38 = vld [vmem:[#allocation5 + $0xe30] sm:$0xff]  ;;  %v598_v40 = vld [vmem:[#allocation5 + $0xe18] sm:$0xff] }
 0x344   :  { %7113 = vmatpush1.bf16.msra.mxu0 %v10305_v33  ;;  %7441 = vmatpush1.bf16.msra.mxu1 %v10307_v57  ;;  %v10355_v57 = vcombine.low %v582_v10, %v586_v11  ;;  %v633_v10 = vld [vmem:[#allocation5 + $0xf30] sm:$0xff]  ;;  %v630_v11 = vld [vmem:[#allocation5 + $0xf18] sm:$0xff] }
 0x345   :  { %7114 = vmatprep.subr.bf16.mxu0 %v10314_v35  ;;  %7442 = vmatprep.subr.bf16.mxu1 %v10316_v36  ;;  %v10362_v35 = vcombine.high %v589_v20, %v593_v21 }
 0x346   :  { %7144 = vmatprep.mubr.bf16.mxu0 %v12199_v48  ;;  %7472 = vmatprep.mubr.bf16.mxu1 %v12199_v48  ;;  %v10340_v48 = vcombine.high %v566_v59, %v570_v12  ;;  %v617_v59 = vld [vmem:[#allocation5 + $0xeb0] sm:$0xff]  ;;  %v614_v12 = vld [vmem:[#allocation5 + $0xe98] sm:$0xff] }
 0x348   :  { %7115 = vmatpush1.bf16.msra.mxu0 %v10313_v41  ;;  %7443 = vmatpush1.bf16.msra.mxu1 %v10315_v42  ;;  %v602_v41 = vld [vmem:[#allocation5 + $0xe38] sm:$0xff]  ;;  %v10361_v42 = vcombine.low %v589_v20, %v593_v21  ;;  %v637_v21 = vld [vmem:[#allocation5 + $0xf50] sm:$0xff] }
 0x349   :  { %7116 = vmatprep.subr.bf16.mxu0 %v10322_v43  ;;  %7444 = vmatprep.subr.bf16.mxu1 %v10324_v45  ;;  %v10363_v43 = vcombine.low %v590_v27, %v594_v25  ;;  %v10370_v45 = vcombine.high %v597_v34, %v601_v38  ;;  %v10372_v46 = vcombine.high %v598_v40, %v602_v41  ;;  %v641_v27 = vld [vmem:[#allocation5 + $0xf70] sm:$0xff]  ;;  %v638_v25 = vld [vmem:[#allocation5 + $0xf58] sm:$0xff] }
 0x34c   :  { %7117 = vmatpush1.bf16.msra.mxu0 %v10321_v51  ;;  %7445 = vmatpush1.bf16.msra.mxu1 %v10323_v39  ;;  %v610_v51 = vld [vmem:[#allocation5 + $0xe78] sm:$0xff]  ;;  %v10369_v39 = vcombine.low %v597_v34, %v601_v38  ;;  %v10409_v38 = vcombine.low %v637_v21, %v641_v27 }
 0x34d   :  { %7118 = vmatprep.subr.bf16.mxu0 %v10330_v52  ;;  %7446 = vmatprep.subr.bf16.mxu1 %v10332_v53  ;;  %v10371_v52 = vcombine.low %v598_v40, %v602_v41  ;;  %v10378_v53 = vcombine.high %v605_v47, %v609_v49  ;;  %v10380_v55 = vcombine.high %v606_v50, %v610_v51  ;;  %v650_v34 = vld [vmem:[#allocation5 + $0xfb8] sm:$0xff] }
 0x350   :  { %7119 = vmatpush1.bf16.msra.mxu0 %v10329_v61  ;;  %7447 = vmatpush1.bf16.msra.mxu1 %v10331_v62  ;;  %v618_v61 = vld [vmem:[#allocation5 + $0xeb8] sm:$0xff]  ;;  %v10377_v62 = vcombine.low %v605_v47, %v609_v49 }
 0x351   :  { %7120 = vmatprep.subr.bf16.mxu0 %v10338_v63  ;;  %7448 = vmatprep.subr.bf16.mxu1 %v10340_v48  ;;  %v10379_v63 = vcombine.low %v606_v50, %v610_v51  ;;  %v10386_v48 = vcombine.high %v613_v58, %v617_v59  ;;  %v10388_v0 = vcombine.high %v614_v12, %v618_v61  ;;  %v658_v47 = vld [vmem:[#allocation5 + $0xff8] sm:$0xff] }
 0x354   :  { %7121 = vmatpush1.bf16.msra.mxu0 %v10337_v5  ;;  %7449 = vmatpush1.bf16.msra.mxu1 %v10339_v6  ;;  %v626_v5 = vld [vmem:[#allocation5 + $0xef8] sm:$0xff]  ;;  %v10385_v6 = vcombine.low %v613_v58, %v617_v59 }
 0x355   :  { %7122 = vmatprep.subr.bf16.mxu0 %v10346_v23  ;;  %7450 = vmatprep.subr.bf16.mxu1 %v10348_v7  ;;  %v10387_v23 = vcombine.low %v614_v12, %v618_v61  ;;  %v10394_v7 = vcombine.high %v621_v2, %v625_v3  ;;  %v10396_v8 = vcombine.high %v622_v4, %v626_v5  ;;  %v666_v58 = vld [vmem:[#allocation5 + $0x1038] sm:$0xff] }
 0x356   :  { %v12255_v18 = vpop.f32.mrb[0].mxu0  ;;  %v12257_v22 = vpop.f32.mrb[0].mxu1 }
 0x357   :  { %v12259_v24 = vpop.f32.mrb[1].mxu0  ;;  %v12261_v28 = vpop.f32.mrb[1].mxu1 }
 0x358   :  { %v6658_v30 = vpop.f32.mrb[2].mxu0  ;;  %7123 = vmatpush1.bf16.msra.mxu0 %v10345_v13  ;;  %v6986_v32 = vpop.f32.mrb[2].mxu1  ;;  %7451 = vmatpush1.bf16.msra.mxu1 %v10347_v15  ;;  %v634_v13 = vld [vmem:[#allocation5 + $0xf38] sm:$0xff]  ;;  %v10393_v15 = vcombine.low %v621_v2, %v625_v3 }
 0x359   :  { %v6659_v33 = vpop.f32.mrb[3].mxu0  ;;  %7124 = vmatprep.subr.bf16.mxu0 %v10354_v17  ;;  %v6987_v36 = vpop.f32.mrb[3].mxu1  ;;  %7452 = vmatprep.subr.bf16.mxu1 %v10356_v19  ;;  %v10395_v17 = vcombine.low %v622_v4, %v626_v5  ;;  %v10402_v19 = vcombine.high %v629_v9, %v633_v10  ;;  %v10404_v20 = vcombine.high %v630_v11, %v634_v13  ;;  %v642_v30 = vld [vmem:[#allocation5 + $0xf78] sm:$0xff] }
 0x35a   :  { %v10403_v32 = vcombine.low %v630_v11, %v634_v13  ;;  %v10410_v33 = vcombine.high %v637_v21, %v641_v27  ;;  %v649_v36 = vld [vmem:[#allocation5 + $0xfb0] sm:$0xff]  ;;  %v10411_v40 = vcombine.low %v638_v25, %v642_v30  ;;  %v674_v2 = vld [vmem:[#allocation5 + $0x1078] sm:$0xff] }
 0x35b   :  { %v690_v21 = vld [vmem:[#allocation5 + $0x10f8] sm:$0xff] }
 0x35c   :  { %7125 = vmatpush1.bf16.msra.mxu0 %v10353_v31  ;;  %7453 = vmatpush1.bf16.msra.mxu1 %v10355_v57  ;;  %v10401_v31 = vcombine.low %v629_v9, %v633_v10  ;;  %v10412_v57 = vcombine.high %v638_v25, %v642_v30  ;;  %v682_v9 = vld [vmem:[#allocation5 + $0x10b8] sm:$0xff] }
 0x35d   :  { %7126 = vmatprep.subr.bf16.mxu0 %v10362_v35  ;;  %7454 = vmatprep.subr.bf16.mxu1 %v10364_v37  ;;  %v645_v35 = vld [vmem:[#allocation5 + $0xf90] sm:$0xff]  ;;  %v646_v37 = vld [vmem:[#allocation5 + $0xf98] sm:$0xff] }
 0x35e   :  { %v10418_v41 = vcombine.high %v645_v35, %v649_v36  ;;  %v10417_v49 = vcombine.low %v645_v35, %v649_v36  ;;  %v10419_v50 = vcombine.low %v646_v37, %v650_v34 }
 0x360   :  { %7127 = vmatpush1.bf16.msra.mxu0 %v10361_v42  ;;  %7455 = vmatpush1.bf16.msra.mxu1 %v10363_v43  ;;  %v10420_v42 = vcombine.high %v646_v37, %v650_v34  ;;  %v653_v43 = vld [vmem:[#allocation5 + $0xfd0] sm:$0xff] }
 0x361   :  { %7128 = vmatprep.subr.bf16.mxu0 %v10370_v45  ;;  %7456 = vmatprep.subr.bf16.mxu1 %v10372_v46  ;;  %v657_v45 = vld [vmem:[#allocation5 + $0xff0] sm:$0xff]  ;;  %v654_v46 = vld [vmem:[#allocation5 + $0xfd8] sm:$0xff] }
 0x362   :  { %v10426_v51 = vcombine.high %v653_v43, %v657_v45  ;;  %v10425_v59 = vcombine.low %v653_v43, %v657_v45  ;;  %v10427_v12 = vcombine.low %v654_v46, %v658_v47  ;;  %v701_v34 = vld [vmem:[#allocation5 + $0x1150] sm:$0xff] }
 0x364   :  { %7129 = vmatpush1.bf16.msra.mxu0 %v10369_v39  ;;  %7457 = vmatpush1.bf16.msra.mxu1 %v10371_v52  ;;  %v10428_v39 = vcombine.high %v654_v46, %v658_v47  ;;  %v661_v52 = vld [vmem:[#allocation5 + $0x1010] sm:$0xff] }
 0x365   :  { %7130 = vmatprep.subr.bf16.mxu0 %v10378_v53  ;;  %7458 = vmatprep.subr.bf16.mxu1 %v10380_v55  ;;  %v665_v53 = vld [vmem:[#allocation5 + $0x1030] sm:$0xff]  ;;  %v662_v55 = vld [vmem:[#allocation5 + $0x1018] sm:$0xff] }
 0x366   :  { %v10434_v61 = vcombine.high %v661_v52, %v665_v53  ;;  %v10433_v3 = vcombine.low %v661_v52, %v665_v53  ;;  %v10435_v4 = vcombine.low %v662_v55, %v666_v58  ;;  %v709_v47 = vld [vmem:[#allocation5 + $0x1190] sm:$0xff] }
 0x368   :  { %7131 = vmatpush1.bf16.msra.mxu0 %v10377_v62  ;;  %7459 = vmatpush1.bf16.msra.mxu1 %v10379_v63  ;;  %v10436_v62 = vcombine.high %v662_v55, %v666_v58  ;;  %v669_v63 = vld [vmem:[#allocation5 + $0x1050] sm:$0xff] }
 0x369   :  { %7132 = vmatprep.subr.bf16.mxu0 %v10386_v48  ;;  %7460 = vmatprep.subr.bf16.mxu1 %v10388_v0  ;;  %v673_v48 = vld [vmem:[#allocation5 + $0x1070] sm:$0xff]  ;;  %v670_v0 = vld [vmem:[#allocation5 + $0x1058] sm:$0xff] }
 0x36a   :  { %v10442_v5 = vcombine.high %v669_v63, %v673_v48  ;;  %v10441_v10 = vcombine.low %v669_v63, %v673_v48  ;;  %v10443_v11 = vcombine.low %v670_v0, %v674_v2  ;;  %v717_v58 = vld [vmem:[#allocation5 + $0x11d0] sm:$0xff] }
 0x36c   :  { %7133 = vmatpush1.bf16.msra.mxu0 %v10385_v6  ;;  %7461 = vmatpush1.bf16.msra.mxu1 %v10387_v23  ;;  %v10444_v6 = vcombine.high %v670_v0, %v674_v2  ;;  %v677_v23 = vld [vmem:[#allocation5 + $0x1090] sm:$0xff] }
 0x36d   :  { %7134 = vmatprep.subr.bf16.mxu0 %v10394_v7  ;;  %7462 = vmatprep.subr.bf16.mxu1 %v10396_v8  ;;  %v681_v7 = vld [vmem:[#allocation5 + $0x10b0] sm:$0xff]  ;;  %v678_v8 = vld [vmem:[#allocation5 + $0x1098] sm:$0xff] }
 0x36e   :  { %v10450_v13 = vcombine.high %v677_v23, %v681_v7  ;;  %v10449_v27 = vcombine.low %v677_v23, %v681_v7  ;;  %v725_v2 = vld [vmem:[#allocation5 + $0x1210] sm:$0xff] }
 0x370   :  { %7135 = vmatpush1.bf16.msra.mxu0 %v10393_v15  ;;  %7463 = vmatpush1.bf16.msra.mxu1 %v10395_v17  ;;  %v10452_v15 = vcombine.high %v678_v8, %v682_v9  ;;  %v685_v17 = vld [vmem:[#allocation5 + $0x10d0] sm:$0xff] }
 0x371   :  { %7136 = vmatprep.subr.bf16.mxu0 %v10402_v19  ;;  %7464 = vmatprep.subr.bf16.mxu1 %v10404_v20  ;;  %v689_v19 = vld [vmem:[#allocation5 + $0x10f0] sm:$0xff]  ;;  %v686_v20 = vld [vmem:[#allocation5 + $0x10d8] sm:$0xff] }
 0x372   :  { %v10458_v25 = vcombine.high %v685_v17, %v689_v19  ;;  %v10460_v30 = vcombine.high %v686_v20, %v690_v21  ;;  %v10457_v35 = vcombine.low %v685_v17, %v689_v19  ;;  %v10459_v36 = vcombine.low %v686_v20, %v690_v21  ;;  %v741_v21 = vld [vmem:[#allocation5 + $0x1290] sm:$0xff] }
 0x374   :  { %7137 = vmatpush1.bf16.msra.mxu0 %v10401_v31  ;;  %7465 = vmatpush1.bf16.msra.mxu1 %v10403_v32  ;;  %v693_v31 = vld [vmem:[#allocation5 + $0x1110] sm:$0xff] }
 0x375   :  { %7138 = vmatprep.subr.bf16.mxu0 %v10410_v33  ;;  %7466 = vmatprep.subr.bf16.mxu1 %v10412_v57  ;;  %v697_v32 = vld [vmem:[#allocation5 + $0x1130] sm:$0xff]  ;;  %v694_v33 = vld [vmem:[#allocation5 + $0x1118] sm:$0xff] }
 0x376   :  { %v698_v57 = vld [vmem:[#allocation5 + $0x1138] sm:$0xff]  ;;  %v10466_v37 = vcombine.high %v693_v31, %v697_v32 }
 0x377   :  { %v10467_v43 = vcombine.low %v694_v33, %v698_v57 }
 0x378   :  { %7139 = vmatpush1.bf16.msra.mxu0 %v10409_v38  ;;  %7467 = vmatpush1.bf16.msra.mxu1 %v10411_v40  ;;  %v705_v38 = vld [vmem:[#allocation5 + $0x1170] sm:$0xff]  ;;  %v702_v40 = vld [vmem:[#allocation5 + $0x1158] sm:$0xff] }
 0x379   :  { %7140 = vmatprep.subr.bf16.mxu0 %v10418_v41  ;;  %7468 = vmatprep.subr.bf16.mxu1 %v10420_v42  ;;  %v706_v41 = vld [vmem:[#allocation5 + $0x1178] sm:$0xff]  ;;  %v10465_v42 = vcombine.low %v693_v31, %v697_v32  ;;  %v10474_v45 = vcombine.high %v701_v34, %v705_v38 }
 0x37a   :  { %v10476_v46 = vcombine.high %v702_v40, %v706_v41  ;;  %v10475_v52 = vcombine.low %v702_v40, %v706_v41  ;;  %v757_v41 = vld [vmem:[#allocation5 + $0x1310] sm:$0xff] }
 0x37c   :  { %7141 = vmatpush1.bf16.msra.mxu0 %v10417_v49  ;;  %7469 = vmatpush1.bf16.msra.mxu1 %v10419_v50  ;;  %v713_v49 = vld [vmem:[#allocation5 + $0x11b0] sm:$0xff]  ;;  %v710_v50 = vld [vmem:[#allocation5 + $0x1198] sm:$0xff] }
 0x37d   :  { %7142 = vmatprep.subr.bf16.mxu0 %v10426_v51  ;;  %7470 = vmatprep.subr.bf16.mxu1 %v10428_v39  ;;  %v714_v51 = vld [vmem:[#allocation5 + $0x11b8] sm:$0xff]  ;;  %v10473_v39 = vcombine.low %v701_v34, %v705_v38  ;;  %v10482_v53 = vcombine.high %v709_v47, %v713_v49 }
 0x37e   :  { %v10484_v55 = vcombine.high %v710_v50, %v714_v51  ;;  %v10483_v63 = vcombine.low %v710_v50, %v714_v51  ;;  %v765_v51 = vld [vmem:[#allocation5 + $0x1350] sm:$0xff] }
 0x380   :  { %7143 = vmatpush1.bf16.msra.mxu0 %v10425_v59  ;;  %7471 = vmatpush1.bf16.msra.mxu1 %v10427_v12  ;;  %v721_v59 = vld [vmem:[#allocation5 + $0x11f0] sm:$0xff]  ;;  %v718_v12 = vld [vmem:[#allocation5 + $0x11d8] sm:$0xff] }
 0x381   :  { %7153 = vmatprep.subr.bf16.mxu0 %v10434_v61  ;;  %7481 = vmatprep.subr.bf16.mxu1 %v10436_v62  ;;  %v722_v61 = vld [vmem:[#allocation5 + $0x11f8] sm:$0xff]  ;;  %v10481_v62 = vcombine.low %v709_v47, %v713_v49  ;;  %v10490_v48 = vcombine.high %v717_v58, %v721_v59 }
 0x382   :  { %v10492_v0 = vcombine.high %v718_v12, %v722_v61  ;;  %v10491_v23 = vcombine.low %v718_v12, %v722_v61  ;;  %v773_v61 = vld [vmem:[#allocation5 + $0x1390] sm:$0xff] }
 0x383   :  { %7145 = vmatmul.mubr.bf16.vlgmr.msra.gmra.mrb[4].mxu0 %v12205_v54  ;;  %7473 = vmatmul.mubr.bf16.vlgmr.msra.gmra.mrb[4].mxu1 %v12205_v54  ;;  %v10451_v54 = vcombine.low %v678_v8, %v682_v9  ;;  %v733_v9 = vld [vmem:[#allocation5 + $0x1250] sm:$0xff] }
 0x384   :  { %7154 = vmatpush1.bf16.msra.mxu0 %v10433_v3  ;;  %7482 = vmatpush1.bf16.msra.mxu1 %v10435_v4  ;;  %v729_v3 = vld [vmem:[#allocation5 + $0x1230] sm:$0xff]  ;;  %v726_v4 = vld [vmem:[#allocation5 + $0x1218] sm:$0xff] }
 0x385   :  { %7155 = vmatprep.subr.bf16.mxu0 %v10442_v5  ;;  %7483 = vmatprep.subr.bf16.mxu1 %v10444_v6  ;;  %v730_v5 = vld [vmem:[#allocation5 + $0x1238] sm:$0xff]  ;;  %v10489_v6 = vcombine.low %v717_v58, %v721_v59  ;;  %v10498_v7 = vcombine.high %v725_v2, %v729_v3 }
 0x386   :  { %7185 = vmatprep.mubr.bf16.mxu0 %v12207_v1  ;;  %7513 = vmatprep.mubr.bf16.mxu1 %v12207_v1  ;;  %v10468_v1 = vcombine.high %v694_v33, %v698_v57  ;;  %v10500_v8 = vcombine.high %v726_v4, %v730_v5  ;;  %v10499_v17 = vcombine.low %v726_v4, %v730_v5  ;;  %v749_v57 = vld [vmem:[#allocation5 + $0x12d0] sm:$0xff] }
 0x387   :  { %v781_v5 = vld [vmem:[#allocation5 + $0x13d0] sm:$0xff] }
 0x388   :  { %7156 = vmatpush1.bf16.msra.mxu0 %v10441_v10  ;;  %7484 = vmatpush1.bf16.msra.mxu1 %v10443_v11  ;;  %v737_v10 = vld [vmem:[#allocation5 + $0x1270] sm:$0xff]  ;;  %v734_v11 = vld [vmem:[#allocation5 + $0x1258] sm:$0xff] }
 0x389   :  { %7157 = vmatprep.subr.bf16.mxu0 %v10450_v13  ;;  %7485 = vmatprep.subr.bf16.mxu1 %v10452_v15  ;;  %v738_v13 = vld [vmem:[#allocation5 + $0x1278] sm:$0xff]  ;;  %v10497_v15 = vcombine.low %v725_v2, %v729_v3  ;;  %v10506_v19 = vcombine.high %v733_v9, %v737_v10 }
 0x38a   :  { %v10508_v20 = vcombine.high %v734_v11, %v738_v13  ;;  %v10507_v31 = vcombine.low %v734_v11, %v738_v13  ;;  %v789_v13 = vld [vmem:[#allocation5 + $0x1410] sm:$0xff] }
 0x38c   :  { %7158 = vmatpush1.bf16.msra.mxu0 %v10449_v27  ;;  %7486 = vmatpush1.bf16.msra.mxu1 %v10451_v54  ;;  %v745_v27 = vld [vmem:[#allocation5 + $0x12b0] sm:$0xff]  ;;  %v742_v54 = vld [vmem:[#allocation5 + $0x1298] sm:$0xff] }
 0x38d   :  { %7159 = vmatprep.subr.bf16.mxu0 %v10458_v25  ;;  %7487 = vmatprep.subr.bf16.mxu1 %v10460_v30  ;;  %v746_v25 = vld [vmem:[#allocation5 + $0x12b8] sm:$0xff]  ;;  %v10505_v30 = vcombine.low %v733_v9, %v737_v10  ;;  %v10514_v32 = vcombine.high %v741_v21, %v745_v27 }
 0x38e   :  { %v10516_v33 = vcombine.high %v742_v54, %v746_v25  ;;  %v10515_v34 = vcombine.low %v742_v54, %v746_v25  ;;  %v797_v25 = vld [vmem:[#allocation5 + $0x1450] sm:$0xff] }
 0x390   :  { %7160 = vmatpush1.bf16.msra.mxu0 %v10457_v35  ;;  %7488 = vmatpush1.bf16.msra.mxu1 %v10459_v36  ;;  %v753_v35 = vld [vmem:[#allocation5 + $0x12f0] sm:$0xff]  ;;  %v750_v36 = vld [vmem:[#allocation5 + $0x12d8] sm:$0xff] }
 0x391   :  { %7161 = vmatprep.subr.bf16.mxu0 %v10466_v37  ;;  %7489 = vmatprep.subr.bf16.mxu1 %v10468_v1  ;;  %v754_v37 = vld [vmem:[#allocation5 + $0x12f8] sm:$0xff]  ;;  %v10513_v1 = vcombine.low %v741_v21, %v745_v27  ;;  %v10522_v38 = vcombine.high %v749_v57, %v753_v35 }
 0x392   :  { %v10524_v40 = vcombine.high %v750_v36, %v754_v37  ;;  %v10523_v47 = vcombine.low %v750_v36, %v754_v37  ;;  %v805_v37 = vld [vmem:[#allocation5 + $0x1490] sm:$0xff] }
 0x394   :  { %7162 = vmatpush1.bf16.msra.mxu0 %v10465_v42  ;;  %7490 = vmatpush1.bf16.msra.mxu1 %v10467_v43  ;;  %v761_v42 = vld [vmem:[#allocation5 + $0x1330] sm:$0xff]  ;;  %v758_v43 = vld [vmem:[#allocation5 + $0x1318] sm:$0xff] }
 0x395   :  { %7163 = vmatprep.subr.bf16.mxu0 %v10474_v45  ;;  %7491 = vmatprep.subr.bf16.mxu1 %v10476_v46  ;;  %v762_v45 = vld [vmem:[#allocation5 + $0x1338] sm:$0xff]  ;;  %v10521_v46 = vcombine.low %v749_v57, %v753_v35  ;;  %v10530_v49 = vcombine.high %v757_v41, %v761_v42 }
 0x396   :  { %v10532_v50 = vcombine.high %v758_v43, %v762_v45  ;;  %v10531_v58 = vcombine.low %v758_v43, %v762_v45  ;;  %v813_v45 = vld [vmem:[#allocation5 + $0x14d0] sm:$0xff] }
 0x398   :  { %7164 = vmatpush1.bf16.msra.mxu0 %v10473_v39  ;;  %7492 = vmatpush1.bf16.msra.mxu1 %v10475_v52  ;;  %v769_v39 = vld [vmem:[#allocation5 + $0x1370] sm:$0xff]  ;;  %v766_v52 = vld [vmem:[#allocation5 + $0x1358] sm:$0xff] }
 0x399   :  { %7165 = vmatprep.subr.bf16.mxu0 %v10482_v53  ;;  %7493 = vmatprep.subr.bf16.mxu1 %v10484_v55  ;;  %v770_v53 = vld [vmem:[#allocation5 + $0x1378] sm:$0xff]  ;;  %v10529_v55 = vcombine.low %v757_v41, %v761_v42  ;;  %v10538_v59 = vcombine.high %v765_v51, %v769_v39 }
 0x39a   :  { %v10540_v12 = vcombine.high %v766_v52, %v770_v53  ;;  %v10539_v2 = vcombine.low %v766_v52, %v770_v53  ;;  %v821_v52 = vld [vmem:[#allocation5 + $0x1510] sm:$0xff] }
 0x39b   :  { %v825_v53 = vld [vmem:[#allocation5 + $0x1530] sm:$0xff] }
 0x39c   :  { %7166 = vmatpush1.bf16.msra.mxu0 %v10481_v62  ;;  %7494 = vmatpush1.bf16.msra.mxu1 %v10483_v63  ;;  %v777_v62 = vld [vmem:[#allocation5 + $0x13b0] sm:$0xff]  ;;  %v774_v63 = vld [vmem:[#allocation5 + $0x1398] sm:$0xff] }
 0x39d   :  { %7167 = vmatprep.subr.bf16.mxu0 %v10490_v48  ;;  %7495 = vmatprep.subr.bf16.mxu1 %v10492_v0  ;;  %v778_v48 = vld [vmem:[#allocation5 + $0x13b8] sm:$0xff]  ;;  %v10537_v0 = vcombine.low %v765_v51, %v769_v39  ;;  %v10546_v3 = vcombine.high %v773_v61, %v777_v62 }
 0x39e   :  { %v10548_v4 = vcombine.high %v774_v63, %v778_v48  ;;  %v10547_v9 = vcombine.low %v774_v63, %v778_v48  ;;  %v833_v63 = vld [vmem:[#allocation5 + $0x1570] sm:$0xff]  ;;  %v830_v48 = vld [vmem:[#allocation5 + $0x1558] sm:$0xff] }
 0x3a0   :  { %7168 = vmatpush1.bf16.msra.mxu0 %v10489_v6  ;;  %7496 = vmatpush1.bf16.msra.mxu1 %v10491_v23  ;;  %v785_v6 = vld [vmem:[#allocation5 + $0x13f0] sm:$0xff]  ;;  %v782_v23 = vld [vmem:[#allocation5 + $0x13d8] sm:$0xff] }
 0x3a1   :  { %7169 = vmatprep.subr.bf16.mxu0 %v10498_v7  ;;  %7497 = vmatprep.subr.bf16.mxu1 %v10500_v8  ;;  %v786_v7 = vld [vmem:[#allocation5 + $0x13f8] sm:$0xff]  ;;  %v10545_v8 = vcombine.low %v773_v61, %v777_v62  ;;  %v10554_v10 = vcombine.high %v781_v5, %v785_v6  ;;  %v10594_v61 = vcombine.high %v821_v52, %v825_v53  ;;  %v829_v62 = vld [vmem:[#allocation5 + $0x1550] sm:$0xff] }
 0x3a2   :  { %v10556_v11 = vcombine.high %v782_v23, %v786_v7  ;;  %v10555_v21 = vcombine.low %v782_v23, %v786_v7  ;;  %v841_v23 = vld [vmem:[#allocation5 + $0x15b0] sm:$0xff]  ;;  %v838_v7 = vld [vmem:[#allocation5 + $0x1598] sm:$0xff] }
 0x3a4   :  { %7170 = vmatpush1.bf16.msra.mxu0 %v10497_v15  ;;  %7498 = vmatpush1.bf16.msra.mxu1 %v10499_v17  ;;  %v793_v15 = vld [vmem:[#allocation5 + $0x1430] sm:$0xff]  ;;  %v790_v17 = vld [vmem:[#allocation5 + $0x1418] sm:$0xff] }
 0x3a5   :  { %7171 = vmatprep.subr.bf16.mxu0 %v10506_v19  ;;  %7499 = vmatprep.subr.bf16.mxu1 %v10508_v20  ;;  %v794_v19 = vld [vmem:[#allocation5 + $0x1438] sm:$0xff]  ;;  %v10553_v20 = vcombine.low %v781_v5, %v785_v6  ;;  %v10562_v27 = vcombine.high %v789_v13, %v793_v15  ;;  %v837_v6 = vld [vmem:[#allocation5 + $0x1590] sm:$0xff] }
 0x3a6   :  { %v10564_v54 = vcombine.high %v790_v17, %v794_v19  ;;  %v10563_v57 = vcombine.low %v790_v17, %v794_v19  ;;  %v849_v17 = vld [vmem:[#allocation5 + $0x15f0] sm:$0xff]  ;;  %v846_v19 = vld [vmem:[#allocation5 + $0x15d8] sm:$0xff] }
 0x3a8   :  { %7172 = vmatpush1.bf16.msra.mxu0 %v10505_v30  ;;  %7500 = vmatpush1.bf16.msra.mxu1 %v10507_v31  ;;  %v801_v30 = vld [vmem:[#allocation5 + $0x1470] sm:$0xff]  ;;  %v798_v31 = vld [vmem:[#allocation5 + $0x1458] sm:$0xff] }
 0x3a9   :  { %7173 = vmatprep.subr.bf16.mxu0 %v10514_v32  ;;  %7501 = vmatprep.subr.bf16.mxu1 %v10516_v33  ;;  %v802_v32 = vld [vmem:[#allocation5 + $0x1478] sm:$0xff]  ;;  %v10561_v33 = vcombine.low %v789_v13, %v793_v15  ;;  %v10570_v35 = vcombine.high %v797_v25, %v801_v30  ;;  %v845_v15 = vld [vmem:[#allocation5 + $0x15d0] sm:$0xff] }
 0x3aa   :  { %v10572_v36 = vcombine.high %v798_v31, %v802_v32  ;;  %v10571_v41 = vcombine.low %v798_v31, %v802_v32  ;;  %v857_v31 = vld [vmem:[#allocation5 + $0x1630] sm:$0xff]  ;;  %v854_v32 = vld [vmem:[#allocation5 + $0x1618] sm:$0xff] }
 0x3ac   :  { %7174 = vmatpush1.bf16.msra.mxu0 %v10513_v1  ;;  %7502 = vmatpush1.bf16.msra.mxu1 %v10515_v34  ;;  %v809_v1 = vld [vmem:[#allocation5 + $0x14b0] sm:$0xff]  ;;  %v806_v34 = vld [vmem:[#allocation5 + $0x1498] sm:$0xff] }
 0x3ad   :  { %7175 = vmatprep.subr.bf16.mxu0 %v10522_v38  ;;  %7503 = vmatprep.subr.bf16.mxu1 %v10524_v40  ;;  %v810_v38 = vld [vmem:[#allocation5 + $0x14b8] sm:$0xff]  ;;  %v10569_v40 = vcombine.low %v797_v25, %v801_v30  ;;  %v10578_v42 = vcombine.high %v805_v37, %v809_v1  ;;  %v853_v30 = vld [vmem:[#allocation5 + $0x1610] sm:$0xff] }
 0x3ae   :  { %v10580_v43 = vcombine.high %v806_v34, %v810_v38 }
 0x3b0   :  { %7176 = vmatpush1.bf16.msra.mxu0 %v10521_v46  ;;  %7504 = vmatpush1.bf16.msra.mxu1 %v10523_v47  ;;  %v817_v46 = vld [vmem:[#allocation5 + $0x14f0] sm:$0xff]  ;;  %v814_v47 = vld [vmem:[#allocation5 + $0x14d8] sm:$0xff] }
 0x3b1   :  { %7177 = vmatprep.subr.bf16.mxu0 %v10530_v49  ;;  %7505 = vmatprep.subr.bf16.mxu1 %v10532_v50  ;;  %v818_v49 = vld [vmem:[#allocation5 + $0x14f8] sm:$0xff]  ;;  %v10577_v50 = vcombine.low %v805_v37, %v809_v1  ;;  %v10586_v51 = vcombine.high %v813_v45, %v817_v46  ;;  %v861_v1 = vld [vmem:[#allocation5 + $0x1650] sm:$0xff] }
 0x3b2   :  { %v10588_v39 = vcombine.high %v814_v47, %v818_v49 }
 0x3b4   :  { %7178 = vmatpush1.bf16.msra.mxu0 %v10529_v55  ;;  %7506 = vmatpush1.bf16.msra.mxu1 %v10531_v58  ;;  %v822_v55 = vld [vmem:[#allocation5 + $0x1518] sm:$0xff] }
 0x3b5   :  { %7179 = vmatprep.subr.bf16.mxu0 %v10538_v59  ;;  %7507 = vmatprep.subr.bf16.mxu1 %v10540_v12  ;;  %v826_v58 = vld [vmem:[#allocation5 + $0x1538] sm:$0xff]  ;;  %v10585_v59 = vcombine.low %v813_v45, %v817_v46  ;;  %v10587_v12 = vcombine.low %v814_v47, %v818_v49  ;;  %v869_v46 = vld [vmem:[#allocation5 + $0x1690] sm:$0xff] }
 0x3b6   :  { %v873_v47 = vld [vmem:[#allocation5 + $0x16b0] sm:$0xff]  ;;  %v870_v49 = vld [vmem:[#allocation5 + $0x1698] sm:$0xff] }
 0x3b8   :  { %7180 = vmatpush1.bf16.msra.mxu0 %v10537_v0  ;;  %7508 = vmatpush1.bf16.msra.mxu1 %v10539_v2  ;;  %v834_v0 = vld [vmem:[#allocation5 + $0x1578] sm:$0xff]  ;;  %v10593_v2 = vcombine.low %v821_v52, %v825_v53  ;;  %v877_v53 = vld [vmem:[#allocation5 + $0x16d0] sm:$0xff] }
 0x3b9   :  { %7181 = vmatprep.subr.bf16.mxu0 %v10546_v3  ;;  %7509 = vmatprep.subr.bf16.mxu1 %v10548_v4  ;;  %v10595_v3 = vcombine.low %v822_v55, %v826_v58  ;;  %v10602_v4 = vcombine.high %v829_v62, %v833_v63  ;;  %v10604_v5 = vcombine.high %v830_v48, %v834_v0 }
 0x3bc   :  { %7182 = vmatpush1.bf16.msra.mxu0 %v10545_v8  ;;  %7510 = vmatpush1.bf16.msra.mxu1 %v10547_v9  ;;  %v842_v8 = vld [vmem:[#allocation5 + $0x15b8] sm:$0xff]  ;;  %v10601_v9 = vcombine.low %v829_v62, %v833_v63  ;;  %v885_v63 = vld [vmem:[#allocation5 + $0x1710] sm:$0xff] }
 0x3bd   :  { %7183 = vmatprep.subr.bf16.mxu0 %v10554_v10  ;;  %7511 = vmatprep.subr.bf16.mxu1 %v10556_v11  ;;  %v10603_v10 = vcombine.low %v830_v48, %v834_v0  ;;  %v10610_v11 = vcombine.high %v837_v6, %v841_v23  ;;  %v10612_v13 = vcombine.high %v838_v7, %v842_v8  ;;  %v889_v48 = vld [vmem:[#allocation5 + $0x1730] sm:$0xff]  ;;  %v886_v0 = vld [vmem:[#allocation5 + $0x1718] sm:$0xff] }
 0x3c0   :  { %7184 = vmatpush1.bf16.msra.mxu0 %v10553_v20  ;;  %7512 = vmatpush1.bf16.msra.mxu1 %v10555_v21  ;;  %v850_v20 = vld [vmem:[#allocation5 + $0x15f8] sm:$0xff]  ;;  %v10609_v21 = vcombine.low %v837_v6, %v841_v23  ;;  %v893_v23 = vld [vmem:[#allocation5 + $0x1750] sm:$0xff] }
 0x3c1   :  { %7194 = vmatprep.subr.bf16.mxu0 %v10562_v27  ;;  %7522 = vmatprep.subr.bf16.mxu1 %v10564_v54  ;;  %v10611_v27 = vcombine.low %v838_v7, %v842_v8  ;;  %v10618_v54 = vcombine.high %v845_v15, %v849_v17  ;;  %v10620_v25 = vcombine.high %v846_v19, %v850_v20  ;;  %v897_v7 = vld [vmem:[#allocation5 + $0x1770] sm:$0xff]  ;;  %v894_v8 = vld [vmem:[#allocation5 + $0x1758] sm:$0xff] }
 0x3c3   :  { %7186 = vmatmul.mubr.bf16.vlgmr.msra.gmra.mrb[4].mxu0 %v12213_v14  ;;  %7514 = vmatmul.mubr.bf16.vlgmr.msra.gmra.mrb[4].mxu1 %v12213_v14  ;;  %v10579_v14 = vcombine.low %v806_v34, %v810_v38  ;;  %v865_v34 = vld [vmem:[#allocation5 + $0x1670] sm:$0xff]  ;;  %v862_v38 = vld [vmem:[#allocation5 + $0x1658] sm:$0xff] }
 0x3c4   :  { %7195 = vmatpush1.bf16.msra.mxu0 %v10561_v33  ;;  %7523 = vmatpush1.bf16.msra.mxu1 %v10563_v57  ;;  %v858_v33 = vld [vmem:[#allocation5 + $0x1638] sm:$0xff]  ;;  %v10617_v57 = vcombine.low %v845_v15, %v849_v17  ;;  %v901_v17 = vld [vmem:[#allocation5 + $0x1790] sm:$0xff] }
 0x3c5   :  { %7196 = vmatprep.subr.bf16.mxu0 %v10570_v35  ;;  %7524 = vmatprep.subr.bf16.mxu1 %v10572_v36  ;;  %v10619_v35 = vcombine.low %v846_v19, %v850_v20  ;;  %v10626_v36 = vcombine.high %v853_v30, %v857_v31  ;;  %v10628_v37 = vcombine.high %v854_v32, %v858_v33  ;;  %v905_v19 = vld [vmem:[#allocation5 + $0x17b0] sm:$0xff]  ;;  %v902_v20 = vld [vmem:[#allocation5 + $0x1798] sm:$0xff] }
 0x3c6   :  { %7226 = vmatprep.mubr.bf16.mxu0 %v12215_v26  ;;  %7554 = vmatprep.mubr.bf16.mxu1 %v12215_v26  ;;  %v10596_v26 = vcombine.high %v822_v55, %v826_v58  ;;  %v881_v55 = vld [vmem:[#allocation5 + $0x16f0] sm:$0xff]  ;;  %v878_v58 = vld [vmem:[#allocation5 + $0x16d8] sm:$0xff] }
 0x3c8   :  { %7197 = vmatpush1.bf16.msra.mxu0 %v10569_v40  ;;  %7525 = vmatpush1.bf16.msra.mxu1 %v10571_v41  ;;  %v866_v40 = vld [vmem:[#allocation5 + $0x1678] sm:$0xff]  ;;  %v10625_v41 = vcombine.low %v853_v30, %v857_v31  ;;  %v909_v31 = vld [vmem:[#allocation5 + $0x17d0] sm:$0xff] }
 0x3c9   :  { %7198 = vmatprep.subr.bf16.mxu0 %v10578_v42  ;;  %7526 = vmatprep.subr.bf16.mxu1 %v10580_v43  ;;  %v10627_v42 = vcombine.low %v854_v32, %v858_v33  ;;  %v10634_v43 = vcombine.high %v861_v1, %v865_v34  ;;  %v10636_v45 = vcombine.high %v862_v38, %v866_v40  ;;  %v913_v32 = vld [vmem:[#allocation5 + $0x17f0] sm:$0xff]  ;;  %v910_v33 = vld [vmem:[#allocation5 + $0x17d8] sm:$0xff] }
 0x3cc   :  { %7199 = vmatpush1.bf16.msra.mxu0 %v10577_v50  ;;  %7527 = vmatpush1.bf16.msra.mxu1 %v10579_v14  ;;  %v874_v50 = vld [vmem:[#allocation5 + $0x16b8] sm:$0xff]  ;;  %v10633_v14 = vcombine.low %v861_v1, %v865_v34  ;;  %v917_v34 = vld [vmem:[#allocation5 + $0x1810] sm:$0xff] }
 0x3cd   :  { %7200 = vmatprep.subr.bf16.mxu0 %v10586_v51  ;;  %7528 = vmatprep.subr.bf16.mxu1 %v10588_v39  ;;  %v10635_v51 = vcombine.low %v862_v38, %v866_v40  ;;  %v10642_v39 = vcombine.high %v869_v46, %v873_v47  ;;  %v10644_v52 = vcombine.high %v870_v49, %v874_v50  ;;  %v921_v38 = vld [vmem:[#allocation5 + $0x1830] sm:$0xff]  ;;  %v918_v40 = vld [vmem:[#allocation5 + $0x1818] sm:$0xff] }
 0x3d0   :  { %7201 = vmatpush1.bf16.msra.mxu0 %v10585_v59  ;;  %7529 = vmatpush1.bf16.msra.mxu1 %v10587_v12  ;;  %v882_v59 = vld [vmem:[#allocation5 + $0x16f8] sm:$0xff]  ;;  %v10641_v12 = vcombine.low %v869_v46, %v873_v47  ;;  %v925_v47 = vld [vmem:[#allocation5 + $0x1850] sm:$0xff] }
 0x3d1   :  { %7202 = vmatprep.subr.bf16.mxu0 %v10594_v61  ;;  %7530 = vmatprep.subr.bf16.mxu1 %v10596_v26  ;;  %v10643_v61 = vcombine.low %v870_v49, %v874_v50  ;;  %v10650_v26 = vcombine.high %v877_v53, %v881_v55  ;;  %v10652_v62 = vcombine.high %v878_v58, %v882_v59  ;;  %v929_v49 = vld [vmem:[#allocation5 + $0x1870] sm:$0xff]  ;;  %v926_v50 = vld [vmem:[#allocation5 + $0x1858] sm:$0xff] }
 0x3d4   :  { %7203 = vmatpush1.bf16.msra.mxu0 %v10593_v2  ;;  %7531 = vmatpush1.bf16.msra.mxu1 %v10595_v3  ;;  %v890_v2 = vld [vmem:[#allocation5 + $0x1738] sm:$0xff]  ;;  %v10649_v3 = vcombine.low %v877_v53, %v881_v55  ;;  %v933_v55 = vld [vmem:[#allocation5 + $0x1890] sm:$0xff] }
 0x3d5   :  { %7204 = vmatprep.subr.bf16.mxu0 %v10602_v4  ;;  %7532 = vmatprep.subr.bf16.mxu1 %v10604_v5  ;;  %v10651_v4 = vcombine.low %v878_v58, %v882_v59  ;;  %v10658_v5 = vcombine.high %v885_v63, %v889_v48  ;;  %v10660_v6 = vcombine.high %v886_v0, %v890_v2  ;;  %v937_v58 = vld [vmem:[#allocation5 + $0x18b0] sm:$0xff]  ;;  %v934_v59 = vld [vmem:[#allocation5 + $0x1898] sm:$0xff] }
 0x3d8   :  { %7205 = vmatpush1.bf16.msra.mxu0 %v10601_v9  ;;  %7533 = vmatpush1.bf16.msra.mxu1 %v10603_v10  ;;  %v898_v9 = vld [vmem:[#allocation5 + $0x1778] sm:$0xff]  ;;  %v10657_v10 = vcombine.low %v885_v63, %v889_v48  ;;  %v941_v48 = vld [vmem:[#allocation5 + $0x18d0] sm:$0xff] }
 0x3d9   :  { %7206 = vmatprep.subr.bf16.mxu0 %v10610_v11  ;;  %7534 = vmatprep.subr.bf16.mxu1 %v10612_v13  ;;  %v10659_v11 = vcombine.low %v886_v0, %v890_v2  ;;  %v10666_v13 = vcombine.high %v893_v23, %v897_v7  ;;  %v10668_v15 = vcombine.high %v894_v8, %v898_v9  ;;  %v945_v0 = vld [vmem:[#allocation5 + $0x18f0] sm:$0xff]  ;;  %v942_v2 = vld [vmem:[#allocation5 + $0x18d8] sm:$0xff] }
 0x3dc   :  { %7207 = vmatpush1.bf16.msra.mxu0 %v10609_v21  ;;  %7535 = vmatpush1.bf16.msra.mxu1 %v10611_v27  ;;  %v906_v21 = vld [vmem:[#allocation5 + $0x17b8] sm:$0xff]  ;;  %v10665_v27 = vcombine.low %v893_v23, %v897_v7  ;;  %v949_v23 = vld [vmem:[#allocation5 + $0x1910] sm:$0xff] }
 0x3dd   :  { %7208 = vmatprep.subr.bf16.mxu0 %v10618_v54  ;;  %7536 = vmatprep.subr.bf16.mxu1 %v10620_v25  ;;  %v10667_v54 = vcombine.low %v894_v8, %v898_v9  ;;  %v10674_v25 = vcombine.high %v901_v17, %v905_v19  ;;  %v10676_v30 = vcombine.high %v902_v20, %v906_v21  ;;  %v953_v7 = vld [vmem:[#allocation5 + $0x1930] sm:$0xff]  ;;  %v950_v8 = vld [vmem:[#allocation5 + $0x1918] sm:$0xff] }
 0x3de   :  { %v954_v9 = vld [vmem:[#allocation5 + $0x1938] sm:$0xff] }
 0x3e0   :  { %7209 = vmatpush1.bf16.msra.mxu0 %v10617_v57  ;;  %7537 = vmatpush1.bf16.msra.mxu1 %v10619_v35  ;;  %v914_v57 = vld [vmem:[#allocation5 + $0x17f8] sm:$0xff]  ;;  %v10673_v35 = vcombine.low %v901_v17, %v905_v19  ;;  %v961_v17 = vld [vmem:[#allocation5 + $0x1970] sm:$0xff] }
 0x3e1   :  { %7210 = vmatprep.subr.bf16.mxu0 %v10626_v36  ;;  %7538 = vmatprep.subr.bf16.mxu1 %v10628_v37  ;;  %v10675_v36 = vcombine.low %v902_v20, %v906_v21  ;;  %v10682_v37 = vcombine.high %v909_v31, %v913_v32  ;;  %v10684_v1 = vcombine.high %v910_v33, %v914_v57  ;;  %v958_v19 = vld [vmem:[#allocation5 + $0x1958] sm:$0xff] }
 0x3e2   :  { %v962_v20 = vld [vmem:[#allocation5 + $0x1978] sm:$0xff]  ;;  %v10721_v21 = vcombine.low %v949_v23, %v953_v7 }
 0x3e4   :  { %7211 = vmatpush1.bf16.msra.mxu0 %v10625_v41  ;;  %7539 = vmatpush1.bf16.msra.mxu1 %v10627_v42  ;;  %v922_v41 = vld [vmem:[#allocation5 + $0x1838] sm:$0xff]  ;;  %v10681_v42 = vcombine.low %v909_v31, %v913_v32  ;;  %v969_v31 = vld [vmem:[#allocation5 + $0x19b0] sm:$0xff] }
 0x3e5   :  { %7212 = vmatprep.subr.bf16.mxu0 %v10634_v43  ;;  %7540 = vmatprep.subr.bf16.mxu1 %v10636_v45  ;;  %v10683_v43 = vcombine.low %v910_v33, %v914_v57  ;;  %v10690_v45 = vcombine.high %v917_v34, %v921_v38  ;;  %v10692_v46 = vcombine.high %v918_v40, %v922_v41  ;;  %v966_v32 = vld [vmem:[#allocation5 + $0x1998] sm:$0xff] }
 0x3e6   :  { %v970_v33 = vld [vmem:[#allocation5 + $0x19b8] sm:$0xff] }
 0x3e8   :  { %7213 = vmatpush1.bf16.msra.mxu0 %v10633_v14  ;;  %7541 = vmatpush1.bf16.msra.mxu1 %v10635_v51  ;;  %v930_v14 = vld [vmem:[#allocation5 + $0x1878] sm:$0xff]  ;;  %v10689_v51 = vcombine.low %v917_v34, %v921_v38  ;;  %v977_v34 = vld [vmem:[#allocation5 + $0x19f0] sm:$0xff] }
 0x3e9   :  { %7214 = vmatprep.subr.bf16.mxu0 %v10642_v39  ;;  %7542 = vmatprep.subr.bf16.mxu1 %v10644_v52  ;;  %v10691_v39 = vcombine.low %v918_v40, %v922_v41  ;;  %v10698_v52 = vcombine.high %v925_v47, %v929_v49  ;;  %v10700_v53 = vcombine.high %v926_v50, %v930_v14  ;;  %v974_v38 = vld [vmem:[#allocation5 + $0x19d8] sm:$0xff] }
 0x3ea   :  { %v978_v40 = vld [vmem:[#allocation5 + $0x19f8] sm:$0xff] }
 0x3ec   :  { %7215 = vmatpush1.bf16.msra.mxu0 %v10641_v12  ;;  %7543 = vmatpush1.bf16.msra.mxu1 %v10643_v61  ;;  %v938_v12 = vld [vmem:[#allocation5 + $0x18b8] sm:$0xff]  ;;  %v10697_v61 = vcombine.low %v925_v47, %v929_v49  ;;  %v985_v47 = vld [vmem:[#allocation5 + $0x1a30] sm:$0xff] }
 0x3ed   :  { %7216 = vmatprep.subr.bf16.mxu0 %v10650_v26  ;;  %7544 = vmatprep.subr.bf16.mxu1 %v10652_v62  ;;  %v10699_v26 = vcombine.low %v926_v50, %v930_v14  ;;  %v10706_v62 = vcombine.high %v933_v55, %v937_v58  ;;  %v10708_v63 = vcombine.high %v934_v59, %v938_v12  ;;  %v982_v49 = vld [vmem:[#allocation5 + $0x1a18] sm:$0xff] }
 0x3ee   :  { %v986_v50 = vld [vmem:[#allocation5 + $0x1a38] sm:$0xff] }
 0x3f0   :  { %7217 = vmatpush1.bf16.msra.mxu0 %v10649_v3  ;;  %7545 = vmatpush1.bf16.msra.mxu1 %v10651_v4  ;;  %v946_v3 = vld [vmem:[#allocation5 + $0x18f8] sm:$0xff]  ;;  %v10705_v4 = vcombine.low %v933_v55, %v937_v58  ;;  %v993_v55 = vld [vmem:[#allocation5 + $0x1a70] sm:$0xff] }
 0x3f1   :  { %7218 = vmatprep.subr.bf16.mxu0 %v10658_v5  ;;  %7546 = vmatprep.subr.bf16.mxu1 %v10660_v6  ;;  %v10714_v5 = vcombine.high %v941_v48, %v945_v0  ;;  %v10716_v6 = vcombine.high %v942_v2, %v946_v3  ;;  %v990_v58 = vld [vmem:[#allocation5 + $0x1a58] sm:$0xff] }
 0x3f4   :  { %7219 = vmatpush1.bf16.msra.mxu0 %v10657_v10  ;;  %7547 = vmatpush1.bf16.msra.mxu1 %v10659_v11  ;;  %v10713_v10 = vcombine.low %v941_v48, %v945_v0  ;;  %v10715_v11 = vcombine.low %v942_v2, %v946_v3  ;;  %v1001_v48 = vld [vmem:[#allocation5 + $0x1ab0] sm:$0xff]  ;;  %v998_v0 = vld [vmem:[#allocation5 + $0x1a98] sm:$0xff] }
 0x3f5   :  { %7220 = vmatprep.subr.bf16.mxu0 %v10666_v13  ;;  %7548 = vmatprep.subr.bf16.mxu1 %v10668_v15  ;;  %v10722_v13 = vcombine.high %v949_v23, %v953_v7  ;;  %v957_v15 = vld [vmem:[#allocation5 + $0x1950] sm:$0xff]  ;;  %v1002_v2 = vld [vmem:[#allocation5 + $0x1ab8] sm:$0xff] }
 0x3f6   :  { %v10729_v57 = vcombine.low %v957_v15, %v961_v17  ;;  %v1009_v23 = vld [vmem:[#allocation5 + $0x1af0] sm:$0xff]  ;;  %v1006_v7 = vld [vmem:[#allocation5 + $0x1ad8] sm:$0xff] }
 0x3f8   :  { %7221 = vmatpush1.bf16.msra.mxu0 %v10665_v27  ;;  %7549 = vmatpush1.bf16.msra.mxu1 %v10667_v54  ;;  %v10723_v27 = vcombine.low %v950_v8, %v954_v9  ;;  %v10730_v54 = vcombine.high %v957_v15, %v961_v17  ;;  %v1017_v15 = vld [vmem:[#allocation5 + $0x1b30] sm:$0xff]  ;;  %v1014_v17 = vld [vmem:[#allocation5 + $0x1b18] sm:$0xff] }
 0x3f9   :  { %7222 = vmatprep.subr.bf16.mxu0 %v10674_v25  ;;  %7550 = vmatprep.subr.bf16.mxu1 %v10676_v30  ;;  %v10732_v25 = vcombine.high %v958_v19, %v962_v20  ;;  %v965_v30 = vld [vmem:[#allocation5 + $0x1990] sm:$0xff] }
 0x3fa   :  { %v10737_v41 = vcombine.low %v965_v30, %v969_v31 }
 0x3fc   :  { %7223 = vmatpush1.bf16.msra.mxu0 %v10673_v35  ;;  %7551 = vmatpush1.bf16.msra.mxu1 %v10675_v36  ;;  %v10731_v35 = vcombine.low %v958_v19, %v962_v20  ;;  %v10738_v36 = vcombine.high %v965_v30, %v969_v31  ;;  %v1018_v19 = vld [vmem:[#allocation5 + $0x1b38] sm:$0xff]  ;;  %v1025_v30 = vld [vmem:[#allocation5 + $0x1b70] sm:$0xff] }
 0x3fd   :  { %7224 = vmatprep.subr.bf16.mxu0 %v10682_v37  ;;  %7552 = vmatprep.subr.bf16.mxu1 %v10684_v1  ;;  %v10740_v37 = vcombine.high %v966_v32, %v970_v33  ;;  %v973_v1 = vld [vmem:[#allocation5 + $0x19d0] sm:$0xff]  ;;  %v1022_v31 = vld [vmem:[#allocation5 + $0x1b58] sm:$0xff] }
 0x3fe   :  { %v10745_v14 = vcombine.low %v973_v1, %v977_v34 }
 0x400   :  { %7225 = vmatpush1.bf16.msra.mxu0 %v10681_v42  ;;  %7553 = vmatpush1.bf16.msra.mxu1 %v10683_v43  ;;  %v10739_v42 = vcombine.low %v966_v32, %v970_v33  ;;  %v10746_v43 = vcombine.high %v973_v1, %v977_v34  ;;  %v1026_v32 = vld [vmem:[#allocation5 + $0x1b78] sm:$0xff]  ;;  %v1033_v1 = vld [vmem:[#allocation5 + $0x1bb0] sm:$0xff] }
 0x401   :  { %7235 = vmatprep.subr.bf16.mxu0 %v10690_v45  ;;  %7563 = vmatprep.subr.bf16.mxu1 %v10692_v46  ;;  %v10748_v45 = vcombine.high %v974_v38, %v978_v40  ;;  %v981_v46 = vld [vmem:[#allocation5 + $0x1a10] sm:$0xff]  ;;  %v1030_v34 = vld [vmem:[#allocation5 + $0x1b98] sm:$0xff] }
 0x403   :  { %7227 = vmatmul.mubr.bf16.vlgmr.msra.gmra.mrb[4].mxu0 %v12221_v44  ;;  %7555 = vmatmul.mubr.bf16.vlgmr.msra.gmra.mrb[4].mxu1 %v12221_v44  ;;  %v10707_v44 = vcombine.low %v934_v59, %v938_v12  ;;  %v994_v59 = vld [vmem:[#allocation5 + $0x1a78] sm:$0xff]  ;;  %v10753_v12 = vcombine.low %v981_v46, %v985_v47 }
 0x404   :  { %7236 = vmatpush1.bf16.msra.mxu0 %v10689_v51  ;;  %7564 = vmatpush1.bf16.msra.mxu1 %v10691_v39  ;;  %v10747_v51 = vcombine.low %v974_v38, %v978_v40  ;;  %v10754_v39 = vcombine.high %v981_v46, %v985_v47  ;;  %v1034_v38 = vld [vmem:[#allocation5 + $0x1bb8] sm:$0xff]  ;;  %v1041_v46 = vld [vmem:[#allocation5 + $0x1bf0] sm:$0xff] }
 0x405   :  { %7237 = vmatprep.subr.bf16.mxu0 %v10698_v52  ;;  %7565 = vmatprep.subr.bf16.mxu1 %v10700_v53  ;;  %v10756_v52 = vcombine.high %v982_v49, %v986_v50  ;;  %v989_v53 = vld [vmem:[#allocation5 + $0x1a50] sm:$0xff]  ;;  %v1038_v47 = vld [vmem:[#allocation5 + $0x1bd8] sm:$0xff] }
 0x406   :  { %7267 = vmatprep.mubr.bf16.mxu0 %v12223_v56  ;;  %7595 = vmatprep.mubr.bf16.mxu1 %v12223_v56  ;;  %v10724_v56 = vcombine.high %v950_v8, %v954_v9  ;;  %v10761_v3 = vcombine.low %v989_v53, %v993_v55  ;;  %v1010_v8 = vld [vmem:[#allocation5 + $0x1af8] sm:$0xff] }
 0x408   :  { %7238 = vmatpush1.bf16.msra.mxu0 %v10697_v61  ;;  %7566 = vmatpush1.bf16.msra.mxu1 %v10699_v26  ;;  %v10755_v61 = vcombine.low %v982_v49, %v986_v50  ;;  %v10762_v26 = vcombine.high %v989_v53, %v993_v55  ;;  %v1042_v49 = vld [vmem:[#allocation5 + $0x1bf8] sm:$0xff]  ;;  %v1049_v53 = vld [vmem:[#allocation5 + $0x1c30] sm:$0xff] }
 0x409   :  { %7239 = vmatprep.subr.bf16.mxu0 %v10706_v62  ;;  %7567 = vmatprep.subr.bf16.mxu1 %v10708_v63  ;;  %v10764_v62 = vcombine.high %v990_v58, %v994_v59  ;;  %v997_v63 = vld [vmem:[#allocation5 + $0x1a90] sm:$0xff]  ;;  %v1046_v55 = vld [vmem:[#allocation5 + $0x1c18] sm:$0xff] }
 0x40a   :  { %v10769_v9 = vcombine.low %v997_v63, %v1001_v48 }
 0x40c   :  { %7240 = vmatpush1.bf16.msra.mxu0 %v10705_v4  ;;  %7568 = vmatpush1.bf16.msra.mxu1 %v10707_v44  ;;  %v10763_v4 = vcombine.low %v990_v58, %v994_v59  ;;  %v10770_v44 = vcombine.high %v997_v63, %v1001_v48  ;;  %v1050_v58 = vld [vmem:[#allocation5 + $0x1c38] sm:$0xff]  ;;  %v1057_v63 = vld [vmem:[#allocation5 + $0x1c70] sm:$0xff] }
 0x40d   :  { %7241 = vmatprep.subr.bf16.mxu0 %v10714_v5  ;;  %7569 = vmatprep.subr.bf16.mxu1 %v10716_v6  ;;  %v10772_v5 = vcombine.high %v998_v0, %v1002_v2  ;;  %v1005_v6 = vld [vmem:[#allocation5 + $0x1ad0] sm:$0xff]  ;;  %v1054_v48 = vld [vmem:[#allocation5 + $0x1c58] sm:$0xff] }
 0x40e   :  { %v10777_v20 = vcombine.low %v1005_v6, %v1009_v23 }
 0x410   :  { %7242 = vmatpush1.bf16.msra.mxu0 %v10713_v10  ;;  %7570 = vmatpush1.bf16.msra.mxu1 %v10715_v11  ;;  %v10771_v10 = vcombine.low %v998_v0, %v1002_v2  ;;  %v10778_v11 = vcombine.high %v1005_v6, %v1009_v23  ;;  %v1058_v0 = vld [vmem:[#allocation5 + $0x1c78] sm:$0xff]  ;;  %v1065_v6 = vld [vmem:[#allocation5 + $0x1cb0] sm:$0xff] }
 0x411   :  { %7243 = vmatprep.subr.bf16.mxu0 %v10722_v13  ;;  %7571 = vmatprep.subr.bf16.mxu1 %v10724_v56  ;;  %v10780_v13 = vcombine.high %v1006_v7, %v1010_v8  ;;  %v1013_v56 = vld [vmem:[#allocation5 + $0x1b10] sm:$0xff]  ;;  %v1062_v23 = vld [vmem:[#allocation5 + $0x1c98] sm:$0xff] }
 0x412   :  { %v10785_v33 = vcombine.low %v1013_v56, %v1017_v15 }
 0x414   :  { %7244 = vmatpush1.bf16.msra.mxu0 %v10721_v21  ;;  %7572 = vmatpush1.bf16.msra.mxu1 %v10723_v27  ;;  %v10779_v21 = vcombine.low %v1006_v7, %v1010_v8  ;;  %v10786_v27 = vcombine.high %v1013_v56, %v1017_v15  ;;  %v1066_v7 = vld [vmem:[#allocation5 + $0x1cb8] sm:$0xff]  ;;  %v1073_v56 = vld [vmem:[#allocation5 + $0x1cf0] sm:$0xff] }
 0x415   :  { %7245 = vmatprep.subr.bf16.mxu0 %v10730_v54  ;;  %7573 = vmatprep.subr.bf16.mxu1 %v10732_v25  ;;  %v10788_v54 = vcombine.high %v1014_v17, %v1018_v19  ;;  %v1021_v25 = vld [vmem:[#allocation5 + $0x1b50] sm:$0xff]  ;;  %v1070_v15 = vld [vmem:[#allocation5 + $0x1cd8] sm:$0xff] }
 0x416   :  { %v10793_v40 = vcombine.low %v1021_v25, %v1025_v30 }
 0x418   :  { %7246 = vmatpush1.bf16.msra.mxu0 %v10729_v57  ;;  %7574 = vmatpush1.bf16.msra.mxu1 %v10731_v35  ;;  %v10787_v57 = vcombine.low %v1014_v17, %v1018_v19  ;;  %v10794_v35 = vcombine.high %v1021_v25, %v1025_v30  ;;  %v1074_v17 = vld [vmem:[#allocation5 + $0x1cf8] sm:$0xff] }
 0x419   :  { %7247 = vmatprep.subr.bf16.mxu0 %v10738_v36  ;;  %7575 = vmatprep.subr.bf16.mxu1 %v10740_v37  ;;  %v10796_v36 = vcombine.high %v1022_v31, %v1026_v32  ;;  %v1029_v37 = vld [vmem:[#allocation5 + $0x1b90] sm:$0xff]  ;;  %v1078_v25 = vld [vmem:[#allocation5 + $0x1d18] sm:$0xff] }
 0x41a   :  { %v10801_v50 = vcombine.low %v1029_v37, %v1033_v1  ;;  %v1082_v30 = vld [vmem:[#allocation5 + $0x1d38] sm:$0xff] }
 0x41c   :  { %7248 = vmatpush1.bf16.msra.mxu0 %v10737_v41  ;;  %7576 = vmatpush1.bf16.msra.mxu1 %v10739_v42  ;;  %v10795_v41 = vcombine.low %v1022_v31, %v1026_v32  ;;  %v10802_v42 = vcombine.high %v1029_v37, %v1033_v1  ;;  %v10843_v32 = vcombine.low %v1070_v15, %v1074_v17  ;;  %v1090_v37 = vld [vmem:[#allocation5 + $0x1d78] sm:$0xff] }
 0x41d   :  { %7249 = vmatprep.subr.bf16.mxu0 %v10746_v43  ;;  %7577 = vmatprep.subr.bf16.mxu1 %v10748_v45  ;;  %v10804_v43 = vcombine.high %v1030_v34, %v1034_v38  ;;  %v1037_v45 = vld [vmem:[#allocation5 + $0x1bd0] sm:$0xff] }
 0x41e   :  { %v10809_v59 = vcombine.low %v1037_v45, %v1041_v46 }
 0x420   :  { %7250 = vmatpush1.bf16.msra.mxu0 %v10745_v14  ;;  %7578 = vmatpush1.bf16.msra.mxu1 %v10747_v51  ;;  %v10803_v14 = vcombine.low %v1030_v34, %v1034_v38  ;;  %v10810_v51 = vcombine.high %v1037_v45, %v1041_v46  ;;  %v10851_v34 = vcombine.low %v1078_v25, %v1082_v30  ;;  %v1098_v45 = vld [vmem:[#allocation5 + $0x1db8] sm:$0xff] }
 0x421   :  { %7251 = vmatprep.subr.bf16.mxu0 %v10754_v39  ;;  %7579 = vmatprep.subr.bf16.mxu1 %v10756_v52  ;;  %v10812_v39 = vcombine.high %v1038_v47, %v1042_v49  ;;  %v1045_v52 = vld [vmem:[#allocation5 + $0x1c10] sm:$0xff] }
 0x422   :  { %v10817_v2 = vcombine.low %v1045_v52, %v1049_v53 }
 0x424   :  { %7252 = vmatpush1.bf16.msra.mxu0 %v10753_v12  ;;  %7580 = vmatpush1.bf16.msra.mxu1 %v10755_v61  ;;  %v10811_v12 = vcombine.low %v1038_v47, %v1042_v49  ;;  %v10818_v61 = vcombine.high %v1045_v52, %v1049_v53  ;;  %v1106_v52 = vld [vmem:[#allocation5 + $0x1df8] sm:$0xff] }
 0x425   :  { %7253 = vmatprep.subr.bf16.mxu0 %v10762_v26  ;;  %7581 = vmatprep.subr.bf16.mxu1 %v10764_v62  ;;  %v10820_v26 = vcombine.high %v1046_v55, %v1050_v58  ;;  %v1053_v62 = vld [vmem:[#allocation5 + $0x1c50] sm:$0xff] }
 0x426   :  { %v10825_v8 = vcombine.low %v1053_v62, %v1057_v63 }
 0x428   :  { %7254 = vmatpush1.bf16.msra.mxu0 %v10761_v3  ;;  %7582 = vmatpush1.bf16.msra.mxu1 %v10763_v4  ;;  %v10819_v3 = vcombine.low %v1046_v55, %v1050_v58  ;;  %v10826_v4 = vcombine.high %v1053_v62, %v1057_v63  ;;  %v1114_v62 = vld [vmem:[#allocation5 + $0x1e38] sm:$0xff] }
 0x429   :  { %7255 = vmatprep.subr.bf16.mxu0 %v10770_v44  ;;  %7583 = vmatprep.subr.bf16.mxu1 %v10772_v5  ;;  %v10828_v44 = vcombine.high %v1054_v48, %v1058_v0  ;;  %v1061_v5 = vld [vmem:[#allocation5 + $0x1c90] sm:$0xff] }
 0x42a   :  { %v10833_v19 = vcombine.low %v1061_v5, %v1065_v6 }
 0x42c   :  { %7256 = vmatpush1.bf16.msra.mxu0 %v10769_v9  ;;  %7584 = vmatpush1.bf16.msra.mxu1 %v10771_v10  ;;  %v10827_v9 = vcombine.low %v1054_v48, %v1058_v0  ;;  %v10834_v10 = vcombine.high %v1061_v5, %v1065_v6  ;;  %v1122_v5 = vld [vmem:[#allocation5 + $0x1e78] sm:$0xff] }
 0x42d   :  { %7257 = vmatprep.subr.bf16.mxu0 %v10778_v11  ;;  %7585 = vmatprep.subr.bf16.mxu1 %v10780_v13  ;;  %v10836_v11 = vcombine.high %v1062_v23, %v1066_v7  ;;  %v1069_v13 = vld [vmem:[#allocation5 + $0x1cd0] sm:$0xff] }
 0x42e   :  { %v10841_v31 = vcombine.low %v1069_v13, %v1073_v56 }
 0x430   :  { %7258 = vmatpush1.bf16.msra.mxu0 %v10777_v20  ;;  %7586 = vmatpush1.bf16.msra.mxu1 %v10779_v21  ;;  %v10842_v20 = vcombine.high %v1069_v13, %v1073_v56  ;;  %v10844_v21 = vcombine.high %v1070_v15, %v1074_v17  ;;  %v1130_v13 = vld [vmem:[#allocation5 + $0x1eb8] sm:$0xff] }
 0x431   :  { %7259 = vmatprep.subr.bf16.mxu0 %v10786_v27  ;;  %7587 = vmatprep.subr.bf16.mxu1 %v10788_v54  ;;  %v1077_v27 = vld [vmem:[#allocation5 + $0x1d10] sm:$0xff] }
 0x432   :  { %v1081_v54 = vld [vmem:[#allocation5 + $0x1d30] sm:$0xff] }
 0x433   :  { %v10849_v1 = vcombine.low %v1077_v27, %v1081_v54 }
 0x434   :  { %7260 = vmatpush1.bf16.msra.mxu0 %v10785_v33  ;;  %7588 = vmatpush1.bf16.msra.mxu1 %v10787_v57  ;;  %v10850_v33 = vcombine.high %v1077_v27, %v1081_v54  ;;  %v1085_v57 = vld [vmem:[#allocation5 + $0x1d50] sm:$0xff]  ;;  %v1138_v27 = vld [vmem:[#allocation5 + $0x1ef8] sm:$0xff] }
 0x435   :  { %7261 = vmatprep.subr.bf16.mxu0 %v10794_v35  ;;  %7589 = vmatprep.subr.bf16.mxu1 %v10796_v36  ;;  %v1089_v35 = vld [vmem:[#allocation5 + $0x1d70] sm:$0xff]  ;;  %v1086_v36 = vld [vmem:[#allocation5 + $0x1d58] sm:$0xff] }
 0x436   :  { %v10858_v38 = vcombine.high %v1085_v57, %v1089_v35  ;;  %v10857_v46 = vcombine.low %v1085_v57, %v1089_v35  ;;  %v10859_v47 = vcombine.low %v1086_v36, %v1090_v37  ;;  %v1142_v57 = vld [vmem:[#allocation5 + $0x1f18] sm:$0xff] }
 0x437   :  { %v1146_v35 = vld [vmem:[#allocation5 + $0x1f38] sm:$0xff] }
 0x438   :  { %7262 = vmatpush1.bf16.msra.mxu0 %v10793_v40  ;;  %7590 = vmatpush1.bf16.msra.mxu1 %v10795_v41  ;;  %v10860_v40 = vcombine.high %v1086_v36, %v1090_v37  ;;  %v1093_v41 = vld [vmem:[#allocation5 + $0x1d90] sm:$0xff] }
 0x439   :  { %7263 = vmatprep.subr.bf16.mxu0 %v10802_v42  ;;  %7591 = vmatprep.subr.bf16.mxu1 %v10804_v43  ;;  %v1097_v42 = vld [vmem:[#allocation5 + $0x1db0] sm:$0xff]  ;;  %v1094_v43 = vld [vmem:[#allocation5 + $0x1d98] sm:$0xff] }
 0x43a   :  { %v10866_v49 = vcombine.high %v1093_v41, %v1097_v42  ;;  %v10865_v53 = vcombine.low %v1093_v41, %v1097_v42  ;;  %v10867_v55 = vcombine.low %v1094_v43, %v1098_v45  ;;  %v1150_v42 = vld [vmem:[#allocation5 + $0x1f58] sm:$0xff] }
 0x43c   :  { %7264 = vmatpush1.bf16.msra.mxu0 %v10801_v50  ;;  %7592 = vmatpush1.bf16.msra.mxu1 %v10803_v14  ;;  %v10868_v50 = vcombine.high %v1094_v43, %v1098_v45  ;;  %v1101_v14 = vld [vmem:[#allocation5 + $0x1dd0] sm:$0xff]  ;;  %v1154_v43 = vld [vmem:[#allocation5 + $0x1f78] sm:$0xff] }
 0x43d   :  { %7265 = vmatprep.subr.bf16.mxu0 %v10810_v51  ;;  %7593 = vmatprep.subr.bf16.mxu1 %v10812_v39  ;;  %v1105_v51 = vld [vmem:[#allocation5 + $0x1df0] sm:$0xff]  ;;  %v1102_v39 = vld [vmem:[#allocation5 + $0x1dd8] sm:$0xff] }
 0x43e   :  { %v10874_v58 = vcombine.high %v1101_v14, %v1105_v51  ;;  %v10873_v63 = vcombine.low %v1101_v14, %v1105_v51  ;;  %v10875_v48 = vcombine.low %v1102_v39, %v1106_v52  ;;  %v1161_v14 = vld [vmem:[#allocation5 + $0x1fb0] sm:$0xff] }
 0x440   :  { %7266 = vmatpush1.bf16.msra.mxu0 %v10809_v59  ;;  %7594 = vmatpush1.bf16.msra.mxu1 %v10811_v12  ;;  %v10876_v59 = vcombine.high %v1102_v39, %v1106_v52  ;;  %v1109_v12 = vld [vmem:[#allocation5 + $0x1e10] sm:$0xff]  ;;  %v1158_v39 = vld [vmem:[#allocation5 + $0x1f98] sm:$0xff] }
 0x441   :  { %7276 = vmatprep.subr.bf16.mxu0 %v10818_v61  ;;  %7604 = vmatprep.subr.bf16.mxu1 %v10820_v26  ;;  %v1113_v61 = vld [vmem:[#allocation5 + $0x1e30] sm:$0xff]  ;;  %v1110_v26 = vld [vmem:[#allocation5 + $0x1e18] sm:$0xff] }
 0x442   :  { %v10882_v0 = vcombine.high %v1109_v12, %v1113_v61  ;;  %v10881_v6 = vcombine.low %v1109_v12, %v1113_v61  ;;  %v1162_v52 = vld [vmem:[#allocation5 + $0x1fb8] sm:$0xff]  ;;  %v1165_v61 = vld [vmem:[#allocation5 + $0x1fd0] sm:$0xff] }
 0x443   :  { %7268 = vmatmul.mubr.bf16.vlgmr.msra.gmra.mrb[4].mxu0 %v12229_v16  ;;  %7596 = vmatmul.mubr.bf16.vlgmr.msra.gmra.mrb[4].mxu1 %v12229_v16  ;;  %v10835_v16 = vcombine.low %v1062_v23, %v1066_v7  ;;  %v10883_v23 = vcombine.low %v1110_v26, %v1114_v62  ;;  %v10932_v12 = vcombine.high %v1158_v39, %v1162_v52 }
 0x444   :  { %7277 = vmatpush1.bf16.msra.mxu0 %v10817_v2  ;;  %7605 = vmatpush1.bf16.msra.mxu1 %v10819_v3  ;;  %v10884_v2 = vcombine.high %v1110_v26, %v1114_v62  ;;  %v1117_v3 = vld [vmem:[#allocation5 + $0x1e50] sm:$0xff] }
 0x445   :  { %7278 = vmatprep.subr.bf16.mxu0 %v10826_v4  ;;  %7606 = vmatprep.subr.bf16.mxu1 %v10828_v44  ;;  %v1121_v4 = vld [vmem:[#allocation5 + $0x1e70] sm:$0xff]  ;;  %v1118_v44 = vld [vmem:[#allocation5 + $0x1e58] sm:$0xff] }
 0x446   :  { %7308 = vmatprep.mubr.bf16.mxu0 %v12231_v29  ;;  %7636 = vmatprep.mubr.bf16.mxu1 %v12231_v29  ;;  %v10852_v29 = vcombine.high %v1078_v25, %v1082_v30  ;;  %v10890_v7 = vcombine.high %v1117_v3, %v1121_v4  ;;  %v10889_v56 = vcombine.low %v1117_v3, %v1121_v4  ;;  %v1169_v26 = vld [vmem:[#allocation5 + $0x1ff0] sm:$0xff] }
 0x447   :  { %v10891_v15 = vcombine.low %v1118_v44, %v1122_v5  ;;  %v10938_v3 = vcombine.high %v1165_v61, %v1169_v26 }
 0x448   :  { %7279 = vmatpush1.bf16.msra.mxu0 %v10825_v8  ;;  %7607 = vmatpush1.bf16.msra.mxu1 %v10827_v9  ;;  %v10892_v8 = vcombine.high %v1118_v44, %v1122_v5  ;;  %v1125_v9 = vld [vmem:[#allocation5 + $0x1e90] sm:$0xff]  ;;  %v10937_v5 = vcombine.low %v1165_v61, %v1169_v26  ;;  %v11504_v61 = vld [vmem:[#allocation8 + $0x164] ss:$16 sps:$4 sm:$0xff]  }
 0x449   :  { %7280 = vmatprep.subr.bf16.mxu0 %v10834_v10  ;;  %7608 = vmatprep.subr.bf16.mxu1 %v10836_v11  ;;  %v1129_v10 = vld [vmem:[#allocation5 + $0x1eb0] sm:$0xff]  ;;  %v1126_v11 = vld [vmem:[#allocation5 + $0x1e98] sm:$0xff] }
 0x44a   :  { %v10898_v17 = vcombine.high %v1125_v9, %v1129_v10  ;;  %v10897_v54 = vcombine.low %v1125_v9, %v1129_v10  ;;  %v10899_v25 = vcombine.low %v1126_v11, %v1130_v13  ;;  %v11436_v9 = vld [vmem:[#allocation8] ss:$16 sps:$4 sm:$0xff]   ;;  %v11439_v10 = vld [vmem:[#allocation8 + $0x8] ss:$16 sps:$4 sm:$0xff]   ;;  %v11507_v26 = vld [vmem:[#allocation8 + $0x16c] ss:$16 sps:$4 sm:$0xff]  }
 0x44c   :  { %7281 = vmatpush1.bf16.msra.mxu0 %v10833_v19  ;;  %7609 = vmatpush1.bf16.msra.mxu1 %v10835_v16  ;;  %v10900_v19 = vcombine.high %v1126_v11, %v1130_v13  ;;  %v1133_v16 = vld [vmem:[#allocation5 + $0x1ed0] sm:$0xff]  ;;  %v11444_v11 = vld [vmem:[#allocation8 + $0x24] ss:$16 sps:$4 sm:$0xff]  }
 0x44d   :  { %7282 = vmatprep.subr.bf16.mxu0 %v10842_v20  ;;  %7610 = vmatprep.subr.bf16.mxu1 %v10844_v21  ;;  %v1137_v20 = vld [vmem:[#allocation5 + $0x1ef0] sm:$0xff]  ;;  %v1134_v21 = vld [vmem:[#allocation5 + $0x1ed8] sm:$0xff] }
 0x44e   :  { %v10906_v30 = vcombine.high %v1133_v16, %v1137_v20  ;;  %v10905_v36 = vcombine.low %v1133_v16, %v1137_v20  ;;  %v10907_v37 = vcombine.low %v1134_v21, %v1138_v27  ;;  %v11448_v16 = vld [vmem:[#allocation8 + $0x40] ss:$16 sps:$4 sm:$0xff]   ;;  %v11451_v20 = vld [vmem:[#allocation8 + $0x48] ss:$16 sps:$4 sm:$0xff]  }
 0x450   :  { %7283 = vmatpush1.bf16.msra.mxu0 %v10841_v31  ;;  %7611 = vmatpush1.bf16.msra.mxu1 %v10843_v32  ;;  %v10908_v31 = vcombine.high %v1134_v21, %v1138_v27  ;;  %v1141_v32 = vld [vmem:[#allocation5 + $0x1f10] sm:$0xff]  ;;  %v11456_v21 = vld [vmem:[#allocation8 + $0x64] ss:$16 sps:$4 sm:$0xff]  }
 0x451   :  { %7284 = vmatprep.subr.bf16.mxu0 %v10850_v33  ;;  %7612 = vmatprep.subr.bf16.mxu1 %v10852_v29  ;;  %v1145_v33 = vld [vmem:[#allocation5 + $0x1f30] sm:$0xff]  ;;  %v1173_v29 = vlaneseq }
 0x452   :  { %v10913_v45 = vcombine.low %v1141_v32, %v1145_v33  ;;  %v11459_v27 = vld [vmem:[#allocation8 + $0x6c] ss:$16 sps:$4 sm:$0xff]  }
 0x453   :  { %v12279_v41 = vshrl.u32 %v1173_v29, 7  ;;  %v11471_v29 = vld [vmem:[#allocation8 + $0xac] ss:$16 sps:$4 sm:$0xff]  }
 0x454   :  { %7285 = vmatpush1.bf16.msra.mxu0 %v10849_v1  ;;  %7613 = vmatpush1.bf16.msra.mxu1 %v10851_v34  ;;  %v10914_v1 = vcombine.high %v1141_v32, %v1145_v33  ;;  %v10916_v34 = vcombine.high %v1142_v57, %v1146_v35  ;;  %v11463_v32 = vld [vmem:[#allocation8 + $0x88] ss:$16 sps:$4 sm:$0xff]   ;;  %v11468_v33 = vld [vmem:[#allocation8 + $0xa4] ss:$16 sps:$4 sm:$0xff]  }
 0x455   :  { %7286 = vmatprep.subr.bf16.mxu0 %v10858_v38  ;;  %7614 = vmatprep.subr.bf16.mxu1 %v10860_v40  ;;  %v1149_v38 = vld [vmem:[#allocation5 + $0x1f50] sm:$0xff]  ;;  %v1179_v51 = vsub.s32 1, %v12279_v41 }
 0x456   :  { %v1153_v40 = vld [vmem:[#allocation5 + $0x1f70] sm:$0xff] }
 0x458   :  { %7287 = vmatpush1.bf16.msra.mxu0 %v10857_v46  ;;  %7615 = vmatpush1.bf16.msra.mxu1 %v10859_v47  ;;  %v10915_v46 = vcombine.low %v1142_v57, %v1146_v35  ;;  %v10922_v47 = vcombine.high %v1149_v38, %v1153_v40  ;;  %v11466_v57 = vld [vmem:[#allocation8 + $0xa0] ss:$16 sps:$4 sm:$0xff]   ;;  %v11469_v35 = vld [vmem:[#allocation8 + $0xa8] ss:$16 sps:$4 sm:$0xff]  }
 0x459   :  { %7288 = vmatprep.subr.bf16.mxu0 %v10866_v49  ;;  %7616 = vmatprep.subr.bf16.mxu1 %v10868_v50  ;;  %v10924_v49 = vcombine.high %v1150_v42, %v1154_v43  ;;  %v1157_v50 = vld [vmem:[#allocation5 + $0x1f90] sm:$0xff] }
 0x45c   :  { %7289 = vmatpush1.bf16.msra.mxu0 %v10865_v53  ;;  %7617 = vmatpush1.bf16.msra.mxu1 %v10867_v55  ;;  %v12282_v53 = vld [vmem:[#allocation7] sm:$0xff]  ;;  %v10921_v55 = vcombine.low %v1149_v38, %v1153_v40  ;;  %v11480_v38 = vld [vmem:[#allocation8 + $0xe4] ss:$16 sps:$4 sm:$0xff]  }
 0x45d   :  { %7290 = vmatprep.subr.bf16.mxu0 %v10874_v58  ;;  %7618 = vmatprep.subr.bf16.mxu1 %v10876_v59  ;;  %v10923_v58 = vcombine.low %v1150_v42, %v1154_v43  ;;  %v10930_v59 = vcombine.high %v1157_v50, %v1161_v14  ;;  %v1180_v62 = vrot.slane %v12282_v53, %v1179_v51  ;;  %v11483_v40 = vld [vmem:[#allocation8 + $0xec] ss:$16 sps:$4 sm:$0xff]   ;;  %v11478_v42 = vld [vmem:[#allocation8 + $0xe0] ss:$16 sps:$4 sm:$0xff]   ;;  %v11481_v43 = vld [vmem:[#allocation8 + $0xe8] ss:$16 sps:$4 sm:$0xff]  }
 0x45f   :  { %v11275_v44 = vadd.f32 %v12259_v24, %v1180_v62  ;;  %v11447_v24 = vld [vmem:[#allocation8 + $0x2c] ss:$16 sps:$4 sm:$0xff]   ;;  %v11502_v62 = vld [vmem:[#allocation8 + $0x160] ss:$16 sps:$4 sm:$0xff]  }
 0x460   :  { %7291 = vmatpush1.bf16.msra.mxu0 %v10873_v63  ;;  %7619 = vmatpush1.bf16.msra.mxu1 %v10875_v48  ;;  %v1166_v63 = vld [vmem:[#allocation5 + $0x1fd8] sm:$0xff] }
 0x461   :  { %7292 = vmatprep.subr.bf16.mxu0 %v10882_v0  ;;  %7620 = vmatprep.subr.bf16.mxu1 %v10884_v2  ;;  %v1170_v48 = vld [vmem:[#allocation5 + $0x1ff8] sm:$0xff]  ;;  %v10929_v0 = vcombine.low %v1157_v50, %v1161_v14  ;;  %v10931_v2 = vcombine.low %v1158_v39, %v1162_v52  ;;  %v11495_v14 = vld [vmem:[#allocation8 + $0x12c] ss:$16 sps:$4 sm:$0xff]   ;;  %v11493_v52 = vld [vmem:[#allocation8 + $0x128] ss:$16 sps:$4 sm:$0xff]  }
 0x462   :  { %v10940_v4 = vcombine.high %v1166_v63, %v1170_v48  ;;  %v11492_v50 = vld [vmem:[#allocation8 + $0x124] ss:$16 sps:$4 sm:$0xff]   ;;  %v11490_v39 = vld [vmem:[#allocation8 + $0x120] ss:$16 sps:$4 sm:$0xff]  }
 0x464   :  { %7293 = vmatpush1.bf16.msra.mxu0 %v10881_v6  ;;  %7621 = vmatpush1.bf16.msra.mxu1 %v10883_v23  ;;  %v10939_v6 = vcombine.low %v1166_v63, %v1170_v48  ;;  %v11438_v23 = vld [vmem:[#allocation8 + $0x4] ss:$16 sps:$4 sm:$0xff]   ;;  %v11505_v63 = vld [vmem:[#allocation8 + $0x168] ss:$16 sps:$4 sm:$0xff]  }
 0x465   :  { %7294 = vmatprep.subr.bf16.mxu0 %v10890_v7  ;;  %7622 = vmatprep.subr.bf16.mxu1 %v10892_v8  ;;  %v11441_v7 = vld [vmem:[#allocation8 + $0xc] ss:$16 sps:$4 sm:$0xff]   ;;  %v7646_v8 = vmax.f32 %v11275_v44, 0.0  ;;  %v11510_v48 = vld [vmem:[#allocation8 + $0x184] ss:$16 sps:$4 sm:$0xff]  }
 0x466   :  { %v11516_v44 = vld [vmem:[#allocation8 + $0x1a4] ss:$16 sps:$4 sm:$0xff]  }
 0x467   :  { %v7654_v13 = vpack.c.bf16 %v7646_v8, %v7646_v8  ;;  %v11517_v8 = vld [vmem:[#allocation8 + $0x1a8] ss:$16 sps:$4 sm:$0xff]  }
 0x468   :  { %7295 = vmatpush1.bf16.msra.mxu0 %v10889_v56  ;;  %7623 = vmatpush1.bf16.msra.mxu1 %v10891_v15  ;;  %v11442_v56 = vld [vmem:[#allocation8 + $0x20] ss:$16 sps:$4 sm:$0xff]   ;;  %v11445_v15 = vld [vmem:[#allocation8 + $0x28] ss:$16 sps:$4 sm:$0xff]  }
 0x469   :  { %7296 = vmatprep.subr.bf16.mxu0 %v10898_v17  ;;  %7624 = vmatprep.subr.bf16.mxu1 %v10900_v19  ;;  %v11450_v17 = vld [vmem:[#allocation8 + $0x44] ss:$16 sps:$4 sm:$0xff]   ;;  %v11453_v19 = vld [vmem:[#allocation8 + $0x4c] ss:$16 sps:$4 sm:$0xff]  }
 0x46c   :  { %7297 = vmatpush1.bf16.msra.mxu0 %v10897_v54  ;;  %7625 = vmatpush1.bf16.msra.mxu1 %v10899_v25  ;;  %v11457_v54 = vld [vmem:[#allocation8 + $0x68] ss:$16 sps:$4 sm:$0xff]   ;;  %v11462_v25 = vld [vmem:[#allocation8 + $0x84] ss:$16 sps:$4 sm:$0xff]  }
 0x46d   :  { %7298 = vmatprep.subr.bf16.mxu0 %v10906_v30  ;;  %7626 = vmatprep.subr.bf16.mxu1 %v10908_v31  ;;  %v11465_v30 = vld [vmem:[#allocation8 + $0x8c] ss:$16 sps:$4 sm:$0xff]   ;;  %v11460_v31 = vld [vmem:[#allocation8 + $0x80] ss:$16 sps:$4 sm:$0xff]  }
 0x470   :  { %7299 = vmatpush1.bf16.msra.mxu0 %v10905_v36  ;;  %7627 = vmatpush1.bf16.msra.mxu1 %v10907_v37  ;;  %v11474_v36 = vld [vmem:[#allocation8 + $0xc4] ss:$16 sps:$4 sm:$0xff]   ;;  %v11477_v37 = vld [vmem:[#allocation8 + $0xcc] ss:$16 sps:$4 sm:$0xff]  }
 0x471   :  { %7300 = vmatprep.subr.bf16.mxu0 %v10914_v1  ;;  %7628 = vmatprep.subr.bf16.mxu1 %v10916_v34  ;;  %v11472_v1 = vld [vmem:[#allocation8 + $0xc0] ss:$16 sps:$4 sm:$0xff]   ;;  %v11475_v34 = vld [vmem:[#allocation8 + $0xc8] ss:$16 sps:$4 sm:$0xff]  }
 0x474   :  { %7301 = vmatpush1.bf16.msra.mxu0 %v10913_v45  ;;  %7629 = vmatpush1.bf16.msra.mxu1 %v10915_v46  ;;  %v11486_v45 = vld [vmem:[#allocation8 + $0x104] ss:$16 sps:$4 sm:$0xff]   ;;  %v11489_v46 = vld [vmem:[#allocation8 + $0x10c] ss:$16 sps:$4 sm:$0xff]  }
 0x475   :  { %7302 = vmatprep.subr.bf16.mxu0 %v10922_v47  ;;  %7630 = vmatprep.subr.bf16.mxu1 %v10924_v49  ;;  %v11484_v47 = vld [vmem:[#allocation8 + $0x100] ss:$16 sps:$4 sm:$0xff]   ;;  %v11487_v49 = vld [vmem:[#allocation8 + $0x108] ss:$16 sps:$4 sm:$0xff]  }
 0x478   :  { %7303 = vmatpush1.bf16.msra.mxu0 %v10921_v55  ;;  %7631 = vmatpush1.bf16.msra.mxu1 %v10923_v58  ;;  %v11498_v55 = vld [vmem:[#allocation8 + $0x144] ss:$16 sps:$4 sm:$0xff]   ;;  %v11501_v58 = vld [vmem:[#allocation8 + $0x14c] ss:$16 sps:$4 sm:$0xff]  }
 0x479   :  { %7304 = vmatprep.subr.bf16.mxu0 %v10930_v59  ;;  %7632 = vmatprep.subr.bf16.mxu1 %v10932_v12  ;;  %v11496_v59 = vld [vmem:[#allocation8 + $0x140] ss:$16 sps:$4 sm:$0xff]   ;;  %v11499_v12 = vld [vmem:[#allocation8 + $0x148] ss:$16 sps:$4 sm:$0xff]  }
 0x47c   :  { %7305 = vmatpush1.bf16.msra.mxu0 %v10929_v0  ;;  %7633 = vmatpush1.bf16.msra.mxu1 %v10931_v2  ;;  %v11513_v0 = vld [vmem:[#allocation8 + $0x18c] ss:$16 sps:$4 sm:$0xff]   ;;  %v11508_v2 = vld [vmem:[#allocation8 + $0x180] ss:$16 sps:$4 sm:$0xff]  }
 0x47d   :  { %7306 = vmatprep.subr.bf16.mxu0 %v10938_v3  ;;  %7634 = vmatprep.subr.bf16.mxu1 %v10940_v4  ;;  %v1175_v3 = vsub.s32 0, %v12279_v41  ;;  %v11511_v4 = vld [vmem:[#allocation8 + $0x188] ss:$16 sps:$4 sm:$0xff]  }
 0x480   :  { %7307 = vmatpush1.bf16.msra.mxu0 %v10937_v5  ;;  %7635 = vmatpush1.bf16.msra.mxu1 %v10939_v6  ;;  %v11519_v5 = vld [vmem:[#allocation8 + $0x1ac] ss:$16 sps:$4 sm:$0xff]   ;;  %v1187_v6 = vsub.s32 3, %v12279_v41 }
 0x481   :  { %9219 = vmatprep.subr.bf16.mxu0 %v11438_v23  ;;  %9383 = vmatprep.subr.bf16.mxu1 %v11441_v7  ;;  %v11514_v23 = vld [vmem:[#allocation8 + $0x1a0] ss:$16 sps:$4 sm:$0xff]   ;;  %v1176_v7 = vrot.slane %v12282_v53, %v1175_v3 }
 0x483   :  { %7309 = vmatmul.mubr.bf16.vlgmr.msra.gmra.mrb[4].mxu0 %v12237_v60  ;;  %7637 = vmatmul.mubr.bf16.vlgmr.msra.gmra.mrb[4].mxu1 %v12237_v60  ;;  %v11454_v60 = vld [vmem:[#allocation8 + $0x60] ss:$16 sps:$4 sm:$0xff]  }
 0x484   :  { %9220 = vmatpush1.bf16.msra.mxu0 %v11436_v9  ;;  %9251 = vmatprep.mubr.bf16.mxu0 %v7654_v13  ;;  %v11522_v9 = vld [vmem:[#allocation8 + $0x1c4] ss:$16 sps:$4 sm:$0xff]  }
 0x485   :  { %9384 = vmatpush1.bf16.msra.mxu1 %v11439_v10  ;;  %9415 = vmatprep.mubr.bf16.mxu1 %v7654_v13  ;;  %v11525_v10 = vld [vmem:[#allocation8 + $0x1cc] ss:$16 sps:$4 sm:$0xff]   ;;  %v11520_v13 = vld [vmem:[#allocation8 + $0x1c0] ss:$16 sps:$4 sm:$0xff]  }
 0x486   :  { %9221 = vmatprep.subr.bf16.mxu0 %v11444_v11  ;;  %9385 = vmatprep.subr.bf16.mxu1 %v11447_v24  ;;  %v1188_v11 = vrot.slane %v12282_v53, %v1187_v6  ;;  %v11274_v24 = vadd.f32 %v12255_v18, %v1176_v7  ;;  %v11532_v18 = vld [vmem:[#allocation8 + $0x200] ss:$16 sps:$4 sm:$0xff]   ;;  %v11597_v7 = vld [vmem:[#allocation8 + $0x34c] ss:$16 sps:$4 sm:$0xff]  }
 0x488   :  { %9222 = vmatpush1.bf16.msra.mxu0 %v11442_v56  ;;  %v11523_v56 = vld [vmem:[#allocation8 + $0x1c8] ss:$16 sps:$4 sm:$0xff]  }
 0x489   :  { %9386 = vmatpush1.bf16.msra.mxu1 %v11445_v15  ;;  %9223 = vmatprep.subr.bf16.mxu0 %v11450_v17  ;;  %v11528_v15 = vld [vmem:[#allocation8 + $0x1e4] ss:$16 sps:$4 sm:$0xff]   ;;  %v11531_v17 = vld [vmem:[#allocation8 + $0x1ec] ss:$16 sps:$4 sm:$0xff]  }
 0x48a   :  { %9387 = vmatprep.subr.bf16.mxu1 %v11453_v19  ;;  %v11277_v19 = vadd.f32 %v12261_v28, %v1188_v11  ;;  %v11543_v28 = vld [vmem:[#allocation8 + $0x22c] ss:$16 sps:$4 sm:$0xff]  }
 0x48b   :  { %v11603_v11 = vld [vmem:[#allocation8 + $0x36c] ss:$16 sps:$4 sm:$0xff]  }
 0x48c   :  { %9224 = vmatpush1.bf16.msra.mxu0 %v11448_v16  ;;  %v11526_v16 = vld [vmem:[#allocation8 + $0x1e0] ss:$16 sps:$4 sm:$0xff]  }
 0x48d   :  { %9388 = vmatpush1.bf16.msra.mxu1 %v11451_v20  ;;  %9225 = vmatprep.subr.bf16.mxu0 %v11456_v21  ;;  %v7645_v20 = vmax.f32 %v11274_v24, 0.0  ;;  %v11529_v21 = vld [vmem:[#allocation8 + $0x1e8] ss:$16 sps:$4 sm:$0xff]  }
 0x48e   :  { %9389 = vmatprep.subr.bf16.mxu1 %v11459_v27  ;;  %v11534_v27 = vld [vmem:[#allocation8 + $0x204] ss:$16 sps:$4 sm:$0xff]   ;;  %v11601_v24 = vld [vmem:[#allocation8 + $0x368] ss:$16 sps:$4 sm:$0xff]  }
 0x490   :  { %9226 = vmatpush1.bf16.msra.mxu0 %v11454_v60  ;;  %v11537_v60 = vld [vmem:[#allocation8 + $0x20c] ss:$16 sps:$4 sm:$0xff]  }
 0x491   :  { %9390 = vmatpush1.bf16.msra.mxu1 %v11457_v54  ;;  %9227 = vmatprep.subr.bf16.mxu0 %v11462_v25  ;;  %v7648_v54 = vmax.f32 %v11277_v19, 0.0  ;;  %v7653_v25 = vpack.c.bf16 %v7645_v20, %v7645_v20  ;;  %v1183_v19 = vsub.s32 2, %v12279_v41  ;;  %v11612_v20 = vld [vmem:[#allocation8 + $0x3a4] ss:$16 sps:$4 sm:$0xff]  }
 0x492   :  { %9391 = vmatprep.subr.bf16.mxu1 %v11465_v30  ;;  %v11535_v30 = vld [vmem:[#allocation8 + $0x208] ss:$16 sps:$4 sm:$0xff]  }
 0x494   :  { %9228 = vmatpush1.bf16.msra.mxu0 %v11460_v31  ;;  %v11540_v31 = vld [vmem:[#allocation8 + $0x224] ss:$16 sps:$4 sm:$0xff]  }
 0x495   :  { %9392 = vmatpush1.bf16.msra.mxu1 %v11463_v32  ;;  %9229 = vmatprep.subr.bf16.mxu0 %v11468_v33  ;;  %v7656_v32 = vpack.c.bf16 %v7648_v54, %v7648_v54  ;;  %v11538_v33 = vld [vmem:[#allocation8 + $0x220] ss:$16 sps:$4 sm:$0xff]   ;;  %v11613_v54 = vld [vmem:[#allocation8 + $0x3a8] ss:$16 sps:$4 sm:$0xff]  }
 0x496   :  { %9393 = vmatprep.subr.bf16.mxu1 %v11471_v29  ;;  %v11541_v29 = vld [vmem:[#allocation8 + $0x228] ss:$16 sps:$4 sm:$0xff]  }
 0x498   :  { %9230 = vmatpush1.bf16.msra.mxu0 %v11466_v57  ;;  %v11546_v57 = vld [vmem:[#allocation8 + $0x244] ss:$16 sps:$4 sm:$0xff]  }
 0x499   :  { %9394 = vmatpush1.bf16.msra.mxu1 %v11469_v35  ;;  %9231 = vmatprep.subr.bf16.mxu0 %v11474_v36  ;;  %v11549_v35 = vld [vmem:[#allocation8 + $0x24c] ss:$16 sps:$4 sm:$0xff]   ;;  %v11544_v36 = vld [vmem:[#allocation8 + $0x240] ss:$16 sps:$4 sm:$0xff]  }
 0x49a   :  { %9395 = vmatprep.subr.bf16.mxu1 %v11477_v37  ;;  %v11547_v37 = vld [vmem:[#allocation8 + $0x248] ss:$16 sps:$4 sm:$0xff]  }
 0x49c   :  { %9232 = vmatpush1.bf16.msra.mxu0 %v11472_v1  ;;  %v11552_v1 = vld [vmem:[#allocation8 + $0x264] ss:$16 sps:$4 sm:$0xff]  }
 0x49d   :  { %9396 = vmatpush1.bf16.msra.mxu1 %v11475_v34  ;;  %9233 = vmatprep.subr.bf16.mxu0 %v11480_v38  ;;  %v11555_v34 = vld [vmem:[#allocation8 + $0x26c] ss:$16 sps:$4 sm:$0xff]   ;;  %v11550_v38 = vld [vmem:[#allocation8 + $0x260] ss:$16 sps:$4 sm:$0xff]  }
 0x49e   :  { %9397 = vmatprep.subr.bf16.mxu1 %v11483_v40  ;;  %v11553_v40 = vld [vmem:[#allocation8 + $0x268] ss:$16 sps:$4 sm:$0xff]  }
 0x4a0   :  { %9234 = vmatpush1.bf16.msra.mxu0 %v11478_v42  ;;  %v11558_v42 = vld [vmem:[#allocation8 + $0x284] ss:$16 sps:$4 sm:$0xff]  }
 0x4a1   :  { %9398 = vmatpush1.bf16.msra.mxu1 %v11481_v43  ;;  %9235 = vmatprep.subr.bf16.mxu0 %v11486_v45  ;;  %v11561_v43 = vld [vmem:[#allocation8 + $0x28c] ss:$16 sps:$4 sm:$0xff]   ;;  %v11556_v45 = vld [vmem:[#allocation8 + $0x280] ss:$16 sps:$4 sm:$0xff]  }
 0x4a2   :  { %9399 = vmatprep.subr.bf16.mxu1 %v11489_v46  ;;  %v11559_v46 = vld [vmem:[#allocation8 + $0x288] ss:$16 sps:$4 sm:$0xff]  }
 0x4a4   :  { %9236 = vmatpush1.bf16.msra.mxu0 %v11484_v47  ;;  %v11564_v47 = vld [vmem:[#allocation8 + $0x2a4] ss:$16 sps:$4 sm:$0xff]  }
 0x4a5   :  { %9400 = vmatpush1.bf16.msra.mxu1 %v11487_v49  ;;  %9237 = vmatprep.subr.bf16.mxu0 %v11492_v50  ;;  %v11567_v49 = vld [vmem:[#allocation8 + $0x2ac] ss:$16 sps:$4 sm:$0xff]   ;;  %v11562_v50 = vld [vmem:[#allocation8 + $0x2a0] ss:$16 sps:$4 sm:$0xff]  }
 0x4a6   :  { %9401 = vmatprep.subr.bf16.mxu1 %v11495_v14  ;;  %v11565_v14 = vld [vmem:[#allocation8 + $0x2a8] ss:$16 sps:$4 sm:$0xff]  }
 0x4a8   :  { %9238 = vmatpush1.bf16.msra.mxu0 %v11490_v39  ;;  %v11570_v39 = vld [vmem:[#allocation8 + $0x2c4] ss:$16 sps:$4 sm:$0xff]  }
 0x4a9   :  { %9402 = vmatpush1.bf16.msra.mxu1 %v11493_v52  ;;  %9239 = vmatprep.subr.bf16.mxu0 %v11498_v55  ;;  %v11573_v52 = vld [vmem:[#allocation8 + $0x2cc] ss:$16 sps:$4 sm:$0xff]   ;;  %v11568_v55 = vld [vmem:[#allocation8 + $0x2c0] ss:$16 sps:$4 sm:$0xff]  }
 0x4aa   :  { %9403 = vmatprep.subr.bf16.mxu1 %v11501_v58  ;;  %v11571_v58 = vld [vmem:[#allocation8 + $0x2c8] ss:$16 sps:$4 sm:$0xff]  }
 0x4ac   :  { %9240 = vmatpush1.bf16.msra.mxu0 %v11496_v59  ;;  %v11576_v59 = vld [vmem:[#allocation8 + $0x2e4] ss:$16 sps:$4 sm:$0xff]  }
 0x4ad   :  { %9404 = vmatpush1.bf16.msra.mxu1 %v11499_v12  ;;  %9241 = vmatprep.subr.bf16.mxu0 %v11504_v61  ;;  %v11579_v12 = vld [vmem:[#allocation8 + $0x2ec] ss:$16 sps:$4 sm:$0xff]   ;;  %v11574_v61 = vld [vmem:[#allocation8 + $0x2e0] ss:$16 sps:$4 sm:$0xff]  }
 0x4ae   :  { %9405 = vmatprep.subr.bf16.mxu1 %v11507_v26  ;;  %v11577_v26 = vld [vmem:[#allocation8 + $0x2e8] ss:$16 sps:$4 sm:$0xff]  }
 0x4b0   :  { %9242 = vmatpush1.bf16.msra.mxu0 %v11502_v62  ;;  %v11582_v62 = vld [vmem:[#allocation8 + $0x304] ss:$16 sps:$4 sm:$0xff]  }
 0x4b1   :  { %9406 = vmatpush1.bf16.msra.mxu1 %v11505_v63  ;;  %9243 = vmatprep.subr.bf16.mxu0 %v11510_v48  ;;  %v11585_v63 = vld [vmem:[#allocation8 + $0x30c] ss:$16 sps:$4 sm:$0xff]   ;;  %v11580_v48 = vld [vmem:[#allocation8 + $0x300] ss:$16 sps:$4 sm:$0xff]  }
 0x4b2   :  { %9407 = vmatprep.subr.bf16.mxu1 %v11513_v0  ;;  %v11583_v0 = vld [vmem:[#allocation8 + $0x308] ss:$16 sps:$4 sm:$0xff]  }
 0x4b4   :  { %9244 = vmatpush1.bf16.msra.mxu0 %v11508_v2  ;;  %v11588_v2 = vld [vmem:[#allocation8 + $0x324] ss:$16 sps:$4 sm:$0xff]  }
 0x4b5   :  { %9408 = vmatpush1.bf16.msra.mxu1 %v11511_v4  ;;  %9245 = vmatprep.subr.bf16.mxu0 %v11516_v44  ;;  %v11591_v4 = vld [vmem:[#allocation8 + $0x32c] ss:$16 sps:$4 sm:$0xff]   ;;  %v11586_v44 = vld [vmem:[#allocation8 + $0x320] ss:$16 sps:$4 sm:$0xff]  }
 0x4b6   :  { %9409 = vmatprep.subr.bf16.mxu1 %v11519_v5  ;;  %v11589_v5 = vld [vmem:[#allocation8 + $0x328] ss:$16 sps:$4 sm:$0xff]  }
 0x4b8   :  { %9246 = vmatpush1.bf16.msra.mxu0 %v11514_v23  ;;  %v11594_v23 = vld [vmem:[#allocation8 + $0x344] ss:$16 sps:$4 sm:$0xff]  }
 0x4b9   :  { %9410 = vmatpush1.bf16.msra.mxu1 %v11517_v8  ;;  %9247 = vmatprep.subr.bf16.mxu0 %v11522_v9  ;;  %v11592_v8 = vld [vmem:[#allocation8 + $0x340] ss:$16 sps:$4 sm:$0xff]   ;;  %v11595_v9 = vld [vmem:[#allocation8 + $0x348] ss:$16 sps:$4 sm:$0xff]  }
 0x4ba   :  { %9411 = vmatprep.subr.bf16.mxu1 %v11525_v10  ;;  %v11600_v10 = vld [vmem:[#allocation8 + $0x364] ss:$16 sps:$4 sm:$0xff]  }
 0x4bc   :  { %9248 = vmatpush1.bf16.msra.mxu0 %v11520_v13  ;;  %v11598_v13 = vld [vmem:[#allocation8 + $0x360] ss:$16 sps:$4 sm:$0xff]  }
 0x4bd   :  { %9412 = vmatpush1.bf16.msra.mxu1 %v11523_v56  ;;  %9249 = vmatprep.subr.bf16.mxu0 %v11528_v15  ;;  %v11606_v56 = vld [vmem:[#allocation8 + $0x384] ss:$16 sps:$4 sm:$0xff]   ;;  %v11609_v15 = vld [vmem:[#allocation8 + $0x38c] ss:$16 sps:$4 sm:$0xff]  }
 0x4be   :  { %9413 = vmatprep.subr.bf16.mxu1 %v11531_v17  ;;  %v11604_v17 = vld [vmem:[#allocation8 + $0x380] ss:$16 sps:$4 sm:$0xff]  }
 0x4c0   :  { %9250 = vmatpush1.bf16.msra.mxu0 %v11526_v16  ;;  %v11607_v16 = vld [vmem:[#allocation8 + $0x388] ss:$16 sps:$4 sm:$0xff]  }
 0x4c1   :  { %9414 = vmatpush1.bf16.msra.mxu1 %v11529_v21  ;;  %9260 = vmatprep.subr.bf16.mxu0 %v11534_v27  ;;  %v11615_v21 = vld [vmem:[#allocation8 + $0x3ac] ss:$16 sps:$4 sm:$0xff]   ;;  %v11610_v27 = vld [vmem:[#allocation8 + $0x3a0] ss:$16 sps:$4 sm:$0xff]  }
 0x4c2   :  { %9424 = vmatprep.subr.bf16.mxu1 %v11537_v60  ;;  %v1184_v60 = vrot.slane %v12282_v53, %v1183_v19 }
 0x4c3   :  { %9252 = vmatmul.mubr.bf16.vlgmr.msra.gmra.mrb[8].mxu0 %v7653_v25 }
 0x4c4   :  { %9416 = vmatmul.mubr.bf16.vlgmr.msra.gmra.mrb[8].mxu1 %v7653_v25  ;;  %9261 = vmatpush1.bf16.msra.mxu0 %v11532_v18  ;;  %v11618_v18 = vld [vmem:[#allocation8 + $0x3c4] ss:$16 sps:$4 sm:$0xff]   ;;  %v11621_v25 = vld [vmem:[#allocation8 + $0x3cc] ss:$16 sps:$4 sm:$0xff]  }
 0x4c5   :  { %9292 = vmatprep.mubr.bf16.mxu0 %v7656_v32  ;;  %9425 = vmatpush1.bf16.msra.mxu1 %v11535_v30  ;;  %v11616_v30 = vld [vmem:[#allocation8 + $0x3c0] ss:$16 sps:$4 sm:$0xff]  }
 0x4c6   :  { %9456 = vmatprep.mubr.bf16.mxu1 %v7656_v32  ;;  %9262 = vmatprep.subr.bf16.mxu0 %v11540_v31  ;;  %v11276_v31 = vadd.f32 %v12257_v22, %v1184_v60  ;;  %v11619_v32 = vld [vmem:[#allocation8 + $0x3c8] ss:$16 sps:$4 sm:$0xff]   ;;  %v11699_v60 = vld [vmem:[#allocation8 + $0x56c] ss:$16 sps:$4 sm:$0xff]  }
 0x4c7   :  { %9426 = vmatprep.subr.bf16.mxu1 %v11543_v28  ;;  %v11624_v28 = vld [vmem:[#allocation8 + $0x3e4] ss:$16 sps:$4 sm:$0xff]   ;;  %v11631_v22 = vld [vmem:[#allocation8 + $0x408] ss:$16 sps:$4 sm:$0xff]  }
 0x4c8   :  { %9263 = vmatpush1.bf16.msra.mxu0 %v11538_v33  ;;  %v11627_v33 = vld [vmem:[#allocation8 + $0x3ec] ss:$16 sps:$4 sm:$0xff]  }
 0x4c9   :  { %9427 = vmatpush1.bf16.msra.mxu1 %v11541_v29  ;;  %9264 = vmatprep.subr.bf16.mxu0 %v11546_v57  ;;  %v11622_v29 = vld [vmem:[#allocation8 + $0x3e0] ss:$16 sps:$4 sm:$0xff]   ;;  %v7647_v57 = vmax.f32 %v11276_v31, 0.0 }
 0x4ca   :  { %9428 = vmatprep.subr.bf16.mxu1 %v11549_v35  ;;  %v11625_v35 = vld [vmem:[#allocation8 + $0x3e8] ss:$16 sps:$4 sm:$0xff]   ;;  %v11700_v31 = vld [vmem:[#allocation8 + $0x580] ss:$16 sps:$4 sm:$0xff]  }
 0x4cc   :  { %9265 = vmatpush1.bf16.msra.mxu0 %v11544_v36  ;;  %v11630_v36 = vld [vmem:[#allocation8 + $0x404] ss:$16 sps:$4 sm:$0xff]  }
 0x4cd   :  { %9429 = vmatpush1.bf16.msra.mxu1 %v11547_v37  ;;  %9266 = vmatprep.subr.bf16.mxu0 %v11552_v1  ;;  %v11633_v37 = vld [vmem:[#allocation8 + $0x40c] ss:$16 sps:$4 sm:$0xff]   ;;  %v11628_v1 = vld [vmem:[#allocation8 + $0x400] ss:$16 sps:$4 sm:$0xff]  }
 0x4ce   :  { %9430 = vmatprep.subr.bf16.mxu1 %v11555_v34  ;;  %v7655_v34 = vpack.c.bf16 %v7647_v57, %v7647_v57  ;;  %v11709_v57 = vld [vmem:[#allocation8 + $0x5a8] ss:$16 sps:$4 sm:$0xff]  }
 0x4d0   :  { %9267 = vmatpush1.bf16.msra.mxu0 %v11550_v38  ;;  %v11636_v38 = vld [vmem:[#allocation8 + $0x424] ss:$16 sps:$4 sm:$0xff]  }
 0x4d1   :  { %9431 = vmatpush1.bf16.msra.mxu1 %v11553_v40  ;;  %9268 = vmatprep.subr.bf16.mxu0 %v11558_v42  ;;  %v11639_v40 = vld [vmem:[#allocation8 + $0x42c] ss:$16 sps:$4 sm:$0xff]   ;;  %v11634_v42 = vld [vmem:[#allocation8 + $0x420] ss:$16 sps:$4 sm:$0xff]  }
 0x4d2   :  { %9432 = vmatprep.subr.bf16.mxu1 %v11561_v43  ;;  %v11637_v43 = vld [vmem:[#allocation8 + $0x428] ss:$16 sps:$4 sm:$0xff]  }
 0x4d4   :  { %9269 = vmatpush1.bf16.msra.mxu0 %v11556_v45  ;;  %v11642_v45 = vld [vmem:[#allocation8 + $0x444] ss:$16 sps:$4 sm:$0xff]  }
 0x4d5   :  { %9433 = vmatpush1.bf16.msra.mxu1 %v11559_v46  ;;  %9270 = vmatprep.subr.bf16.mxu0 %v11564_v47  ;;  %v11645_v46 = vld [vmem:[#allocation8 + $0x44c] ss:$16 sps:$4 sm:$0xff]   ;;  %v11640_v47 = vld [vmem:[#allocation8 + $0x440] ss:$16 sps:$4 sm:$0xff]  }
 0x4d6   :  { %9434 = vmatprep.subr.bf16.mxu1 %v11567_v49  ;;  %v11643_v49 = vld [vmem:[#allocation8 + $0x448] ss:$16 sps:$4 sm:$0xff]  }
 0x4d8   :  { %9271 = vmatpush1.bf16.msra.mxu0 %v11562_v50  ;;  %v11648_v50 = vld [vmem:[#allocation8 + $0x464] ss:$16 sps:$4 sm:$0xff]  }
 0x4d9   :  { %9435 = vmatpush1.bf16.msra.mxu1 %v11565_v14  ;;  %9272 = vmatprep.subr.bf16.mxu0 %v11570_v39  ;;  %v11651_v14 = vld [vmem:[#allocation8 + $0x46c] ss:$16 sps:$4 sm:$0xff]   ;;  %v11646_v39 = vld [vmem:[#allocation8 + $0x460] ss:$16 sps:$4 sm:$0xff]  }
 0x4da   :  { %9436 = vmatprep.subr.bf16.mxu1 %v11573_v52  ;;  %v11649_v52 = vld [vmem:[#allocation8 + $0x468] ss:$16 sps:$4 sm:$0xff]  }
 0x4dc   :  { %9273 = vmatpush1.bf16.msra.mxu0 %v11568_v55  ;;  %v11654_v55 = vld [vmem:[#allocation8 + $0x484] ss:$16 sps:$4 sm:$0xff]  }
 0x4dd   :  { %9437 = vmatpush1.bf16.msra.mxu1 %v11571_v58  ;;  %9274 = vmatprep.subr.bf16.mxu0 %v11576_v59  ;;  %v11657_v58 = vld [vmem:[#allocation8 + $0x48c] ss:$16 sps:$4 sm:$0xff]   ;;  %v11652_v59 = vld [vmem:[#allocation8 + $0x480] ss:$16 sps:$4 sm:$0xff]  }
 0x4de   :  { %9438 = vmatprep.subr.bf16.mxu1 %v11579_v12  ;;  %v11655_v12 = vld [vmem:[#allocation8 + $0x488] ss:$16 sps:$4 sm:$0xff]  }
 0x4e0   :  { %9275 = vmatpush1.bf16.msra.mxu0 %v11574_v61  ;;  %v11660_v61 = vld [vmem:[#allocation8 + $0x4a4] ss:$16 sps:$4 sm:$0xff]  }
 0x4e1   :  { %9439 = vmatpush1.bf16.msra.mxu1 %v11577_v26  ;;  %9276 = vmatprep.subr.bf16.mxu0 %v11582_v62  ;;  %v11663_v26 = vld [vmem:[#allocation8 + $0x4ac] ss:$16 sps:$4 sm:$0xff]   ;;  %v11658_v62 = vld [vmem:[#allocation8 + $0x4a0] ss:$16 sps:$4 sm:$0xff]  }
 0x4e2   :  { %9440 = vmatprep.subr.bf16.mxu1 %v11585_v63  ;;  %v11661_v63 = vld [vmem:[#allocation8 + $0x4a8] ss:$16 sps:$4 sm:$0xff]  }
 0x4e4   :  { %9277 = vmatpush1.bf16.msra.mxu0 %v11580_v48  ;;  %v11666_v48 = vld [vmem:[#allocation8 + $0x4c4] ss:$16 sps:$4 sm:$0xff]  }
 0x4e5   :  { %9441 = vmatpush1.bf16.msra.mxu1 %v11583_v0  ;;  %9278 = vmatprep.subr.bf16.mxu0 %v11588_v2  ;;  %v11669_v0 = vld [vmem:[#allocation8 + $0x4cc] ss:$16 sps:$4 sm:$0xff]   ;;  %v11664_v2 = vld [vmem:[#allocation8 + $0x4c0] ss:$16 sps:$4 sm:$0xff]  }
 0x4e6   :  { %9442 = vmatprep.subr.bf16.mxu1 %v11591_v4  ;;  %v11667_v4 = vld [vmem:[#allocation8 + $0x4c8] ss:$16 sps:$4 sm:$0xff]  }
 0x4e8   :  { %9279 = vmatpush1.bf16.msra.mxu0 %v11586_v44  ;;  %v11672_v44 = vld [vmem:[#allocation8 + $0x4e4] ss:$16 sps:$4 sm:$0xff]  }
 0x4e9   :  { %9443 = vmatpush1.bf16.msra.mxu1 %v11589_v5  ;;  %9280 = vmatprep.subr.bf16.mxu0 %v11594_v23  ;;  %v11675_v5 = vld [vmem:[#allocation8 + $0x4ec] ss:$16 sps:$4 sm:$0xff]   ;;  %v11670_v23 = vld [vmem:[#allocation8 + $0x4e0] ss:$16 sps:$4 sm:$0xff]  }
 0x4ea   :  { %9444 = vmatprep.subr.bf16.mxu1 %v11597_v7  ;;  %v11673_v7 = vld [vmem:[#allocation8 + $0x4e8] ss:$16 sps:$4 sm:$0xff]  }
 0x4ec   :  { %9281 = vmatpush1.bf16.msra.mxu0 %v11592_v8  ;;  %v11678_v8 = vld [vmem:[#allocation8 + $0x504] ss:$16 sps:$4 sm:$0xff]  }
 0x4ed   :  { %9445 = vmatpush1.bf16.msra.mxu1 %v11595_v9  ;;  %9282 = vmatprep.subr.bf16.mxu0 %v11600_v10  ;;  %v11681_v9 = vld [vmem:[#allocation8 + $0x50c] ss:$16 sps:$4 sm:$0xff]   ;;  %v11676_v10 = vld [vmem:[#allocation8 + $0x500] ss:$16 sps:$4 sm:$0xff]  }
 0x4ee   :  { %9446 = vmatprep.subr.bf16.mxu1 %v11603_v11  ;;  %v11679_v11 = vld [vmem:[#allocation8 + $0x508] ss:$16 sps:$4 sm:$0xff]  }
 0x4f0   :  { %9283 = vmatpush1.bf16.msra.mxu0 %v11598_v13  ;;  %v11684_v13 = vld [vmem:[#allocation8 + $0x524] ss:$16 sps:$4 sm:$0xff]  }
 0x4f1   :  { %9447 = vmatpush1.bf16.msra.mxu1 %v11601_v24  ;;  %9284 = vmatprep.subr.bf16.mxu0 %v11606_v56  ;;  %v11687_v24 = vld [vmem:[#allocation8 + $0x52c] ss:$16 sps:$4 sm:$0xff]   ;;  %v11682_v56 = vld [vmem:[#allocation8 + $0x520] ss:$16 sps:$4 sm:$0xff]  }
 0x4f2   :  { %9448 = vmatprep.subr.bf16.mxu1 %v11609_v15  ;;  %v11685_v15 = vld [vmem:[#allocation8 + $0x528] ss:$16 sps:$4 sm:$0xff]  }
 0x4f4   :  { %9285 = vmatpush1.bf16.msra.mxu0 %v11604_v17  ;;  %v11690_v17 = vld [vmem:[#allocation8 + $0x544] ss:$16 sps:$4 sm:$0xff]  }
 0x4f5   :  { %9449 = vmatpush1.bf16.msra.mxu1 %v11607_v16  ;;  %9286 = vmatprep.subr.bf16.mxu0 %v11612_v20  ;;  %v11693_v16 = vld [vmem:[#allocation8 + $0x54c] ss:$16 sps:$4 sm:$0xff]   ;;  %v11688_v20 = vld [vmem:[#allocation8 + $0x540] ss:$16 sps:$4 sm:$0xff]  }
 0x4f6   :  { %9450 = vmatprep.subr.bf16.mxu1 %v11615_v21  ;;  %v11691_v21 = vld [vmem:[#allocation8 + $0x548] ss:$16 sps:$4 sm:$0xff]  }
 0x4f8   :  { %9287 = vmatpush1.bf16.msra.mxu0 %v11610_v27  ;;  %v11696_v27 = vld [vmem:[#allocation8 + $0x564] ss:$16 sps:$4 sm:$0xff]  }
 0x4f9   :  { %9451 = vmatpush1.bf16.msra.mxu1 %v11613_v54  ;;  %9288 = vmatprep.subr.bf16.mxu0 %v11618_v18  ;;  %v11694_v54 = vld [vmem:[#allocation8 + $0x560] ss:$16 sps:$4 sm:$0xff]   ;;  %v11697_v18 = vld [vmem:[#allocation8 + $0x568] ss:$16 sps:$4 sm:$0xff]  }
 0x4fa   :  { %9452 = vmatprep.subr.bf16.mxu1 %v11621_v25  ;;  %v11702_v25 = vld [vmem:[#allocation8 + $0x584] ss:$16 sps:$4 sm:$0xff]  }
 0x4fc   :  { %9289 = vmatpush1.bf16.msra.mxu0 %v11616_v30  ;;  %v11705_v30 = vld [vmem:[#allocation8 + $0x58c] ss:$16 sps:$4 sm:$0xff]  }
 0x4fd   :  { %9453 = vmatpush1.bf16.msra.mxu1 %v11619_v32  ;;  %9290 = vmatprep.subr.bf16.mxu0 %v11624_v28  ;;  %v11703_v32 = vld [vmem:[#allocation8 + $0x588] ss:$16 sps:$4 sm:$0xff]   ;;  %v11708_v28 = vld [vmem:[#allocation8 + $0x5a4] ss:$16 sps:$4 sm:$0xff]  }
 0x4fe   :  { %9454 = vmatprep.subr.bf16.mxu1 %v11627_v33  ;;  %v11711_v33 = vld [vmem:[#allocation8 + $0x5ac] ss:$16 sps:$4 sm:$0xff]  }
 0x500   :  { %9291 = vmatpush1.bf16.msra.mxu0 %v11622_v29  ;;  %v11706_v29 = vld [vmem:[#allocation8 + $0x5a0] ss:$16 sps:$4 sm:$0xff]  }
 0x501   :  { %9455 = vmatpush1.bf16.msra.mxu1 %v11625_v35  ;;  %9301 = vmatprep.subr.bf16.mxu0 %v11630_v36  ;;  %v11714_v35 = vld [vmem:[#allocation8 + $0x5c4] ss:$16 sps:$4 sm:$0xff]   ;;  %v11717_v36 = vld [vmem:[#allocation8 + $0x5cc] ss:$16 sps:$4 sm:$0xff]  }
 0x502   :  { %9465 = vmatprep.subr.bf16.mxu1 %v11633_v37  ;;  %v11712_v37 = vld [vmem:[#allocation8 + $0x5c0] ss:$16 sps:$4 sm:$0xff]  }
 0x503   :  { %9293 = vmatmul.mubr.bf16.vlgmr.msra.gmra.mrb[8].mxu0 %v7655_v34 }
 0x504   :  { %9457 = vmatmul.mubr.bf16.vlgmr.msra.gmra.mrb[8].mxu1 %v7655_v34  ;;  %9302 = vmatpush1.bf16.msra.mxu0 %v11628_v1  ;;  %v11715_v1 = vld [vmem:[#allocation8 + $0x5c8] ss:$16 sps:$4 sm:$0xff]   ;;  %v11720_v34 = vld [vmem:[#allocation8 + $0x5e4] ss:$16 sps:$4 sm:$0xff]  }
 0x505   :  { %9466 = vmatpush1.bf16.msra.mxu1 %v11631_v22  ;;  %9303 = vmatprep.subr.bf16.mxu0 %v11636_v38  ;;  %v11723_v22 = vld [vmem:[#allocation8 + $0x5ec] ss:$16 sps:$4 sm:$0xff]   ;;  %v11718_v38 = vld [vmem:[#allocation8 + $0x5e0] ss:$16 sps:$4 sm:$0xff]  }
 0x506   :  { %9467 = vmatprep.subr.bf16.mxu1 %v11639_v40  ;;  %v11721_v40 = vld [vmem:[#allocation8 + $0x5e8] ss:$16 sps:$4 sm:$0xff]  }
 0x508   :  { %9304 = vmatpush1.bf16.msra.mxu0 %v11634_v42  ;;  %v11726_v42 = vld [vmem:[#allocation8 + $0x604] ss:$16 sps:$4 sm:$0xff]  }
 0x509   :  { %9468 = vmatpush1.bf16.msra.mxu1 %v11637_v43  ;;  %9305 = vmatprep.subr.bf16.mxu0 %v11642_v45  ;;  %v11729_v43 = vld [vmem:[#allocation8 + $0x60c] ss:$16 sps:$4 sm:$0xff]   ;;  %v1191_v45 = vsub.s32 4, %v12279_v41 }
 0x50a   :  { %9469 = vmatprep.subr.bf16.mxu1 %v11645_v46  ;;  %v1195_v46 = vsub.s32 5, %v12279_v41 }
 0x50c   :  { %9306 = vmatpush1.bf16.msra.mxu0 %v11640_v47  ;;  %v1203_v47 = vsub.s32 7, %v12279_v41 }
 0x50d   :  { %9470 = vmatpush1.bf16.msra.mxu1 %v11643_v49  ;;  %9307 = vmatprep.subr.bf16.mxu0 %v11648_v50  ;;  %v1192_v49 = vrot.slane %v12282_v53, %v1191_v45  ;;  %v1196_v50 = vrot.slane %v12282_v53, %v1195_v46  ;;  %v11778_v45 = vld [vmem:[#allocation8 + $0x720] ss:$16 sps:$4 sm:$0xff]   ;;  %v11781_v46 = vld [vmem:[#allocation8 + $0x728] ss:$16 sps:$4 sm:$0xff]  }
 0x50e   :  { %9471 = vmatprep.subr.bf16.mxu1 %v11651_v14  ;;  %v1204_v14 = vrot.slane %v12282_v53, %v1203_v47  ;;  %v11732_v53 = vld [vmem:[#allocation8 + $0x624] ss:$16 sps:$4 sm:$0xff]  }
 0x50f   :  { %v11786_v47 = vld [vmem:[#allocation8 + $0x744] ss:$16 sps:$4 sm:$0xff]  }
 0x510   :  { %9308 = vmatpush1.bf16.msra.mxu0 %v11646_v39 }
 0x511   :  { %9472 = vmatpush1.bf16.msra.mxu1 %v11649_v52  ;;  %9309 = vmatprep.subr.bf16.mxu0 %v11654_v55 }
 0x512   :  { %9473 = vmatprep.subr.bf16.mxu1 %v11657_v58 }
 0x514   :  { %9310 = vmatpush1.bf16.msra.mxu0 %v11652_v59 }
 0x515   :  { %9474 = vmatpush1.bf16.msra.mxu1 %v11655_v12  ;;  %9311 = vmatprep.subr.bf16.mxu0 %v11660_v61 }
 0x516   :  { %9475 = vmatprep.subr.bf16.mxu1 %v11663_v26 }
 0x518   :  { %9312 = vmatpush1.bf16.msra.mxu0 %v11658_v62 }
 0x519   :  { %9476 = vmatpush1.bf16.msra.mxu1 %v11661_v63  ;;  %9313 = vmatprep.subr.bf16.mxu0 %v11666_v48 }
 0x51a   :  { %9477 = vmatprep.subr.bf16.mxu1 %v11669_v0 }
 0x51c   :  { %9314 = vmatpush1.bf16.msra.mxu0 %v11664_v2 }
 0x51d   :  { %9478 = vmatpush1.bf16.msra.mxu1 %v11667_v4  ;;  %9315 = vmatprep.subr.bf16.mxu0 %v11672_v44 }
 0x51e   :  { %9479 = vmatprep.subr.bf16.mxu1 %v11675_v5  ;;  %v11724_v5 = vld [vmem:[#allocation8 + $0x600] ss:$16 sps:$4 sm:$0xff]  }
 0x520   :  { %9316 = vmatpush1.bf16.msra.mxu0 %v11670_v23  ;;  %v11727_v23 = vld [vmem:[#allocation8 + $0x608] ss:$16 sps:$4 sm:$0xff]  }
 0x521   :  { %9480 = vmatpush1.bf16.msra.mxu1 %v11673_v7  ;;  %9317 = vmatprep.subr.bf16.mxu0 %v11678_v8  ;;  %v11735_v8 = vld [vmem:[#allocation8 + $0x62c] ss:$16 sps:$4 sm:$0xff]  }
 0x522   :  { %9481 = vmatprep.subr.bf16.mxu1 %v11681_v9 }
 0x524   :  { %9318 = vmatpush1.bf16.msra.mxu0 %v11676_v10  ;;  %v11730_v10 = vld [vmem:[#allocation8 + $0x620] ss:$16 sps:$4 sm:$0xff]  }
 0x525   :  { %9482 = vmatpush1.bf16.msra.mxu1 %v11679_v11  ;;  %9319 = vmatprep.subr.bf16.mxu0 %v11684_v13  ;;  %v11733_v11 = vld [vmem:[#allocation8 + $0x628] ss:$16 sps:$4 sm:$0xff]   ;;  %v11738_v13 = vld [vmem:[#allocation8 + $0x644] ss:$16 sps:$4 sm:$0xff]  }
 0x526   :  { %9483 = vmatprep.subr.bf16.mxu1 %v11687_v24  ;;  %v11741_v24 = vld [vmem:[#allocation8 + $0x64c] ss:$16 sps:$4 sm:$0xff]  }
 0x528   :  { %9320 = vmatpush1.bf16.msra.mxu0 %v11682_v56  ;;  %v11736_v56 = vld [vmem:[#allocation8 + $0x640] ss:$16 sps:$4 sm:$0xff]  }
 0x529   :  { %9484 = vmatpush1.bf16.msra.mxu1 %v11685_v15  ;;  %9321 = vmatprep.subr.bf16.mxu0 %v11690_v17  ;;  %v11739_v15 = vld [vmem:[#allocation8 + $0x648] ss:$16 sps:$4 sm:$0xff]   ;;  %v11744_v17 = vld [vmem:[#allocation8 + $0x664] ss:$16 sps:$4 sm:$0xff]  }
 0x52a   :  { %9485 = vmatprep.subr.bf16.mxu1 %v11693_v16  ;;  %v11747_v16 = vld [vmem:[#allocation8 + $0x66c] ss:$16 sps:$4 sm:$0xff]  }
 0x52c   :  { %9322 = vmatpush1.bf16.msra.mxu0 %v11688_v20  ;;  %v11742_v20 = vld [vmem:[#allocation8 + $0x660] ss:$16 sps:$4 sm:$0xff]  }
 0x52d   :  { %9486 = vmatpush1.bf16.msra.mxu1 %v11691_v21  ;;  %9323 = vmatprep.subr.bf16.mxu0 %v11696_v27  ;;  %v11745_v21 = vld [vmem:[#allocation8 + $0x668] ss:$16 sps:$4 sm:$0xff]   ;;  %v11750_v27 = vld [vmem:[#allocation8 + $0x684] ss:$16 sps:$4 sm:$0xff]  }
 0x52e   :  { %9487 = vmatprep.subr.bf16.mxu1 %v11699_v60  ;;  %v11753_v60 = vld [vmem:[#allocation8 + $0x68c] ss:$16 sps:$4 sm:$0xff]  }
 0x530   :  { %9324 = vmatpush1.bf16.msra.mxu0 %v11694_v54  ;;  %v11748_v54 = vld [vmem:[#allocation8 + $0x680] ss:$16 sps:$4 sm:$0xff]  }
 0x531   :  { %9488 = vmatpush1.bf16.msra.mxu1 %v11697_v18  ;;  %9325 = vmatprep.subr.bf16.mxu0 %v11702_v25  ;;  %v11751_v18 = vld [vmem:[#allocation8 + $0x688] ss:$16 sps:$4 sm:$0xff]   ;;  %v11756_v25 = vld [vmem:[#allocation8 + $0x6a4] ss:$16 sps:$4 sm:$0xff]  }
 0x532   :  { %9489 = vmatprep.subr.bf16.mxu1 %v11705_v30  ;;  %v11759_v30 = vld [vmem:[#allocation8 + $0x6ac] ss:$16 sps:$4 sm:$0xff]  }
 0x534   :  { %9326 = vmatpush1.bf16.msra.mxu0 %v11700_v31  ;;  %v11754_v31 = vld [vmem:[#allocation8 + $0x6a0] ss:$16 sps:$4 sm:$0xff]  }
 0x535   :  { %9490 = vmatpush1.bf16.msra.mxu1 %v11703_v32  ;;  %9327 = vmatprep.subr.bf16.mxu0 %v11708_v28  ;;  %v11757_v32 = vld [vmem:[#allocation8 + $0x6a8] ss:$16 sps:$4 sm:$0xff]   ;;  %v11762_v28 = vld [vmem:[#allocation8 + $0x6c4] ss:$16 sps:$4 sm:$0xff]  }
 0x536   :  { %9491 = vmatprep.subr.bf16.mxu1 %v11711_v33  ;;  %v11765_v33 = vld [vmem:[#allocation8 + $0x6cc] ss:$16 sps:$4 sm:$0xff]  }
 0x538   :  { %9328 = vmatpush1.bf16.msra.mxu0 %v11706_v29  ;;  %v11760_v29 = vld [vmem:[#allocation8 + $0x6c0] ss:$16 sps:$4 sm:$0xff]  }
 0x539   :  { %9492 = vmatpush1.bf16.msra.mxu1 %v11709_v57  ;;  %9329 = vmatprep.subr.bf16.mxu0 %v11714_v35  ;;  %v11763_v57 = vld [vmem:[#allocation8 + $0x6c8] ss:$16 sps:$4 sm:$0xff]   ;;  %v11768_v35 = vld [vmem:[#allocation8 + $0x6e4] ss:$16 sps:$4 sm:$0xff]  }
 0x53a   :  { %9493 = vmatprep.subr.bf16.mxu1 %v11717_v36  ;;  %v11771_v36 = vld [vmem:[#allocation8 + $0x6ec] ss:$16 sps:$4 sm:$0xff]  }
 0x53c   :  { %9330 = vmatpush1.bf16.msra.mxu0 %v11712_v37  ;;  %v11766_v37 = vld [vmem:[#allocation8 + $0x6e0] ss:$16 sps:$4 sm:$0xff]  }
 0x53d   :  { %9494 = vmatpush1.bf16.msra.mxu1 %v11715_v1  ;;  %9331 = vmatprep.subr.bf16.mxu0 %v11720_v34  ;;  %v11769_v1 = vld [vmem:[#allocation8 + $0x6e8] ss:$16 sps:$4 sm:$0xff]   ;;  %v11774_v34 = vld [vmem:[#allocation8 + $0x704] ss:$16 sps:$4 sm:$0xff]  }
 0x53e   :  { %9495 = vmatprep.subr.bf16.mxu1 %v11723_v22  ;;  %v11777_v22 = vld [vmem:[#allocation8 + $0x70c] ss:$16 sps:$4 sm:$0xff]  }
 0x540   :  { %9332 = vmatpush1.bf16.msra.mxu0 %v11718_v38  ;;  %v11772_v38 = vld [vmem:[#allocation8 + $0x700] ss:$16 sps:$4 sm:$0xff]  }
 0x541   :  { %9496 = vmatpush1.bf16.msra.mxu1 %v11721_v40  ;;  %9342 = vmatprep.subr.bf16.mxu0 %v11726_v42  ;;  %v11775_v40 = vld [vmem:[#allocation8 + $0x708] ss:$16 sps:$4 sm:$0xff]   ;;  %v11780_v42 = vld [vmem:[#allocation8 + $0x724] ss:$16 sps:$4 sm:$0xff]  }
 0x542   :  { %9506 = vmatprep.subr.bf16.mxu1 %v11729_v43  ;;  %v11783_v43 = vld [vmem:[#allocation8 + $0x72c] ss:$16 sps:$4 sm:$0xff]  }
 0x556   :  { %v7310_v39 = vpop.f32.mrb[4].mxu0  ;;  %v12311_v55 = vpop.f32.mrb[4].mxu1 }
 0x557   :  { %v11278_v52 = vadd.f32 %v7310_v39, %v1192_v49  ;;  %v7312_v58 = vpop.f32.mrb[5].mxu0  ;;  %v7640_v12 = vpop.f32.mrb[5].mxu1  ;;  %v11789_v49 = vld [vmem:[#allocation8 + $0x74c] ss:$16 sps:$4 sm:$0xff]   ;;  %v11792_v39 = vld [vmem:[#allocation8 + $0x764] ss:$16 sps:$4 sm:$0xff]  }
 0x558   :  { %v11279_v59 = vadd.f32 %v7312_v58, %v1196_v50  ;;  %v7314_v61 = vpop.f32.mrb[6].mxu0  ;;  %v11281_v62 = vadd.f32 %v7640_v12, %v1204_v14  ;;  %v7642_v63 = vpop.f32.mrb[6].mxu1  ;;  %v11784_v50 = vld [vmem:[#allocation8 + $0x740] ss:$16 sps:$4 sm:$0xff]   ;;  %v11787_v14 = vld [vmem:[#allocation8 + $0x748] ss:$16 sps:$4 sm:$0xff]  }
 0x559   :  { %v7649_v26 = vmax.f32 %v11278_v52, 0.0  ;;  %v7315_v48 = vpop.f32.mrb[7].mxu0  ;;  %v7643_v2 = vpop.f32.mrb[7].mxu1  ;;  %v11795_v52 = vld [vmem:[#allocation8 + $0x76c] ss:$16 sps:$4 sm:$0xff]   ;;  %v1199_v63 = vsub.s32 6, %v12279_v41 }
 0x55a   :  { %v7650_v0 = vmax.f32 %v11279_v59, 0.0  ;;  %v7652_v4 = vmax.f32 %v11281_v62, 0.0  ;;  %v11790_v58 = vld [vmem:[#allocation8 + $0x760] ss:$16 sps:$4 sm:$0xff]   ;;  %v11793_v59 = vld [vmem:[#allocation8 + $0x768] ss:$16 sps:$4 sm:$0xff]  }
 0x55b   :  { %v7657_v7 = vpack.c.bf16 %v7649_v26, %v7649_v26  ;;  %v11798_v12 = vld [vmem:[#allocation8 + $0x784] ss:$16 sps:$4 sm:$0xff]   ;;  %v11801_v61 = vld [vmem:[#allocation8 + $0x78c] ss:$16 sps:$4 sm:$0xff]   ;;  %v11796_v26 = vld [vmem:[#allocation8 + $0x780] ss:$16 sps:$4 sm:$0xff]  }
 0x55c   :  { %v7658_v44 = vpack.c.bf16 %v7650_v0, %v7650_v0  ;;  %v7660_v9 = vpack.c.bf16 %v7652_v4, %v7652_v4  ;;  %v11799_v62 = vld [vmem:[#allocation8 + $0x788] ss:$16 sps:$4 sm:$0xff]   ;;  %v11804_v48 = vld [vmem:[#allocation8 + $0x7a4] ss:$16 sps:$4 sm:$0xff]   ;;  %v11807_v0 = vld [vmem:[#allocation8 + $0x7ac] ss:$16 sps:$4 sm:$0xff]  }
 0x55d   :  { %v11802_v2 = vld [vmem:[#allocation8 + $0x7a0] ss:$16 sps:$4 sm:$0xff]   ;;  %v11805_v4 = vld [vmem:[#allocation8 + $0x7a8] ss:$16 sps:$4 sm:$0xff]  }
 0x55e   :  { %9333 = vmatprep.mubr.bf16.mxu0 %v7658_v44  ;;  %9497 = vmatprep.mubr.bf16.mxu1 %v7658_v44  ;;  %v11852_v44 = vld [vmem:[#allocation7] sm:$0xff] }
 0x55f   :  { %9334 = vmatmul.mubr.bf16.vlgmr.msra.gmra.mrb[8].mxu0 %v7657_v7  ;;  %9498 = vmatmul.mubr.bf16.vlgmr.msra.gmra.mrb[8].mxu1 %v7657_v7  ;;  %v11813_v7 = vld [vmem:[#allocation8 + $0x7cc] ss:$16 sps:$4 sm:$0xff]  }
 0x560   :  { %9343 = vmatpush1.bf16.msra.mxu0 %v11724_v5  ;;  %9507 = vmatpush1.bf16.msra.mxu1 %v11727_v23  ;;  %v1200_v5 = vrot.slane %v11852_v44, %v1199_v63  ;;  %v11810_v23 = vld [vmem:[#allocation8 + $0x7c4] ss:$16 sps:$4 sm:$0xff]  }
 0x561   :  { %9374 = vmatprep.mubr.bf16.mxu0 %v7660_v9  ;;  %9538 = vmatprep.mubr.bf16.mxu1 %v7660_v9 }
 0x562   :  { %9344 = vmatprep.subr.bf16.mxu0 %v11732_v53  ;;  %9508 = vmatprep.subr.bf16.mxu1 %v11735_v8  ;;  %v11808_v53 = vld [vmem:[#allocation8 + $0x7c0] ss:$16 sps:$4 sm:$0xff]   ;;  %v11811_v8 = vld [vmem:[#allocation8 + $0x7c8] ss:$16 sps:$4 sm:$0xff]   ;;  %v11280_v9 = vadd.f32 %v12311_v55, %v1200_v5 }
 0x563   :  { %v11824_v55 = vld [vmem:[#allocation11 + $0x48] sm:$0xff]  }
 0x564   :  { %9345 = vmatpush1.bf16.msra.mxu0 %v11730_v10  ;;  %9509 = vmatpush1.bf16.msra.mxu1 %v11733_v11  ;;  %v11816_v10 = vld [vmem:[#allocation8 + $0x7e4] ss:$16 sps:$4 sm:$0xff]   ;;  %v11819_v11 = vld [vmem:[#allocation8 + $0x7ec] ss:$16 sps:$4 sm:$0xff]  }
 0x565   :  { %9346 = vmatprep.subr.bf16.mxu0 %v11738_v13  ;;  %9510 = vmatprep.subr.bf16.mxu1 %v11741_v24  ;;  %v11814_v13 = vld [vmem:[#allocation8 + $0x7e0] ss:$16 sps:$4 sm:$0xff]   ;;  %v11817_v24 = vld [vmem:[#allocation8 + $0x7e8] ss:$16 sps:$4 sm:$0xff]  }
 0x568   :  { %9347 = vmatpush1.bf16.msra.mxu0 %v11736_v56  ;;  %9511 = vmatpush1.bf16.msra.mxu1 %v11739_v15  ;;  %v7651_v56 = vmax.f32 %v11280_v9, 0.0  ;;  %v11820_v15 = vld [vmem:[#allocation11 + $0x40] sm:$0xff]  }
 0x569   :  { %9348 = vmatprep.subr.bf16.mxu0 %v11744_v17  ;;  %9512 = vmatprep.subr.bf16.mxu1 %v11747_v16  ;;  %v11821_v17 = vld [vmem:[#allocation11 + $0xc0] sm:$0xff]  }
 0x56a   :  { %v11822_v16 = vld [vmem:[#allocation11] sm:$0xff]  }
 0x56c   :  { %9349 = vmatpush1.bf16.msra.mxu0 %v11742_v20  ;;  %9513 = vmatpush1.bf16.msra.mxu1 %v11745_v21  ;;  %v11823_v20 = vld [vmem:[#allocation11 + $0x80] sm:$0xff]   ;;  %v7659_v21 = vpack.c.bf16 %v7651_v56, %v7651_v56 }
 0x56d   :  { %9350 = vmatprep.subr.bf16.mxu0 %v11750_v27  ;;  %9514 = vmatprep.subr.bf16.mxu1 %v11753_v60  ;;  %v11825_v27 = vld [vmem:[#allocation11 + $0xc8] sm:$0xff]  }
 0x56e   :  { %v11826_v60 = vld [vmem:[#allocation11 + $0x8] sm:$0xff]  }
 0x570   :  { %9351 = vmatpush1.bf16.msra.mxu0 %v11748_v54  ;;  %9515 = vmatpush1.bf16.msra.mxu1 %v11751_v18  ;;  %v11827_v54 = vld [vmem:[#allocation11 + $0x88] sm:$0xff]   ;;  %v11828_v18 = vld [vmem:[#allocation11 + $0x50] sm:$0xff]  }
 0x571   :  { %9352 = vmatprep.subr.bf16.mxu0 %v11756_v25  ;;  %9516 = vmatprep.subr.bf16.mxu1 %v11759_v30  ;;  %v11829_v25 = vld [vmem:[#allocation11 + $0xd0] sm:$0xff]  }
 0x572   :  { %v11830_v30 = vld [vmem:[#allocation11 + $0x10] sm:$0xff]  }
 0x574   :  { %9353 = vmatpush1.bf16.msra.mxu0 %v11754_v31  ;;  %9517 = vmatpush1.bf16.msra.mxu1 %v11757_v32  ;;  %v11831_v31 = vld [vmem:[#allocation11 + $0x90] sm:$0xff]   ;;  %v11832_v32 = vld [vmem:[#allocation11 + $0x58] sm:$0xff]  }
 0x575   :  { %9354 = vmatprep.subr.bf16.mxu0 %v11762_v28  ;;  %9518 = vmatprep.subr.bf16.mxu1 %v11765_v33  ;;  %v11833_v28 = vld [vmem:[#allocation11 + $0xd8] sm:$0xff]  }
 0x576   :  { %v11834_v33 = vld [vmem:[#allocation11 + $0x18] sm:$0xff]  }
 0x578   :  { %9355 = vmatpush1.bf16.msra.mxu0 %v11760_v29  ;;  %9519 = vmatpush1.bf16.msra.mxu1 %v11763_v57  ;;  %v11835_v29 = vld [vmem:[#allocation11 + $0x98] sm:$0xff]   ;;  %v11836_v57 = vld [vmem:[#allocation11 + $0x60] sm:$0xff]  }
 0x579   :  { %9356 = vmatprep.subr.bf16.mxu0 %v11768_v35  ;;  %9520 = vmatprep.subr.bf16.mxu1 %v11771_v36  ;;  %v11837_v35 = vld [vmem:[#allocation11 + $0xe0] sm:$0xff]  }
 0x57a   :  { %v11838_v36 = vld [vmem:[#allocation11 + $0x20] sm:$0xff]  }
 0x57c   :  { %9357 = vmatpush1.bf16.msra.mxu0 %v11766_v37  ;;  %9521 = vmatpush1.bf16.msra.mxu1 %v11769_v1  ;;  %v11839_v37 = vld [vmem:[#allocation11 + $0xa0] sm:$0xff]   ;;  %v11840_v1 = vld [vmem:[#allocation11 + $0x68] sm:$0xff]  }
 0x57d   :  { %9358 = vmatprep.subr.bf16.mxu0 %v11774_v34  ;;  %9522 = vmatprep.subr.bf16.mxu1 %v11777_v22  ;;  %v11841_v34 = vld [vmem:[#allocation11 + $0xe8] sm:$0xff]  }
 0x57e   :  { %v11842_v22 = vld [vmem:[#allocation11 + $0x28] sm:$0xff]  }
 0x580   :  { %9359 = vmatpush1.bf16.msra.mxu0 %v11772_v38  ;;  %9523 = vmatpush1.bf16.msra.mxu1 %v11775_v40  ;;  %v11843_v38 = vld [vmem:[#allocation11 + $0xa8] sm:$0xff]   ;;  %v11844_v40 = vld [vmem:[#allocation11 + $0x70] sm:$0xff]  }
 0x581   :  { %9360 = vmatprep.subr.bf16.mxu0 %v11780_v42  ;;  %9524 = vmatprep.subr.bf16.mxu1 %v11783_v43  ;;  %v11845_v42 = vld [vmem:[#allocation11 + $0xf0] sm:$0xff]  }
 0x582   :  { %v11846_v43 = vld [vmem:[#allocation11 + $0x30] sm:$0xff]  }
 0x584   :  { %9361 = vmatpush1.bf16.msra.mxu0 %v11778_v45  ;;  %9525 = vmatpush1.bf16.msra.mxu1 %v11781_v46  ;;  %v11847_v45 = vld [vmem:[#allocation11 + $0xb0] sm:$0xff]   ;;  %v11848_v46 = vld [vmem:[#allocation11 + $0x78] sm:$0xff]  }
 0x585   :  { %9362 = vmatprep.subr.bf16.mxu0 %v11786_v47  ;;  %9526 = vmatprep.subr.bf16.mxu1 %v11789_v49  ;;  %v11849_v47 = vld [vmem:[#allocation11 + $0xf8] sm:$0xff]  }
 0x586   :  { %v11850_v49 = vld [vmem:[#allocation11 + $0x38] sm:$0xff]  }
 0x588   :  { %9363 = vmatpush1.bf16.msra.mxu0 %v11784_v50  ;;  %9527 = vmatpush1.bf16.msra.mxu1 %v11787_v14  ;;  %v11851_v50 = vld [vmem:[#allocation11 + $0xb8] sm:$0xff]  }
 0x589   :  { %9364 = vmatprep.subr.bf16.mxu0 %v11792_v39  ;;  %9528 = vmatprep.subr.bf16.mxu1 %v11795_v52  ;;  %v7917_v14 = vld [vmem:[#allocation10] sm:$0xf] }
 0x58a   :  { %v7922_v39 = vrot.slane %v7917_v14, %v1175_v3  ;;  %v7930_v52 = vrot.slane %v7917_v14, %v1183_v19 }
 0x58c   :  { %9365 = vmatpush1.bf16.msra.mxu0 %v11790_v58  ;;  %9529 = vmatpush1.bf16.msra.mxu1 %v11793_v59  ;;  %v7926_v58 = vrot.slane %v7917_v14, %v1179_v51  ;;  %v7934_v59 = vrot.slane %v7917_v14, %v1187_v6 }
 0x58d   :  { %9366 = vmatprep.subr.bf16.mxu0 %v11798_v12  ;;  %9530 = vmatprep.subr.bf16.mxu1 %v11801_v61 }
 0x590   :  { %9367 = vmatpush1.bf16.msra.mxu0 %v11796_v26  ;;  %9531 = vmatpush1.bf16.msra.mxu1 %v11799_v62 }
 0x591   :  { %9368 = vmatprep.subr.bf16.mxu0 %v11804_v48  ;;  %9532 = vmatprep.subr.bf16.mxu1 %v11807_v0 }
 0x594   :  { %9369 = vmatpush1.bf16.msra.mxu0 %v11802_v2  ;;  %9533 = vmatpush1.bf16.msra.mxu1 %v11805_v4 }
 0x595   :  { %9370 = vmatprep.subr.bf16.mxu0 %v11810_v23  ;;  %9534 = vmatprep.subr.bf16.mxu1 %v11813_v7 }
 0x598   :  { %9371 = vmatpush1.bf16.msra.mxu0 %v11808_v53  ;;  %9535 = vmatpush1.bf16.msra.mxu1 %v11811_v8 }
 0x599   :  { %9372 = vmatprep.subr.bf16.mxu0 %v11816_v10  ;;  %9536 = vmatprep.subr.bf16.mxu1 %v11819_v11  ;;  %v11197_v11 = vld [vmem:[#allocation13] ss:$0 sm:$0xff] }
 0x59c   :  { %9373 = vmatpush1.bf16.msra.mxu0 %v11814_v13  ;;  %9537 = vmatpush1.bf16.msra.mxu1 %v11817_v24 }
 0x59d   :  { %11230 = vmatprep.subr.bf16.mxu0 %v11820_v15  ;;  %11252 = vmatprep.subr.bf16.mxu1 %v11821_v17 }
 0x59f   :  { %9375 = vmatmul.mubr.bf16.vlgmr.msra.gmra.mrb[8].mxu0 %v7659_v21  ;;  %9539 = vmatmul.mubr.bf16.vlgmr.msra.gmra.mrb[8].mxu1 %v7659_v21 }
 0x5a0   :  { %11231 = vmatpush3.bf16.msra.mxu0 %v11822_v16  ;;  %11253 = vmatpush3.bf16.msra.mxu1 %v11823_v20 }
 0x5a1   :  { %11232 = vmatprep.subr.bf16.mxu0 %v11824_v55  ;;  %11254 = vmatprep.subr.bf16.mxu1 %v11825_v27 }
 0x5a4   :  { %11233 = vmatpush3.bf16.msra.mxu0 %v11826_v60  ;;  %11255 = vmatpush3.bf16.msra.mxu1 %v11827_v54 }
 0x5a5   :  { %11234 = vmatprep.subr.bf16.mxu0 %v11828_v18  ;;  %11256 = vmatprep.subr.bf16.mxu1 %v11829_v25 }
 0x5a8   :  { %11235 = vmatpush3.bf16.msra.mxu0 %v11830_v30  ;;  %11257 = vmatpush3.bf16.msra.mxu1 %v11831_v31 }
 0x5a9   :  { %11236 = vmatprep.subr.bf16.mxu0 %v11832_v32  ;;  %11258 = vmatprep.subr.bf16.mxu1 %v11833_v28 }
 0x5ac   :  { %11237 = vmatpush3.bf16.msra.mxu0 %v11834_v33  ;;  %11259 = vmatpush3.bf16.msra.mxu1 %v11835_v29 }
 0x5ad   :  { %11238 = vmatprep.subr.bf16.mxu0 %v11836_v57  ;;  %11260 = vmatprep.subr.bf16.mxu1 %v11837_v35 }
 0x5b0   :  { %11239 = vmatpush3.bf16.msra.mxu0 %v11838_v36  ;;  %11261 = vmatpush3.bf16.msra.mxu1 %v11839_v37 }
 0x5b1   :  { %11240 = vmatprep.subr.bf16.mxu0 %v11840_v1  ;;  %11262 = vmatprep.subr.bf16.mxu1 %v11841_v34 }
 0x5b4   :  { %11241 = vmatpush3.bf16.msra.mxu0 %v11842_v22  ;;  %11263 = vmatpush3.bf16.msra.mxu1 %v11843_v38 }
 0x5b5   :  { %11242 = vmatprep.subr.bf16.mxu0 %v11844_v40  ;;  %11264 = vmatprep.subr.bf16.mxu1 %v11845_v42 }
 0x5b8   :  { %11243 = vmatpush3.bf16.msra.mxu0 %v11846_v43  ;;  %11265 = vmatpush3.bf16.msra.mxu1 %v11847_v45 }
 0x5b9   :  { %11244 = vmatprep.subr.bf16.mxu0 %v11848_v46  ;;  %11266 = vmatprep.subr.bf16.mxu1 %v11849_v47 }
 0x5bc   :  { %11245 = vmatpush3.bf16.msra.mxu0 %v11850_v49  ;;  %11267 = vmatpush3.bf16.msra.mxu1 %v11851_v50 }
 0x672   :  { %v9376_v12 = vpop.f32.mrb[8].mxu0  ;;  %v9540_v61 = vpop.f32.mrb[8].mxu1 }
 0x673   :  { %v11282_v26 = vadd.f32 %v9376_v12, %v7922_v39  ;;  %v11284_v62 = vadd.f32 %v9540_v61, %v7930_v52  ;;  %v9378_v63 = vpop.f32.mrb[9].mxu0  ;;  %v9542_v48 = vpop.f32.mrb[9].mxu1 }
 0x674   :  { %v11283_v0 = vadd.f32 %v9378_v63, %v7926_v58  ;;  %v11285_v2 = vadd.f32 %v9542_v48, %v7934_v59  ;;  %v9380_v4 = vpop.f32.mrb[10].mxu0  ;;  %v9544_v44 = vpop.f32.mrb[10].mxu1 }
 0x675   :  { %v9547_v3 = vmax.f32 %v11282_v26, 0.0  ;;  %v9549_v5 = vmax.f32 %v11284_v62, 0.0  ;;  %v9381_v23 = vpop.f32.mrb[11].mxu0  ;;  %v9545_v19 = vpop.f32.mrb[11].mxu1 }
 0x676   :  { %v9548_v7 = vmax.f32 %v11283_v0, 0.0  ;;  %v9550_v53 = vmax.f32 %v11285_v2, 0.0 }
 0x677   :  { %v9551_v41 = vpack.c.bf16 %v9547_v3, %v9547_v3  ;;  %v9553_v6 = vpack.c.bf16 %v9549_v5, %v9549_v5 }
 0x678   :  { %v9552_v51 = vpack.c.bf16 %v9548_v7, %v9548_v7  ;;  %v9554_v8 = vpack.c.bf16 %v9550_v53, %v9550_v53 }
 0x67a   :  { %9850 = vmatprep.mubr.bf16.mxu0 %v9552_v51  ;;  %9890 = vmatprep.mubr.bf16.mxu1 %v9554_v8 }
 0x67b   :  { %9851 = vmatmul.mubr.bf16.vlgmr.msra.gmra.mrb[12].mxu0 %v9551_v41  ;;  %9891 = vmatmul.mubr.bf16.vlgmr.msra.gmra.mrb[12].mxu1 %v9553_v6 }
 0x74e   :  { %v11246_v9 = vpop.f32.mrb[12].mxu0  ;;  %v11268_v10 = vpop.f32.mrb[12].mxu1 }
 0x74f   :  { %v11247_v13 = vpop.f32.mrb[13].mxu0  ;;  %v11269_v24 = vpop.f32.mrb[13].mxu1 }
 0x750   :  { %v11248_v56 = vadd.f32 %v11247_v13, %v11246_v9  ;;  %v11270_v15 = vadd.f32 %v11269_v24, %v11268_v10  ;;  %v11249_v17 = vpop.f32.mrb[14].mxu0  ;;  %v11271_v16 = vpop.f32.mrb[14].mxu1 }
 0x751   :  { %v11250_v20 = vpop.f32.mrb[15].mxu0  ;;  %v11272_v21 = vpop.f32.mrb[15].mxu1 }
 0x752   :  { %v9853_v55 = vadd.f32 %v11248_v56, %v11197_v11 }
 0x754   :  { %v9893_v27 = vadd.f32 %v11270_v15, %v9853_v55 }
 0x756   :  { %9898 = vst [vmem:[#allocation14] sm:$0xff] %v9893_v27 }
 0x757   :  { %12018 = shalt.err (!%p12015_p4)
}
 0x758   :  { %s12019_s15 = scalar_lea.hbm %s12342_s7, 128 }
 0x759   :  { %p12020_p5 = scmp.ne.s32.totalorder %s12342_s7, %s12019_s15  ;;  %p12023_p6 = scmp.lt.u32.totalorder %s12019_s15, %s12342_s7 }
 0x75b   :  { %p12025_p7 = pnand %p12023_p6, %p12020_p5 }
 0x75d   :  { %12028 = shalt.err (!%p12025_p7)
}
 0x75e   :  { %9908 = dma.vmem_to_hbm [thread:$0]  %s9906_s13, 128, %s12342_s7, [#allocation4]  }
 0x75f   :  { %12037 = dma.done.wait [#allocation4], 128  }
 0x760   :  { %12038 = vsyncadd [#allocation4], 4294967168 }
 0x761   :  { %9912 = vsyncpa [#allocation3], 1 }
 0x762   :  { %9913 = vsyncpa [#allocation6], 1 }
 0x763   :  { %9914 = vsyncpa [#allocation9], 1 }
 0x764   :  { %9915 = vsyncpa [#allocation12], 1 }
 0x765   :  { %9916 = vsyncpa [#allocation4], 1 }

</bundles_post_ra>
